<compile_context>
chip_gen: v7x
topology: tpu7x:2x2x1
jax: 0.10.0
libtpu: 0.0.40
codegen_flags: <defaults>
</compile_context>

<pallas_src>
import functools

import jax
import jax.numpy as jnp
import numpy as np
from jax.experimental import pallas as pl
from jax.experimental.pallas import tpu as pltpu

BF16 = jnp.bfloat16
F32 = jnp.float32

_VMEM_LIMIT = 32 * 1024 * 1024  # fits default scoped VMEM on v5e/v6e/v7x


# ----------------------------------------------------------------------------
# Pallas kernel 1: M-tiled matmul + bias (+ optional ReLU), single K step.
# Used for conv1 and conv2 (via im2col). bf16 inputs, f32 accumulate/epilogue.
# ----------------------------------------------------------------------------
def _matmul_bias_kernel(x_ref, w_ref, b_ref, o_ref, *, apply_relu):
    out = jnp.dot(x_ref[...], w_ref[...], preferred_element_type=jnp.float32)
    out = out + b_ref[...]
    if apply_relu:
        out = jnp.maximum(out, 0.0)
    o_ref[...] = out.astype(o_ref.dtype)


def linear_pallas(x, w, b, *, relu=False, out_dtype=F32, tm=512):
    """y = x @ w + b (optionally ReLU). M-tiled; whole K in one MXU pass."""
    M, K = x.shape
    Kw, N = w.shape
    assert K == Kw
    tm = min(tm, M)
    nm = pl.cdiv(M, tm)
    return pl.pallas_call(
        functools.partial(_matmul_bias_kernel, apply_relu=relu),
        out_shape=jax.ShapeDtypeStruct((M, N), out_dtype),
        grid_spec=pltpu.PrefetchScalarGridSpec(
            num_scalar_prefetch=0,
            grid=(nm,),
            in_specs=[
                pl.BlockSpec((tm, K), lambda i: (i, 0)),
                pl.BlockSpec((K, N), lambda i: (0, 0)),
                pl.BlockSpec((1, N), lambda i: (0, 0)),
            ],
            out_specs=pl.BlockSpec((tm, N), lambda i: (i, 0)),
        ),
        compiler_params=pltpu.CompilerParams(
            dimension_semantics=("parallel",),
            vmem_limit_bytes=_VMEM_LIMIT,
        ),
    )(x.astype(BF16), w.astype(BF16), b.reshape(1, N).astype(F32))


# ----------------------------------------------------------------------------
# Pallas kernel 2: fused MLP head  logits = relu(x @ w1 + b1) @ w2 + b2.
# K-tiled over fc1's 9216 contraction dim with an f32 accumulator; the tiny
# fc2 matmul runs in the final K step's epilogue (no separate call, no HBM
# round trip for the hidden activations).
# ----------------------------------------------------------------------------
def _mlp_head_kernel(x_ref, w1_ref, b1_ref, w2_ref, b2_ref, o_ref, acc_ref):
    k = pl.program_id(0)

    @pl.when(k == 0)
    def _():
        acc_ref[...] = jnp.zeros_like(acc_ref)

    acc_ref[...] += jnp.dot(
        x_ref[...], w1_ref[...], preferred_element_type=jnp.float32
    )

    @pl.when(k == pl.num_programs(0) - 1)
    def _():
        h = jnp.maximum(acc_ref[...] + b1_ref[...], 0.0)  # f32 epilogue
        logits = (
            jnp.dot(h.astype(w2_ref.dtype), w2_ref[...],
                    preferred_element_type=jnp.float32)
            + b2_ref[...]
        )
        o_ref[...] = logits.astype(o_ref.dtype)


def mlp_head_pallas(x, w1, b1, w2, b2, *, k_tile=1152):
    M, K = x.shape
    K1, H = w1.shape
    H2, N = w2.shape
    assert K == K1 and H == H2
    if K % k_tile != 0:
        k_tile = K
    nk = K // k_tile
    return pl.pallas_call(
        _mlp_head_kernel,
        out_shape=jax.ShapeDtypeStruct((M, N), F32),
        grid_spec=pltpu.PrefetchScalarGridSpec(
            num_scalar_prefetch=0,
            grid=(nk,),
            in_specs=[
                pl.BlockSpec((M, k_tile), lambda k: (0, k)),
                pl.BlockSpec((k_tile, H), lambda k: (k, 0)),
                pl.BlockSpec((1, H), lambda k: (0, 0)),
                pl.BlockSpec((H, N), lambda k: (0, 0)),
                pl.BlockSpec((1, N), lambda k: (0, 0)),
            ],
            out_specs=pl.BlockSpec((M, N), lambda k: (0, 0)),
            scratch_shapes=[pltpu.VMEM((M, H), jnp.float32)],
        ),
        compiler_params=pltpu.CompilerParams(
            dimension_semantics=("arbitrary",),
            vmem_limit_bytes=_VMEM_LIMIT,
        ),
    )(
        x.astype(BF16),
        w1.astype(BF16),
        b1.reshape(1, H).astype(F32),
        w2.astype(BF16),
        b2.reshape(1, N).astype(F32),
    )


# ----------------------------------------------------------------------------
# Pallas kernel 3: 2x2 / stride-2 max pooling, one whole image per grid step.
# Input is pre-reshaped (free metadata op) to (B, H, Wo, 2, C); the kernel
# reduces the size-2 axis, splits H in-kernel, and reduces again. Max is done
# in f32 (safe on v5e's no-bf16 VPU); output is stored bf16 for the fc matmul.
# ----------------------------------------------------------------------------
def _maxpool_kernel(x_ref, o_ref):
    x = x_ref[...]                         # (H, Wo, 2, C) f32
    x = jnp.max(x, axis=2)                 # (H, Wo, C)
    h, wo, c = x.shape
    x = x.reshape(h // 2, 2, wo, c)        # split major (H) dim: cheap
    o_ref[...] = jnp.max(x, axis=1).astype(o_ref.dtype)


def maxpool2x2_pallas(x_nhwc, *, out_dtype=BF16):
    B, H, W, C = x_nhwc.shape
    Ho, Wo = H // 2, W // 2
    x5 = x_nhwc.reshape(B, H, Wo, 2, C)    # free, contiguous split of W
    return pl.pallas_call(
        _maxpool_kernel,
        out_shape=jax.ShapeDtypeStruct((B, Ho, Wo, C), out_dtype),
        grid=(B,),
        in_specs=[
            pl.BlockSpec((None, H, Wo, 2, C), lambda b: (b, 0, 0, 0, 0))
        ],
        out_specs=pl.BlockSpec((None, Ho, Wo, C), lambda b: (b, 0, 0, 0)),
        compiler_params=pltpu.CompilerParams(
            dimension_semantics=("parallel",),
            vmem_limit_bytes=_VMEM_LIMIT,
        ),
    )(x5)


# ----------------------------------------------------------------------------
# JAX glue: im2col, parameter init (PyTorch layouts), one-time weight prep,
# forward pass, pure-XLA reference.
# ----------------------------------------------------------------------------
def im2col_3x3(x_nhwc):
    """(B, H, W, C) -> (B*(H-2)*(W-2), 9*C); feature order (kh, kw, c)."""
    B, H, W, C = x_nhwc.shape
    Ho, Wo = H - 2, W - 2
    cols = [
        x_nhwc[:, kh : kh + Ho, kw : kw + Wo, :]
        for kh in range(3)
        for kw in range(3)
    ]
    patches = jnp.concatenate(cols, axis=-1)  # (B, Ho, Wo, 9*C)
    return patches.reshape(B * Ho * Wo, 9 * C)


def conv_w_to_mat(w):
    """(Cout, Cin, 3, 3) torch weight -> (9*Cin, Cout) matching im2col order."""
    cout = w.shape[0]
    return jnp.transpose(w, (2, 3, 1, 0)).reshape(-1, cout)


def init_params(key):
    ks = jax.random.split(key, 8)

    def conv_w(k, cout, cin):  # torch Conv2d weight layout (Cout, Cin, 3, 3)
        return jax.random.normal(k, (cout, cin, 3, 3), jnp.float32) * np.sqrt(
            2.0 / (cin * 9)
        )

    def lin_w(k, cout, cin):  # torch Linear weight layout (Cout, Cin)
        return jax.random.normal(k, (cout, cin), jnp.float32) * np.sqrt(2.0 / cin)

    return {
        "conv1_w": conv_w(ks[0], 32, 1),
        "conv1_b": jax.random.normal(ks[1], (32,), jnp.float32) * 0.01,
        "conv2_w": conv_w(ks[2], 64, 32),
        "conv2_b": jax.random.normal(ks[3], (64,), jnp.float32) * 0.01,
        "fc1_w": lin_w(ks[4], 128, 9216),
        "fc1_b": jax.random.normal(ks[5], (128,), jnp.float32) * 0.01,
        "fc2_w": lin_w(ks[6], 10, 128),
        "fc2_b": jax.random.normal(ks[7], (10,), jnp.float32) * 0.01,
    }


def prepare_params(params):
    """One-time: convert torch-layout f32 weights into matmul-ready bf16 form.

    The torch flatten is over (C, H, W); we permute fc1's rows so that the
    pooled NHWC activations can be flattened with a plain reshape at runtime.
    """
    fc1 = params["fc1_w"].reshape(128, 64, 12, 12)             # (out, c, h, w)
    fc1 = jnp.transpose(fc1, (2, 3, 1, 0)).reshape(9216, 128)  # rows: (h, w, c)
    return {
        "conv1_w": conv_w_to_mat(params["conv1_w"]).astype(BF16),
        "conv1_b": params["conv1_b"].astype(F32),
        "conv2_w": conv_w_to_mat(params["conv2_w"]).astype(BF16),
        "conv2_b": params["conv2_b"].astype(F32),
        "fc1_w": fc1.astype(BF16),
        "fc1_b": params["fc1_b"].astype(F32),
        "fc2_w": params["fc2_w"].T.astype(BF16),                # (128, 10)
        "fc2_b": params["fc2_b"].astype(F32),
    }


def simple_cnn_forward(prepped, x_nchw):
    B = x_nchw.shape[0]
    x = jnp.transpose(x_nchw, (0, 2, 3, 1)).astype(BF16)  # NHWC (B, 28, 28, 1)

    # conv1 (1->32, 3x3) + ReLU -> (B, 26, 26, 32), bf16 activations.
    # TODO(synk): conv2's im2col matrix is still materialized by XLA; a direct
    # 9-tap in-kernel conv would cut its HBM read traffic further.
    p1 = im2col_3x3(x)                                            # (B*676, 9)
    y1 = linear_pallas(
        p1, prepped["conv1_w"], prepped["conv1_b"], relu=True, out_dtype=BF16
    ).reshape(B, 26, 26, 32)

    # conv2 (32->64, 3x3) + ReLU -> (B, 24, 24, 64), f32 (feeds f32 max pool).
    p2 = im2col_3x3(y1)                                           # (B*576, 288)
    y2 = linear_pallas(
        p2, prepped["conv2_w"], prepped["conv2_b"], relu=True, out_dtype=F32
    ).reshape(B, 24, 24, 64)

    # max_pool2d(2) -> (B, 12, 12, 64), stored bf16 for the fc matmul.
    y3 = maxpool2x2_pallas(y2, out_dtype=BF16)

    # dropout1 / dropout2: inference identity.
    # Flatten in NHWC order; the torch-NCHW permutation is baked into fc1_w.
    flat = y3.reshape(B, 12 * 12 * 64)

    # fc1 (9216->128) + ReLU + fc2 (128->10), fused, K-tiled. Torch forward
    # returns these logits (not the log_softmax).
    return mlp_head_pallas(
        flat, prepped["fc1_w"], prepped["fc1_b"],
        prepped["fc2_w"], prepped["fc2_b"], k_tile=1152,
    )


def reference_forward(params, x_nchw):
    """Pure-JAX/XLA reference using the same bf16-input / f32-accumulate math."""
    dn = ("NHWC", "HWIO", "NHWC")
    B = x_nchw.shape[0]
    x = jnp.transpose(x_nchw, (0, 2, 3, 1)).astype(BF16)
    w1 = jnp.transpose(params["conv1_w"], (2, 3, 1, 0)).astype(BF16)
    y1 = jax.lax.conv_general_dilated(
        x, w1, (1, 1), "VALID", dimension_numbers=dn, preferred_element_type=F32
    )
    y1 = jax.nn.relu(y1 + params["conv1_b"]).astype(BF16)
    w2 = jnp.transpose(params["conv2_w"], (2, 3, 1, 0)).astype(BF16)
    y2 = jax.lax.conv_general_dilated(
        y1, w2, (1, 1), "VALID", dimension_numbers=dn, preferred_element_type=F32
    )
    y2 = jax.nn.relu(y2 + params["conv2_b"])
    y3 = y2.reshape(B, 12, 2, 12, 2, 64).max(axis=(2, 4))
    flat = jnp.transpose(y3, (0, 3, 1, 2)).reshape(B, -1).astype(BF16)
    h = jax.nn.relu(
        jnp.dot(flat, params["fc1_w"].T.astype(BF16), preferred_element_type=F32)
        + params["fc1_b"]
    )
    return (
        jnp.dot(h.astype(BF16), params["fc2_w"].T.astype(BF16),
                preferred_element_type=F32)
        + params["fc2_b"]
    )


if __name__ == "__main__":
    key = jax.random.PRNGKey(0)
    pkey, xkey = jax.random.split(key)
    params = init_params(pkey)
    prepped = prepare_params(params)  # one-time weight prep, outside jit
    # 28x28 input is implied by fc1's 9216 = 64 * 12 * 12 input features.
    x = jax.random.normal(xkey, (2, 1, 28, 28), jnp.float32)  # NCHW, like torch

    out = jax.jit(simple_cnn_forward)(prepped, x)
    out = jax.block_until_ready(out)
    assert out.shape == (2, 10), out.shape
    assert bool(jnp.all(jnp.isfinite(out)))

    ref = reference_forward(params, x)
    np.testing.assert_allclose(np.asarray(out), np.asarray(ref), rtol=2e-2, atol=2e-2)

    print("KERNEL_OK")
</pallas_src>

<mosaic_0001>
module attributes {stable_mosaic.version = 11 : i64} {
  func.func @_matmul_bias_kernel(%arg0: i32, %arg1: memref<512x9xbf16, #tpu.memory_space<vmem>>, %arg2: memref<9x32xbf16, #tpu.memory_space<vmem>>, %arg3: memref<1x32xf32, #tpu.memory_space<vmem>>, %arg4: memref<512x32xbf16, #tpu.memory_space<vmem>>) attributes {dimension_semantics = [#tpu.dimension_semantics<parallel>], iteration_bounds = array<i64: 3>, scalar_prefetch = 0 : i64, scratch_operands = 0 : i64, tpu.core_type = #tpu.core_type<tc>, window_params = [{transform_indices = @transform_0, window_bounds = array<i64: 512, 9>}, {pipeline_mode = #tpu.pipeline_mode<synchronous>, transform_indices = @transform_1, window_bounds = array<i64: 9, 32>}, {pipeline_mode = #tpu.pipeline_mode<synchronous>, transform_indices = @transform_2, window_bounds = array<i64: 1, 32>}, {transform_indices = @transform_3, window_bounds = array<i64: 512, 32>}]} {
    %c0 = arith.constant 0 : index
    %c0_0 = arith.constant 0 : index
    %0 = vector.load %arg1[%c0, %c0_0] : memref<512x9xbf16, #tpu.memory_space<vmem>>, vector<512x9xbf16>
    %c0_1 = arith.constant 0 : index
    %c0_2 = arith.constant 0 : index
    %1 = vector.load %arg2[%c0_1, %c0_2] : memref<9x32xbf16, #tpu.memory_space<vmem>>, vector<9x32xbf16>
    %cst = arith.constant dense<0.000000e+00> : vector<512x32xf32>
    %2 = tpu.matmul %0, %1, %cst {dimension_numbers = #tpu.dot_dimension_numbers<[1], [0], [0], [1], [0, 0, 1, 1], [], []>} : vector<512x9xbf16>, vector<9x32xbf16>, vector<512x32xf32> -> vector<512x32xf32>
    %c0_3 = arith.constant 0 : index
    %c0_4 = arith.constant 0 : index
    %3 = vector.load %arg3[%c0_3, %c0_4] : memref<1x32xf32, #tpu.memory_space<vmem>>, vector<1x32xf32>
    %4 = vector.broadcast %3 : vector<1x32xf32> to vector<512x32xf32>
    %5 = arith.addf %2, %4 : vector<512x32xf32>
    %cst_5 = arith.constant 0.000000e+00 : f32
    %6 = vector.broadcast %cst_5 : f32 to vector<512x32xf32>
    %7 = arith.maximumf %5, %6 : vector<512x32xf32>
    %8 = arith.truncf %7 : vector<512x32xf32> to vector<512x32xbf16>
    %c0_6 = arith.constant 0 : index
    %c0_7 = arith.constant 0 : index
    %9 = vector.load %arg4[%c0_6, %c0_7] : memref<512x32xbf16, #tpu.memory_space<vmem>>, vector<512x32xbf16>
    tpu.vector_store %arg4[%c0_6, %c0_7], %8 {strides = array<i32>} : memref<512x32xbf16, #tpu.memory_space<vmem>>, vector<512x32xbf16>,
    return
  }
  func.func @transform_0(%arg0: i32) -> (i32, i32) {
    %c0_i32 = arith.constant 0 : i32
    %c0_i32_0 = arith.constant 0 : i32
    return %arg0, %c0_i32 : i32, i32
  }
  func.func @transform_1(%arg0: i32) -> (i32, i32) {
    %c0_i32 = arith.constant 0 : i32
    %c0_i32_0 = arith.constant 0 : i32
    %c0_i32_1 = arith.constant 0 : i32
    return %c0_i32, %c0_i32_0 : i32, i32
  }
  func.func @transform_2(%arg0: i32) -> (i32, i32) {
    %c0_i32 = arith.constant 0 : i32
    %c0_i32_0 = arith.constant 0 : i32
    %c0_i32_1 = arith.constant 0 : i32
    return %c0_i32, %c0_i32_0 : i32, i32
  }
  func.func @transform_3(%arg0: i32) -> (i32, i32) {
    %c0_i32 = arith.constant 0 : i32
    %c0_i32_0 = arith.constant 0 : i32
    return %arg0, %c0_i32 : i32, i32
  }
}

module attributes {stable_mosaic.version = 11 : i64} {
  func.func @_matmul_bias_kernel(%arg0: i32, %arg1: memref<512x288xbf16, #tpu.memory_space<vmem>>, %arg2: memref<288x64xbf16, #tpu.memory_space<vmem>>, %arg3: memref<1x64xf32, #tpu.memory_space<vmem>>, %arg4: memref<512x64xf32, #tpu.memory_space<vmem>>) attributes {dimension_semantics = [#tpu.dimension_semantics<parallel>], iteration_bounds = array<i64: 3>, scalar_prefetch = 0 : i64, scratch_operands = 0 : i64, tpu.core_type = #tpu.core_type<tc>, window_params = [{transform_indices = @transform_0, window_bounds = array<i64: 512, 288>}, {pipeline_mode = #tpu.pipeline_mode<synchronous>, transform_indices = @transform_1, window_bounds = array<i64: 288, 64>}, {pipeline_mode = #tpu.pipeline_mode<synchronous>, transform_indices = @transform_2, window_bounds = array<i64: 1, 64>}, {transform_indices = @transform_3, window_bounds = array<i64: 512, 64>}]} {
    %c0 = arith.constant 0 : index
    %c0_0 = arith.constant 0 : index
    %0 = vector.load %arg1[%c0, %c0_0] : memref<512x288xbf16, #tpu.memory_space<vmem>>, vector<512x288xbf16>
    %c0_1 = arith.constant 0 : index
    %c0_2 = arith.constant 0 : index
    %1 = vector.load %arg2[%c0_1, %c0_2] : memref<288x64xbf16, #tpu.memory_space<vmem>>, vector<288x64xbf16>
    %cst = arith.constant dense<0.000000e+00> : vector<512x64xf32>
    %2 = tpu.matmul %0, %1, %cst {dimension_numbers = #tpu.dot_dimension_numbers<[1], [0], [0], [1], [0, 0, 1, 1], [], []>} : vector<512x288xbf16>, vector<288x64xbf16>, vector<512x64xf32> -> vector<512x64xf32>
    %c0_3 = arith.constant 0 : index
    %c0_4 = arith.constant 0 : index
    %3 = vector.load %arg3[%c0_3, %c0_4] : memref<1x64xf32, #tpu.memory_space<vmem>>, vector<1x64xf32>
    %4 = vector.broadcast %3 : vector<1x64xf32> to vector<512x64xf32>
    %5 = arith.addf %2, %4 : vector<512x64xf32>
    %cst_5 = arith.constant 0.000000e+00 : f32
    %6 = vector.broadcast %cst_5 : f32 to vector<512x64xf32>
    %7 = arith.maximumf %5, %6 : vector<512x64xf32>
    %c0_6 = arith.constant 0 : index
    %c0_7 = arith.constant 0 : index
    %8 = vector.load %arg4[%c0_6, %c0_7] : memref<512x64xf32, #tpu.memory_space<vmem>>, vector<512x64xf32>
    tpu.vector_store %arg4[%c0_6, %c0_7], %7 {strides = array<i32>} : memref<512x64xf32, #tpu.memory_space<vmem>>, vector<512x64xf32>,
    return
  }
  func.func @transform_0(%arg0: i32) -> (i32, i32) {
    %c0_i32 = arith.constant 0 : i32
    %c0_i32_0 = arith.constant 0 : i32
    return %arg0, %c0_i32 : i32, i32
  }
  func.func @transform_1(%arg0: i32) -> (i32, i32) {
    %c0_i32 = arith.constant 0 : i32
    %c0_i32_0 = arith.constant 0 : i32
    %c0_i32_1 = arith.constant 0 : i32
    return %c0_i32, %c0_i32_0 : i32, i32
  }
  func.func @transform_2(%arg0: i32) -> (i32, i32) {
    %c0_i32 = arith.constant 0 : i32
    %c0_i32_0 = arith.constant 0 : i32
    %c0_i32_1 = arith.constant 0 : i32
    return %c0_i32, %c0_i32_0 : i32, i32
  }
  func.func @transform_3(%arg0: i32) -> (i32, i32) {
    %c0_i32 = arith.constant 0 : i32
    %c0_i32_0 = arith.constant 0 : i32
    return %arg0, %c0_i32 : i32, i32
  }
}

module attributes {stable_mosaic.version = 11 : i64} {
  func.func @_maxpool_kernel(%arg0: i32, %arg1: memref<1x24x12x2x64xf32, #tpu.memory_space<vmem>>, %arg2: memref<1x12x12x64xbf16, #tpu.memory_space<vmem>>) attributes {dimension_semantics = [#tpu.dimension_semantics<parallel>], iteration_bounds = array<i64: 2>, scalar_prefetch = 0 : i64, scratch_operands = 0 : i64, tpu.core_type = #tpu.core_type<tc>, window_params = [{transform_indices = @transform_0, window_bounds = array<i64: 1, 24, 12, 2, 64>}, {transform_indices = @transform_1, window_bounds = array<i64: 1, 12, 12, 64>}]} {
    %c0 = arith.constant 0 : index
    %c0_0 = arith.constant 0 : index
    %c0_1 = arith.constant 0 : index
    %c0_2 = arith.constant 0 : index
    %c0_3 = arith.constant 0 : index
    %0 = vector.load %arg1[%c0, %c0_0, %c0_1, %c0_2, %c0_3] : memref<1x24x12x2x64xf32, #tpu.memory_space<vmem>>, vector<1x24x12x2x64xf32>
    %1 = vector.shape_cast %0 : vector<1x24x12x2x64xf32> to vector<24x12x2x64xf32>
    %cst = arith.constant dense<0xFF800000> : vector<24x12x64xf32>
    %2 = vector.multi_reduction <maximumf>, %1, %cst [2] : vector<24x12x2x64xf32> to vector<24x12x64xf32>
    %3 = vector.shape_cast %2 : vector<24x12x64xf32> to vector<12x2x12x64xf32>
    %cst_4 = arith.constant dense<0xFF800000> : vector<12x12x64xf32>
    %4 = vector.multi_reduction <maximumf>, %3, %cst_4 [1] : vector<12x2x12x64xf32> to vector<12x12x64xf32>
    %5 = arith.truncf %4 : vector<12x12x64xf32> to vector<12x12x64xbf16>
    %c0_5 = arith.constant 0 : index
    %c0_6 = arith.constant 0 : index
    %c0_7 = arith.constant 0 : index
    %c0_8 = arith.constant 0 : index
    %6 = vector.load %arg2[%c0_5, %c0_6, %c0_7, %c0_8] : memref<1x12x12x64xbf16, #tpu.memory_space<vmem>>, vector<1x12x12x64xbf16>
    %7 = vector.shape_cast %6 : vector<1x12x12x64xbf16> to vector<12x12x64xbf16>
    %8 = vector.shape_cast %5 : vector<12x12x64xbf16> to vector<1x12x12x64xbf16>
    tpu.vector_store %arg2[%c0_5, %c0_6, %c0_7, %c0_8], %8 {strides = array<i32>} : memref<1x12x12x64xbf16, #tpu.memory_space<vmem>>, vector<1x12x12x64xbf16>,
    return
  }
  func.func @transform_0(%arg0: i32) -> (i32, i32, i32, i32, i32) {
    %c0_i32 = arith.constant 0 : i32
    %c0_i32_0 = arith.constant 0 : i32
    %c0_i32_1 = arith.constant 0 : i32
    %c0_i32_2 = arith.constant 0 : i32
    %c0_i32_3 = arith.constant 0 : i32
    return %arg0, %c0_i32, %c0_i32_0, %c0_i32_1, %c0_i32_2 : i32, i32, i32, i32, i32
  }
  func.func @transform_1(%arg0: i32) -> (i32, i32, i32, i32) {
    %c0_i32 = arith.constant 0 : i32
    %c0_i32_0 = arith.constant 0 : i32
    %c0_i32_1 = arith.constant 0 : i32
    %c0_i32_2 = arith.constant 0 : i32
    return %arg0, %c0_i32, %c0_i32_0, %c0_i32_1 : i32, i32, i32, i32
  }
}

module attributes {stable_mosaic.version = 11 : i64} {
  func.func @_mlp_head_kernel(%arg0: i32, %arg1: memref<2x1152xbf16, #tpu.memory_space<vmem>>, %arg2: memref<1152x128xbf16, #tpu.memory_space<vmem>>, %arg3: memref<1x128xf32, #tpu.memory_space<vmem>>, %arg4: memref<128x10xbf16, #tpu.memory_space<vmem>>, %arg5: memref<1x10xf32, #tpu.memory_space<vmem>>, %arg6: memref<2x10xf32, #tpu.memory_space<vmem>>, %arg7: memref<2x128xf32, #tpu.memory_space<vmem>>) attributes {dimension_semantics = [#tpu.dimension_semantics<arbitrary>], iteration_bounds = array<i64: 8>, scalar_prefetch = 0 : i64, scratch_operands = 1 : i64, tpu.core_type = #tpu.core_type<tc>, window_params = [{transform_indices = @transform_0, window_bounds = array<i64: 2, 1152>}, {transform_indices = @transform_1, window_bounds = array<i64: 1152, 128>}, {pipeline_mode = #tpu.pipeline_mode<synchronous>, transform_indices = @transform_2, window_bounds = array<i64: 1, 128>}, {pipeline_mode = #tpu.pipeline_mode<synchronous>, transform_indices = @transform_3, window_bounds = array<i64: 128, 10>}, {pipeline_mode = #tpu.pipeline_mode<synchronous>, transform_indices = @transform_4, window_bounds = array<i64: 1, 10>}, {pipeline_mode = #tpu.pipeline_mode<synchronous>, transform_indices = @transform_5, window_bounds = array<i64: 2, 10>}]} {
    %c0_i32 = arith.constant 0 : i32
    %0 = arith.cmpi eq, %arg0, %c0_i32 : i32
    %1 = arith.extui %0 : i1 to i32
    %c0_i32_0 = arith.constant 0 : i32
    %2 = arith.cmpi ne, %1, %c0_i32_0 : i32
    scf.if %2 {
      %cst_9 = arith.constant 0.000000e+00 : f32
      %12 = vector.broadcast %cst_9 : f32 to vector<2x128xf32>
      %c0_10 = arith.constant 0 : index
      %c0_11 = arith.constant 0 : index
      %13 = vector.load %arg7[%c0_10, %c0_11] : memref<2x128xf32, #tpu.memory_space<vmem>>, vector<2x128xf32>
      tpu.vector_store %arg7[%c0_10, %c0_11], %12 {strides = array<i32>} : memref<2x128xf32, #tpu.memory_space<vmem>>, vector<2x128xf32>,
    } else {
    }
    %c0 = arith.constant 0 : index
    %c0_1 = arith.constant 0 : index
    %3 = vector.load %arg7[%c0, %c0_1] : memref<2x128xf32, #tpu.memory_space<vmem>>, vector<2x128xf32>
    %c0_2 = arith.constant 0 : index
    %c0_3 = arith.constant 0 : index
    %4 = vector.load %arg1[%c0_2, %c0_3] : memref<2x1152xbf16, #tpu.memory_space<vmem>>, vector<2x1152xbf16>
    %c0_4 = arith.constant 0 : index
    %c0_5 = arith.constant 0 : index
    %5 = vector.load %arg2[%c0_4, %c0_5] : memref<1152x128xbf16, #tpu.memory_space<vmem>>, vector<1152x128xbf16>
    %cst = arith.constant dense<0.000000e+00> : vector<2x128xf32>
    %6 = tpu.matmul %4, %5, %cst {dimension_numbers = #tpu.dot_dimension_numbers<[1], [0], [0], [1], [0, 0, 1, 1], [], []>} : vector<2x1152xbf16>, vector<1152x128xbf16>, vector<2x128xf32> -> vector<2x128xf32>
    %7 = arith.addf %3, %6 : vector<2x128xf32>
    %c0_6 = arith.constant 0 : index
    %c0_7 = arith.constant 0 : index
    %8 = vector.load %arg7[%c0_6, %c0_7] : memref<2x128xf32, #tpu.memory_space<vmem>>, vector<2x128xf32>
    tpu.vector_store %arg7[%c0_6, %c0_7], %7 {strides = array<i32>} : memref<2x128xf32, #tpu.memory_space<vmem>>, vector<2x128xf32>,
    %c7_i32 = arith.constant 7 : i32
    %9 = arith.cmpi eq, %arg0, %c7_i32 : i32
    %10 = arith.extui %9 : i1 to i32
    %c0_i32_8 = arith.constant 0 : i32
    %11 = arith.cmpi ne, %10, %c0_i32_8 : i32
    scf.if %11 {
      %c0_9 = arith.constant 0 : index
      %c0_10 = arith.constant 0 : index
      %12 = vector.load %arg7[%c0_9, %c0_10] : memref<2x128xf32, #tpu.memory_space<vmem>>, vector<2x128xf32>
      %c0_11 = arith.constant 0 : index
      %c0_12 = arith.constant 0 : index
      %13 = vector.load %arg3[%c0_11, %c0_12] : memref<1x128xf32, #tpu.memory_space<vmem>>, vector<1x128xf32>
      %14 = vector.broadcast %13 : vector<1x128xf32> to vector<2x128xf32>
      %15 = arith.addf %12, %14 : vector<2x128xf32>
      %cst_13 = arith.constant 0.000000e+00 : f32
      %16 = vector.broadcast %cst_13 : f32 to vector<2x128xf32>
      %17 = arith.maximumf %15, %16 : vector<2x128xf32>
      %18 = arith.truncf %17 : vector<2x128xf32> to vector<2x128xbf16>
      %c0_14 = arith.constant 0 : index
      %c0_15 = arith.constant 0 : index
      %19 = vector.load %arg4[%c0_14, %c0_15] : memref<128x10xbf16, #tpu.memory_space<vmem>>, vector<128x10xbf16>
      %cst_16 = arith.constant dense<0.000000e+00> : vector<2x10xf32>
      %20 = tpu.matmul %18, %19, %cst_16 {dimension_numbers = #tpu.dot_dimension_numbers<[1], [0], [0], [1], [0, 0, 1, 1], [], []>} : vector<2x128xbf16>, vector<128x10xbf16>, vector<2x10xf32> -> vector<2x10xf32>
      %c0_17 = arith.constant 0 : index
      %c0_18 = arith.constant 0 : index
      %21 = vector.load %arg5[%c0_17, %c0_18] : memref<1x10xf32, #tpu.memory_space<vmem>>, vector<1x10xf32>
      %22 = vector.broadcast %21 : vector<1x10xf32> to vector<2x10xf32>
      %23 = arith.addf %20, %22 : vector<2x10xf32>
      %c0_19 = arith.constant 0 : index
      %c0_20 = arith.constant 0 : index
      %24 = vector.load %arg6[%c0_19, %c0_20] : memref<2x10xf32, #tpu.memory_space<vmem>>, vector<2x10xf32>
      tpu.vector_store %arg6[%c0_19, %c0_20], %23 {strides = array<i32>} : memref<2x10xf32, #tpu.memory_space<vmem>>, vector<2x10xf32>,
    } else {
    }
    return
  }
  func.func @transform_0(%arg0: i32) -> (i32, i32) {
    %c0_i32 = arith.constant 0 : i32
    %c0_i32_0 = arith.constant 0 : i32
    return %c0_i32, %arg0 : i32, i32
  }
  func.func @transform_1(%arg0: i32) -> (i32, i32) {
    %c0_i32 = arith.constant 0 : i32
    %c0_i32_0 = arith.constant 0 : i32
    return %arg0, %c0_i32 : i32, i32
  }
  func.func @transform_2(%arg0: i32) -> (i32, i32) {
    %c0_i32 = arith.constant 0 : i32
    %c0_i32_0 = arith.constant 0 : i32
    %c0_i32_1 = arith.constant 0 : i32
    return %c0_i32, %c0_i32_0 : i32, i32
  }
  func.func @transform_3(%arg0: i32) -> (i32, i32) {
    %c0_i32 = arith.constant 0 : i32
    %c0_i32_0 = arith.constant 0 : i32
    %c0_i32_1 = arith.constant 0 : i32
    return %c0_i32, %c0_i32_0 : i32, i32
  }
  func.func @transform_4(%arg0: i32) -> (i32, i32) {
    %c0_i32 = arith.constant 0 : i32
    %c0_i32_0 = arith.constant 0 : i32
    %c0_i32_1 = arith.constant 0 : i32
    return %c0_i32, %c0_i32_0 : i32, i32
  }
  func.func @transform_5(%arg0: i32) -> (i32, i32) {
    %c0_i32 = arith.constant 0 : i32
    %c0_i32_0 = arith.constant 0 : i32
    %c0_i32_1 = arith.constant 0 : i32
    return %c0_i32, %c0_i32_0 : i32, i32
  }
}

</mosaic_0001>

<bundles_post_ra>
// kernel: simple_cnn_forward.4
= control target key start
LH: loop header
LB: loop body
LE: loop exit
PB: predicated region body
PF: predicated region fallthrough
CT: control target
= control target key end

     0   :  { %8 = vsyncpa [#allocation3], 0  ;;  %s2945_s0 = inlined_call_operand.vmem [shape: bf16[1352,9], index: 0, kind: input, shape index: {}]   ;;  %s2946_s1 = inlined_call_operand.hbm [shape: bf16[9,32], index: 1, kind: input, shape index: {}]   ;;  %s2947_s2 = inlined_call_operand.hbm [shape: f32[1,32], index: 2, kind: input, shape index: {}]   ;;  %s2948_s3 = inlined_call_operand.vmem [shape: bf16[1352,32], index: 3, kind: output, shape index: {}]  }
   0x1   :  { %9 = vsyncpa [#allocation5], 0  ;;  %s2373_s12 = smov 0   ;;  %s2375_s13 = smov 0  }
   0x2   :  { %s2377_s14 = smov 0  }
   0x3 LB: > { %s2386_s15 = sadd.s32 4294967295, %s2314_s14   ;;  %s2388_s16 = sadd.s32 1, %s2314_s14   ;;  %s2314_s14 = sphi %s2377_s14, %s2965_s14   ;;  %s2310_s13 = sphi %s2375_s13, %s2964_s13   ;;  %s2306_s12 = sphi %s2373_s12, %s2963_s12  }
   0x4   : > { %s87_s17 = ssub.s32 %s2314_s14, %s2388_s16  ;;  %s90_s18 = sadd.s32 1, %s2310_s13 }
   0x5   : > { %p88_p0 = scmp.eq.s32.totalorder %s87_s17, 0  ;;  %p100_p1 = scmp.ne.s32.totalorder %s2310_s13, %s2306_s12 }
   0x6   : > { %p101_p2 = scmp.eq.s32.totalorder %s2386_s15, 2  ;;  %p1726_p3 = scmp.ge.s32.totalorder %s2314_s14, 1 }
   0x7   : > { %s2396_s19 = scalar_select %p88_p0, %s2310_s13, %s90_s18  }
   0x8   : > { %p2398_p4 = por %p101_p2, %p100_p1  ;;  %p114_p5 = scmp.lt.s32.totalorder %s2314_s14, 4 }
   0x9   : > { %p2949_p6 = scmp.eq.s32.totalorder %s2386_s15, 0  ;;  %s2348_s22 = smov [#allocation2]  }
   0xa   : > { %s2951_s20 = scalar_select %p2398_p4, 1, 0 }
   0xb   : > { %p2403_p7 = pnand %p1726_p3, %p114_p5  ;;  %s126_s23 = sshll.u32 %s2348_s22, 4  ;;  %s127_s23 = int_to_ptr.vmem [resolvable:$true] %s126_s23 }
   0xc   : > { %s2349_s25 = smov [#allocation4]   ;;  %s2196_s29 = scalar_lea.hbm %s2946_s1, 128 }
   0xd   : > { %s2952_s21 = scalar_select %p2403_p7, 1, 0 }
   0xe   : > { %p2059_p8 = pneg %p2403_p7  ;;  %s140_s26 = sshll.u32 %s2349_s25, 4  ;;  %s2415_s26 = int_to_ptr.vmem [resolvable:$true] %s140_s26 }
   0xf   : > { %p2197_p10 = scmp.ne.s32.totalorder %s2946_s1, %s2196_s29  ;;  %p2203_p0 = scmp.lt.u32.totalorder %s2196_s29, %s2946_s1 }
  0x10   : > { %p2411_p9 = pnand %p2949_p6, %p2059_p8 }
  0x12   : > { %p2198_p11 = pneg %p2411_p9 }
  0x14   : > { %p2199_p12 = pnand %p2198_p11, %p2197_p10 }
  0x16   : > { %p2200_p13 = pneg %p2199_p12 }
  0x18   : > { %p2205_p1 = pnand %p2203_p0, %p2200_p13 }
  0x1a   : > { %2208 = shalt.err (!%p2205_p1)
}
  0x1b   : > { %s2209_s7 = scalar_lea.vmem %s127_s23, 128  ;;  %p2217_p8 = scmp.lt.s32.totalorder %s127_s23, %s127_s23 }
  0x1c   : > { %p2210_p2 = scmp.ne.s32.totalorder %s127_s23, %s2209_s7  ;;  %p2218_p6 = scmp.lt.s32.totalorder %s2209_s7, %s2209_s7 }
  0x1e   : > { %p2212_p3 = pnand %p2210_p2, %p2198_p11  ;;  %p2219_p4 = por %p2218_p6, %p2217_p8 }
  0x20   : > { %p2213_p5 = pneg %p2212_p3 }
  0x22   : > { %p2220_p7 = pnand %p2219_p4, %p2213_p5 }
  0x24   : > { %2223 = shalt.err (!%p2220_p7)
}
  0x25   : > { %s2350_s8 = smov 64   ;;  %s2351_s9 = smov 4  }
  0x26   : > { %2062 = dma.hbm_to_vmem [thread:$0]  (!%p2411_p9), %s2946_s1, 128, %s127_s23, [#allocation3], %s2350_s8, %s2350_s8, %s2351_s9  }
  0x27   : > { %s2224_s18 = scalar_lea.hbm %s2947_s2, 16 }
  0x28   : > { %p2225_p10 = scmp.ne.s32.totalorder %s2947_s2, %s2224_s18  ;;  %p2231_p7 = scmp.lt.u32.totalorder %s2224_s18, %s2947_s2 }
  0x2a   : > { %p2227_p4 = pnand %p2225_p10, %p2198_p11 }
  0x2c   : > { %p2228_p6 = pneg %p2227_p4 }
  0x2e   : > { %p2233_p12 = pnand %p2231_p7, %p2228_p6 }
  0x30   : > { %2236 = shalt.err (!%p2233_p12)
}
  0x31   : > { %s2237_s23 = scalar_lea.vmem %s2415_s26, 16  ;;  %s2244_s29 = scalar_lea.vmem %s2415_s26, 32 }
  0x32   : > { %p2238_p13 = scmp.ne.s32.totalorder %s2415_s26, %s2237_s23  ;;  %p2245_p2 = scmp.lt.s32.totalorder %s2415_s26, %s2415_s26 }
  0x33   : > { %p2246_p3 = scmp.lt.s32.totalorder %s2244_s29, %s2237_s23 }
  0x34   : > { %p2240_p0 = pnand %p2238_p13, %p2198_p11 }
  0x35   : > { %p2247_p5 = por %p2246_p3, %p2245_p2 }
  0x36   : > { %p2241_p1 = pneg %p2240_p0 }
  0x38   : > { %p2248_p8 = pnand %p2247_p5, %p2241_p1 }
  0x3a   : > { %2251 = shalt.err (!%p2248_p8)
}
  0x3b   : > { %2065 = dma.hbm_to_vmem [thread:$0]  (!%p2411_p9), %s2947_s2, 16, %s2415_s26, [#allocation5]  }
  0x3c   : > { %p2954_p10 = scmp.ne.s32.totalorder %s2952_s21, 0 }
  0x3d   : > { %p2955_p11 = scmp.eq.s32.totalorder (!%p2954_p10), %s2386_s15, 0 }
  0x3e   : > { %170 = sbr.rel (%p2954_p10) target bundleno = 453 (0x1c5), region = 32 }
  0x45   : > { %2297 = dma.done.wait (%p2955_p11), [#allocation3], 128   ;;  %p2956_p4 = pmov %p2955_p11 }
  0x47   : > { %2299 = vsyncadd (%p2956_p4), [#allocation3], 4294967168  ;;  %p2957_p6 = pmov %p2956_p4 }
  0x48   : > { %p2958_p7 = pmov %p2956_p4 }
  0x49   : > { %2301 = dma.done.wait (%p2957_p6), [#allocation5], 16  }
  0x4a   : > { %2303 = vsyncadd (%p2958_p7), [#allocation5], 4294967280  ;;  %vm556_vm0 = vcmask 1043456   ;;  %s2476_s24 = sshll.u32 %s2386_s15, 6  ;;  %vm557_vm1 = vcmask 1044480   ;;  %v2352_v0 = vmov 65535  }
  0x4b   : > { %p206_p9 = scmp.lt.s32.totalorder %s2476_s24, 168  ;;  %v558_v1 = vsel %vm556_vm0, 4294967295, %v2352_v0  ;;  %vm459_vm2 = vcmask 72704   ;;  %v2163_v3 = vld [vmem:[#allocation2] sm:$0x1f]   ;;  %s198_s8 = sand.u32 1, %s2306_s12  }
  0x4c   : > { %v559_v2 = vsel %vm557_vm1, %v558_v1, 0  ;;  %v2550_v37 = vld [vmem:[#allocation4] ss:$0 sm:$0xff]  ;;  %s1733_s9 = sshll.u32 %s198_s8, 8  ;;  %vm1172_vm3 = vcmask 257024   ;;  %p2959_p12 = scmp.ne.s32.totalorder %s2951_s20, 0 }
  0x4d   : > { %s207_s21 = scalar_select %p206_p9, %s2476_s24, 168  ;;  %v561_v5 = vand.u32 %v2163_v3, %v559_v2 }
  0x4e   : > { %s2560_s12 = scalar_lea.vmem [#allocation6], %s1733_s9   ;;  %s1245_s10 = ssub.s32 (%p2959_p12), 169, %s2476_s24 }
  0x4f   : > { %s1735_s26 = sshll.u32 %s207_s21, 2  ;;  %1983 = vmatprep.subr.bf16.mxu0 %v561_v5  ;;  %2049 = vmatprep.subr.bf16.mxu1 %v561_v5  ;;  %s1947_s11 = sshll.u32 (%p2959_p12), %s2386_s15, 8 }
  0x50   : > { %s2483_s7 = scalar_lea.vmem %s2945_s0, %s1735_s26  ;;  %1984 = vmatpush3.bf16.msra.mxu0 %v561_v5  ;;  %2050 = vmatpush3.bf16.msra.mxu1 %v561_v5  ;;  %p1246_p13 = scmp.lt.s32.totalorder (%p2959_p12), %s1245_s10, 64 }
  0x51   : > { %v2164_v4 = vld [vmem:[%s2483_s7] sm:$0xff]   ;;  %v2166_v7 = vld [vmem:[%s2483_s7 + $0x8] sm:$0xff]   ;;  %v2168_v9 = vld [vmem:[%s2483_s7 + $0x10] sm:$0xff]   ;;  %s2753_s18 = scalar_lea.vmem (%p2959_p12), %s2948_s3, %s1947_s11  }
  0x52   : > { %v2165_v6 = vld [vmem:[%s2483_s7 + $0x80] sm:$0xff]   ;;  %1985 = vmatprep.mubr.msk.bf16.mxu0 %vm459_vm2, %v2164_v4  ;;  %v2167_v8 = vld [vmem:[%s2483_s7 + $0x88] sm:$0xff]   ;;  %v2169_v10 = vld [vmem:[%s2483_s7 + $0x90] sm:$0xff]  }
  0x53   : > { %2017 = vmatprep.mubr.msk.bf16.mxu1 %vm459_vm2, %v2165_v6  ;;  %1986 = vmatmul.mubr.msk.bf16.vlgmr.msra.gmra.mrb[0].mxu0 %vm459_vm2, %v2166_v7  ;;  %v2170_v11 = vld [vmem:[%s2483_s7 + $0x18] sm:$0xff]   ;;  %v2172_v13 = vld [vmem:[%s2483_s7 + $0x20] sm:$0xff]   ;;  %v2174_v15 = vld [vmem:[%s2483_s7 + $0x28] sm:$0xff]  }
  0x54   : > { %2018 = vmatmul.mubr.msk.bf16.vlgmr.msra.gmra.mrb[0].mxu1 %vm459_vm2, %v2167_v8  ;;  %1989 = vmatprep.mubr.msk.bf16.mxu0 %vm459_vm2, %v2168_v9  ;;  %v2171_v12 = vld [vmem:[%s2483_s7 + $0x98] sm:$0xff]   ;;  %v2173_v14 = vld [vmem:[%s2483_s7 + $0xa0] sm:$0xff]   ;;  %v2175_v16 = vld [vmem:[%s2483_s7 + $0xa8] sm:$0xff]  }
  0x55   : > { %2021 = vmatprep.mubr.msk.bf16.mxu1 %vm459_vm2, %v2169_v10  ;;  %v2176_v17 = vld [vmem:[%s2483_s7 + $0x30] sm:$0xff]   ;;  %v2178_v19 = vld [vmem:[%s2483_s7 + $0x38] sm:$0xff]   ;;  %v2180_v21 = vld [vmem:[%s2483_s7 + $0x40] sm:$0xff]  }
  0x56   : > { %v2177_v18 = vld [vmem:[%s2483_s7 + $0xb0] sm:$0xff]   ;;  %v2179_v20 = vld [vmem:[%s2483_s7 + $0xb8] sm:$0xff]   ;;  %v2181_v22 = vld [vmem:[%s2483_s7 + $0xc0] sm:$0xff]  }
  0x57   : > { %v2182_v23 = vld [vmem:[%s2483_s7 + $0x48] sm:$0xff]   ;;  %v2184_v25 = vld [vmem:[%s2483_s7 + $0x50] sm:$0xff]   ;;  %v2186_v27 = vld [vmem:[%s2483_s7 + $0x58] sm:$0xff]  }
  0x58   : > { %v2183_v24 = vld [vmem:[%s2483_s7 + $0xc8] sm:$0xff]   ;;  %v2185_v26 = vld [vmem:[%s2483_s7 + $0xd0] sm:$0xff]   ;;  %v2187_v28 = vld [vmem:[%s2483_s7 + $0xd8] sm:$0xff]  }
  0x59   : > { %v2188_v29 = vld [vmem:[%s2483_s7 + $0x60] sm:$0xff]   ;;  %v2190_v31 = vld [vmem:[%s2483_s7 + $0x68] sm:$0xff]   ;;  %v2192_v33 = vld [vmem:[%s2483_s7 + $0x70] sm:$0xff]  }
  0x5a   : > { %v2189_v30 = vld [vmem:[%s2483_s7 + $0xe0] sm:$0xff]   ;;  %v2191_v32 = vld [vmem:[%s2483_s7 + $0xe8] sm:$0xff]   ;;  %v2193_v34 = vld [vmem:[%s2483_s7 + $0xf0] sm:$0xff]  }
  0x5b   : > { %1990 = vmatmul.mubr.msk.bf16.gmra.mrb[4].mxu0 %vm459_vm2, %v2170_v11  ;;  %v2194_v35 = vld [vmem:[%s2483_s7 + $0x78] sm:$0xff]  }
  0x5c   : > { %2022 = vmatmul.mubr.msk.bf16.gmra.mrb[4].mxu1 %vm459_vm2, %v2171_v12  ;;  %1993 = vmatprep.mubr.msk.bf16.mxu0 %vm459_vm2, %v2172_v13  ;;  %v2195_v36 = vld [vmem:[%s2483_s7 + $0xf8] sm:$0xff]  }
  0x5d   : > { %2025 = vmatprep.mubr.msk.bf16.mxu1 %vm459_vm2, %v2173_v14 }
  0x63   : > { %1994 = vmatmul.mubr.msk.bf16.gmra.mrb[8].mxu0 %vm459_vm2, %v2174_v15 }
  0x64   : > { %2026 = vmatmul.mubr.msk.bf16.gmra.mrb[8].mxu1 %vm459_vm2, %v2175_v16  ;;  %1997 = vmatprep.mubr.msk.bf16.mxu0 %vm459_vm2, %v2176_v17 }
  0x65   : > { %2029 = vmatprep.mubr.msk.bf16.mxu1 %vm459_vm2, %v2177_v18 }
  0x6b   : > { %1998 = vmatmul.mubr.msk.bf16.gmra.mrb[12].mxu0 %vm459_vm2, %v2178_v19 }
  0x6c   : > { %2030 = vmatmul.mubr.msk.bf16.gmra.mrb[12].mxu1 %vm459_vm2, %v2179_v20  ;;  %2001 = vmatprep.mubr.msk.bf16.mxu0 %vm459_vm2, %v2180_v21 }
  0x6d   : > { %2033 = vmatprep.mubr.msk.bf16.mxu1 %vm459_vm2, %v2181_v22 }
  0x73   : > { %2002 = vmatmul.mubr.msk.bf16.gmra.mrb[16].mxu0 %vm459_vm2, %v2182_v23 }
  0x74   : > { %2034 = vmatmul.mubr.msk.bf16.gmra.mrb[16].mxu1 %vm459_vm2, %v2183_v24  ;;  %2005 = vmatprep.mubr.msk.bf16.mxu0 %vm459_vm2, %v2184_v25 }
  0x75   : > { %2037 = vmatprep.mubr.msk.bf16.mxu1 %vm459_vm2, %v2185_v26 }
  0x7b   : > { %2006 = vmatmul.mubr.msk.bf16.gmra.mrb[20].mxu0 %vm459_vm2, %v2186_v27 }
  0x7c   : > { %2038 = vmatmul.mubr.msk.bf16.gmra.mrb[20].mxu1 %vm459_vm2, %v2187_v28  ;;  %2009 = vmatprep.mubr.msk.bf16.mxu0 %vm459_vm2, %v2188_v29 }
  0x7d   : > { %2041 = vmatprep.mubr.msk.bf16.mxu1 %vm459_vm2, %v2189_v30 }
  0x83   : > { %2010 = vmatmul.mubr.msk.bf16.gmra.mrb[24].mxu0 %vm459_vm2, %v2190_v31 }
  0x84   : > { %2042 = vmatmul.mubr.msk.bf16.gmra.mrb[24].mxu1 %vm459_vm2, %v2191_v32  ;;  %2013 = vmatprep.mubr.msk.bf16.mxu0 %vm459_vm2, %v2192_v33 }
  0x85   : > { %2045 = vmatprep.mubr.msk.bf16.mxu1 %vm459_vm2, %v2193_v34 }
  0x8b   : > { %2014 = vmatmul.mubr.msk.bf16.gmra.mrb[28].mxu0 %vm459_vm2, %v2194_v35 }
  0x8c   : > { %2046 = vmatmul.mubr.msk.bf16.gmra.mrb[28].mxu1 %vm459_vm2, %v2195_v36 }
 0x126   : > { %v1987_v38 = vpop.f32.mrb[0].mxu0 }
 0x127   : > { %v2019_v39 = vpop.f32.mrb[0].mxu1  ;;  %v606_v40 = vadd.f32 %v1987_v38, %v2550_v37  ;;  %v597_v42 = vpop.f32.mrb[1].mxu0 }
 0x128   : > { %v734_v41 = vadd.f32 %v2019_v39, %v2550_v37  ;;  %v725_v43 = vpop.f32.mrb[1].mxu1  ;;  %v598_v44 = vadd.f32 %v2550_v37, %v597_v42  ;;  %v1988_v46 = vpop.f32.mrb[2].mxu0 }
 0x129   : > { %v726_v45 = vadd.f32 %v2550_v37, %v725_v43  ;;  %v2020_v47 = vpop.f32.mrb[2].mxu1  ;;  %v854_v48 = vmax.f32 %v606_v40, 0.0  ;;  %v609_v50 = vadd.f32 %v1988_v46, %v2550_v37  ;;  %v600_v52 = vpop.f32.mrb[3].mxu0 }
 0x12a   : > { %v886_v49 = vmax.f32 %v734_v41, 0.0  ;;  %v737_v51 = vadd.f32 %v2020_v47, %v2550_v37  ;;  %v728_v53 = vpop.f32.mrb[3].mxu1  ;;  %v852_v54 = vmax.f32 %v598_v44, 0.0  ;;  %v601_v56 = vadd.f32 %v2550_v37, %v600_v52 }
 0x12b   : > { %v884_v55 = vmax.f32 %v726_v45, 0.0  ;;  %v729_v57 = vadd.f32 %v2550_v37, %v728_v53  ;;  %v1885_v58 = vpack.c.bf16 %v854_v48, %v854_v48  ;;  %v855_v60 = vmax.f32 %v609_v50, 0.0 }
 0x12c   : > { %v1917_v59 = vpack.c.bf16 %v886_v49, %v886_v49  ;;  %v887_v61 = vmax.f32 %v737_v51, 0.0  ;;  %v1883_v62 = vpack.c.bf16 %v852_v54, %v852_v54  ;;  %v853_v0 = vmax.f32 %v601_v56, 0.0 }
 0x12d   : > { %v1915_v63 = vpack.c.bf16 %v884_v55, %v884_v55  ;;  %v885_v1 = vmax.f32 %v729_v57, 0.0  ;;  %1175 = vst.msk [vmem:[%s2560_s12 + $0x8] sm:$0xf] %vm1172_vm3, %v1885_v58  ;;  %v1886_v2 = vpack.c.bf16 %v855_v60, %v855_v60 }
 0x12e   : > { %1207 = vst.msk [vmem:[%s2560_s12 + $0x88] sm:$0xf] %vm1172_vm3, %v1917_v59  ;;  %v1918_v3 = vpack.c.bf16 %v887_v61, %v887_v61  ;;  %1173 = vst.msk [vmem:[%s2560_s12] sm:$0xf] %vm1172_vm3, %v1883_v62  ;;  %v1884_v4 = vpack.c.bf16 %v853_v0, %v853_v0  ;;  %v1991_v6 = vpop.f32.mrb[4].mxu0 }
 0x12f   : > { %1205 = vst.msk [vmem:[%s2560_s12 + $0x80] sm:$0xf] %vm1172_vm3, %v1915_v63  ;;  %v1916_v5 = vpack.c.bf16 %v885_v1, %v885_v1  ;;  %v2023_v7 = vpop.f32.mrb[4].mxu1  ;;  %1176 = vst.msk [vmem:[%s2560_s12 + $0xc] sm:$0xf] %vm1172_vm3, %v1886_v2  ;;  %v622_v8 = vadd.f32 %v1991_v6, %v2550_v37  ;;  %v613_v10 = vpop.f32.mrb[5].mxu0 }
 0x130   : > { %1208 = vst.msk [vmem:[%s2560_s12 + $0x8c] sm:$0xf] %vm1172_vm3, %v1918_v3  ;;  %v750_v9 = vadd.f32 %v2023_v7, %v2550_v37  ;;  %v741_v11 = vpop.f32.mrb[5].mxu1  ;;  %1174 = vst.msk [vmem:[%s2560_s12 + $0x4] sm:$0xf] %vm1172_vm3, %v1884_v4  ;;  %v614_v12 = vadd.f32 %v2550_v37, %v613_v10  ;;  %v1992_v14 = vpop.f32.mrb[6].mxu0 }
 0x131   : > { %1206 = vst.msk [vmem:[%s2560_s12 + $0x84] sm:$0xf] %vm1172_vm3, %v1916_v5  ;;  %v742_v13 = vadd.f32 %v2550_v37, %v741_v11  ;;  %v2024_v15 = vpop.f32.mrb[6].mxu1  ;;  %v858_v16 = vmax.f32 %v622_v8, 0.0  ;;  %v625_v18 = vadd.f32 %v1992_v14, %v2550_v37  ;;  %v616_v20 = vpop.f32.mrb[7].mxu0 }
 0x132   : > { %v890_v17 = vmax.f32 %v750_v9, 0.0  ;;  %v753_v19 = vadd.f32 %v2024_v15, %v2550_v37  ;;  %v744_v21 = vpop.f32.mrb[7].mxu1  ;;  %v856_v22 = vmax.f32 %v614_v12, 0.0  ;;  %v617_v24 = vadd.f32 %v2550_v37, %v616_v20 }
 0x133   : > { %v888_v23 = vmax.f32 %v742_v13, 0.0  ;;  %v745_v25 = vadd.f32 %v2550_v37, %v744_v21  ;;  %v1889_v26 = vpack.c.bf16 %v858_v16, %v858_v16  ;;  %v859_v28 = vmax.f32 %v625_v18, 0.0 }
 0x134   : > { %v1921_v27 = vpack.c.bf16 %v890_v17, %v890_v17  ;;  %v891_v29 = vmax.f32 %v753_v19, 0.0  ;;  %v1887_v30 = vpack.c.bf16 %v856_v22, %v856_v22  ;;  %v857_v32 = vmax.f32 %v617_v24, 0.0 }
 0x135   : > { %v1919_v31 = vpack.c.bf16 %v888_v23, %v888_v23  ;;  %v889_v33 = vmax.f32 %v745_v25, 0.0  ;;  %1179 = vst.msk [vmem:[%s2560_s12 + $0x18] sm:$0xf] %vm1172_vm3, %v1889_v26  ;;  %v1890_v34 = vpack.c.bf16 %v859_v28, %v859_v28 }
 0x136   : > { %1211 = vst.msk [vmem:[%s2560_s12 + $0x98] sm:$0xf] %vm1172_vm3, %v1921_v27  ;;  %v1922_v35 = vpack.c.bf16 %v891_v29, %v891_v29  ;;  %1177 = vst.msk [vmem:[%s2560_s12 + $0x10] sm:$0xf] %vm1172_vm3, %v1887_v30  ;;  %v1888_v36 = vpack.c.bf16 %v857_v32, %v857_v32  ;;  %v1995_v39 = vpop.f32.mrb[8].mxu0 }
 0x137   : > { %1209 = vst.msk [vmem:[%s2560_s12 + $0x90] sm:$0xf] %vm1172_vm3, %v1919_v31  ;;  %v1920_v38 = vpack.c.bf16 %v889_v33, %v889_v33  ;;  %v2027_v40 = vpop.f32.mrb[8].mxu1  ;;  %1180 = vst.msk [vmem:[%s2560_s12 + $0x1c] sm:$0xf] %vm1172_vm3, %v1890_v34  ;;  %v638_v41 = vadd.f32 %v1995_v39, %v2550_v37  ;;  %v629_v43 = vpop.f32.mrb[9].mxu0 }
 0x138   : > { %1212 = vst.msk [vmem:[%s2560_s12 + $0x9c] sm:$0xf] %vm1172_vm3, %v1922_v35  ;;  %v766_v42 = vadd.f32 %v2027_v40, %v2550_v37  ;;  %v757_v44 = vpop.f32.mrb[9].mxu1  ;;  %1178 = vst.msk [vmem:[%s2560_s12 + $0x14] sm:$0xf] %vm1172_vm3, %v1888_v36  ;;  %v630_v45 = vadd.f32 %v2550_v37, %v629_v43  ;;  %v1996_v47 = vpop.f32.mrb[10].mxu0 }
 0x139   : > { %1210 = vst.msk [vmem:[%s2560_s12 + $0x94] sm:$0xf] %vm1172_vm3, %v1920_v38  ;;  %v758_v46 = vadd.f32 %v2550_v37, %v757_v44  ;;  %v2028_v48 = vpop.f32.mrb[10].mxu1  ;;  %v862_v49 = vmax.f32 %v638_v41, 0.0  ;;  %v641_v51 = vadd.f32 %v1996_v47, %v2550_v37  ;;  %v632_v53 = vpop.f32.mrb[11].mxu0 }
 0x13a   : > { %v894_v50 = vmax.f32 %v766_v42, 0.0  ;;  %v769_v52 = vadd.f32 %v2028_v48, %v2550_v37  ;;  %v760_v54 = vpop.f32.mrb[11].mxu1  ;;  %v860_v55 = vmax.f32 %v630_v45, 0.0  ;;  %v633_v57 = vadd.f32 %v2550_v37, %v632_v53 }
 0x13b   : > { %v892_v56 = vmax.f32 %v758_v46, 0.0  ;;  %v761_v58 = vadd.f32 %v2550_v37, %v760_v54  ;;  %v1893_v59 = vpack.c.bf16 %v862_v49, %v862_v49  ;;  %v863_v61 = vmax.f32 %v641_v51, 0.0 }
 0x13c   : > { %v1925_v60 = vpack.c.bf16 %v894_v50, %v894_v50  ;;  %v895_v62 = vmax.f32 %v769_v52, 0.0  ;;  %v1891_v63 = vpack.c.bf16 %v860_v55, %v860_v55  ;;  %v861_v1 = vmax.f32 %v633_v57, 0.0 }
 0x13d   : > { %v1923_v0 = vpack.c.bf16 %v892_v56, %v892_v56  ;;  %v893_v2 = vmax.f32 %v761_v58, 0.0  ;;  %1183 = vst.msk [vmem:[%s2560_s12 + $0x28] sm:$0xf] %vm1172_vm3, %v1893_v59  ;;  %v1894_v3 = vpack.c.bf16 %v863_v61, %v863_v61 }
 0x13e   : > { %1215 = vst.msk [vmem:[%s2560_s12 + $0xa8] sm:$0xf] %vm1172_vm3, %v1925_v60  ;;  %v1926_v4 = vpack.c.bf16 %v895_v62, %v895_v62  ;;  %1181 = vst.msk [vmem:[%s2560_s12 + $0x20] sm:$0xf] %vm1172_vm3, %v1891_v63  ;;  %v1892_v5 = vpack.c.bf16 %v861_v1, %v861_v1  ;;  %v1999_v7 = vpop.f32.mrb[12].mxu0 }
 0x13f   : > { %1213 = vst.msk [vmem:[%s2560_s12 + $0xa0] sm:$0xf] %vm1172_vm3, %v1923_v0  ;;  %v1924_v6 = vpack.c.bf16 %v893_v2, %v893_v2  ;;  %v2031_v8 = vpop.f32.mrb[12].mxu1  ;;  %1184 = vst.msk [vmem:[%s2560_s12 + $0x2c] sm:$0xf] %vm1172_vm3, %v1894_v3  ;;  %v654_v9 = vadd.f32 %v1999_v7, %v2550_v37  ;;  %v645_v11 = vpop.f32.mrb[13].mxu0 }
 0x140   : > { %1216 = vst.msk [vmem:[%s2560_s12 + $0xac] sm:$0xf] %vm1172_vm3, %v1926_v4  ;;  %v782_v10 = vadd.f32 %v2031_v8, %v2550_v37  ;;  %v773_v12 = vpop.f32.mrb[13].mxu1  ;;  %1182 = vst.msk [vmem:[%s2560_s12 + $0x24] sm:$0xf] %vm1172_vm3, %v1892_v5  ;;  %v646_v13 = vadd.f32 %v2550_v37, %v645_v11  ;;  %v2000_v15 = vpop.f32.mrb[14].mxu0 }
 0x141   : > { %1214 = vst.msk [vmem:[%s2560_s12 + $0xa4] sm:$0xf] %vm1172_vm3, %v1924_v6  ;;  %v774_v14 = vadd.f32 %v2550_v37, %v773_v12  ;;  %v2032_v16 = vpop.f32.mrb[14].mxu1  ;;  %v866_v17 = vmax.f32 %v654_v9, 0.0  ;;  %v657_v19 = vadd.f32 %v2000_v15, %v2550_v37  ;;  %v648_v21 = vpop.f32.mrb[15].mxu0 }
 0x142   : > { %v898_v18 = vmax.f32 %v782_v10, 0.0  ;;  %v785_v20 = vadd.f32 %v2032_v16, %v2550_v37  ;;  %v776_v22 = vpop.f32.mrb[15].mxu1  ;;  %v864_v23 = vmax.f32 %v646_v13, 0.0  ;;  %v649_v25 = vadd.f32 %v2550_v37, %v648_v21 }
 0x143   : > { %v896_v24 = vmax.f32 %v774_v14, 0.0  ;;  %v777_v26 = vadd.f32 %v2550_v37, %v776_v22  ;;  %v1897_v27 = vpack.c.bf16 %v866_v17, %v866_v17  ;;  %v867_v29 = vmax.f32 %v657_v19, 0.0 }
 0x144   : > { %v1929_v28 = vpack.c.bf16 %v898_v18, %v898_v18  ;;  %v899_v30 = vmax.f32 %v785_v20, 0.0  ;;  %v1895_v31 = vpack.c.bf16 %v864_v23, %v864_v23  ;;  %v865_v33 = vmax.f32 %v649_v25, 0.0 }
 0x145   : > { %v1927_v32 = vpack.c.bf16 %v896_v24, %v896_v24  ;;  %v897_v34 = vmax.f32 %v777_v26, 0.0  ;;  %1187 = vst.msk [vmem:[%s2560_s12 + $0x38] sm:$0xf] %vm1172_vm3, %v1897_v27  ;;  %v1898_v35 = vpack.c.bf16 %v867_v29, %v867_v29 }
 0x146   : > { %1219 = vst.msk [vmem:[%s2560_s12 + $0xb8] sm:$0xf] %vm1172_vm3, %v1929_v28  ;;  %v1930_v36 = vpack.c.bf16 %v899_v30, %v899_v30  ;;  %1185 = vst.msk [vmem:[%s2560_s12 + $0x30] sm:$0xf] %vm1172_vm3, %v1895_v31  ;;  %v1896_v38 = vpack.c.bf16 %v865_v33, %v865_v33  ;;  %v2003_v40 = vpop.f32.mrb[16].mxu0 }
 0x147   : > { %1217 = vst.msk [vmem:[%s2560_s12 + $0xb0] sm:$0xf] %vm1172_vm3, %v1927_v32  ;;  %v1928_v39 = vpack.c.bf16 %v897_v34, %v897_v34  ;;  %v2035_v41 = vpop.f32.mrb[16].mxu1  ;;  %1188 = vst.msk [vmem:[%s2560_s12 + $0x3c] sm:$0xf] %vm1172_vm3, %v1898_v35  ;;  %v670_v42 = vadd.f32 %v2003_v40, %v2550_v37  ;;  %v661_v44 = vpop.f32.mrb[17].mxu0 }
 0x148   : > { %1220 = vst.msk [vmem:[%s2560_s12 + $0xbc] sm:$0xf] %vm1172_vm3, %v1930_v36  ;;  %v798_v43 = vadd.f32 %v2035_v41, %v2550_v37  ;;  %v789_v45 = vpop.f32.mrb[17].mxu1  ;;  %1186 = vst.msk [vmem:[%s2560_s12 + $0x34] sm:$0xf] %vm1172_vm3, %v1896_v38  ;;  %v662_v46 = vadd.f32 %v2550_v37, %v661_v44  ;;  %v2004_v48 = vpop.f32.mrb[18].mxu0 }
 0x149   : > { %1218 = vst.msk [vmem:[%s2560_s12 + $0xb4] sm:$0xf] %vm1172_vm3, %v1928_v39  ;;  %v790_v47 = vadd.f32 %v2550_v37, %v789_v45  ;;  %v2036_v49 = vpop.f32.mrb[18].mxu1  ;;  %v870_v50 = vmax.f32 %v670_v42, 0.0  ;;  %v673_v52 = vadd.f32 %v2004_v48, %v2550_v37  ;;  %v664_v54 = vpop.f32.mrb[19].mxu0 }
 0x14a   : > { %v902_v51 = vmax.f32 %v798_v43, 0.0  ;;  %v801_v53 = vadd.f32 %v2036_v49, %v2550_v37  ;;  %v792_v55 = vpop.f32.mrb[19].mxu1  ;;  %v868_v56 = vmax.f32 %v662_v46, 0.0  ;;  %v665_v58 = vadd.f32 %v2550_v37, %v664_v54 }
 0x14b   : > { %v900_v57 = vmax.f32 %v790_v47, 0.0  ;;  %v793_v59 = vadd.f32 %v2550_v37, %v792_v55  ;;  %v1901_v60 = vpack.c.bf16 %v870_v50, %v870_v50  ;;  %v871_v62 = vmax.f32 %v673_v52, 0.0 }
 0x14c   : > { %v1933_v61 = vpack.c.bf16 %v902_v51, %v902_v51  ;;  %v903_v63 = vmax.f32 %v801_v53, 0.0  ;;  %v1899_v0 = vpack.c.bf16 %v868_v56, %v868_v56  ;;  %v869_v2 = vmax.f32 %v665_v58, 0.0 }
 0x14d   : > { %v1931_v1 = vpack.c.bf16 %v900_v57, %v900_v57  ;;  %v901_v3 = vmax.f32 %v793_v59, 0.0  ;;  %1191 = vst.msk [vmem:[%s2560_s12 + $0x48] sm:$0xf] %vm1172_vm3, %v1901_v60  ;;  %v1902_v4 = vpack.c.bf16 %v871_v62, %v871_v62 }
 0x14e   : > { %1223 = vst.msk [vmem:[%s2560_s12 + $0xc8] sm:$0xf] %vm1172_vm3, %v1933_v61  ;;  %v1934_v5 = vpack.c.bf16 %v903_v63, %v903_v63  ;;  %1189 = vst.msk [vmem:[%s2560_s12 + $0x40] sm:$0xf] %vm1172_vm3, %v1899_v0  ;;  %v1900_v6 = vpack.c.bf16 %v869_v2, %v869_v2  ;;  %v2007_v8 = vpop.f32.mrb[20].mxu0 }
 0x14f   : > { %1221 = vst.msk [vmem:[%s2560_s12 + $0xc0] sm:$0xf] %vm1172_vm3, %v1931_v1  ;;  %v1932_v7 = vpack.c.bf16 %v901_v3, %v901_v3  ;;  %v2039_v9 = vpop.f32.mrb[20].mxu1  ;;  %1192 = vst.msk [vmem:[%s2560_s12 + $0x4c] sm:$0xf] %vm1172_vm3, %v1902_v4  ;;  %v686_v10 = vadd.f32 %v2007_v8, %v2550_v37  ;;  %v677_v12 = vpop.f32.mrb[21].mxu0 }
 0x150   : > { %1224 = vst.msk [vmem:[%s2560_s12 + $0xcc] sm:$0xf] %vm1172_vm3, %v1934_v5  ;;  %v814_v11 = vadd.f32 %v2039_v9, %v2550_v37  ;;  %v805_v13 = vpop.f32.mrb[21].mxu1  ;;  %1190 = vst.msk [vmem:[%s2560_s12 + $0x44] sm:$0xf] %vm1172_vm3, %v1900_v6  ;;  %v678_v14 = vadd.f32 %v2550_v37, %v677_v12  ;;  %v2008_v16 = vpop.f32.mrb[22].mxu0 }
 0x151   : > { %1222 = vst.msk [vmem:[%s2560_s12 + $0xc4] sm:$0xf] %vm1172_vm3, %v1932_v7  ;;  %v806_v15 = vadd.f32 %v2550_v37, %v805_v13  ;;  %v2040_v17 = vpop.f32.mrb[22].mxu1  ;;  %v874_v18 = vmax.f32 %v686_v10, 0.0  ;;  %v689_v20 = vadd.f32 %v2008_v16, %v2550_v37  ;;  %v680_v22 = vpop.f32.mrb[23].mxu0 }
 0x152   : > { %v906_v19 = vmax.f32 %v814_v11, 0.0  ;;  %v817_v21 = vadd.f32 %v2040_v17, %v2550_v37  ;;  %v808_v23 = vpop.f32.mrb[23].mxu1  ;;  %v872_v24 = vmax.f32 %v678_v14, 0.0  ;;  %v681_v26 = vadd.f32 %v2550_v37, %v680_v22 }
 0x153   : > { %v904_v25 = vmax.f32 %v806_v15, 0.0  ;;  %v809_v27 = vadd.f32 %v2550_v37, %v808_v23  ;;  %v1905_v28 = vpack.c.bf16 %v874_v18, %v874_v18  ;;  %v875_v30 = vmax.f32 %v689_v20, 0.0 }
 0x154   : > { %v1937_v29 = vpack.c.bf16 %v906_v19, %v906_v19  ;;  %v907_v31 = vmax.f32 %v817_v21, 0.0  ;;  %v1903_v32 = vpack.c.bf16 %v872_v24, %v872_v24  ;;  %v873_v34 = vmax.f32 %v681_v26, 0.0 }
 0x155   : > { %v1935_v33 = vpack.c.bf16 %v904_v25, %v904_v25  ;;  %v905_v35 = vmax.f32 %v809_v27, 0.0  ;;  %1195 = vst.msk [vmem:[%s2560_s12 + $0x58] sm:$0xf] %vm1172_vm3, %v1905_v28  ;;  %v1906_v36 = vpack.c.bf16 %v875_v30, %v875_v30 }
 0x156   : > { %1227 = vst.msk [vmem:[%s2560_s12 + $0xd8] sm:$0xf] %vm1172_vm3, %v1937_v29  ;;  %v1938_v38 = vpack.c.bf16 %v907_v31, %v907_v31  ;;  %1193 = vst.msk [vmem:[%s2560_s12 + $0x50] sm:$0xf] %vm1172_vm3, %v1903_v32  ;;  %v1904_v39 = vpack.c.bf16 %v873_v34, %v873_v34  ;;  %v2011_v41 = vpop.f32.mrb[24].mxu0 }
 0x157   : > { %1225 = vst.msk [vmem:[%s2560_s12 + $0xd0] sm:$0xf] %vm1172_vm3, %v1935_v33  ;;  %v1936_v40 = vpack.c.bf16 %v905_v35, %v905_v35  ;;  %v2043_v42 = vpop.f32.mrb[24].mxu1  ;;  %1196 = vst.msk [vmem:[%s2560_s12 + $0x5c] sm:$0xf] %vm1172_vm3, %v1906_v36  ;;  %v702_v43 = vadd.f32 %v2011_v41, %v2550_v37  ;;  %v693_v45 = vpop.f32.mrb[25].mxu0 }
 0x158   : > { %1228 = vst.msk [vmem:[%s2560_s12 + $0xdc] sm:$0xf] %vm1172_vm3, %v1938_v38  ;;  %v830_v44 = vadd.f32 %v2043_v42, %v2550_v37  ;;  %v821_v46 = vpop.f32.mrb[25].mxu1  ;;  %1194 = vst.msk [vmem:[%s2560_s12 + $0x54] sm:$0xf] %vm1172_vm3, %v1904_v39  ;;  %v694_v47 = vadd.f32 %v2550_v37, %v693_v45  ;;  %v2012_v49 = vpop.f32.mrb[26].mxu0 }
 0x159   : > { %1226 = vst.msk [vmem:[%s2560_s12 + $0xd4] sm:$0xf] %vm1172_vm3, %v1936_v40  ;;  %v822_v48 = vadd.f32 %v2550_v37, %v821_v46  ;;  %v2044_v50 = vpop.f32.mrb[26].mxu1  ;;  %v878_v51 = vmax.f32 %v702_v43, 0.0  ;;  %v705_v53 = vadd.f32 %v2012_v49, %v2550_v37  ;;  %v696_v55 = vpop.f32.mrb[27].mxu0 }
 0x15a   : > { %v910_v52 = vmax.f32 %v830_v44, 0.0  ;;  %v833_v54 = vadd.f32 %v2044_v50, %v2550_v37  ;;  %v824_v56 = vpop.f32.mrb[27].mxu1  ;;  %v876_v57 = vmax.f32 %v694_v47, 0.0  ;;  %v697_v59 = vadd.f32 %v2550_v37, %v696_v55 }
 0x15b   : > { %v908_v58 = vmax.f32 %v822_v48, 0.0  ;;  %v825_v60 = vadd.f32 %v2550_v37, %v824_v56  ;;  %v1909_v61 = vpack.c.bf16 %v878_v51, %v878_v51  ;;  %v879_v63 = vmax.f32 %v705_v53, 0.0 }
 0x15c   : > { %v1941_v62 = vpack.c.bf16 %v910_v52, %v910_v52  ;;  %v911_v0 = vmax.f32 %v833_v54, 0.0  ;;  %v1907_v1 = vpack.c.bf16 %v876_v57, %v876_v57  ;;  %v877_v3 = vmax.f32 %v697_v59, 0.0 }
 0x15d   : > { %v1939_v2 = vpack.c.bf16 %v908_v58, %v908_v58  ;;  %v909_v4 = vmax.f32 %v825_v60, 0.0  ;;  %1199 = vst.msk [vmem:[%s2560_s12 + $0x68] sm:$0xf] %vm1172_vm3, %v1909_v61  ;;  %v1910_v5 = vpack.c.bf16 %v879_v63, %v879_v63 }
 0x15e   : > { %1231 = vst.msk [vmem:[%s2560_s12 + $0xe8] sm:$0xf] %vm1172_vm3, %v1941_v62  ;;  %v1942_v6 = vpack.c.bf16 %v911_v0, %v911_v0  ;;  %1197 = vst.msk [vmem:[%s2560_s12 + $0x60] sm:$0xf] %vm1172_vm3, %v1907_v1  ;;  %v1908_v7 = vpack.c.bf16 %v877_v3, %v877_v3  ;;  %v2015_v9 = vpop.f32.mrb[28].mxu0 }
 0x15f   : > { %1229 = vst.msk [vmem:[%s2560_s12 + $0xe0] sm:$0xf] %vm1172_vm3, %v1939_v2  ;;  %v1940_v8 = vpack.c.bf16 %v909_v4, %v909_v4  ;;  %v2047_v10 = vpop.f32.mrb[28].mxu1  ;;  %1200 = vst.msk [vmem:[%s2560_s12 + $0x6c] sm:$0xf] %vm1172_vm3, %v1910_v5  ;;  %v718_v11 = vadd.f32 %v2015_v9, %v2550_v37  ;;  %v709_v13 = vpop.f32.mrb[29].mxu0 }
 0x160   : > { %1232 = vst.msk [vmem:[%s2560_s12 + $0xec] sm:$0xf] %vm1172_vm3, %v1942_v6  ;;  %v846_v12 = vadd.f32 %v2047_v10, %v2550_v37  ;;  %v837_v14 = vpop.f32.mrb[29].mxu1  ;;  %1198 = vst.msk [vmem:[%s2560_s12 + $0x64] sm:$0xf] %vm1172_vm3, %v1908_v7  ;;  %v710_v15 = vadd.f32 %v2550_v37, %v709_v13  ;;  %v2016_v17 = vpop.f32.mrb[30].mxu0 }
 0x161   : > { %1230 = vst.msk [vmem:[%s2560_s12 + $0xe4] sm:$0xf] %vm1172_vm3, %v1940_v8  ;;  %v838_v16 = vadd.f32 %v2550_v37, %v837_v14  ;;  %v2048_v18 = vpop.f32.mrb[30].mxu1  ;;  %v882_v19 = vmax.f32 %v718_v11, 0.0  ;;  %v721_v21 = vadd.f32 %v2016_v17, %v2550_v37  ;;  %v712_v23 = vpop.f32.mrb[31].mxu0 }
 0x162   : > { %v914_v20 = vmax.f32 %v846_v12, 0.0  ;;  %v849_v22 = vadd.f32 %v2048_v18, %v2550_v37  ;;  %v840_v24 = vpop.f32.mrb[31].mxu1  ;;  %v880_v25 = vmax.f32 %v710_v15, 0.0  ;;  %v713_v27 = vadd.f32 %v2550_v37, %v712_v23 }
 0x163   : > { %v912_v26 = vmax.f32 %v838_v16, 0.0  ;;  %v841_v28 = vadd.f32 %v2550_v37, %v840_v24  ;;  %v1913_v29 = vpack.c.bf16 %v882_v19, %v882_v19  ;;  %v883_v31 = vmax.f32 %v721_v21, 0.0  ;;  %1243 = sbr.rel (!%p2959_p12) target bundleno = 453 (0x1c5), region = 44 }
 0x164   : > { %v1945_v30 = vpack.c.bf16 %v914_v20, %v914_v20  ;;  %v915_v32 = vmax.f32 %v849_v22, 0.0  ;;  %v1911_v33 = vpack.c.bf16 %v880_v25, %v880_v25  ;;  %v881_v35 = vmax.f32 %v713_v27, 0.0 }
 0x165   : > { %v1943_v34 = vpack.c.bf16 %v912_v26, %v912_v26  ;;  %v913_v36 = vmax.f32 %v841_v28, 0.0  ;;  %1203 = vst.msk [vmem:[%s2560_s12 + $0x78] sm:$0xf] %vm1172_vm3, %v1913_v29  ;;  %v1914_v38 = vpack.c.bf16 %v883_v31, %v883_v31 }
 0x166   : > { %1235 = vst.msk [vmem:[%s2560_s12 + $0xf8] sm:$0xf] %vm1172_vm3, %v1945_v30  ;;  %v1946_v39 = vpack.c.bf16 %v915_v32, %v915_v32  ;;  %1201 = vst.msk [vmem:[%s2560_s12 + $0x70] sm:$0xf] %vm1172_vm3, %v1911_v33  ;;  %v1912_v37 = vpack.c.bf16 %v881_v35, %v881_v35 }
 0x167   : > { %1233 = vst.msk [vmem:[%s2560_s12 + $0xf0] sm:$0xf] %vm1172_vm3, %v1943_v34  ;;  %v1944_v40 = vpack.c.bf16 %v913_v36, %v913_v36  ;;  %1204 = vst.msk [vmem:[%s2560_s12 + $0x7c] sm:$0xf] %vm1172_vm3, %v1914_v38 }
 0x168   : > { %1236 = vst.msk [vmem:[%s2560_s12 + $0xfc] sm:$0xf] %vm1172_vm3, %v1946_v39  ;;  %1202 = vst.msk [vmem:[%s2560_s12 + $0x74] sm:$0xf] %vm1172_vm3, %v1912_v37 }
 0x169   : > { %1234 = vst.msk [vmem:[%s2560_s12 + $0xf4] sm:$0xf] %vm1172_vm3, %v1944_v40 }
 0x16a   : > { %s2967_s10 = smov (!%p1246_p13, %s1245_s10), 64 }
 0x16b   : > { %s1868_s22 = sshll.u32 %s2967_s10, 6 }
 0x16c   : > { %p1871_p0 = scmp.eq.s32.totalorder %s1868_s22, 0 }
 0x16d   : > { %s2759_s25 = sshrl.u32 (!%p1871_p0), %s2967_s10, 6 }
 0x16e   : > { %1254 = sbr.rel (%p1871_p0) target bundleno = 453 (0x1c5), region = 48  ;;  %p1872_p1 = scmp.le.s32.totalorder (!%p1871_p0), %s2759_s25, 0 }
 0x175   : > { %1663 = sbr.rel (%p1872_p1) target bundleno = 432 (0x1b0), region = 121  ;;  %s2960_s15 = smov (!%p1872_p1), %s2753_s18 }
 0x176   : > { %s2961_s20 = smov (!%p1872_p1), %s2560_s12  ;;  %s2768_s27 = smov (!%p1872_p1), 0  }
 0x177   : > { %s2770_s28 = smov (!%p1872_p1), 0  }
 0x17c LB: >> { %v1270_v41 = vld [vmem:[%s2322_s20] sm:$0xf]  ;;  %v1272_v42 = vld [vmem:[%s2322_s20 + $0x4] sm:$0xf]  ;;  %v1274_v43 = vld [vmem:[%s2322_s20 + $0x8] sm:$0xf]  ;;  %s2330_s28 = sphi %s2770_s28, %s1264_s28   ;;  %s2326_s27 = sphi %s2768_s27, %s2962_s27   ;;  %s2322_s20 = sphi %s2961_s20, %s1403_s20   ;;  %s2318_s15 = sphi %s2960_s15, %s1404_s15  }
 0x17d   : >> { %1271 = vst [vmem:[%s2318_s15] sm:$0xf] %v1270_v41  ;;  %1273 = vst [vmem:[%s2318_s15 + $0x4] sm:$0xf] %v1272_v42  ;;  %v1276_v44 = vld [vmem:[%s2322_s20 + $0xc] sm:$0xf]  ;;  %s1398_s23 = sadd.s32 1, %s2326_s27 }
 0x17e   : >> { %1275 = vst [vmem:[%s2318_s15 + $0x8] sm:$0xf] %v1274_v43  ;;  %v1278_v45 = vld [vmem:[%s2322_s20 + $0x10] sm:$0xf]  ;;  %v1280_v46 = vld [vmem:[%s2322_s20 + $0x14] sm:$0xf]  ;;  %p1399_p2 = scmp.ge.s32.totalorder %s1398_s23, %s2759_s25 }
 0x17f   : >> { %1277 = vst [vmem:[%s2318_s15 + $0xc] sm:$0xf] %v1276_v44  ;;  %1279 = vst [vmem:[%s2318_s15 + $0x10] sm:$0xf] %v1278_v45  ;;  %v1282_v47 = vld [vmem:[%s2322_s20 + $0x18] sm:$0xf] }
 0x180   : >> { %1281 = vst [vmem:[%s2318_s15 + $0x14] sm:$0xf] %v1280_v46  ;;  %v1284_v48 = vld [vmem:[%s2322_s20 + $0x1c] sm:$0xf]  ;;  %v1286_v49 = vld [vmem:[%s2322_s20 + $0x20] sm:$0xf] }
 0x181   : >> { %1283 = vst [vmem:[%s2318_s15 + $0x18] sm:$0xf] %v1282_v47  ;;  %1285 = vst [vmem:[%s2318_s15 + $0x1c] sm:$0xf] %v1284_v48  ;;  %v1288_v50 = vld [vmem:[%s2322_s20 + $0x24] sm:$0xf] }
 0x182   : >> { %1287 = vst [vmem:[%s2318_s15 + $0x20] sm:$0xf] %v1286_v49  ;;  %v1290_v51 = vld [vmem:[%s2322_s20 + $0x28] sm:$0xf]  ;;  %v1292_v52 = vld [vmem:[%s2322_s20 + $0x2c] sm:$0xf] }
 0x183   : >> { %1289 = vst [vmem:[%s2318_s15 + $0x24] sm:$0xf] %v1288_v50  ;;  %1291 = vst [vmem:[%s2318_s15 + $0x28] sm:$0xf] %v1290_v51  ;;  %v1294_v53 = vld [vmem:[%s2322_s20 + $0x30] sm:$0xf] }
 0x184   : >> { %1293 = vst [vmem:[%s2318_s15 + $0x2c] sm:$0xf] %v1292_v52  ;;  %v1296_v54 = vld [vmem:[%s2322_s20 + $0x34] sm:$0xf]  ;;  %v1298_v55 = vld [vmem:[%s2322_s20 + $0x38] sm:$0xf] }
 0x185   : >> { %1295 = vst [vmem:[%s2318_s15 + $0x30] sm:$0xf] %v1294_v53  ;;  %1297 = vst [vmem:[%s2318_s15 + $0x34] sm:$0xf] %v1296_v54  ;;  %v1300_v56 = vld [vmem:[%s2322_s20 + $0x3c] sm:$0xf] }
 0x186   : >> { %1299 = vst [vmem:[%s2318_s15 + $0x38] sm:$0xf] %v1298_v55  ;;  %v1302_v57 = vld [vmem:[%s2322_s20 + $0x40] sm:$0xf]  ;;  %v1304_v58 = vld [vmem:[%s2322_s20 + $0x44] sm:$0xf] }
 0x187   : >> { %1301 = vst [vmem:[%s2318_s15 + $0x3c] sm:$0xf] %v1300_v56  ;;  %1303 = vst [vmem:[%s2318_s15 + $0x40] sm:$0xf] %v1302_v57  ;;  %v1306_v59 = vld [vmem:[%s2322_s20 + $0x48] sm:$0xf] }
 0x188   : >> { %1305 = vst [vmem:[%s2318_s15 + $0x44] sm:$0xf] %v1304_v58  ;;  %v1308_v60 = vld [vmem:[%s2322_s20 + $0x4c] sm:$0xf]  ;;  %v1310_v61 = vld [vmem:[%s2322_s20 + $0x50] sm:$0xf] }
 0x189   : >> { %1307 = vst [vmem:[%s2318_s15 + $0x48] sm:$0xf] %v1306_v59  ;;  %1309 = vst [vmem:[%s2318_s15 + $0x4c] sm:$0xf] %v1308_v60  ;;  %v1312_v62 = vld [vmem:[%s2322_s20 + $0x54] sm:$0xf] }
 0x18a   : >> { %1311 = vst [vmem:[%s2318_s15 + $0x50] sm:$0xf] %v1310_v61  ;;  %v1314_v63 = vld [vmem:[%s2322_s20 + $0x58] sm:$0xf]  ;;  %v1316_v0 = vld [vmem:[%s2322_s20 + $0x5c] sm:$0xf] }
 0x18b   : >> { %1313 = vst [vmem:[%s2318_s15 + $0x54] sm:$0xf] %v1312_v62  ;;  %1315 = vst [vmem:[%s2318_s15 + $0x58] sm:$0xf] %v1314_v63  ;;  %v1318_v1 = vld [vmem:[%s2322_s20 + $0x60] sm:$0xf] }
 0x18c   : >> { %1317 = vst [vmem:[%s2318_s15 + $0x5c] sm:$0xf] %v1316_v0  ;;  %v1320_v2 = vld [vmem:[%s2322_s20 + $0x64] sm:$0xf]  ;;  %v1322_v3 = vld [vmem:[%s2322_s20 + $0x68] sm:$0xf] }
 0x18d   : >> { %1319 = vst [vmem:[%s2318_s15 + $0x60] sm:$0xf] %v1318_v1  ;;  %1321 = vst [vmem:[%s2318_s15 + $0x64] sm:$0xf] %v1320_v2  ;;  %v1324_v4 = vld [vmem:[%s2322_s20 + $0x6c] sm:$0xf] }
 0x18e   : >> { %1323 = vst [vmem:[%s2318_s15 + $0x68] sm:$0xf] %v1322_v3  ;;  %v1326_v5 = vld [vmem:[%s2322_s20 + $0x70] sm:$0xf]  ;;  %v1328_v6 = vld [vmem:[%s2322_s20 + $0x74] sm:$0xf] }
 0x18f   : >> { %1325 = vst [vmem:[%s2318_s15 + $0x6c] sm:$0xf] %v1324_v4  ;;  %1327 = vst [vmem:[%s2318_s15 + $0x70] sm:$0xf] %v1326_v5  ;;  %v1330_v7 = vld [vmem:[%s2322_s20 + $0x78] sm:$0xf] }
 0x190   : >> { %1329 = vst [vmem:[%s2318_s15 + $0x74] sm:$0xf] %v1328_v6  ;;  %v1332_v8 = vld [vmem:[%s2322_s20 + $0x7c] sm:$0xf]  ;;  %v1334_v9 = vld [vmem:[%s2322_s20 + $0x80] sm:$0xf] }
 0x191   : >> { %1331 = vst [vmem:[%s2318_s15 + $0x78] sm:$0xf] %v1330_v7  ;;  %1333 = vst [vmem:[%s2318_s15 + $0x7c] sm:$0xf] %v1332_v8  ;;  %v1336_v10 = vld [vmem:[%s2322_s20 + $0x84] sm:$0xf] }
 0x192   : >> { %1335 = vst [vmem:[%s2318_s15 + $0x80] sm:$0xf] %v1334_v9  ;;  %v1338_v11 = vld [vmem:[%s2322_s20 + $0x88] sm:$0xf]  ;;  %v1340_v12 = vld [vmem:[%s2322_s20 + $0x8c] sm:$0xf] }
 0x193   : >> { %1337 = vst [vmem:[%s2318_s15 + $0x84] sm:$0xf] %v1336_v10  ;;  %1339 = vst [vmem:[%s2318_s15 + $0x88] sm:$0xf] %v1338_v11  ;;  %v1342_v13 = vld [vmem:[%s2322_s20 + $0x90] sm:$0xf] }
 0x194   : >> { %1341 = vst [vmem:[%s2318_s15 + $0x8c] sm:$0xf] %v1340_v12  ;;  %v1344_v14 = vld [vmem:[%s2322_s20 + $0x94] sm:$0xf]  ;;  %v1346_v15 = vld [vmem:[%s2322_s20 + $0x98] sm:$0xf] }
 0x195   : >> { %1343 = vst [vmem:[%s2318_s15 + $0x90] sm:$0xf] %v1342_v13  ;;  %1345 = vst [vmem:[%s2318_s15 + $0x94] sm:$0xf] %v1344_v14  ;;  %v1348_v16 = vld [vmem:[%s2322_s20 + $0x9c] sm:$0xf] }
 0x196   : >> { %1347 = vst [vmem:[%s2318_s15 + $0x98] sm:$0xf] %v1346_v15  ;;  %v1350_v17 = vld [vmem:[%s2322_s20 + $0xa0] sm:$0xf]  ;;  %v1352_v18 = vld [vmem:[%s2322_s20 + $0xa4] sm:$0xf] }
 0x197   : >> { %1349 = vst [vmem:[%s2318_s15 + $0x9c] sm:$0xf] %v1348_v16  ;;  %1351 = vst [vmem:[%s2318_s15 + $0xa0] sm:$0xf] %v1350_v17  ;;  %v1354_v19 = vld [vmem:[%s2322_s20 + $0xa8] sm:$0xf] }
 0x198   : >> { %1353 = vst [vmem:[%s2318_s15 + $0xa4] sm:$0xf] %v1352_v18  ;;  %v1356_v20 = vld [vmem:[%s2322_s20 + $0xac] sm:$0xf]  ;;  %v1358_v21 = vld [vmem:[%s2322_s20 + $0xb0] sm:$0xf] }
 0x199   : >> { %1355 = vst [vmem:[%s2318_s15 + $0xa8] sm:$0xf] %v1354_v19  ;;  %1357 = vst [vmem:[%s2318_s15 + $0xac] sm:$0xf] %v1356_v20  ;;  %v1360_v22 = vld [vmem:[%s2322_s20 + $0xb4] sm:$0xf] }
 0x19a   : >> { %1359 = vst [vmem:[%s2318_s15 + $0xb0] sm:$0xf] %v1358_v21  ;;  %v1362_v23 = vld [vmem:[%s2322_s20 + $0xb8] sm:$0xf]  ;;  %v1364_v24 = vld [vmem:[%s2322_s20 + $0xbc] sm:$0xf] }
 0x19b   : >> { %1361 = vst [vmem:[%s2318_s15 + $0xb4] sm:$0xf] %v1360_v22  ;;  %1363 = vst [vmem:[%s2318_s15 + $0xb8] sm:$0xf] %v1362_v23  ;;  %v1366_v25 = vld [vmem:[%s2322_s20 + $0xc0] sm:$0xf] }
 0x19c   : >> { %1365 = vst [vmem:[%s2318_s15 + $0xbc] sm:$0xf] %v1364_v24  ;;  %v1368_v26 = vld [vmem:[%s2322_s20 + $0xc4] sm:$0xf]  ;;  %v1370_v27 = vld [vmem:[%s2322_s20 + $0xc8] sm:$0xf] }
 0x19d   : >> { %1367 = vst [vmem:[%s2318_s15 + $0xc0] sm:$0xf] %v1366_v25  ;;  %1369 = vst [vmem:[%s2318_s15 + $0xc4] sm:$0xf] %v1368_v26  ;;  %v1372_v28 = vld [vmem:[%s2322_s20 + $0xcc] sm:$0xf] }
 0x19e   : >> { %1371 = vst [vmem:[%s2318_s15 + $0xc8] sm:$0xf] %v1370_v27  ;;  %v1374_v29 = vld [vmem:[%s2322_s20 + $0xd0] sm:$0xf]  ;;  %v1376_v30 = vld [vmem:[%s2322_s20 + $0xd4] sm:$0xf] }
 0x19f   : >> { %1373 = vst [vmem:[%s2318_s15 + $0xcc] sm:$0xf] %v1372_v28  ;;  %1375 = vst [vmem:[%s2318_s15 + $0xd0] sm:$0xf] %v1374_v29  ;;  %v1378_v31 = vld [vmem:[%s2322_s20 + $0xd8] sm:$0xf] }
 0x1a0   : >> { %1377 = vst [vmem:[%s2318_s15 + $0xd4] sm:$0xf] %v1376_v30  ;;  %v1380_v32 = vld [vmem:[%s2322_s20 + $0xdc] sm:$0xf]  ;;  %v1382_v33 = vld [vmem:[%s2322_s20 + $0xe0] sm:$0xf] }
 0x1a1   : >> { %1379 = vst [vmem:[%s2318_s15 + $0xd8] sm:$0xf] %v1378_v31  ;;  %1381 = vst [vmem:[%s2318_s15 + $0xdc] sm:$0xf] %v1380_v32  ;;  %v1384_v34 = vld [vmem:[%s2322_s20 + $0xe4] sm:$0xf] }
 0x1a2   : >> { %1383 = vst [vmem:[%s2318_s15 + $0xe0] sm:$0xf] %v1382_v33  ;;  %v1386_v35 = vld [vmem:[%s2322_s20 + $0xe8] sm:$0xf]  ;;  %v1388_v36 = vld [vmem:[%s2322_s20 + $0xec] sm:$0xf] }
 0x1a3   : >> { %1385 = vst [vmem:[%s2318_s15 + $0xe4] sm:$0xf] %v1384_v34  ;;  %1387 = vst [vmem:[%s2318_s15 + $0xe8] sm:$0xf] %v1386_v35  ;;  %v1390_v38 = vld [vmem:[%s2322_s20 + $0xf0] sm:$0xf] }
 0x1a4   : >> { %1389 = vst [vmem:[%s2318_s15 + $0xec] sm:$0xf] %v1388_v36  ;;  %v1392_v39 = vld [vmem:[%s2322_s20 + $0xf4] sm:$0xf]  ;;  %v1394_v37 = vld [vmem:[%s2322_s20 + $0xf8] sm:$0xf] }
 0x1a5   : >> { %1391 = vst [vmem:[%s2318_s15 + $0xf0] sm:$0xf] %v1390_v38  ;;  %1393 = vst [vmem:[%s2318_s15 + $0xf4] sm:$0xf] %v1392_v39  ;;  %v1396_v40 = vld [vmem:[%s2322_s20 + $0xfc] sm:$0xf] }
 0x1a6   : >> { %1395 = vst [vmem:[%s2318_s15 + $0xf8] sm:$0xf] %v1394_v37  ;;  %1397 = vst [vmem:[%s2318_s15 + $0xfc] sm:$0xf] %v1396_v40  ;;  %s2969_s23 = smov (%p1399_p2, %s1398_s23), 0  ;;  %s1264_s28 = sadd.s32 1, %s2330_s28  }
 0x1a7   : >> { %s1873_s29 = sshll.u32 %s2969_s23, 8  ;;  %p1263_p3 = scmp.ge.s32.totalorder %s1264_s28, %s2759_s25 }
 0x1a8   : >> { %s1403_s20 = scalar_lea.vmem %s2560_s12, %s1873_s29 [#allocation6]   ;;  %s1404_s15 = scalar_lea.vmem %s2753_s18, %s1873_s29  }
 0x1a9   : >> { %s2962_s27 = smov %s2969_s23  ;;  %1266 = sbr.rel (!%p1263_p3) target bundleno = 380 (0x17c), region = 127 }
 0x1b0 PF: > { %s2927_s30 = sand.u32 63, %s2967_s10   ;;  %s1948_s4 = sshll.u32 %s2759_s25, 8 }
 0x1b1   : > { %s1409_s24 = scalar_lea.vmem %s2560_s12, %s1948_s4 [#allocation6]   ;;  %s1411_s21 = scalar_lea.vmem %s2753_s18, %s1948_s4  }
 0x1b2   : > { %p1878_p5 = scmp.le.s32.totalorder %s2927_s30, 0 }
 0x1b3   : > { %s2332_s26 = smov (!%p1878_p5), %s1411_s21   ;;  %s2336_s5 = smov (!%p1878_p5), %s1409_s24  }
 0x1b4   : > { %1677 = sbr.rel (%p1878_p5) target bundleno = 453 (0x1c5), region = 132  ;;  %s2340_s6 = smov (!%p1878_p5), 0  }
 0x1b5   : > { %s2344_s7 = smov (!%p1878_p5), 0  }
 0x1bb LB: >> { %v1421_v41 = vld [vmem:[%s2338_s5] sm:$0xf]  ;;  %s1423_s8 = sadd.s32 1, %s2342_s6  ;;  %s1415_s7 = sadd.s32 1, %s2346_s7   ;;  %s2346_s7 = sphi %s2344_s7, %s1415_s7   ;;  %s2342_s6 = sphi %s2340_s6, %s2341_s6   ;;  %s2338_s5 = sphi %s2336_s5, %s1428_s5   ;;  %s2334_s26 = sphi %s2332_s26, %s1429_s26  }
 0x1bc   : >> { %1422 = vst [vmem:[%s2334_s26] sm:$0xf] %v1421_v41  ;;  %p1424_p8 = scmp.ge.s32.totalorder %s1423_s8, %s2927_s30  ;;  %p1414_p10 = scmp.ge.s32.totalorder %s1415_s7, %s2927_s30 }
 0x1be   : >> { %s2971_s8 = smov (%p1424_p8, %s1423_s8), 0  ;;  %1417 = sbr.rel (!%p1414_p10) target bundleno = 443 (0x1bb), region = 138 }
 0x1bf   : >> { %s1879_s9 = sshll.u32 %s2971_s8, 2  ;;  %s2341_s6 = smov %s2971_s8  }
 0x1c0   : >> { %s1428_s5 = scalar_lea.vmem %s1409_s24, %s1879_s9 [#allocation6]   ;;  %s1429_s26 = scalar_lea.vmem %s1411_s21, %s1879_s9  }
 0x1c5 PF: > { %p12_p11 = scmp.ge.s32.totalorder %s2388_s16, 5   ;;  %s2963_s12 = smov %s2310_s13 }
 0x1c6   : > { %s2964_s13 = smov %s2396_s19  ;;  %s2965_s14 = smov %s2388_s16 }
 0x1c7   :  { %14 = sbr.rel (!%p12_p11) target bundleno = 3 (0x3), region = 149 }
 0x1ce   :  { %1616 = vsyncpa [#allocation3], 1 }
 0x1cf   :  { %1618 = vsyncpa [#allocation3 + $0x1], 1 }
 0x1d0   :  { %1619 = vsyncpa [#allocation5], 1 }

// kernel: simple_cnn_forward.5
= control target key start
LH: loop header
LB: loop body
LE: loop exit
PB: predicated region body
PF: predicated region fallthrough
CT: control target
= control target key end

     0   :  { %s2884_s12 = smov 0   ;;  %s2886_s13 = smov 0   ;;  %s3669_s0 = inlined_call_operand.vmem [shape: bf16[1152,288], index: 0, kind: input, shape index: {}]   ;;  %s3670_s1 = inlined_call_operand.vmem [shape: bf16[288,64], index: 1, kind: input, shape index: {}]   ;;  %s3671_s2 = inlined_call_operand.vmem [shape: f32[1,64], index: 2, kind: input, shape index: {}]   ;;  %s3672_s3 = inlined_call_operand.vmem [shape: f32[1152,64], index: 3, kind: output, shape index: {}]  }
   0x1   :  { %s2888_s14 = smov 0  }
   0x2 LB: > { %s2897_s15 = sadd.s32 4294967295, %s2829_s14   ;;  %s2899_s16 = sadd.s32 1, %s2829_s14   ;;  %s2829_s14 = sphi %s2888_s14, %s3681_s14   ;;  %s2825_s13 = sphi %s2886_s13, %s3680_s13   ;;  %s2821_s12 = sphi %s2884_s12, %s3679_s12  }
   0x3   : > { %s85_s17 = ssub.s32 %s2829_s14, %s2899_s16  ;;  %s88_s18 = sadd.s32 1, %s2825_s13 }
   0x4   : > { %p86_p0 = scmp.eq.s32.totalorder %s85_s17, 0  ;;  %p98_p1 = scmp.ne.s32.totalorder %s2825_s13, %s2821_s12 }
   0x5   : > { %p99_p2 = scmp.eq.s32.totalorder %s2897_s15, 2  ;;  %p2234_p3 = scmp.ge.s32.totalorder %s2829_s14, 1 }
   0x6   : > { %s2907_s19 = scalar_select %p86_p0, %s2825_s13, %s88_s18  }
   0x7   : > { %p2909_p4 = por %p99_p2, %p98_p1  ;;  %p149_p5 = scmp.lt.s32.totalorder %s2829_s14, 4 }
   0x9   : > { %p150_p6 = pnand %p2234_p3, %p149_p5 }
   0xa   : > { %v2629_v0 = vld [vmem:[%s3670_s1] sm:$0xff] (!%p150_p6)   ;;  %v2863_v1 = vmov (!%p150_p6), 0   ;;  %s2919_s23 = sshll.u32 (!%p150_p6), %s2897_s15, 6  ;;  %v2630_v2 = vld [vmem:[%s3670_s1 + $0x8] sm:$0xff] (!%p150_p6)   ;;  %v2631_v3 = vld [vmem:[%s3670_s1 + $0x10] sm:$0xff] (!%p150_p6)   ;;  %vm960_vm0 = vcmask (!%p150_p6), 261120  }
   0xb   : > { %153 = sbr.rel (%p150_p6) target bundleno = 552 (0x228), region = 32  ;;  %1057 = vmatprep.subr.bf16.mxu0 (!%p150_p6), %v2863_v1  ;;  %2507 = vmatprep.subr.bf16.mxu1 (!%p150_p6), %v2863_v1  ;;  %p184_p7 = scmp.lt.s32.totalorder (!%p150_p6), %s2919_s23, 143  ;;  %v2632_v4 = vld [vmem:[%s3670_s1 + $0x18] sm:$0xff] (!%p150_p6)   ;;  %v2633_v5 = vld [vmem:[%s3670_s1 + $0x20] sm:$0xff] (!%p150_p6)   ;;  %v2634_v7 = vld [vmem:[%s3670_s1 + $0x28] sm:$0xff] (!%p150_p6)   ;;  %vm1699_vm1 = vcmask (!%p150_p6), 523264  }
   0xc   : > { %1058 = vmatpush1.bf16.msra.mxu0 (!%p150_p6), %v2629_v0  ;;  %2523 = vmatpush1.bf16.msra.mxu1 (!%p150_p6), %v2629_v0  ;;  %v2635_v9 = vld [vmem:[%s3670_s1 + $0x30] sm:$0xff] (!%p150_p6)   ;;  %v2636_v10 = vld [vmem:[%s3670_s1 + $0x38] sm:$0xff] (!%p150_p6)   ;;  %v2637_v11 = vld [vmem:[%s3670_s1 + $0x40] sm:$0xff] (!%p150_p6)  }
   0xd   : > { %1059 = vmatprep.subr.bf16.mxu0 (!%p150_p6), %v2863_v1  ;;  %2508 = vmatprep.subr.bf16.mxu1 (!%p150_p6), %v2863_v1  ;;  %v2638_v12 = vld [vmem:[%s3670_s1 + $0x48] sm:$0xff] (!%p150_p6)   ;;  %v2639_v13 = vld [vmem:[%s3670_s1 + $0x50] sm:$0xff] (!%p150_p6)   ;;  %v2640_v14 = vld [vmem:[%s3670_s1 + $0x58] sm:$0xff] (!%p150_p6)  }
   0xe   : > { %v2641_v15 = vld [vmem:[%s3670_s1 + $0x60] sm:$0xff] (!%p150_p6)   ;;  %v2642_v16 = vld [vmem:[%s3670_s1 + $0x68] sm:$0xff] (!%p150_p6)   ;;  %v2643_v17 = vld [vmem:[%s3670_s1 + $0x70] sm:$0xff] (!%p150_p6)  }
   0xf   : > { %v2644_v18 = vld [vmem:[%s3670_s1 + $0x78] sm:$0xff] (!%p150_p6)   ;;  %v2651_v19 = vld [vmem:[%s3670_s1 + $0x80] sm:$0xff] (!%p150_p6)   ;;  %v2676_v24 = vld [vmem:[%s3670_s1 + $0x88] sm:$0xff] (!%p150_p6)  }
  0x10   : > { %1060 = vmatpush1.bf16.msra.mxu0 (!%p150_p6), %v2630_v2  ;;  %2524 = vmatpush1.bf16.msra.mxu1 (!%p150_p6), %v2630_v2 }
  0x11   : > { %1061 = vmatprep.subr.bf16.mxu0 (!%p150_p6), %v2863_v1  ;;  %2509 = vmatprep.subr.bf16.mxu1 (!%p150_p6), %v2863_v1 }
  0x12   : > { %s185_s28 = scalar_select %p184_p7, %s2919_s23, 143 }
  0x13   : > { %s1772_s27 = ssub.s32 (%p2909_p4), 144, %s2919_s23 }
  0x14   : > { %1062 = vmatpush1.bf16.msra.mxu0 %v2631_v3  ;;  %2525 = vmatpush1.bf16.msra.mxu1 %v2631_v3  ;;  %s2539_s4 = smul.u32 12, %s185_s28  ;;  %s2402_s28 = sshll.u32 (%p2909_p4), %s2897_s15, 9 }
  0x15   : > { %1063 = vmatprep.subr.bf16.mxu0 %v2863_v1  ;;  %2510 = vmatprep.subr.bf16.mxu1 %v2863_v1  ;;  %p1773_p8 = scmp.lt.s32.totalorder (%p2909_p4), %s1772_s27, 64 }
  0x16   : > { %s2944_s9 = scalar_lea.vmem %s3669_s0, %s2539_s4  ;;  %s3470_s4 = scalar_lea.vmem (%p2909_p4), %s3672_s3, %s2402_s28  }
  0x17   : > { %v2647_v6 = vld [vmem:[%s2944_s9 + $0x4] ss:$12 sps:$4 sm:$0xff]   ;;  %v2645_v20 = vld [vmem:[%s2944_s9] ss:$12 sps:$4 sm:$0xff]   ;;  %v2652_v22 = vld [vmem:[%s2944_s9 + $0x1c] ss:$12 sps:$4 sm:$0xff]  }
  0x18   : > { %1064 = vmatpush1.bf16.msra.mxu0 %v2632_v4  ;;  %2526 = vmatpush1.bf16.msra.mxu1 %v2632_v4  ;;  %v2650_v8 = vld [vmem:[%s2944_s9 + $0x244] ss:$12 sps:$4 sm:$0xff]   ;;  %v2648_v21 = vld [vmem:[%s2944_s9 + $0x240] ss:$12 sps:$4 sm:$0xff]   ;;  %v2654_v23 = vld [vmem:[%s2944_s9 + $0x25c] ss:$12 sps:$4 sm:$0xff]  }
  0x19   : > { %1065 = vmatprep.subr.bf16.mxu0 %v2863_v1  ;;  %2511 = vmatprep.subr.bf16.mxu1 %v2863_v1  ;;  %v2656_v25 = vld [vmem:[%s2944_s9 + $0x18] ss:$12 sps:$4 sm:$0xff]   ;;  %v2658_v27 = vld [vmem:[%s2944_s9 + $0x34] ss:$12 sps:$4 sm:$0xff]   ;;  %v2662_v29 = vld [vmem:[%s2944_s9 + $0x30] ss:$12 sps:$4 sm:$0xff]  }
  0x1a   : > { %1089 = vmatprep.mubr.bf16.mxu0 %v2647_v6  ;;  %1281 = vmatprep.mubr.bf16.mxu1 %v2650_v8  ;;  %v2657_v26 = vld [vmem:[%s2944_s9 + $0x258] ss:$12 sps:$4 sm:$0xff]   ;;  %v2660_v28 = vld [vmem:[%s2944_s9 + $0x274] ss:$12 sps:$4 sm:$0xff]   ;;  %v2663_v30 = vld [vmem:[%s2944_s9 + $0x270] ss:$12 sps:$4 sm:$0xff]  }
  0x1b   : > { %v2664_v31 = vld [vmem:[%s2944_s9 + $0x4c] ss:$12 sps:$4 sm:$0xff]   ;;  %v2668_v33 = vld [vmem:[%s2944_s9 + $0x48] ss:$12 sps:$4 sm:$0xff]   ;;  %v2670_v35 = vld [vmem:[%s2944_s9 + $0x64] ss:$12 sps:$4 sm:$0xff]  }
  0x1c   : > { %1066 = vmatpush1.bf16.msra.mxu0 %v2633_v5  ;;  %2527 = vmatpush1.bf16.msra.mxu1 %v2633_v5  ;;  %v2666_v32 = vld [vmem:[%s2944_s9 + $0x28c] ss:$12 sps:$4 sm:$0xff]   ;;  %v2669_v34 = vld [vmem:[%s2944_s9 + $0x288] ss:$12 sps:$4 sm:$0xff]   ;;  %v2672_v36 = vld [vmem:[%s2944_s9 + $0x2a4] ss:$12 sps:$4 sm:$0xff]  }
  0x1d   : > { %1067 = vmatprep.subr.bf16.mxu0 %v2863_v1  ;;  %2512 = vmatprep.subr.bf16.mxu1 %v2863_v1  ;;  %v2674_v37 = vld [vmem:[%s2944_s9 + $0x60] ss:$12 sps:$4 sm:$0xff]   ;;  %v2677_v39 = vld [vmem:[%s2944_s9 + $0x7c] ss:$12 sps:$4 sm:$0xff]   ;;  %v2681_v41 = vld [vmem:[%s2944_s9 + $0x78] ss:$12 sps:$4 sm:$0xff]  }
  0x1e   : > { %v2675_v38 = vld [vmem:[%s2944_s9 + $0x2a0] ss:$12 sps:$4 sm:$0xff]   ;;  %v2679_v40 = vld [vmem:[%s2944_s9 + $0x2bc] ss:$12 sps:$4 sm:$0xff]   ;;  %v2682_v42 = vld [vmem:[%s2944_s9 + $0x2b8] ss:$12 sps:$4 sm:$0xff]  }
  0x1f   : > { %v2683_v43 = vld [vmem:[%s2944_s9 + $0x94] ss:$12 sps:$4 sm:$0xff]   ;;  %v2687_v45 = vld [vmem:[%s2944_s9 + $0x90] ss:$12 sps:$4 sm:$0xff]   ;;  %v2689_v47 = vld [vmem:[%s2944_s9 + $0xac] ss:$12 sps:$4 sm:$0xff]  }
  0x20   : > { %1068 = vmatpush1.bf16.msra.mxu0 %v2634_v7  ;;  %2528 = vmatpush1.bf16.msra.mxu1 %v2634_v7  ;;  %v2685_v44 = vld [vmem:[%s2944_s9 + $0x2d4] ss:$12 sps:$4 sm:$0xff]   ;;  %v2688_v46 = vld [vmem:[%s2944_s9 + $0x2d0] ss:$12 sps:$4 sm:$0xff]   ;;  %v2691_v48 = vld [vmem:[%s2944_s9 + $0x2ec] ss:$12 sps:$4 sm:$0xff]  }
  0x21   : > { %1069 = vmatprep.subr.bf16.mxu0 %v2863_v1  ;;  %2513 = vmatprep.subr.bf16.mxu1 %v2863_v1  ;;  %v2693_v49 = vld [vmem:[%s2944_s9 + $0xa8] ss:$12 sps:$4 sm:$0xff]   ;;  %v2695_v51 = vld [vmem:[%s2944_s9 + $0xc4] ss:$12 sps:$4 sm:$0xff]   ;;  %v2698_v53 = vld [vmem:[%s2944_s9 + $0xc0] ss:$12 sps:$4 sm:$0xff]  }
  0x22   : > { %v2694_v50 = vld [vmem:[%s2944_s9 + $0x2e8] ss:$12 sps:$4 sm:$0xff]   ;;  %v2699_v54 = vld [vmem:[%s2944_s9 + $0x20] ss:$12 sps:$4 sm:$0xff]   ;;  %v2702_v56 = vld [vmem:[%s2944_s9 + $0x38] ss:$12 sps:$4 sm:$0xff]  }
  0x23   : > { %v2697_v52 = vld [vmem:[%s2944_s9 + $0x8] ss:$12 sps:$4 sm:$0xff]   ;;  %v2703_v57 = vld [vmem:[%s2944_s9 + $0xd8] ss:$12 sps:$4 sm:$0xff]   ;;  %v2704_v58 = vld [vmem:[%s2944_s9 + $0x50] ss:$12 sps:$4 sm:$0xff]  }
  0x24   : > { %1070 = vmatpush1.bf16.msra.mxu0 %v2635_v9  ;;  %2529 = vmatpush1.bf16.msra.mxu1 %v2635_v9  ;;  %v2700_v55 = vld [vmem:[%s2944_s9 + $0xdc] ss:$12 sps:$4 sm:$0xff]   ;;  %v2705_v59 = vld [vmem:[%s2944_s9 + $0xf4] ss:$12 sps:$4 sm:$0xff]   ;;  %v2710_v63 = vld [vmem:[%s2944_s9 + $0x10c] ss:$12 sps:$4 sm:$0xff]  }
  0x25   : > { %1071 = vmatprep.subr.bf16.mxu0 %v2863_v1  ;;  %2514 = vmatprep.subr.bf16.mxu1 %v2863_v1  ;;  %v2707_v60 = vld [vmem:[%s2944_s9 + $0x68] ss:$12 sps:$4 sm:$0xff]   ;;  %v2708_v61 = vld [vmem:[%s2944_s9 + $0xf0] ss:$12 sps:$4 sm:$0xff]   ;;  %v2709_v62 = vld [vmem:[%s2944_s9 + $0x80] ss:$12 sps:$4 sm:$0xff]  }
  0x26   : > { %v2712_v0 = vld [vmem:[%s2944_s9 + $0x98] ss:$12 sps:$4 sm:$0xff]   ;;  %v2714_v2 = vld [vmem:[%s2944_s9 + $0xb0] ss:$12 sps:$4 sm:$0xff]   ;;  %v2717_v4 = vld [vmem:[%s2944_s9 + $0xc8] ss:$12 sps:$4 sm:$0xff]  }
  0x27   : > { %v2715_v3 = vld [vmem:[%s2944_s9 + $0x124] ss:$12 sps:$4 sm:$0xff]   ;;  %v2718_v5 = vld [vmem:[%s2944_s9 + $0x120] ss:$12 sps:$4 sm:$0xff]   ;;  %v2720_v7 = vld [vmem:[%s2944_s9 + $0x13c] ss:$12 sps:$4 sm:$0xff]  }
  0x28   : > { %1072 = vmatpush1.bf16.msra.mxu0 %v2636_v10  ;;  %2530 = vmatpush1.bf16.msra.mxu1 %v2636_v10  ;;  %v2719_v6 = vld [vmem:[%s2944_s9 + $0xe0] ss:$12 sps:$4 sm:$0xff]   ;;  %v2722_v8 = vld [vmem:[%s2944_s9 + $0xf8] ss:$12 sps:$4 sm:$0xff]   ;;  %v2724_v10 = vld [vmem:[%s2944_s9 + $0x110] ss:$12 sps:$4 sm:$0xff]  }
  0x29   : > { %1073 = vmatprep.subr.bf16.mxu0 %v2863_v1  ;;  %2515 = vmatprep.subr.bf16.mxu1 %v2863_v1  ;;  %v2723_v9 = vld [vmem:[%s2944_s9 + $0x138] ss:$12 sps:$4 sm:$0xff]  }
  0x2c   : > { %1074 = vmatpush1.bf16.msra.mxu0 %v2637_v11  ;;  %2531 = vmatpush1.bf16.msra.mxu1 %v2637_v11  ;;  %v2725_v11 = vld [vmem:[%s2944_s9 + $0x154] ss:$12 sps:$4 sm:$0xff]  }
  0x2d   : > { %1075 = vmatprep.subr.bf16.mxu0 %v2863_v1  ;;  %2516 = vmatprep.subr.bf16.mxu1 %v2863_v1 }
  0x30   : > { %1076 = vmatpush1.bf16.msra.mxu0 %v2638_v12  ;;  %2532 = vmatpush1.bf16.msra.mxu1 %v2638_v12  ;;  %v2727_v12 = vld [vmem:[%s2944_s9 + $0x128] ss:$12 sps:$4 sm:$0xff]  }
  0x31   : > { %1077 = vmatprep.subr.bf16.mxu0 %v2863_v1  ;;  %2517 = vmatprep.subr.bf16.mxu1 %v2863_v1 }
  0x34   : > { %1078 = vmatpush1.bf16.msra.mxu0 %v2639_v13  ;;  %2533 = vmatpush1.bf16.msra.mxu1 %v2639_v13  ;;  %v2728_v13 = vld [vmem:[%s2944_s9 + $0x150] ss:$12 sps:$4 sm:$0xff]  }
  0x35   : > { %1079 = vmatprep.subr.bf16.mxu0 %v2863_v1  ;;  %2518 = vmatprep.subr.bf16.mxu1 %v2863_v1 }
  0x38   : > { %1080 = vmatpush1.bf16.msra.mxu0 %v2640_v14  ;;  %2534 = vmatpush1.bf16.msra.mxu1 %v2640_v14  ;;  %v2729_v14 = vld [vmem:[%s2944_s9 + $0x140] ss:$12 sps:$4 sm:$0xff]  }
  0x39   : > { %1081 = vmatprep.subr.bf16.mxu0 %v2863_v1  ;;  %2519 = vmatprep.subr.bf16.mxu1 %v2863_v1 }
  0x3c   : > { %1082 = vmatpush1.bf16.msra.mxu0 %v2641_v15  ;;  %2535 = vmatpush1.bf16.msra.mxu1 %v2641_v15  ;;  %v2730_v15 = vld [vmem:[%s2944_s9 + $0x16c] ss:$12 sps:$4 sm:$0xff]  }
  0x3d   : > { %1083 = vmatprep.subr.bf16.mxu0 %v2863_v1  ;;  %2520 = vmatprep.subr.bf16.mxu1 %v2863_v1 }
  0x40   : > { %1084 = vmatpush1.bf16.msra.mxu0 %v2642_v16  ;;  %2536 = vmatpush1.bf16.msra.mxu1 %v2642_v16  ;;  %v2732_v16 = vld [vmem:[%s2944_s9 + $0x158] ss:$12 sps:$4 sm:$0xff]  }
  0x41   : > { %1085 = vmatprep.subr.bf16.mxu0 %v2863_v1  ;;  %2521 = vmatprep.subr.bf16.mxu1 %v2863_v1 }
  0x44   : > { %1086 = vmatpush1.bf16.msra.mxu0 %v2643_v17  ;;  %2537 = vmatpush1.bf16.msra.mxu1 %v2643_v17  ;;  %v2733_v17 = vld [vmem:[%s2944_s9 + $0x168] ss:$12 sps:$4 sm:$0xff]  }
  0x45   : > { %1087 = vmatprep.subr.bf16.mxu0 %v2863_v1  ;;  %2522 = vmatprep.subr.bf16.mxu1 %v2863_v1  ;;  %v2713_v1 = vld [vmem:[%s2944_s9 + $0x108] ss:$12 sps:$4 sm:$0xff]  }
  0x48   : > { %1088 = vmatpush1.bf16.msra.mxu0 %v2644_v18  ;;  %2538 = vmatpush1.bf16.msra.mxu1 %v2644_v18  ;;  %v2734_v18 = vld [vmem:[%s2944_s9 + $0x170] ss:$12 sps:$4 sm:$0xff]  }
  0x49   : > { %2439 = vmatprep.subr.bf16.mxu1 %v2651_v19 }
  0x4b   : > { %1090 = vmatmul.mubr.bf16.vlgmr.msra.gmra.mrb[0].mxu0 %v2645_v20  ;;  %1282 = vmatmul.mubr.bf16.vlgmr.msra.gmra.mrb[0].mxu1 %v2648_v21  ;;  %v2737_v20 = vld [vmem:[%s2944_s9 + $0x188] ss:$12 sps:$4 sm:$0xff]   ;;  %v2738_v21 = vld [vmem:[%s2944_s9 + $0x180] ss:$12 sps:$4 sm:$0xff]  }
  0x4c   : > { %2440 = vmatpush3.bf16.msra.mxu1 %v2651_v19  ;;  %1097 = vmatprep.mubr.bf16.mxu0 %v2652_v22  ;;  %v2735_v19 = vld [vmem:[%s2944_s9 + $0x184] ss:$12 sps:$4 sm:$0xff]   ;;  %v2739_v22 = vld [vmem:[%s2944_s9 + $0x1a0] ss:$12 sps:$4 sm:$0xff]  }
  0x4d   : > { %1289 = vmatprep.mubr.bf16.mxu1 %v2654_v23  ;;  %2441 = vmatprep.subr.bf16.mxu1 %v2676_v24  ;;  %v2740_v23 = vld [vmem:[%s2944_s9 + $0x19c] ss:$12 sps:$4 sm:$0xff]  }
  0x50   : > { %2442 = vmatpush3.bf16.msra.mxu1 %v2676_v24  ;;  %v2742_v24 = vld [vmem:[%s2944_s9 + $0x1b8] ss:$12 sps:$4 sm:$0xff]  }
  0x53   : > { %1098 = vmatmul.mubr.bf16.gmra.mrb[4].mxu0 %v2656_v25  ;;  %1290 = vmatmul.mubr.bf16.gmra.mrb[4].mxu1 %v2657_v26  ;;  %v2743_v25 = vld [vmem:[%s2944_s9 + $0x198] ss:$12 sps:$4 sm:$0xff]   ;;  %v2744_v26 = vld [vmem:[%s2944_s9 + $0x1d0] ss:$12 sps:$4 sm:$0xff]  }
  0x54   : > { %1105 = vmatprep.mubr.bf16.mxu0 %v2658_v27  ;;  %1297 = vmatprep.mubr.bf16.mxu1 %v2660_v28  ;;  %v2745_v27 = vld [vmem:[%s2944_s9 + $0x1b4] ss:$12 sps:$4 sm:$0xff]  }
  0x55   : > { %v2747_v28 = vld [vmem:[%s2944_s9 + $0x1e8] ss:$12 sps:$4 sm:$0xff]  }
  0x5b   : > { %1106 = vmatmul.mubr.bf16.gmra.mrb[8].mxu0 %v2662_v29  ;;  %1298 = vmatmul.mubr.bf16.gmra.mrb[8].mxu1 %v2663_v30  ;;  %v2748_v29 = vld [vmem:[%s2944_s9 + $0x1b0] ss:$12 sps:$4 sm:$0xff]   ;;  %v2749_v30 = vld [vmem:[%s2944_s9 + $0x200] ss:$12 sps:$4 sm:$0xff]  }
  0x5c   : > { %1113 = vmatprep.mubr.bf16.mxu0 %v2664_v31  ;;  %1305 = vmatprep.mubr.bf16.mxu1 %v2666_v32  ;;  %v2750_v31 = vld [vmem:[%s2944_s9 + $0x1cc] ss:$12 sps:$4 sm:$0xff]  }
  0x5d   : > { %v2752_v32 = vld [vmem:[%s2944_s9 + $0x218] ss:$12 sps:$4 sm:$0xff]  }
  0x63   : > { %1114 = vmatmul.mubr.bf16.gmra.mrb[12].mxu0 %v2668_v33  ;;  %1306 = vmatmul.mubr.bf16.gmra.mrb[12].mxu1 %v2669_v34  ;;  %v2753_v33 = vld [vmem:[%s2944_s9 + $0x1c8] ss:$12 sps:$4 sm:$0xff]   ;;  %v2754_v34 = vld [vmem:[%s2944_s9 + $0x230] ss:$12 sps:$4 sm:$0xff]  }
  0x64   : > { %1121 = vmatprep.mubr.bf16.mxu0 %v2670_v35  ;;  %1313 = vmatprep.mubr.bf16.mxu1 %v2672_v36  ;;  %v2755_v35 = vld [vmem:[%s2944_s9 + $0x1e4] ss:$12 sps:$4 sm:$0xff]   ;;  %v2757_v36 = vld [vmem:[%s2944_s9 + $0x248] ss:$12 sps:$4 sm:$0xff]  }
  0x6b   : > { %1122 = vmatmul.mubr.bf16.gmra.mrb[16].mxu0 %v2674_v37  ;;  %1314 = vmatmul.mubr.bf16.gmra.mrb[16].mxu1 %v2675_v38  ;;  %v2758_v37 = vld [vmem:[%s2944_s9 + $0x1e0] ss:$12 sps:$4 sm:$0xff]  }
  0x6c   : > { %1129 = vmatprep.mubr.bf16.mxu0 %v2677_v39  ;;  %1321 = vmatprep.mubr.bf16.mxu1 %v2679_v40  ;;  %v2759_v38 = vld [vmem:[%s2944_s9 + $0x260] ss:$12 sps:$4 sm:$0xff]   ;;  %v2760_v39 = vld [vmem:[%s2944_s9 + $0x1fc] ss:$12 sps:$4 sm:$0xff]   ;;  %v2762_v40 = vld [vmem:[%s2944_s9 + $0x278] ss:$12 sps:$4 sm:$0xff]  }
  0x73   : > { %1130 = vmatmul.mubr.bf16.gmra.mrb[20].mxu0 %v2681_v41  ;;  %1322 = vmatmul.mubr.bf16.gmra.mrb[20].mxu1 %v2682_v42  ;;  %v2763_v41 = vld [vmem:[%s2944_s9 + $0x1f8] ss:$12 sps:$4 sm:$0xff]   ;;  %v2764_v42 = vld [vmem:[%s2944_s9 + $0x290] ss:$12 sps:$4 sm:$0xff]  }
  0x74   : > { %1137 = vmatprep.mubr.bf16.mxu0 %v2683_v43  ;;  %1329 = vmatprep.mubr.bf16.mxu1 %v2685_v44  ;;  %v2765_v43 = vld [vmem:[%s2944_s9 + $0x214] ss:$12 sps:$4 sm:$0xff]  }
  0x75   : > { %v2767_v44 = vld [vmem:[%s2944_s9 + $0x2a8] ss:$12 sps:$4 sm:$0xff]  }
  0x7b   : > { %1138 = vmatmul.mubr.bf16.gmra.mrb[24].mxu0 %v2687_v45  ;;  %1330 = vmatmul.mubr.bf16.gmra.mrb[24].mxu1 %v2688_v46  ;;  %v2768_v45 = vld [vmem:[%s2944_s9 + $0x210] ss:$12 sps:$4 sm:$0xff]   ;;  %v2769_v46 = vld [vmem:[%s2944_s9 + $0x2c0] ss:$12 sps:$4 sm:$0xff]  }
  0x7c   : > { %1145 = vmatprep.mubr.bf16.mxu0 %v2689_v47  ;;  %1337 = vmatprep.mubr.bf16.mxu1 %v2691_v48  ;;  %v2770_v47 = vld [vmem:[%s2944_s9 + $0x22c] ss:$12 sps:$4 sm:$0xff]  }
  0x7d   : > { %v2772_v48 = vld [vmem:[%s2944_s9 + $0x2d8] ss:$12 sps:$4 sm:$0xff]  }
  0x83   : > { %1146 = vmatmul.mubr.bf16.gmra.mrb[28].mxu0 %v2693_v49  ;;  %1338 = vmatmul.mubr.bf16.gmra.mrb[28].mxu1 %v2694_v50  ;;  %v2773_v49 = vld [vmem:[%s2944_s9 + $0x228] ss:$12 sps:$4 sm:$0xff]   ;;  %v2774_v50 = vld [vmem:[%s2944_s9 + $0x2f0] ss:$12 sps:$4 sm:$0xff]   ;;  %s175_s9 = sand.u32 1, %s2821_s12  }
  0x84   : > { %1153 = vmatprep.mubr.bf16.mxu0 %v2695_v51  ;;  %2443 = vmatprep.mubr.msk.bf16.mxu1 %vm960_vm0, %v2697_v52  ;;  %s2235_s26 = sshll.u32 %s175_s9, 9 }
  0x85   : > { %s3213_s12 = scalar_lea.vmem [#allocation2], %s2235_s26  }
  0x8b   : > { %1154 = vmatmul.mubr.bf16.gmra.mrb[32].mxu0 %v2698_v53  ;;  %2444 = vmatmul.mubr.msk.bf16.vlgmr.msra.gmra.mrb[32].mxu1 %vm960_vm0, %v2699_v54 }
  0x8c   : > { %1161 = vmatprep.mubr.bf16.mxu0 %v2700_v55  ;;  %2447 = vmatprep.mubr.msk.bf16.mxu1 %vm960_vm0, %v2702_v56 }
  0x93   : > { %1162 = vmatmul.mubr.bf16.gmra.mrb[36].mxu0 %v2703_v57  ;;  %2448 = vmatmul.mubr.msk.bf16.gmra.mrb[36].mxu1 %vm960_vm0, %v2704_v58 }
  0x94   : > { %1169 = vmatprep.mubr.bf16.mxu0 %v2705_v59  ;;  %2451 = vmatprep.mubr.msk.bf16.mxu1 %vm960_vm0, %v2707_v60 }
  0x9b   : > { %1170 = vmatmul.mubr.bf16.gmra.mrb[40].mxu0 %v2708_v61  ;;  %2452 = vmatmul.mubr.msk.bf16.gmra.mrb[40].mxu1 %vm960_vm0, %v2709_v62 }
  0x9c   : > { %1177 = vmatprep.mubr.bf16.mxu0 %v2710_v63  ;;  %2455 = vmatprep.mubr.msk.bf16.mxu1 %vm960_vm0, %v2712_v0 }
  0xa3   : > { %1178 = vmatmul.mubr.bf16.gmra.mrb[44].mxu0 %v2713_v1  ;;  %2456 = vmatmul.mubr.msk.bf16.gmra.mrb[44].mxu1 %vm960_vm0, %v2714_v2 }
  0xa4   : > { %1185 = vmatprep.mubr.bf16.mxu0 %v2715_v3  ;;  %2459 = vmatprep.mubr.msk.bf16.mxu1 %vm960_vm0, %v2717_v4 }
  0xab   : > { %1186 = vmatmul.mubr.bf16.gmra.mrb[48].mxu0 %v2718_v5  ;;  %2460 = vmatmul.mubr.msk.bf16.gmra.mrb[48].mxu1 %vm960_vm0, %v2719_v6 }
  0xac   : > { %1193 = vmatprep.mubr.bf16.mxu0 %v2720_v7  ;;  %2463 = vmatprep.mubr.msk.bf16.mxu1 %vm960_vm0, %v2722_v8 }
  0xb3   : > { %1194 = vmatmul.mubr.bf16.gmra.mrb[52].mxu0 %v2723_v9  ;;  %2464 = vmatmul.mubr.msk.bf16.gmra.mrb[52].mxu1 %vm960_vm0, %v2724_v10 }
  0xb4   : > { %1201 = vmatprep.mubr.bf16.mxu0 %v2725_v11  ;;  %2467 = vmatprep.mubr.msk.bf16.mxu1 %vm960_vm0, %v2727_v12 }
  0xbb   : > { %1202 = vmatmul.mubr.bf16.gmra.mrb[56].mxu0 %v2728_v13  ;;  %2468 = vmatmul.mubr.msk.bf16.gmra.mrb[56].mxu1 %vm960_vm0, %v2729_v14 }
  0xbc   : > { %1209 = vmatprep.mubr.bf16.mxu0 %v2730_v15  ;;  %2471 = vmatprep.mubr.msk.bf16.mxu1 %vm960_vm0, %v2732_v16 }
  0xc3   : > { %1210 = vmatmul.mubr.bf16.gmra.mrb[60].mxu0 %v2733_v17  ;;  %2472 = vmatmul.mubr.msk.bf16.gmra.mrb[60].mxu1 %vm960_vm0, %v2734_v18 }
  0xc4   : > { %1217 = vmatprep.mubr.bf16.mxu0 %v2735_v19  ;;  %2475 = vmatprep.mubr.msk.bf16.mxu1 %vm960_vm0, %v2737_v20 }
  0xcb   : > { %1218 = vmatmul.mubr.bf16.gmra.mrb[64].mxu0 %v2738_v21  ;;  %2476 = vmatmul.mubr.msk.bf16.gmra.mrb[64].mxu1 %vm960_vm0, %v2739_v22 }
  0xcc   : > { %1225 = vmatprep.mubr.bf16.mxu0 %v2740_v23  ;;  %2479 = vmatprep.mubr.msk.bf16.mxu1 %vm960_vm0, %v2742_v24 }
  0xd3   : > { %1226 = vmatmul.mubr.bf16.gmra.mrb[68].mxu0 %v2743_v25  ;;  %2480 = vmatmul.mubr.msk.bf16.gmra.mrb[68].mxu1 %vm960_vm0, %v2744_v26 }
  0xd4   : > { %1233 = vmatprep.mubr.bf16.mxu0 %v2745_v27  ;;  %2483 = vmatprep.mubr.msk.bf16.mxu1 %vm960_vm0, %v2747_v28 }
  0xdb   : > { %1234 = vmatmul.mubr.bf16.gmra.mrb[72].mxu0 %v2748_v29  ;;  %2484 = vmatmul.mubr.msk.bf16.gmra.mrb[72].mxu1 %vm960_vm0, %v2749_v30 }
  0xdc   : > { %1241 = vmatprep.mubr.bf16.mxu0 %v2750_v31  ;;  %2487 = vmatprep.mubr.msk.bf16.mxu1 %vm960_vm0, %v2752_v32 }
  0xe3   : > { %1242 = vmatmul.mubr.bf16.gmra.mrb[76].mxu0 %v2753_v33  ;;  %2488 = vmatmul.mubr.msk.bf16.gmra.mrb[76].mxu1 %vm960_vm0, %v2754_v34 }
  0xe4   : > { %1249 = vmatprep.mubr.bf16.mxu0 %v2755_v35  ;;  %2491 = vmatprep.mubr.msk.bf16.mxu1 %vm960_vm0, %v2757_v36 }
  0xeb   : > { %1250 = vmatmul.mubr.bf16.gmra.mrb[80].mxu0 %v2758_v37  ;;  %2492 = vmatmul.mubr.msk.bf16.gmra.mrb[80].mxu1 %vm960_vm0, %v2759_v38 }
  0xec   : > { %1257 = vmatprep.mubr.bf16.mxu0 %v2760_v39  ;;  %2495 = vmatprep.mubr.msk.bf16.mxu1 %vm960_vm0, %v2762_v40 }
  0xf3   : > { %1258 = vmatmul.mubr.bf16.gmra.mrb[84].mxu0 %v2763_v41  ;;  %2496 = vmatmul.mubr.msk.bf16.gmra.mrb[84].mxu1 %vm960_vm0, %v2764_v42 }
  0xf4   : > { %1265 = vmatprep.mubr.bf16.mxu0 %v2765_v43  ;;  %2499 = vmatprep.mubr.msk.bf16.mxu1 %vm960_vm0, %v2767_v44 }
  0xfb   : > { %1266 = vmatmul.mubr.bf16.gmra.mrb[88].mxu0 %v2768_v45  ;;  %2500 = vmatmul.mubr.msk.bf16.gmra.mrb[88].mxu1 %vm960_vm0, %v2769_v46 }
  0xfc   : > { %1273 = vmatprep.mubr.bf16.mxu0 %v2770_v47  ;;  %2503 = vmatprep.mubr.msk.bf16.mxu1 %vm960_vm0, %v2772_v48 }
 0x103   : > { %1274 = vmatmul.mubr.bf16.gmra.mrb[92].mxu0 %v2773_v49  ;;  %2504 = vmatmul.mubr.msk.bf16.gmra.mrb[92].mxu1 %vm960_vm0, %v2774_v50 }
 0x11e   : > { %v3137_v51 = vpop.f32.mrb[0].mxu0  ;;  %v3139_v52 = vpop.f32.mrb[0].mxu1 }
 0x11f   : > { %v1093_v53 = vpop.f32.mrb[1].mxu0  ;;  %v1285_v54 = vpop.f32.mrb[1].mxu1 }
 0x120   : > { %v3141_v55 = vpop.f32.mrb[2].mxu0  ;;  %v3143_v56 = vpop.f32.mrb[2].mxu1  ;;  %v3201_v53 = vld [vmem:[%s3671_s2] ss:$0 sm:$0xff] }
 0x121   : > { %v1096_v57 = vpop.f32.mrb[3].mxu0  ;;  %v1288_v58 = vpop.f32.mrb[3].mxu1 }
 0x122   : > { %v1092_v57 = vadd.f32 %v3201_v53, %v3137_v51 }
 0x126   : > { %v1099_v59 = vpop.f32.mrb[4].mxu0  ;;  %v3145_v60 = vpop.f32.mrb[4].mxu1 }
 0x127   : > { %v1101_v61 = vpop.f32.mrb[5].mxu0  ;;  %v1293_v62 = vpop.f32.mrb[5].mxu1  ;;  %v1100_v54 = vadd.f32 %v3201_v53, %v1099_v59 }
 0x128   : > { %v1102_v63 = vpop.f32.mrb[6].mxu0  ;;  %v3147_v0 = vpop.f32.mrb[6].mxu1 }
 0x129   : > { %v1104_v1 = vpop.f32.mrb[7].mxu0  ;;  %v1296_v2 = vpop.f32.mrb[7].mxu1  ;;  %v1103_v62 = vadd.f32 %v3201_v53, %v1102_v63 }
 0x12e   : > { %v3149_v3 = vpop.f32.mrb[8].mxu0  ;;  %v3151_v4 = vpop.f32.mrb[8].mxu1 }
 0x12f   : > { %v1109_v5 = vpop.f32.mrb[9].mxu0  ;;  %v1301_v6 = vpop.f32.mrb[9].mxu1 }
 0x130   : > { %v3153_v7 = vpop.f32.mrb[10].mxu0  ;;  %v3155_v8 = vpop.f32.mrb[10].mxu1  ;;  %v1095_v6 = vadd.f32 %v3201_v53, %v3141_v55 }
 0x131   : > { %v1112_v9 = vpop.f32.mrb[11].mxu0  ;;  %v1304_v10 = vpop.f32.mrb[11].mxu1 }
 0x136   : > { %v3157_v11 = vpop.f32.mrb[12].mxu0  ;;  %v3159_v12 = vpop.f32.mrb[12].mxu1 }
 0x137   : > { %v1117_v13 = vpop.f32.mrb[13].mxu0  ;;  %v1309_v14 = vpop.f32.mrb[13].mxu1 }
 0x138   : > { %v3161_v15 = vpop.f32.mrb[14].mxu0  ;;  %v3163_v16 = vpop.f32.mrb[14].mxu1 }
 0x139   : > { %v1120_v17 = vpop.f32.mrb[15].mxu0  ;;  %v1312_v18 = vpop.f32.mrb[15].mxu1 }
 0x13e   : > { %v3165_v19 = vpop.f32.mrb[16].mxu0  ;;  %v3167_v20 = vpop.f32.mrb[16].mxu1 }
 0x13f   : > { %v1125_v21 = vpop.f32.mrb[17].mxu0  ;;  %v1317_v22 = vpop.f32.mrb[17].mxu1 }
 0x140   : > { %v3169_v23 = vpop.f32.mrb[18].mxu0  ;;  %v3171_v24 = vpop.f32.mrb[18].mxu1  ;;  %v1116_v22 = vadd.f32 %v3201_v53, %v3157_v11  ;;  %v1111_v11 = vadd.f32 %v3201_v53, %v3153_v7 }
 0x141   : > { %v1128_v25 = vpop.f32.mrb[19].mxu0  ;;  %v1320_v26 = vpop.f32.mrb[19].mxu1 }
 0x142   : > { %v1108_v25 = vadd.f32 %v3201_v53, %v3149_v3 }
 0x146   : > { %v3173_v27 = vpop.f32.mrb[20].mxu0  ;;  %v3175_v28 = vpop.f32.mrb[20].mxu1 }
 0x147   : > { %v1133_v29 = vpop.f32.mrb[21].mxu0  ;;  %v1325_v30 = vpop.f32.mrb[21].mxu1  ;;  %v1132_v7 = vadd.f32 %v3201_v53, %v3173_v27  ;;  %v1127_v27 = vadd.f32 %v3201_v53, %v3169_v23 }
 0x148   : > { %v3177_v31 = vpop.f32.mrb[22].mxu0  ;;  %v3179_v32 = vpop.f32.mrb[22].mxu1  ;;  %v1119_v30 = vadd.f32 %v3201_v53, %v3161_v15 }
 0x149   : > { %v1136_v33 = vpop.f32.mrb[23].mxu0  ;;  %v1328_v34 = vpop.f32.mrb[23].mxu1 }
 0x14e   : > { %v3181_v35 = vpop.f32.mrb[24].mxu0  ;;  %v3183_v36 = vpop.f32.mrb[24].mxu1 }
 0x14f   : > { %v1141_v37 = vpop.f32.mrb[25].mxu0  ;;  %v1333_v38 = vpop.f32.mrb[25].mxu1 }
 0x150   : > { %v3185_v39 = vpop.f32.mrb[26].mxu0  ;;  %v3187_v40 = vpop.f32.mrb[26].mxu1 }
 0x151   : > { %v1144_v41 = vpop.f32.mrb[27].mxu0  ;;  %v1336_v42 = vpop.f32.mrb[27].mxu1 }
 0x156   : > { %v3189_v43 = vpop.f32.mrb[28].mxu0  ;;  %v3191_v44 = vpop.f32.mrb[28].mxu1 }
 0x157   : > { %v1149_v45 = vpop.f32.mrb[29].mxu0  ;;  %v1341_v46 = vpop.f32.mrb[29].mxu1  ;;  %v1148_v23 = vadd.f32 %v3201_v53, %v3189_v43  ;;  %v1143_v43 = vadd.f32 %v3201_v53, %v3185_v39 }
 0x158   : > { %v3193_v47 = vpop.f32.mrb[30].mxu0  ;;  %v3195_v48 = vpop.f32.mrb[30].mxu1 }
 0x159   : > { %v1152_v49 = vpop.f32.mrb[31].mxu0  ;;  %v1344_v50 = vpop.f32.mrb[31].mxu1 }
 0x15e   : > { %v3206_v58 = vpop.f32.mrb[32].mxu0  ;;  %v2445_v61 = vpop.f32.mrb[32].mxu1 }
 0x15f   : > { %v1389_v1 = vadd.f32 %v2445_v61, %v1100_v54  ;;  %v1157_v2 = vpop.f32.mrb[33].mxu0  ;;  %v1380_v5 = vpop.f32.mrb[33].mxu1  ;;  %v1124_v61 = vadd.f32 %v3201_v53, %v3165_v19  ;;  %v1156_v39 = vadd.f32 %v3201_v53, %v3206_v58 }
 0x160   : > { %v1381_v9 = vadd.f32 %v1380_v5, %v1092_v57  ;;  %v3211_v10 = vpop.f32.mrb[34].mxu0  ;;  %v2446_v59 = vpop.f32.mrb[34].mxu1  ;;  %v1135_v2 = vadd.f32 %v3201_v53, %v3177_v31 }
 0x161   : > { %v1637_v13 = vmax.f32 %v1389_v1, 0.0  ;;  %v1392_v14 = vadd.f32 %v2446_v59, %v1103_v62  ;;  %v1160_v17 = vpop.f32.mrb[35].mxu0  ;;  %v1383_v51 = vpop.f32.mrb[35].mxu1 }
 0x162   : > { %v1635_v18 = vmax.f32 %v1381_v9, 0.0  ;;  %v1384_v21 = vadd.f32 %v1383_v51, %v1095_v6 }
 0x163   : > { %1702 = vst.msk [vmem:[%s3213_s12 + $0x10] sm:$0xff] %vm1699_vm1, %v1637_v13  ;;  %v1638_v55 = vmax.f32 %v1392_v14, 0.0 }
 0x164   : > { %1700 = vst.msk [vmem:[%s3213_s12] sm:$0xff] %vm1699_vm1, %v1635_v18  ;;  %v1636_v63 = vmax.f32 %v1384_v21, 0.0 }
 0x165   : > { %1703 = vst.msk [vmem:[%s3213_s12 + $0x18] sm:$0xff] %vm1699_vm1, %v1638_v55 }
 0x166   : > { %1701 = vst.msk [vmem:[%s3213_s12 + $0x8] sm:$0xff] %vm1699_vm1, %v1636_v63  ;;  %v3227_v26 = vpop.f32.mrb[36].mxu0  ;;  %v2449_v29 = vpop.f32.mrb[36].mxu1 }
 0x167   : > { %v1405_v33 = vadd.f32 %v2449_v29, %v1116_v22  ;;  %v1165_v34 = vpop.f32.mrb[37].mxu0  ;;  %v1396_v37 = vpop.f32.mrb[37].mxu1  ;;  %v1140_v22 = vadd.f32 %v3201_v53, %v3181_v35 }
 0x168   : > { %v1397_v38 = vadd.f32 %v1396_v37, %v1108_v25  ;;  %v3233_v3 = vpop.f32.mrb[38].mxu0  ;;  %v2450_v41 = vpop.f32.mrb[38].mxu1 }
 0x169   : > { %v1641_v42 = vmax.f32 %v1405_v33, 0.0  ;;  %v1408_v45 = vadd.f32 %v2450_v41, %v1119_v30  ;;  %v1168_v46 = vpop.f32.mrb[39].mxu0  ;;  %v1399_v49 = vpop.f32.mrb[39].mxu1  ;;  %v1151_v30 = vadd.f32 %v3201_v53, %v3193_v47 }
 0x16a   : > { %v1639_v50 = vmax.f32 %v1397_v38, 0.0  ;;  %v1400_v54 = vadd.f32 %v1399_v49, %v1111_v11 }
 0x16b   : > { %1706 = vst.msk [vmem:[%s3213_s12 + $0x30] sm:$0xff] %vm1699_vm1, %v1641_v42  ;;  %v1642_v15 = vmax.f32 %v1408_v45, 0.0 }
 0x16c   : > { %1704 = vst.msk [vmem:[%s3213_s12 + $0x20] sm:$0xff] %vm1699_vm1, %v1639_v50  ;;  %v1640_v57 = vmax.f32 %v1400_v54, 0.0 }
 0x16d   : > { %1707 = vst.msk [vmem:[%s3213_s12 + $0x38] sm:$0xff] %vm1699_vm1, %v1642_v15  ;;  %v1164_v15 = vadd.f32 %v3201_v53, %v3227_v26  ;;  %v1159_v26 = vadd.f32 %v3201_v53, %v3211_v10 }
 0x16e   : > { %1705 = vst.msk [vmem:[%s3213_s12 + $0x28] sm:$0xff] %vm1699_vm1, %v1640_v57  ;;  %v3247_v62 = vpop.f32.mrb[40].mxu0  ;;  %v2453_v1 = vpop.f32.mrb[40].mxu1 }
 0x16f   : > { %v1421_v5 = vadd.f32 %v2453_v1, %v1132_v7  ;;  %v1173_v6 = vpop.f32.mrb[41].mxu0  ;;  %v1412_v9 = vpop.f32.mrb[41].mxu1  ;;  %v1172_v10 = vadd.f32 %v3201_v53, %v3247_v62 }
 0x170   : > { %v1413_v59 = vadd.f32 %v1412_v9, %v1124_v61  ;;  %v3253_v19 = vpop.f32.mrb[42].mxu0  ;;  %v2454_v13 = vpop.f32.mrb[42].mxu1  ;;  %v1167_v61 = vadd.f32 %v3201_v53, %v3233_v3 }
 0x171   : > { %v1645_v14 = vmax.f32 %v1421_v5, 0.0  ;;  %v1424_v17 = vadd.f32 %v2454_v13, %v1135_v2  ;;  %v1176_v51 = vpop.f32.mrb[43].mxu0  ;;  %v1415_v18 = vpop.f32.mrb[43].mxu1 }
 0x172   : > { %v1643_v21 = vmax.f32 %v1413_v59, 0.0  ;;  %v1416_v55 = vadd.f32 %v1415_v18, %v1127_v27 }
 0x173   : > { %1710 = vst.msk [vmem:[%s3213_s12 + $0x50] sm:$0xff] %vm1699_vm1, %v1645_v14  ;;  %v1646_v31 = vmax.f32 %v1424_v17, 0.0 }
 0x174   : > { %1708 = vst.msk [vmem:[%s3213_s12 + $0x40] sm:$0xff] %vm1699_vm1, %v1643_v21  ;;  %v1644_v63 = vmax.f32 %v1416_v55, 0.0 }
 0x175   : > { %1711 = vst.msk [vmem:[%s3213_s12 + $0x58] sm:$0xff] %vm1699_vm1, %v1646_v31 }
 0x176   : > { %1709 = vst.msk [vmem:[%s3213_s12 + $0x48] sm:$0xff] %vm1699_vm1, %v1644_v63  ;;  %v1179_v25 = vpop.f32.mrb[44].mxu0  ;;  %v2457_v29 = vpop.f32.mrb[44].mxu1 }
 0x177   : > { %v1437_v33 = vadd.f32 %v2457_v29, %v1148_v23  ;;  %v1181_v34 = vpop.f32.mrb[45].mxu0  ;;  %v1428_v37 = vpop.f32.mrb[45].mxu1  ;;  %v1180_v21 = vadd.f32 %v3201_v53, %v1179_v25  ;;  %v1175_v25 = vadd.f32 %v3201_v53, %v3253_v19 }
 0x178   : > { %v1429_v11 = vadd.f32 %v1428_v37, %v1140_v22  ;;  %v1182_v38 = vpop.f32.mrb[46].mxu0  ;;  %v2458_v35 = vpop.f32.mrb[46].mxu1 }
 0x179   : > { %v1649_v41 = vmax.f32 %v1437_v33, 0.0  ;;  %v1440_v42 = vadd.f32 %v2458_v35, %v1151_v30  ;;  %v1184_v45 = vpop.f32.mrb[47].mxu0  ;;  %v1431_v46 = vpop.f32.mrb[47].mxu1  ;;  %v1183_v63 = vadd.f32 %v3201_v53, %v1182_v38 }
 0x17a   : > { %v1647_v49 = vmax.f32 %v1429_v11, 0.0  ;;  %v1432_v50 = vadd.f32 %v1431_v46, %v1143_v43 }
 0x17b   : > { %1714 = vst.msk [vmem:[%s3213_s12 + $0x70] sm:$0xff] %vm1699_vm1, %v1649_v41  ;;  %v1650_v47 = vmax.f32 %v1440_v42, 0.0 }
 0x17c   : > { %1712 = vst.msk [vmem:[%s3213_s12 + $0x60] sm:$0xff] %vm1699_vm1, %v1647_v49  ;;  %v1648_v54 = vmax.f32 %v1432_v50, 0.0 }
 0x17d   : > { %1715 = vst.msk [vmem:[%s3213_s12 + $0x78] sm:$0xff] %vm1699_vm1, %v1650_v47 }
 0x17e   : > { %1713 = vst.msk [vmem:[%s3213_s12 + $0x68] sm:$0xff] %vm1699_vm1, %v1648_v54  ;;  %v1187_v57 = vpop.f32.mrb[48].mxu0  ;;  %v2461_v7 = vpop.f32.mrb[48].mxu1 }
 0x17f   : > { %v1453_v1 = vadd.f32 %v2461_v7, %v1164_v15  ;;  %v1189_v2 = vpop.f32.mrb[49].mxu0  ;;  %v1444_v5 = vpop.f32.mrb[49].mxu1  ;;  %v1188_v19 = vadd.f32 %v3201_v53, %v1187_v57 }
 0x180   : > { %v1445_v6 = vadd.f32 %v1444_v5, %v1156_v39  ;;  %v1190_v9 = vpop.f32.mrb[50].mxu0  ;;  %v2462_v58 = vpop.f32.mrb[50].mxu1 }
 0x181   : > { %v1653_v27 = vmax.f32 %v1453_v1, 0.0  ;;  %v1456_v59 = vadd.f32 %v2462_v58, %v1167_v61  ;;  %v1192_v13 = vpop.f32.mrb[51].mxu0  ;;  %v1447_v14 = vpop.f32.mrb[51].mxu1  ;;  %v1191_v39 = vadd.f32 %v3201_v53, %v1190_v9 }
 0x182   : > { %v1651_v17 = vmax.f32 %v1445_v6, 0.0  ;;  %v1448_v51 = vadd.f32 %v1447_v14, %v1159_v26 }
 0x183   : > { %1718 = vst.msk [vmem:[%s3213_s12 + $0x90] sm:$0xff] %vm1699_vm1, %v1653_v27  ;;  %v1654_v3 = vmax.f32 %v1456_v59, 0.0 }
 0x184   : > { %1716 = vst.msk [vmem:[%s3213_s12 + $0x80] sm:$0xff] %vm1699_vm1, %v1651_v17  ;;  %v1652_v18 = vmax.f32 %v1448_v51, 0.0 }
 0x185   : > { %1719 = vst.msk [vmem:[%s3213_s12 + $0x98] sm:$0xff] %vm1699_vm1, %v1654_v3 }
 0x186   : > { %1717 = vst.msk [vmem:[%s3213_s12 + $0x88] sm:$0xff] %vm1699_vm1, %v1652_v18  ;;  %v1195_v55 = vpop.f32.mrb[52].mxu0  ;;  %v2465_v31 = vpop.f32.mrb[52].mxu1 }
 0x187   : > { %v1469_v23 = vadd.f32 %v2465_v31, %v1180_v21  ;;  %v1197_v22 = vpop.f32.mrb[53].mxu0  ;;  %v1460_v29 = vpop.f32.mrb[53].mxu1  ;;  %v1196_v45 = vadd.f32 %v3201_v53, %v1195_v55 }
 0x188   : > { %v1461_v30 = vadd.f32 %v1460_v29, %v1172_v10  ;;  %v1198_v33 = vpop.f32.mrb[54].mxu0  ;;  %v2466_v34 = vpop.f32.mrb[54].mxu1 }
 0x189   : > { %v1657_v62 = vmax.f32 %v1469_v23, 0.0  ;;  %v1472_v37 = vadd.f32 %v2466_v34, %v1183_v63  ;;  %v1200_v43 = vpop.f32.mrb[55].mxu0  ;;  %v1463_v11 = vpop.f32.mrb[55].mxu1  ;;  %v1199_v50 = vadd.f32 %v3201_v53, %v1198_v33 }
 0x18a   : > { %v1655_v35 = vmax.f32 %v1461_v30, 0.0  ;;  %v1464_v41 = vadd.f32 %v1463_v11, %v1175_v25 }
 0x18b   : > { %1722 = vst.msk [vmem:[%s3213_s12 + $0xb0] sm:$0xff] %vm1699_vm1, %v1657_v62  ;;  %v1658_v38 = vmax.f32 %v1472_v37, 0.0 }
 0x18c   : > { %1720 = vst.msk [vmem:[%s3213_s12 + $0xa0] sm:$0xff] %vm1699_vm1, %v1655_v35  ;;  %v1656_v42 = vmax.f32 %v1464_v41, 0.0 }
 0x18d   : > { %1723 = vst.msk [vmem:[%s3213_s12 + $0xb8] sm:$0xff] %vm1699_vm1, %v1658_v38 }
 0x18e   : > { %1721 = vst.msk [vmem:[%s3213_s12 + $0xa8] sm:$0xff] %vm1699_vm1, %v1656_v42  ;;  %v1203_v46 = vpop.f32.mrb[56].mxu0  ;;  %v2469_v49 = vpop.f32.mrb[56].mxu1 }
 0x18f   : > { %v1485_v47 = vadd.f32 %v2469_v49, %v1196_v45  ;;  %v1205_v54 = vpop.f32.mrb[57].mxu0  ;;  %v1476_v15 = vpop.f32.mrb[57].mxu1  ;;  %v1204_v9 = vadd.f32 %v3201_v53, %v1203_v46 }
 0x190   : > { %v1477_v7 = vadd.f32 %v1476_v15, %v1188_v19  ;;  %v1206_v61 = vpop.f32.mrb[58].mxu0  ;;  %v2470_v1 = vpop.f32.mrb[58].mxu1 }
 0x191   : > { %v1661_v2 = vmax.f32 %v1485_v47, 0.0  ;;  %v1488_v57 = vadd.f32 %v2470_v1, %v1199_v50  ;;  %v1208_v5 = vpop.f32.mrb[59].mxu0  ;;  %v1479_v26 = vpop.f32.mrb[59].mxu1  ;;  %v1207_v18 = vadd.f32 %v3201_v53, %v1206_v61 }
 0x192   : > { %v1659_v6 = vmax.f32 %v1477_v7, 0.0  ;;  %v1480_v58 = vadd.f32 %v1479_v26, %v1191_v39 }
 0x193   : > { %1726 = vst.msk [vmem:[%s3213_s12 + $0xd0] sm:$0xff] %vm1699_vm1, %v1661_v2  ;;  %v1662_v27 = vmax.f32 %v1488_v57, 0.0 }
 0x194   : > { %1724 = vst.msk [vmem:[%s3213_s12 + $0xc0] sm:$0xff] %vm1699_vm1, %v1659_v6  ;;  %v1660_v59 = vmax.f32 %v1480_v58, 0.0 }
 0x195   : > { %1727 = vst.msk [vmem:[%s3213_s12 + $0xd8] sm:$0xff] %vm1699_vm1, %v1662_v27 }
 0x196   : > { %1725 = vst.msk [vmem:[%s3213_s12 + $0xc8] sm:$0xff] %vm1699_vm1, %v1660_v59  ;;  %v1211_v13 = vpop.f32.mrb[60].mxu0  ;;  %v2473_v14 = vpop.f32.mrb[60].mxu1 }
 0x197   : > { %v1212_v17 = vadd.f32 %v3201_v53, %v1211_v13  ;;  %v1213_v51 = vpop.f32.mrb[61].mxu0  ;;  %v1492_v3 = vpop.f32.mrb[61].mxu1 }
 0x198   : > { %v1493_v21 = vadd.f32 %v1492_v3, %v1204_v9  ;;  %v1214_v10 = vpop.f32.mrb[62].mxu0  ;;  %v2474_v55 = vpop.f32.mrb[62].mxu1 }
 0x199   : > { %v1501_v31 = vadd.f32 %v2473_v14, %v1212_v17  ;;  %v1215_v63 = vadd.f32 %v3201_v53, %v1214_v10  ;;  %v1216_v23 = vpop.f32.mrb[63].mxu0  ;;  %v1495_v22 = vpop.f32.mrb[63].mxu1 }
 0x19a   : > { %v1663_v29 = vmax.f32 %v1493_v21, 0.0  ;;  %v1496_v25 = vadd.f32 %v1495_v22, %v1207_v18 }
 0x19b   : > { %v1665_v30 = vmax.f32 %v1501_v31, 0.0  ;;  %v1504_v33 = vadd.f32 %v2474_v55, %v1215_v63 }
 0x19c   : > { %1728 = vst.msk [vmem:[%s3213_s12 + $0xe0] sm:$0xff] %vm1699_vm1, %v1663_v29  ;;  %v1664_v34 = vmax.f32 %v1496_v25, 0.0 }
 0x19d   : > { %1730 = vst.msk [vmem:[%s3213_s12 + $0xf0] sm:$0xff] %vm1699_vm1, %v1665_v30  ;;  %v1666_v62 = vmax.f32 %v1504_v33, 0.0 }
 0x19e   : > { %1729 = vst.msk [vmem:[%s3213_s12 + $0xe8] sm:$0xff] %vm1699_vm1, %v1664_v34  ;;  %v1219_v37 = vpop.f32.mrb[64].mxu0  ;;  %v2477_v43 = vpop.f32.mrb[64].mxu1 }
 0x19f   : > { %1731 = vst.msk [vmem:[%s3213_s12 + $0xf8] sm:$0xff] %vm1699_vm1, %v1666_v62  ;;  %v1220_v11 = vadd.f32 %v3201_v53, %v1219_v37  ;;  %v1221_v35 = vpop.f32.mrb[65].mxu0  ;;  %v1508_v41 = vpop.f32.mrb[65].mxu1 }
 0x1a0   : > { %v1222_v38 = vpop.f32.mrb[66].mxu0  ;;  %v2478_v42 = vpop.f32.mrb[66].mxu1 }
 0x1a1   : > { %v1509_v45 = vadd.f32 %v1508_v41, %v1220_v11  ;;  %v1223_v19 = vadd.f32 %v3201_v53, %v1222_v38  ;;  %v1224_v46 = vpop.f32.mrb[67].mxu0  ;;  %v1511_v49 = vpop.f32.mrb[67].mxu1 }
 0x1a3   : > { %v1667_v50 = vmax.f32 %v1509_v45, 0.0  ;;  %v1512_v47 = vadd.f32 %v1511_v49, %v1223_v19  ;;  %v1292_v19 = vadd.f32 %v3201_v53, %v3145_v60  ;;  %v1284_v49 = vadd.f32 %v3201_v53, %v3139_v52 }
 0x1a4   : > { %v1287_v60 = vadd.f32 %v3201_v53, %v3143_v56 }
 0x1a5   : > { %1732 = vst.msk [vmem:[%s3213_s12 + $0x100] sm:$0xff] %vm1699_vm1, %v1667_v50  ;;  %v1668_v54 = vmax.f32 %v1512_v47, 0.0 }
 0x1a6   : > { %v1227_v15 = vpop.f32.mrb[68].mxu0  ;;  %v2481_v39 = vpop.f32.mrb[68].mxu1 }
 0x1a7   : > { %1733 = vst.msk [vmem:[%s3213_s12 + $0x108] sm:$0xff] %vm1699_vm1, %v1668_v54  ;;  %v1228_v7 = vadd.f32 %v3201_v53, %v1227_v15  ;;  %v1229_v61 = vpop.f32.mrb[69].mxu0  ;;  %v1524_v1 = vpop.f32.mrb[69].mxu1  ;;  %v1295_v54 = vadd.f32 %v3201_v53, %v3147_v0 }
 0x1a8   : > { %v1230_v2 = vpop.f32.mrb[70].mxu0  ;;  %v2482_v57 = vpop.f32.mrb[70].mxu1 }
 0x1a9   : > { %v1517_v5 = vadd.f32 %v2477_v43, %v1228_v7  ;;  %v1231_v26 = vadd.f32 %v3201_v53, %v1230_v2  ;;  %v1232_v6 = vpop.f32.mrb[71].mxu0  ;;  %v1527_v58 = vpop.f32.mrb[71].mxu1 }
 0x1ab   : > { %v1669_v27 = vmax.f32 %v1517_v5, 0.0  ;;  %v1520_v59 = vadd.f32 %v2478_v42, %v1231_v26 }
 0x1ad   : > { %1734 = vst.msk [vmem:[%s3213_s12 + $0x110] sm:$0xff] %vm1699_vm1, %v1669_v27  ;;  %v1670_v9 = vmax.f32 %v1520_v59, 0.0 }
 0x1ae   : > { %v1235_v13 = vpop.f32.mrb[72].mxu0  ;;  %v3343_v14 = vpop.f32.mrb[72].mxu1 }
 0x1af   : > { %1735 = vst.msk [vmem:[%s3213_s12 + $0x118] sm:$0xff] %vm1699_vm1, %v1670_v9  ;;  %v1236_v17 = vadd.f32 %v3201_v53, %v1235_v13  ;;  %v1237_v51 = vpop.f32.mrb[73].mxu0  ;;  %v1540_v3 = vpop.f32.mrb[73].mxu1 }
 0x1b0   : > { %v1238_v18 = vpop.f32.mrb[74].mxu0  ;;  %v3348_v21 = vpop.f32.mrb[74].mxu1  ;;  %v1308_v51 = vadd.f32 %v3201_v53, %v3159_v12 }
 0x1b1   : > { %v1525_v10 = vadd.f32 %v1524_v1, %v1236_v17  ;;  %v1239_v55 = vadd.f32 %v3201_v53, %v1238_v18  ;;  %v1240_v31 = vpop.f32.mrb[75].mxu0  ;;  %v1543_v63 = vpop.f32.mrb[75].mxu1  ;;  %v1300_v18 = vadd.f32 %v3201_v53, %v3151_v4 }
 0x1b2   : > { %v1311_v31 = vadd.f32 %v3201_v53, %v3163_v16 }
 0x1b3   : > { %v1671_v23 = vmax.f32 %v1525_v10, 0.0  ;;  %v1528_v22 = vadd.f32 %v1527_v58, %v1239_v55 }
 0x1b5   : > { %1736 = vst.msk [vmem:[%s3213_s12 + $0x120] sm:$0xff] %vm1699_vm1, %v1671_v23  ;;  %v1672_v29 = vmax.f32 %v1528_v22, 0.0 }
 0x1b6   : > { %v1243_v25 = vpop.f32.mrb[76].mxu0  ;;  %v3353_v30 = vpop.f32.mrb[76].mxu1 }
 0x1b7   : > { %1737 = vst.msk [vmem:[%s3213_s12 + $0x128] sm:$0xff] %vm1699_vm1, %v1672_v29  ;;  %v1244_v33 = vadd.f32 %v3201_v53, %v1243_v25  ;;  %v1245_v34 = vpop.f32.mrb[77].mxu0  ;;  %v3358_v62 = vpop.f32.mrb[77].mxu1  ;;  %v1303_v29 = vadd.f32 %v3201_v53, %v3155_v8 }
 0x1b8   : > { %v1246_v37 = vpop.f32.mrb[78].mxu0  ;;  %v3360_v43 = vpop.f32.mrb[78].mxu1 }
 0x1b9   : > { %v1533_v11 = vadd.f32 %v2481_v39, %v1244_v33  ;;  %v1247_v35 = vadd.f32 %v3201_v53, %v1246_v37  ;;  %v1248_v41 = vpop.f32.mrb[79].mxu0  ;;  %v3363_v38 = vpop.f32.mrb[79].mxu1 }
 0x1bb   : > { %v1673_v42 = vmax.f32 %v1533_v11, 0.0  ;;  %v1536_v45 = vadd.f32 %v2482_v57, %v1247_v35 }
 0x1bd   : > { %1738 = vst.msk [vmem:[%s3213_s12 + $0x130] sm:$0xff] %vm1699_vm1, %v1673_v42  ;;  %v1674_v46 = vmax.f32 %v1536_v45, 0.0 }
 0x1be   : > { %v1251_v50 = vpop.f32.mrb[80].mxu0  ;;  %v2493_v47 = vpop.f32.mrb[80].mxu1 }
 0x1bf   : > { %1739 = vst.msk [vmem:[%s3213_s12 + $0x138] sm:$0xff] %vm1699_vm1, %v1674_v46  ;;  %v1252_v15 = vadd.f32 %v3201_v53, %v1251_v50  ;;  %v1581_v39 = vadd.f32 %v2493_v47, %v1292_v19  ;;  %v1253_v7 = vpop.f32.mrb[81].mxu0  ;;  %v1572_v61 = vpop.f32.mrb[81].mxu1  ;;  %v1316_v47 = vadd.f32 %v3201_v53, %v3167_v20 }
 0x1c0   : > { %v1573_v1 = vadd.f32 %v1572_v61, %v1284_v49  ;;  %v1254_v2 = vpop.f32.mrb[82].mxu0  ;;  %v2494_v52 = vpop.f32.mrb[82].mxu1  ;;  %v1324_v49 = vadd.f32 %v3201_v53, %v3175_v28 }
 0x1c1   : > { %v1541_v57 = vadd.f32 %v1540_v3, %v1252_v15  ;;  %v1685_v5 = vmax.f32 %v1581_v39, 0.0  ;;  %v1255_v0 = vadd.f32 %v3201_v53, %v1254_v2  ;;  %v1584_v26 = vadd.f32 %v2494_v52, %v1295_v54  ;;  %v1256_v6 = vpop.f32.mrb[83].mxu0  ;;  %v1575_v58 = vpop.f32.mrb[83].mxu1 }
 0x1c2   : > { %v1683_v27 = vmax.f32 %v1573_v1, 0.0  ;;  %v1576_v59 = vadd.f32 %v1575_v58, %v1287_v60  ;;  %v1319_v60 = vadd.f32 %v3201_v53, %v3171_v24 }
 0x1c3   : > { %v1675_v9 = vmax.f32 %v1541_v57, 0.0  ;;  %1750 = vst.msk [vmem:[%s3213_s12 + $0x190] sm:$0xff] %vm1699_vm1, %v1685_v5  ;;  %v1544_v56 = vadd.f32 %v1543_v63, %v1255_v0  ;;  %v1686_v13 = vmax.f32 %v1584_v26, 0.0 }
 0x1c4   : > { %1748 = vst.msk [vmem:[%s3213_s12 + $0x180] sm:$0xff] %vm1699_vm1, %v1683_v27  ;;  %v1684_v17 = vmax.f32 %v1576_v59, 0.0 }
 0x1c5   : > { %1740 = vst.msk [vmem:[%s3213_s12 + $0x140] sm:$0xff] %vm1699_vm1, %v1675_v9  ;;  %v1676_v3 = vmax.f32 %v1544_v56, 0.0  ;;  %1751 = vst.msk [vmem:[%s3213_s12 + $0x198] sm:$0xff] %vm1699_vm1, %v1686_v13  ;;  %v1340_v9 = vadd.f32 %v3201_v53, %v3191_v44  ;;  %v1332_v13 = vadd.f32 %v3201_v53, %v3183_v36 }
 0x1c6   : > { %1749 = vst.msk [vmem:[%s3213_s12 + $0x188] sm:$0xff] %vm1699_vm1, %v1684_v17  ;;  %v1259_v10 = vpop.f32.mrb[84].mxu0  ;;  %v2497_v55 = vpop.f32.mrb[84].mxu1 }
 0x1c7   : > { %1741 = vst.msk [vmem:[%s3213_s12 + $0x148] sm:$0xff] %vm1699_vm1, %v1676_v3  ;;  %v1260_v63 = vadd.f32 %v3201_v53, %v1259_v10  ;;  %v1597_v12 = vadd.f32 %v2497_v55, %v1308_v51  ;;  %v1261_v23 = vpop.f32.mrb[85].mxu0  ;;  %v1588_v22 = vpop.f32.mrb[85].mxu1  ;;  %v1335_v55 = vadd.f32 %v3201_v53, %v3187_v40 }
 0x1c8   : > { %v1589_v4 = vadd.f32 %v1588_v22, %v1300_v18  ;;  %v1262_v25 = vpop.f32.mrb[86].mxu0  ;;  %v2498_v33 = vpop.f32.mrb[86].mxu1 }
 0x1c9   : > { %v1549_v34 = vadd.f32 %v3343_v14, %v1260_v63  ;;  %v1689_v37 = vmax.f32 %v1597_v12, 0.0  ;;  %v1263_v16 = vadd.f32 %v3201_v53, %v1262_v25  ;;  %v1600_v11 = vadd.f32 %v2498_v33, %v1311_v31  ;;  %v1264_v35 = vpop.f32.mrb[87].mxu0  ;;  %v1591_v41 = vpop.f32.mrb[87].mxu1 }
 0x1ca   : > { %v1687_v42 = vmax.f32 %v1589_v4, 0.0  ;;  %v1592_v45 = vadd.f32 %v1591_v41, %v1303_v29 }
 0x1cb   : > { %v1677_v19 = vmax.f32 %v1549_v34, 0.0  ;;  %1754 = vst.msk [vmem:[%s3213_s12 + $0x1b0] sm:$0xff] %vm1699_vm1, %v1689_v37  ;;  %v1552_v8 = vadd.f32 %v3348_v21, %v1263_v16  ;;  %v1690_v46 = vmax.f32 %v1600_v11, 0.0  ;;  %v1327_v21 = vadd.f32 %v3201_v53, %v3179_v32 }
 0x1cc   : > { %1752 = vst.msk [vmem:[%s3213_s12 + $0x1a0] sm:$0xff] %vm1699_vm1, %v1687_v42  ;;  %v1688_v14 = vmax.f32 %v1592_v45, 0.0 }
 0x1cd   : > { %1742 = vst.msk [vmem:[%s3213_s12 + $0x150] sm:$0xff] %vm1699_vm1, %v1677_v19  ;;  %v1678_v50 = vmax.f32 %v1552_v8, 0.0  ;;  %1755 = vst.msk [vmem:[%s3213_s12 + $0x1b8] sm:$0xff] %vm1699_vm1, %v1690_v46 }
 0x1ce   : > { %1753 = vst.msk [vmem:[%s3213_s12 + $0x1a8] sm:$0xff] %vm1699_vm1, %v1688_v14  ;;  %v1267_v54 = vpop.f32.mrb[88].mxu0  ;;  %v2501_v15 = vpop.f32.mrb[88].mxu1 }
 0x1cf   : > { %1743 = vst.msk [vmem:[%s3213_s12 + $0x158] sm:$0xff] %vm1699_vm1, %v1678_v50  ;;  %v1268_v39 = vadd.f32 %v3201_v53, %v1267_v54  ;;  %v1613_v28 = vadd.f32 %v2501_v15, %v1324_v49  ;;  %v1269_v7 = vpop.f32.mrb[89].mxu0  ;;  %v1604_v61 = vpop.f32.mrb[89].mxu1 }
 0x1d0   : > { %v1605_v20 = vadd.f32 %v1604_v61, %v1316_v47  ;;  %v1270_v1 = vpop.f32.mrb[90].mxu0  ;;  %v2502_v2 = vpop.f32.mrb[90].mxu1 }
 0x1d1   : > { %v1557_v52 = vadd.f32 %v3358_v62, %v1268_v39  ;;  %v1693_v57 = vmax.f32 %v1613_v28, 0.0  ;;  %v1271_v32 = vadd.f32 %v3201_v53, %v1270_v1  ;;  %v1616_v5 = vadd.f32 %v2502_v2, %v1327_v21  ;;  %v1272_v0 = vpop.f32.mrb[91].mxu0  ;;  %v1607_v26 = vpop.f32.mrb[91].mxu1 }
 0x1d2   : > { %v1691_v6 = vmax.f32 %v1605_v20, 0.0  ;;  %v1608_v58 = vadd.f32 %v1607_v26, %v1319_v60 }
 0x1d3   : > { %v1679_v27 = vmax.f32 %v1557_v52, 0.0  ;;  %1758 = vst.msk [vmem:[%s3213_s12 + $0x1d0] sm:$0xff] %vm1699_vm1, %v1693_v57  ;;  %v1560_v24 = vadd.f32 %v3363_v38, %v1271_v32  ;;  %v1694_v59 = vmax.f32 %v1616_v5, 0.0  ;;  %v1343_v38 = vadd.f32 %v3201_v53, %v3195_v48 }
 0x1d4   : > { %1756 = vst.msk [vmem:[%s3213_s12 + $0x1c0] sm:$0xff] %vm1699_vm1, %v1691_v6  ;;  %v1692_v62 = vmax.f32 %v1608_v58, 0.0 }
 0x1d5   : > { %1744 = vst.msk [vmem:[%s3213_s12 + $0x160] sm:$0xff] %vm1699_vm1, %v1679_v27  ;;  %v1680_v56 = vmax.f32 %v1560_v24, 0.0  ;;  %1759 = vst.msk [vmem:[%s3213_s12 + $0x1d8] sm:$0xff] %vm1699_vm1, %v1694_v59 }
 0x1d6   : > { %1757 = vst.msk [vmem:[%s3213_s12 + $0x1c8] sm:$0xff] %vm1699_vm1, %v1692_v62  ;;  %v1275_v17 = vpop.f32.mrb[92].mxu0  ;;  %v2505_v51 = vpop.f32.mrb[92].mxu1 }
 0x1d7   : > { %1745 = vst.msk [vmem:[%s3213_s12 + $0x168] sm:$0xff] %vm1699_vm1, %v1680_v56  ;;  %v1276_v3 = vadd.f32 %v3201_v53, %v1275_v17  ;;  %v1629_v44 = vadd.f32 %v2505_v51, %v1340_v9  ;;  %v1277_v18 = vpop.f32.mrb[93].mxu0  ;;  %v1620_v10 = vpop.f32.mrb[93].mxu1 }
 0x1d8   : > { %v1621_v36 = vadd.f32 %v1620_v10, %v1332_v13  ;;  %v1278_v31 = vpop.f32.mrb[94].mxu0  ;;  %v2506_v63 = vpop.f32.mrb[94].mxu1 }
 0x1d9   : > { %v1565_v12 = vadd.f32 %v3353_v30, %v1276_v3  ;;  %v1697_v48 = vmax.f32 %v1629_v44, 0.0  ;;  %v1279_v23 = vadd.f32 %v3201_v53, %v1278_v31  ;;  %v1632_v22 = vadd.f32 %v2506_v63, %v1343_v38  ;;  %v1280_v29 = vpop.f32.mrb[95].mxu0  ;;  %v1623_v4 = vpop.f32.mrb[95].mxu1  ;;  %1770 = sbr.rel (!%p2909_p4) target bundleno = 552 (0x228), region = 36 }
 0x1da   : > { %v1695_v25 = vmax.f32 %v1621_v36, 0.0  ;;  %v1624_v33 = vadd.f32 %v1623_v4, %v1335_v55 }
 0x1db   : > { %v1681_v34 = vmax.f32 %v1565_v12, 0.0  ;;  %1762 = vst.msk [vmem:[%s3213_s12 + $0x1f0] sm:$0xff] %vm1699_vm1, %v1697_v48  ;;  %v1568_v40 = vadd.f32 %v3360_v43, %v1279_v23  ;;  %v1698_v37 = vmax.f32 %v1632_v22, 0.0 }
 0x1dc   : > { %1760 = vst.msk [vmem:[%s3213_s12 + $0x1e0] sm:$0xff] %vm1699_vm1, %v1695_v25  ;;  %v1696_v30 = vmax.f32 %v1624_v33, 0.0 }
 0x1dd   : > { %1746 = vst.msk [vmem:[%s3213_s12 + $0x170] sm:$0xff] %vm1699_vm1, %v1681_v34  ;;  %v1682_v16 = vmax.f32 %v1568_v40, 0.0  ;;  %1763 = vst.msk [vmem:[%s3213_s12 + $0x1f8] sm:$0xff] %vm1699_vm1, %v1698_v37 }
 0x1de   : > { %1761 = vst.msk [vmem:[%s3213_s12 + $0x1e8] sm:$0xff] %vm1699_vm1, %v1696_v30 }
 0x1df   : > { %1747 = vst.msk [vmem:[%s3213_s12 + $0x178] sm:$0xff] %vm1699_vm1, %v1682_v16 }
 0x1e0   : > { %s3683_s27 = smov (!%p1773_p8, %s1772_s27), 64 }
 0x1e1   : > { %s2387_s5 = sshll.u32 %s3683_s27, 7 }
 0x1e2   : > { %p2390_p9 = scmp.eq.s32.totalorder %s2387_s5, 0 }
 0x1e3   : > { %s3476_s6 = sshrl.u32 (!%p2390_p9), %s3683_s27, 6 }
 0x1e4   : > { %1781 = sbr.rel (%p2390_p9) target bundleno = 552 (0x228), region = 40  ;;  %p2391_p10 = scmp.le.s32.totalorder (!%p2390_p9), %s3476_s6, 0 }
 0x1eb   : > { %2187 = sbr.rel (%p2391_p10) target bundleno = 531 (0x213), region = 116  ;;  %s3674_s15 = smov (!%p2391_p10), %s3470_s4 }
 0x1ec   : > { %s3675_s20 = smov (!%p2391_p10), %s3213_s12  ;;  %s3485_s23 = smov (!%p2391_p10), 0  }
 0x1ed   : > { %s3487_s7 = smov (!%p2391_p10), 0  }
 0x1f2 LB: >> { %v1969_v53 = vld [vmem:[%s2837_s20] sm:$0xff]  ;;  %v1971_v43 = vld [vmem:[%s2837_s20 + $0x8] sm:$0xff]  ;;  %v1973_v11 = vld [vmem:[%s2837_s20 + $0x10] sm:$0xff]  ;;  %s2097_s8 = sadd.s32 1, %s2841_s23  ;;  %s1963_s7 = sadd.s32 1, %s2845_s7   ;;  %s2845_s7 = sphi %s3487_s7, %s1963_s7   ;;  %s2841_s23 = sphi %s3485_s23, %s3678_s23   ;;  %s2837_s20 = sphi %s3675_s20, %s3677_s20   ;;  %s2833_s15 = sphi %s3674_s15, %s3676_s15  }
 0x1f3   : >> { %1970 = vst [vmem:[%s2833_s15] sm:$0xff] %v1969_v53  ;;  %1972 = vst [vmem:[%s2833_s15 + $0x8] sm:$0xff] %v1971_v43  ;;  %v1975_v35 = vld [vmem:[%s2837_s20 + $0x18] sm:$0xff]  ;;  %v1977_v41 = vld [vmem:[%s2837_s20 + $0x20] sm:$0xff]  ;;  %p2098_p11 = scmp.ge.s32.totalorder %s2097_s8, %s3476_s6  ;;  %p1962_p12 = scmp.ge.s32.totalorder %s1963_s7, %s3476_s6 }
 0x1f4   : >> { %1974 = vst [vmem:[%s2833_s15 + $0x10] sm:$0xff] %v1973_v11  ;;  %v1979_v42 = vld [vmem:[%s2837_s20 + $0x28] sm:$0xff]  ;;  %1976 = vst [vmem:[%s2833_s15 + $0x18] sm:$0xff] %v1975_v35  ;;  %v1981_v45 = vld [vmem:[%s2837_s20 + $0x30] sm:$0xff] }
 0x1f5   : >> { %1978 = vst [vmem:[%s2833_s15 + $0x20] sm:$0xff] %v1977_v41  ;;  %1980 = vst [vmem:[%s2833_s15 + $0x28] sm:$0xff] %v1979_v42  ;;  %v1983_v19 = vld [vmem:[%s2837_s20 + $0x38] sm:$0xff]  ;;  %v1985_v8 = vld [vmem:[%s2837_s20 + $0x40] sm:$0xff]  ;;  %s3685_s8 = smov (%p2098_p11, %s2097_s8), 0 }
 0x1f6   : >> { %1982 = vst [vmem:[%s2833_s15 + $0x30] sm:$0xff] %v1981_v45  ;;  %1984 = vst [vmem:[%s2833_s15 + $0x38] sm:$0xff] %v1983_v19  ;;  %v1987_v46 = vld [vmem:[%s2837_s20 + $0x48] sm:$0xff]  ;;  %v1989_v14 = vld [vmem:[%s2837_s20 + $0x50] sm:$0xff]  ;;  %s2392_s10 = sshll.u32 %s3685_s8, 9  ;;  %s3678_s23 = smov %s3685_s8 }
 0x1f7   : >> { %1986 = vst [vmem:[%s2833_s15 + $0x40] sm:$0xff] %v1985_v8  ;;  %v1991_v49 = vld [vmem:[%s2837_s20 + $0x58] sm:$0xff]  ;;  %1988 = vst [vmem:[%s2833_s15 + $0x48] sm:$0xff] %v1987_v46  ;;  %v1993_v50 = vld [vmem:[%s2837_s20 + $0x60] sm:$0xff]  ;;  %s3543_s11 = scalar_lea.vmem %s3213_s12, %s2392_s10 [#allocation2]   ;;  %s3546_s14 = scalar_lea.vmem %s3470_s4, %s2392_s10  }
 0x1f8   : >> { %1990 = vst [vmem:[%s2833_s15 + $0x50] sm:$0xff] %v1989_v14  ;;  %1992 = vst [vmem:[%s2833_s15 + $0x58] sm:$0xff] %v1991_v49  ;;  %v1995_v47 = vld [vmem:[%s2837_s20 + $0x68] sm:$0xff]  ;;  %v1997_v54 = vld [vmem:[%s2837_s20 + $0x70] sm:$0xff] }
 0x1f9   : >> { %1994 = vst [vmem:[%s2833_s15 + $0x60] sm:$0xff] %v1993_v50  ;;  %1996 = vst [vmem:[%s2833_s15 + $0x68] sm:$0xff] %v1995_v47  ;;  %v1999_v15 = vld [vmem:[%s2837_s20 + $0x78] sm:$0xff]  ;;  %v2001_v21 = vld [vmem:[%s2837_s20 + $0x80] sm:$0xff] }
 0x1fa   : >> { %1998 = vst [vmem:[%s2833_s15 + $0x70] sm:$0xff] %v1997_v54  ;;  %v2003_v39 = vld [vmem:[%s2837_s20 + $0x88] sm:$0xff]  ;;  %2000 = vst [vmem:[%s2833_s15 + $0x78] sm:$0xff] %v1999_v15  ;;  %v2005_v28 = vld [vmem:[%s2837_s20 + $0x90] sm:$0xff] }
 0x1fb   : >> { %2002 = vst [vmem:[%s2833_s15 + $0x80] sm:$0xff] %v2001_v21  ;;  %2004 = vst [vmem:[%s2833_s15 + $0x88] sm:$0xff] %v2003_v39  ;;  %v2007_v7 = vld [vmem:[%s2837_s20 + $0x98] sm:$0xff]  ;;  %v2009_v61 = vld [vmem:[%s2837_s20 + $0xa0] sm:$0xff] }
 0x1fc   : >> { %2006 = vst [vmem:[%s2833_s15 + $0x90] sm:$0xff] %v2005_v28  ;;  %2008 = vst [vmem:[%s2833_s15 + $0x98] sm:$0xff] %v2007_v7  ;;  %v2011_v60 = vld [vmem:[%s2837_s20 + $0xa8] sm:$0xff]  ;;  %v2013_v20 = vld [vmem:[%s2837_s20 + $0xb0] sm:$0xff] }
 0x1fd   : >> { %2010 = vst [vmem:[%s2833_s15 + $0xa0] sm:$0xff] %v2009_v61  ;;  %v2015_v1 = vld [vmem:[%s2837_s20 + $0xb8] sm:$0xff]  ;;  %2012 = vst [vmem:[%s2833_s15 + $0xa8] sm:$0xff] %v2011_v60  ;;  %v2017_v2 = vld [vmem:[%s2837_s20 + $0xc0] sm:$0xff] }
 0x1fe   : >> { %2014 = vst [vmem:[%s2833_s15 + $0xb0] sm:$0xff] %v2013_v20  ;;  %2016 = vst [vmem:[%s2833_s15 + $0xb8] sm:$0xff] %v2015_v1  ;;  %v2019_v52 = vld [vmem:[%s2837_s20 + $0xc8] sm:$0xff]  ;;  %v2021_v57 = vld [vmem:[%s2837_s20 + $0xd0] sm:$0xff] }
 0x1ff   : >> { %2018 = vst [vmem:[%s2833_s15 + $0xc0] sm:$0xff] %v2017_v2  ;;  %2020 = vst [vmem:[%s2833_s15 + $0xc8] sm:$0xff] %v2019_v52  ;;  %v2023_v32 = vld [vmem:[%s2837_s20 + $0xd8] sm:$0xff]  ;;  %v2025_v5 = vld [vmem:[%s2837_s20 + $0xe0] sm:$0xff] }
 0x200   : >> { %2022 = vst [vmem:[%s2833_s15 + $0xd0] sm:$0xff] %v2021_v57  ;;  %v2027_v0 = vld [vmem:[%s2837_s20 + $0xe8] sm:$0xff]  ;;  %2024 = vst [vmem:[%s2833_s15 + $0xd8] sm:$0xff] %v2023_v32  ;;  %v2029_v26 = vld [vmem:[%s2837_s20 + $0xf0] sm:$0xff] }
 0x201   : >> { %2026 = vst [vmem:[%s2833_s15 + $0xe0] sm:$0xff] %v2025_v5  ;;  %2028 = vst [vmem:[%s2833_s15 + $0xe8] sm:$0xff] %v2027_v0  ;;  %v2031_v6 = vld [vmem:[%s2837_s20 + $0xf8] sm:$0xff]  ;;  %v2033_v58 = vld [vmem:[%s2837_s20 + $0x100] sm:$0xff] }
 0x202   : >> { %2030 = vst [vmem:[%s2833_s15 + $0xf0] sm:$0xff] %v2029_v26  ;;  %2032 = vst [vmem:[%s2833_s15 + $0xf8] sm:$0xff] %v2031_v6  ;;  %v2035_v27 = vld [vmem:[%s2837_s20 + $0x108] sm:$0xff]  ;;  %v2037_v24 = vld [vmem:[%s2837_s20 + $0x110] sm:$0xff] }
 0x203   : >> { %2034 = vst [vmem:[%s2833_s15 + $0x100] sm:$0xff] %v2033_v58  ;;  %v2039_v59 = vld [vmem:[%s2837_s20 + $0x118] sm:$0xff]  ;;  %2036 = vst [vmem:[%s2833_s15 + $0x108] sm:$0xff] %v2035_v27  ;;  %v2041_v62 = vld [vmem:[%s2837_s20 + $0x120] sm:$0xff] }
 0x204   : >> { %2038 = vst [vmem:[%s2833_s15 + $0x110] sm:$0xff] %v2037_v24  ;;  %2040 = vst [vmem:[%s2833_s15 + $0x118] sm:$0xff] %v2039_v59  ;;  %v2043_v9 = vld [vmem:[%s2837_s20 + $0x128] sm:$0xff]  ;;  %v2045_v56 = vld [vmem:[%s2837_s20 + $0x130] sm:$0xff] }
 0x205   : >> { %2042 = vst [vmem:[%s2833_s15 + $0x120] sm:$0xff] %v2041_v62  ;;  %2044 = vst [vmem:[%s2833_s15 + $0x128] sm:$0xff] %v2043_v9  ;;  %v2047_v13 = vld [vmem:[%s2837_s20 + $0x138] sm:$0xff]  ;;  %v2049_v17 = vld [vmem:[%s2837_s20 + $0x140] sm:$0xff] }
 0x206   : >> { %2046 = vst [vmem:[%s2833_s15 + $0x130] sm:$0xff] %v2045_v56  ;;  %v2051_v51 = vld [vmem:[%s2837_s20 + $0x148] sm:$0xff]  ;;  %2048 = vst [vmem:[%s2833_s15 + $0x138] sm:$0xff] %v2047_v13  ;;  %v2053_v38 = vld [vmem:[%s2837_s20 + $0x150] sm:$0xff] }
 0x207   : >> { %2050 = vst [vmem:[%s2833_s15 + $0x140] sm:$0xff] %v2049_v17  ;;  %2052 = vst [vmem:[%s2833_s15 + $0x148] sm:$0xff] %v2051_v51  ;;  %v2055_v3 = vld [vmem:[%s2837_s20 + $0x158] sm:$0xff]  ;;  %v2057_v44 = vld [vmem:[%s2837_s20 + $0x160] sm:$0xff] }
 0x208   : >> { %2054 = vst [vmem:[%s2833_s15 + $0x150] sm:$0xff] %v2053_v38  ;;  %2056 = vst [vmem:[%s2833_s15 + $0x158] sm:$0xff] %v2055_v3  ;;  %v2059_v18 = vld [vmem:[%s2837_s20 + $0x168] sm:$0xff]  ;;  %v2061_v10 = vld [vmem:[%s2837_s20 + $0x170] sm:$0xff] }
 0x209   : >> { %2058 = vst [vmem:[%s2833_s15 + $0x160] sm:$0xff] %v2057_v44  ;;  %v2063_v55 = vld [vmem:[%s2837_s20 + $0x178] sm:$0xff]  ;;  %2060 = vst [vmem:[%s2833_s15 + $0x168] sm:$0xff] %v2059_v18  ;;  %v2065_v36 = vld [vmem:[%s2837_s20 + $0x180] sm:$0xff] }
 0x20a   : >> { %2062 = vst [vmem:[%s2833_s15 + $0x170] sm:$0xff] %v2061_v10  ;;  %2064 = vst [vmem:[%s2833_s15 + $0x178] sm:$0xff] %v2063_v55  ;;  %v2067_v31 = vld [vmem:[%s2837_s20 + $0x188] sm:$0xff]  ;;  %v2069_v63 = vld [vmem:[%s2837_s20 + $0x190] sm:$0xff] }
 0x20b   : >> { %2066 = vst [vmem:[%s2833_s15 + $0x180] sm:$0xff] %v2065_v36  ;;  %2068 = vst [vmem:[%s2833_s15 + $0x188] sm:$0xff] %v2067_v31  ;;  %v2071_v12 = vld [vmem:[%s2837_s20 + $0x198] sm:$0xff]  ;;  %v2073_v48 = vld [vmem:[%s2837_s20 + $0x1a0] sm:$0xff] }
 0x20c   : >> { %2070 = vst [vmem:[%s2833_s15 + $0x190] sm:$0xff] %v2069_v63  ;;  %v2075_v23 = vld [vmem:[%s2837_s20 + $0x1a8] sm:$0xff]  ;;  %2072 = vst [vmem:[%s2833_s15 + $0x198] sm:$0xff] %v2071_v12  ;;  %v2077_v22 = vld [vmem:[%s2837_s20 + $0x1b0] sm:$0xff]  ;;  %1965 = sbr.rel (!%p1962_p12) target bundleno = 498 (0x1f2), region = 122 }
 0x20d   : >> { %2074 = vst [vmem:[%s2833_s15 + $0x1a0] sm:$0xff] %v2073_v48  ;;  %2076 = vst [vmem:[%s2833_s15 + $0x1a8] sm:$0xff] %v2075_v23  ;;  %v2079_v29 = vld [vmem:[%s2837_s20 + $0x1b8] sm:$0xff]  ;;  %v2081_v4 = vld [vmem:[%s2837_s20 + $0x1c0] sm:$0xff] }
 0x20e   : >> { %2078 = vst [vmem:[%s2833_s15 + $0x1b0] sm:$0xff] %v2077_v22  ;;  %2080 = vst [vmem:[%s2833_s15 + $0x1b8] sm:$0xff] %v2079_v29  ;;  %v2083_v25 = vld [vmem:[%s2837_s20 + $0x1c8] sm:$0xff]  ;;  %v2085_v33 = vld [vmem:[%s2837_s20 + $0x1d0] sm:$0xff] }
 0x20f   : >> { %2082 = vst [vmem:[%s2833_s15 + $0x1c0] sm:$0xff] %v2081_v4  ;;  %v2087_v34 = vld [vmem:[%s2837_s20 + $0x1d8] sm:$0xff]  ;;  %2084 = vst [vmem:[%s2833_s15 + $0x1c8] sm:$0xff] %v2083_v25  ;;  %v2089_v40 = vld [vmem:[%s2837_s20 + $0x1e0] sm:$0xff] }
 0x210   : >> { %2086 = vst [vmem:[%s2833_s15 + $0x1d0] sm:$0xff] %v2085_v33  ;;  %2088 = vst [vmem:[%s2833_s15 + $0x1d8] sm:$0xff] %v2087_v34  ;;  %v2091_v37 = vld [vmem:[%s2837_s20 + $0x1e8] sm:$0xff]  ;;  %v2093_v30 = vld [vmem:[%s2837_s20 + $0x1f0] sm:$0xff] }
 0x211   : >> { %2090 = vst [vmem:[%s2833_s15 + $0x1e0] sm:$0xff] %v2089_v40  ;;  %2092 = vst [vmem:[%s2833_s15 + $0x1e8] sm:$0xff] %v2091_v37  ;;  %v2095_v16 = vld [vmem:[%s2837_s20 + $0x1f8] sm:$0xff]  ;;  %s3677_s20 = smov %s3543_s11 }
 0x212   : >> { %2094 = vst [vmem:[%s2833_s15 + $0x1f0] sm:$0xff] %v2093_v30  ;;  %2096 = vst [vmem:[%s2833_s15 + $0x1f8] sm:$0xff] %v2095_v16  ;;  %s3676_s15 = smov %s3546_s14 }
 0x213 PF: > { %s3651_s17 = sand.u32 63, %s3683_s27   ;;  %s2403_s18 = sshll.u32 %s3476_s6, 9 }
 0x214   : > { %s2108_s21 = scalar_lea.vmem %s3213_s12, %s2403_s18 [#allocation2]   ;;  %s2110_s22 = scalar_lea.vmem %s3470_s4, %s2403_s18  }
 0x215   : > { %p2397_p13 = scmp.le.s32.totalorder %s3651_s17, 0 }
 0x216   : > { %s2847_s9 = smov (!%p2397_p13), %s2110_s22   ;;  %s2851_s24 = smov (!%p2397_p13), %s2108_s21  }
 0x217   : > { %2201 = sbr.rel (%p2397_p13) target bundleno = 552 (0x228), region = 127  ;;  %s2855_s25 = smov (!%p2397_p13), 0  }
 0x218   : > { %s2859_s26 = smov (!%p2397_p13), 0  }
 0x21e LB: >> { %v2120_v53 = vld [vmem:[%s2853_s24] sm:$0xff]  ;;  %s2122_s27 = sadd.s32 1, %s2857_s25  ;;  %s2114_s26 = sadd.s32 1, %s2861_s26   ;;  %s2861_s26 = sphi %s2859_s26, %s2114_s26   ;;  %s2857_s25 = sphi %s2855_s25, %s2856_s25   ;;  %s2853_s24 = sphi %s2851_s24, %s2127_s24   ;;  %s2849_s9 = sphi %s2847_s9, %s2128_s9  }
 0x21f   : >> { %2121 = vst [vmem:[%s2849_s9] sm:$0xff] %v2120_v53  ;;  %p2123_p0 = scmp.ge.s32.totalorder %s2122_s27, %s3651_s17  ;;  %p2113_p1 = scmp.ge.s32.totalorder %s2114_s26, %s3651_s17 }
 0x221   : >> { %s3687_s27 = smov (%p2123_p0, %s2122_s27), 0  ;;  %2116 = sbr.rel (!%p2113_p1) target bundleno = 542 (0x21e), region = 133 }
 0x222   : >> { %s2398_s12 = sshll.u32 %s3687_s27, 3  ;;  %s2856_s25 = smov %s3687_s27  }
 0x223   : >> { %s2127_s24 = scalar_lea.vmem %s2108_s21, %s2398_s12 [#allocation2]   ;;  %s2128_s9 = scalar_lea.vmem %s2110_s22, %s2398_s12  }
 0x228 PF: > { %p10_p2 = scmp.ge.s32.totalorder %s2899_s16, 5   ;;  %s3679_s12 = smov %s2825_s13 }
 0x229   : > { %s3680_s13 = smov %s2907_s19  ;;  %s3681_s14 = smov %s2899_s16 }
 0x22a   :  { %12 = sbr.rel (!%p10_p2) target bundleno = 2 (0x2), region = 144 }

// kernel: simple_cnn_forward.7
= control target key start
LH: loop header
LB: loop body
LE: loop exit
PB: predicated region body
PF: predicated region fallthrough
CT: control target
= control target key end

     0   :  { %10 = vsyncpa [#allocation4], 0  ;;  %s1693_s18 = smov 0   ;;  %s1861_s0 = inlined_call_operand.vmem [shape: bf16[2,9216], index: 0, kind: input, shape index: {}]   ;;  %s1862_s1 = inlined_call_operand.vmem [shape: bf16[9216,128], index: 1, kind: input, shape index: {}]   ;;  %s1863_s2 = inlined_call_operand.vmem [shape: f32[1,128], index: 2, kind: input, shape index: {}]   ;;  %s1864_s3 = inlined_call_operand.vmem [shape: bf16[128,10], index: 3, kind: input, shape index: {}]   ;;  %s1865_s4 = inlined_call_operand.vmem [shape: f32[1,10], index: 4, kind: input, shape index: {}]   ;;  %s1866_s5 = inlined_call_operand.hbm [shape: f32[2,10], index: 5, kind: output, shape index: {}]  }
   0x1 LB: > { %s1699_s19 = sadd.s32 4294967295, %s1654_s18   ;;  %p1279_p0 = scmp.ge.s32.totalorder %s1654_s18, 1  ;;  %s1654_s18 = sphi %s1693_s18, %s16_s18  }
   0x2   : > { %p194_p1 = scmp.lt.s32.totalorder %s1654_s18, 9 }
   0x4   : > { %p195_p2 = pnand %p1279_p0, %p194_p1 }
   0x5   : > { %s221_s20 = smul.u32 (!%p195_p2), 9, %s1699_s19  ;;  %p1281_p5 = scmp.ne.s32.totalorder (!%p195_p2), %s1699_s19, 0 }
   0x6   : > { %198 = sbr.rel (%p195_p2) target bundleno = 590 (0x24e), region = 40 }
   0x7   : > { %s226_s21 = smul.u32 (!%p195_p2), 144, %s1699_s19  ;;  %p222_p3 = scmp.lt.s32.totalorder (!%p195_p2), %s221_s20, 71 }
   0x9   : > { %p227_p4 = scmp.lt.s32.totalorder (!%p195_p2), %s226_s21, 1151 }
   0xd   : > { %s1868_s20 = smov (!%p222_p3, %s221_s20), 71  ;;  %s1870_s21 = smov (!%p227_p4, %s226_s21), 1151 }
   0xe   : > { %s1708_s24 = scalar_lea.vmem %s1861_s0, %s1868_s20  ;;  %s1280_s25 = sshll.u32 %s1870_s21, 2  ;;  %v1656_v0 = vmov (!%p1281_p5), 0.0  }
   0xf   : > { %s1713_s28 = scalar_lea.vmem %s1862_s1, %s1280_s25  ;;  %236 = sbr.rel (%p1281_p5) target bundleno = 22 (0x16), region = 44  ;;  %237 = vst [vmem:[#allocation2] sm:$0x3] (!%p1281_p5), %v1656_v0 }
  0x16 PF: > { %v1537_v1 = vld [vmem:[%s1713_s28 + $0x40] sm:$0xff]   ;;  %v1541_v5 = vld [vmem:[%s1713_s28 + $0x48] sm:$0xff]   ;;  %v1545_v9 = vld [vmem:[%s1713_s28 + $0x50] sm:$0xff]   ;;  %v391_v30 = vlaneseq  ;;  %v1657_v36 = vmov 1966171168   ;;  %vm1659_vm0 = vmmov 0  }
  0x17   : > { %v1538_v2 = vld [vmem:[%s1713_s28 + $0xc0] sm:$0xff]   ;;  %1370 = vmatprep.subr.bf16.mxu0 %v1537_v1  ;;  %v1542_v6 = vld [vmem:[%s1713_s28 + $0xc8] sm:$0xff]   ;;  %v1546_v10 = vld [vmem:[%s1713_s28 + $0xd0] sm:$0xff]   ;;  %v389_v37 = vunpack.c.l.s4 %v1657_v36  ;;  %p1355_p6 = scmp.ne.s32.totalorder %s1699_s19, 7 }
  0x18   : > { %v1539_v3 = vld [vmem:[%s1713_s28] sm:$0xff]   ;;  %1392 = vmatprep.subr.bf16.mxu1 %v1538_v2  ;;  %v1543_v7 = vld [vmem:[%s1713_s28 + $0x8] sm:$0xff]   ;;  %v1547_v11 = vld [vmem:[%s1713_s28 + $0x10] sm:$0xff]   ;;  %v392_v34 = vshrl.u32 %v391_v30, 7  ;;  %vm1661_vm1 = vmmov (!%p1355_p6), 0   ;;  %vm1219_vm2 = vcmask (!%p1355_p6), 74752  }
  0x19   : > { %v1540_v4 = vld [vmem:[%s1713_s28 + $0x80] sm:$0xff]   ;;  %1371 = vmatpush3.bf16.msra.mxu0 %v1539_v3  ;;  %v1544_v8 = vld [vmem:[%s1713_s28 + $0x88] sm:$0xff]   ;;  %v1548_v12 = vld [vmem:[%s1713_s28 + $0x90] sm:$0xff]   ;;  %v390_v40 = vunpack.c.0.s8 %v389_v37 }
  0x1a   : > { %1393 = vmatpush3.bf16.msra.mxu1 %v1540_v4  ;;  %1372 = vmatprep.subr.bf16.mxu0 %v1541_v5  ;;  %v1549_v13 = vld [vmem:[%s1713_s28 + $0x58] sm:$0xff]   ;;  %v1553_v17 = vld [vmem:[%s1713_s28 + $0x60] sm:$0xff]   ;;  %v1557_v21 = vld [vmem:[%s1713_s28 + $0x68] sm:$0xff]  }
  0x1b   : > { %1394 = vmatprep.subr.bf16.mxu1 %v1542_v6  ;;  %v1550_v14 = vld [vmem:[%s1713_s28 + $0xd8] sm:$0xff]   ;;  %v1554_v18 = vld [vmem:[%s1713_s28 + $0xe0] sm:$0xff]   ;;  %v1558_v22 = vld [vmem:[%s1713_s28 + $0xe8] sm:$0xff]   ;;  %v1751_v42 = vsub.s32 %v390_v40, %v392_v34 }
  0x1c   : > { %v1551_v15 = vld [vmem:[%s1713_s28 + $0x18] sm:$0xff]   ;;  %v1555_v19 = vld [vmem:[%s1713_s28 + $0x20] sm:$0xff]   ;;  %v1559_v23 = vld [vmem:[%s1713_s28 + $0x28] sm:$0xff]  }
  0x1d   : > { %1373 = vmatpush3.bf16.msra.mxu0 %v1543_v7  ;;  %v1552_v16 = vld [vmem:[%s1713_s28 + $0x98] sm:$0xff]   ;;  %v1556_v20 = vld [vmem:[%s1713_s28 + $0xa0] sm:$0xff]   ;;  %v1560_v24 = vld [vmem:[%s1713_s28 + $0xa8] sm:$0xff]  }
  0x1e   : > { %1395 = vmatpush3.bf16.msra.mxu1 %v1544_v8  ;;  %1374 = vmatprep.subr.bf16.mxu0 %v1545_v9  ;;  %v1561_v25 = vld [vmem:[%s1713_s28 + $0x70] sm:$0xff]   ;;  %v1565_v29 = vld [vmem:[%s1713_s28 + $0x78] sm:$0xff]   ;;  %v1570_v35 = vld [vmem:[%s1713_s28 + $0x140] sm:$0xff]  }
  0x1f   : > { %1396 = vmatprep.subr.bf16.mxu1 %v1546_v10  ;;  %v1562_v26 = vld [vmem:[%s1713_s28 + $0xf0] sm:$0xff]   ;;  %v1566_v31 = vld [vmem:[%s1713_s28 + $0xf8] sm:$0xff]   ;;  %v239_v38 = vld [vmem:[%s1708_s24] sm:$0xff] }
  0x20   : > { %v1563_v27 = vld [vmem:[%s1713_s28 + $0x30] sm:$0xff]   ;;  %v1567_v32 = vld [vmem:[%s1713_s28 + $0x38] sm:$0xff]   ;;  %v387_v39 = vcombine.high %v239_v38, %v239_v38  ;;  %v1572_v41 = vld [vmem:[%s1713_s28 + $0x1c0] sm:$0xff]   ;;  %v394_v43 = vrot.slane %v239_v38, %v1751_v42 }
  0x21   : > { %1375 = vmatpush3.bf16.msra.mxu0 %v1547_v11  ;;  %v1564_v28 = vld [vmem:[%s1713_s28 + $0xb0] sm:$0xff]   ;;  %v1568_v33 = vld [vmem:[%s1713_s28 + $0xb8] sm:$0xff]   ;;  %v1571_v49 = vld [vmem:[%s1713_s28 + $0x100] sm:$0xff]  }
  0x22   : > { %1397 = vmatpush3.bf16.msra.mxu1 %v1548_v12  ;;  %1376 = vmatprep.subr.bf16.mxu0 %v1549_v13  ;;  %v1755_v44 = vrot.slane %v387_v39, %v1751_v42  ;;  %v402_v45 = vcombine.high %v394_v43, %v394_v43  ;;  %v410_v46 = vrot.slane %v394_v43, %v1751_v42  ;;  %v1574_v52 = vld [vmem:[%s1713_s28 + $0x148] sm:$0xff]   ;;  %v1573_v54 = vld [vmem:[%s1713_s28 + $0x180] sm:$0xff]   ;;  %v1578_v58 = vld [vmem:[%s1713_s28 + $0x150] sm:$0xff]  }
  0x23   : > { %1398 = vmatprep.subr.bf16.mxu1 %v1550_v14  ;;  %v1576_v55 = vld [vmem:[%s1713_s28 + $0x1c8] sm:$0xff]   ;;  %v1580_v60 = vld [vmem:[%s1713_s28 + $0x1d0] sm:$0xff]   ;;  %v1582_v62 = vld [vmem:[%s1713_s28 + $0x158] sm:$0xff]  }
  0x24   : > { %v403_v47 = vcombine.high %v1755_v44, %v1755_v44  ;;  %v424_v48 = vrot.slane %v402_v45, %v1751_v42  ;;  %v432_v51 = vcombine.high %v410_v46, %v410_v46  ;;  %v1575_v57 = vld [vmem:[%s1713_s28 + $0x108] sm:$0xff]   ;;  %v1579_v61 = vld [vmem:[%s1713_s28 + $0x110] sm:$0xff]   ;;  %v1584_v0 = vld [vmem:[%s1713_s28 + $0x1d8] sm:$0xff]  }
  0x25   : > { %1377 = vmatpush3.bf16.msra.mxu0 %v1551_v15  ;;  %v1577_v59 = vld [vmem:[%s1713_s28 + $0x188] sm:$0xff]   ;;  %v1581_v63 = vld [vmem:[%s1713_s28 + $0x190] sm:$0xff]   ;;  %v1583_v1 = vld [vmem:[%s1713_s28 + $0x118] sm:$0xff]  }
  0x26   : > { %1399 = vmatpush3.bf16.msra.mxu1 %v1552_v16  ;;  %1378 = vmatprep.subr.bf16.mxu0 %v1553_v17  ;;  %v431_v50 = vrot.slane %v403_v47, %v1751_v42  ;;  %v434_v53 = vcombine.high %v424_v48, %v424_v48  ;;  %v1586_v2 = vld [vmem:[%s1713_s28 + $0x160] sm:$0xff]   ;;  %v1585_v3 = vld [vmem:[%s1713_s28 + $0x198] sm:$0xff]   ;;  %v1590_v6 = vld [vmem:[%s1713_s28 + $0x168] sm:$0xff]  }
  0x27   : > { %1400 = vmatprep.subr.bf16.mxu1 %v1554_v18  ;;  %923 = vmatprep.mubr.bf16.mxu0 %v424_v48  ;;  %v1588_v4 = vld [vmem:[%s1713_s28 + $0x1e0] sm:$0xff]   ;;  %v1592_v8 = vld [vmem:[%s1713_s28 + $0x1e8] sm:$0xff]   ;;  %v1594_v10 = vld [vmem:[%s1713_s28 + $0x170] sm:$0xff]   ;;  %v417_v18 = vrot.slane %v1755_v44, %v1751_v42 }
  0x28   : > { %v435_v56 = vcombine.high %v431_v50, %v431_v50  ;;  %963 = vmatprep.mubr.bf16.mxu1 %v434_v53  ;;  %v1587_v5 = vld [vmem:[%s1713_s28 + $0x120] sm:$0xff]   ;;  %v1591_v9 = vld [vmem:[%s1713_s28 + $0x128] sm:$0xff]   ;;  %v1596_v12 = vld [vmem:[%s1713_s28 + $0x1f0] sm:$0xff]  }
  0x29   : > { %1379 = vmatpush3.bf16.msra.mxu0 %v1555_v19  ;;  %v1589_v7 = vld [vmem:[%s1713_s28 + $0x1a0] sm:$0xff]   ;;  %v1593_v11 = vld [vmem:[%s1713_s28 + $0x1a8] sm:$0xff]   ;;  %v1595_v13 = vld [vmem:[%s1713_s28 + $0x130] sm:$0xff]  }
  0x2a   : > { %1401 = vmatpush3.bf16.msra.mxu1 %v1556_v20  ;;  %1380 = vmatprep.subr.bf16.mxu0 %v1557_v21  ;;  %v1598_v14 = vld [vmem:[%s1713_s28 + $0x178] sm:$0xff]   ;;  %v1597_v15 = vld [vmem:[%s1713_s28 + $0x1b0] sm:$0xff]   ;;  %v1602_v20 = vld [vmem:[%s1713_s28 + $0x200] sm:$0xff]   ;;  %v1658_v21 = vmov 0.0  }
  0x2b   : > { %1402 = vmatprep.subr.bf16.mxu1 %v1558_v22  ;;  %v1600_v16 = vld [vmem:[%s1713_s28 + $0x1f8] sm:$0xff]   ;;  %v433_v22 = vcombine.high %v417_v18, %v417_v18  ;;  %v1282_v30 = vld.sshfl [vmem:[%s1708_s24 + $0x8] sm:$0x1 pattern:$0x75316420] }
  0x2c   : > { %v1599_v17 = vld [vmem:[%s1713_s28 + $0x138] sm:$0xff]  }
  0x2d   : > { %1381 = vmatpush3.bf16.msra.mxu0 %v1559_v23  ;;  %v1601_v19 = vld [vmem:[%s1713_s28 + $0x1b8] sm:$0xff]   ;;  %v1603_v23 = vld [vmem:[%s1713_s28 + $0x208] sm:$0xff]  }
  0x2e   : > { %1403 = vmatpush3.bf16.msra.mxu1 %v1560_v24  ;;  %1382 = vmatprep.subr.bf16.mxu0 %v1561_v25  ;;  %v1604_v24 = vld [vmem:[%s1713_s28 + $0x210] sm:$0xff]   ;;  %v1605_v25 = vld [vmem:[%s1713_s28 + $0x218] sm:$0xff]  }
  0x2f   : > { %1404 = vmatprep.subr.bf16.mxu1 %v1562_v26  ;;  %v1606_v26 = vld [vmem:[%s1713_s28 + $0x220] sm:$0xff]  }
  0x31   : > { %1383 = vmatpush3.bf16.msra.mxu0 %v1563_v27  ;;  %v1607_v27 = vld [vmem:[%s1713_s28 + $0x228] sm:$0xff]  }
  0x32   : > { %1405 = vmatpush3.bf16.msra.mxu1 %v1564_v28  ;;  %1384 = vmatprep.subr.bf16.mxu0 %v1565_v29  ;;  %v1608_v28 = vld [vmem:[%s1713_s28 + $0x230] sm:$0xff]   ;;  %v1609_v29 = vld [vmem:[%s1713_s28 + $0x238] sm:$0xff]  }
  0x33   : > { %1406 = vmatprep.subr.bf16.mxu1 %v1566_v31  ;;  %v449_v31 = vrot.slane %v1282_v30, %v1751_v42 }
  0x35   : > { %1385 = vmatpush3.bf16.msra.mxu0 %v1567_v32 }
  0x36   : > { %1407 = vmatpush3.bf16.msra.mxu1 %v1568_v33  ;;  %1414 = vmatprep.subr.bf16.mxu0 %v1570_v35 }
  0x37   : > { %1436 = vmatprep.subr.bf16.mxu1 %v1572_v41 }
  0x38   : > { %924 = vmatmul.mubr.bf16.vlgmr.msra.gmra.mrb[0].mxu0 %v410_v46 }
  0x39   : > { %1415 = vmatpush3.bf16.msra.mxu0 %v1571_v49  ;;  %964 = vmatmul.mubr.bf16.vlgmr.msra.gmra.mrb[0].mxu1 %v432_v51 }
  0x3a   : > { %1416 = vmatprep.subr.bf16.mxu0 %v1574_v52  ;;  %1437 = vmatpush3.bf16.msra.mxu1 %v1573_v54 }
  0x3b   : > { %1003 = vmatprep.mubr.bf16.mxu0 %v431_v50  ;;  %1438 = vmatprep.subr.bf16.mxu1 %v1576_v55  ;;  %v238_v55 = vld [vmem:[#allocation2] sm:$0x3] }
  0x3c   : > { %1043 = vmatprep.mubr.bf16.mxu1 %v435_v56 }
  0x3d   : > { %1417 = vmatpush3.bf16.msra.mxu0 %v1575_v57 }
  0x3e   : > { %1418 = vmatprep.subr.bf16.mxu0 %v1578_v58  ;;  %1439 = vmatpush3.bf16.msra.mxu1 %v1577_v59 }
  0x3f   : > { %1440 = vmatprep.subr.bf16.mxu1 %v1580_v60 }
  0x41   : > { %1419 = vmatpush3.bf16.msra.mxu0 %v1579_v61 }
  0x42   : > { %1420 = vmatprep.subr.bf16.mxu0 %v1582_v62  ;;  %1441 = vmatpush3.bf16.msra.mxu1 %v1581_v63  ;;  %v1610_v62 = vld [vmem:[%s1864_s3] sm:$0xff] (!%p1355_p6)   ;;  %v1660_v63 = vmov (!%p1355_p6), 0.0  }
  0x43   : > { %1442 = vmatprep.subr.bf16.mxu1 %v1584_v0  ;;  %v1611_v0 = vld [vmem:[%s1864_s3 + $0x8] sm:$0xff] (!%p1355_p6)  }
  0x45   : > { %1421 = vmatpush3.bf16.msra.mxu0 %v1583_v1  ;;  %v1612_v1 = vld [vmem:[%s1864_s3 + $0x10] sm:$0xff] (!%p1355_p6)  }
  0x46   : > { %1422 = vmatprep.subr.bf16.mxu0 %v1586_v2  ;;  %1443 = vmatpush3.bf16.msra.mxu1 %v1585_v3  ;;  %v1613_v2 = vld [vmem:[%s1864_s3 + $0x18] sm:$0xff] (!%p1355_p6)   ;;  %v1614_v3 = vld [vmem:[%s1864_s3 + $0x20] sm:$0xff] (!%p1355_p6)  }
  0x47   : > { %1444 = vmatprep.subr.bf16.mxu1 %v1588_v4  ;;  %v1615_v4 = vld [vmem:[%s1864_s3 + $0x28] sm:$0xff] (!%p1355_p6)  }
  0x49   : > { %1423 = vmatpush3.bf16.msra.mxu0 %v1587_v5 }
  0x4a   : > { %1424 = vmatprep.subr.bf16.mxu0 %v1590_v6  ;;  %1445 = vmatpush3.bf16.msra.mxu1 %v1589_v7  ;;  %v1356_v6 = vld [vmem:[%s1863_s2] ss:$0 sm:$0xff] (!%p1355_p6) }
  0x4b   : > { %1446 = vmatprep.subr.bf16.mxu1 %v1592_v8  ;;  %v1616_v8 = vld [vmem:[%s1864_s3 + $0x30] sm:$0xff] (!%p1355_p6)  }
  0x4d   : > { %1425 = vmatpush3.bf16.msra.mxu0 %v1591_v9 }
  0x4e   : > { %1426 = vmatprep.subr.bf16.mxu0 %v1594_v10  ;;  %1447 = vmatpush3.bf16.msra.mxu1 %v1593_v11  ;;  %v1617_v10 = vld [vmem:[%s1864_s3 + $0x38] sm:$0xff] (!%p1355_p6)  }
  0x4f   : > { %1448 = vmatprep.subr.bf16.mxu1 %v1596_v12  ;;  %v1357_v12 = vld [vmem:[%s1865_s4] ss:$0 sm:$0xff] (!%p1355_p6) }
  0x51   : > { %1427 = vmatpush3.bf16.msra.mxu0 %v1595_v13 }
  0x52   : > { %1428 = vmatprep.subr.bf16.mxu0 %v1598_v14  ;;  %1449 = vmatpush3.bf16.msra.mxu1 %v1597_v15 }
  0x53   : > { %1450 = vmatprep.subr.bf16.mxu1 %v1600_v16 }
  0x55   : > { %1429 = vmatpush3.bf16.msra.mxu0 %v1599_v17 }
  0x56   : > { %1476 = vmatprep.subr.bf16.mxu0 %v1658_v21  ;;  %1451 = vmatpush3.bf16.msra.mxu1 %v1601_v19 }
  0x58   : > { %1004 = vmatmul.mubr.bf16.vlgmr.msra.gmra.mrb[4].mxu0 %v417_v18 }
  0x59   : > { %1477 = vmatpush3.bf16.msra.mxu0 %v1602_v20  ;;  %1492 = vmatprep.mubr.msk.bf16.mxu0 %vm1659_vm0, %v1658_v21 }
  0x5a   : > { %1044 = vmatmul.mubr.bf16.vlgmr.msra.gmra.mrb[4].mxu1 %v433_v22  ;;  %1478 = vmatprep.subr.bf16.mxu0 %v1658_v21 }
  0x5d   : > { %1479 = vmatpush3.bf16.msra.mxu0 %v1603_v23 }
  0x5e   : > { %1480 = vmatprep.subr.bf16.mxu0 %v1658_v21 }
  0x61   : > { %1481 = vmatpush3.bf16.msra.mxu0 %v1604_v24 }
  0x62   : > { %1482 = vmatprep.subr.bf16.mxu0 %v1658_v21 }
  0x65   : > { %1483 = vmatpush3.bf16.msra.mxu0 %v1605_v25 }
  0x66   : > { %1484 = vmatprep.subr.bf16.mxu0 %v1658_v21 }
  0x69   : > { %1485 = vmatpush3.bf16.msra.mxu0 %v1606_v26 }
  0x6a   : > { %1486 = vmatprep.subr.bf16.mxu0 %v1658_v21 }
  0x6d   : > { %1487 = vmatpush3.bf16.msra.mxu0 %v1607_v27 }
  0x6e   : > { %1488 = vmatprep.subr.bf16.mxu0 %v1658_v21 }
  0x71   : > { %1489 = vmatpush3.bf16.msra.mxu0 %v1608_v28 }
  0x72   : > { %1490 = vmatprep.subr.bf16.mxu0 %v1658_v21 }
  0x75   : > { %1491 = vmatpush3.bf16.msra.mxu0 %v1609_v29 }
  0x76   : > { %1496 = vmatprep.subr.bf16.mxu0 (!%p1355_p6), %v1660_v63 }
  0x78   : > { %1493 = vmatmul.mubr.bf16.vlgmr.msra.gmra.mrb[8].mxu0 %v449_v31 }
  0x79   : > { %1497 = vmatpush3.bf16.msra.mxu0 (!%p1355_p6), %v1610_v62  ;;  %1512 = vmatprep.mubr.msk.bf16.mxu0 (!%p1355_p6), %vm1661_vm1, %v1660_v63 }
  0x7a   : > { %1498 = vmatprep.subr.bf16.mxu0 (!%p1355_p6), %v1660_v63 }
  0x7d   : > { %1499 = vmatpush3.bf16.msra.mxu0 (!%p1355_p6), %v1611_v0 }
  0x7e   : > { %1500 = vmatprep.subr.bf16.mxu0 (!%p1355_p6), %v1660_v63 }
  0x81   : > { %1501 = vmatpush3.bf16.msra.mxu0 (!%p1355_p6), %v1612_v1 }
  0x82   : > { %1502 = vmatprep.subr.bf16.mxu0 (!%p1355_p6), %v1660_v63 }
  0x85   : > { %1503 = vmatpush3.bf16.msra.mxu0 (!%p1355_p6), %v1613_v2 }
  0x86   : > { %1504 = vmatprep.subr.bf16.mxu0 (!%p1355_p6), %v1660_v63 }
  0x89   : > { %1505 = vmatpush3.bf16.msra.mxu0 (!%p1355_p6), %v1614_v3 }
  0x8a   : > { %1506 = vmatprep.subr.bf16.mxu0 (!%p1355_p6), %v1660_v63 }
  0x8d   : > { %1507 = vmatpush3.bf16.msra.mxu0 (!%p1355_p6), %v1615_v4 }
  0x8e   : > { %1508 = vmatprep.subr.bf16.mxu0 (!%p1355_p6), %v1660_v63 }
  0x91   : > { %1509 = vmatpush3.bf16.msra.mxu0 (!%p1355_p6), %v1616_v8 }
  0x92   : > { %1510 = vmatprep.subr.bf16.mxu0 (!%p1355_p6), %v1660_v63 }
  0x95   : > { %1511 = vmatpush3.bf16.msra.mxu0 (!%p1355_p6), %v1617_v10 }
 0x10b   : > { %v1386_v32 = vpop.f32.mrb[0].mxu0 }
 0x10c   : > { %v1387_v33 = vpop.f32.mrb[1].mxu0  ;;  %v1408_v34 = vpop.f32.mrb[0].mxu1 }
 0x10d   : > { %v1388_v35 = vadd.f32 %v1387_v33, %v1386_v32  ;;  %v1389_v36 = vpop.f32.mrb[2].mxu0  ;;  %v1409_v37 = vpop.f32.mrb[1].mxu1 }
 0x10e   : > { %v1390_v38 = vpop.f32.mrb[3].mxu0  ;;  %v1410_v39 = vadd.f32 %v1409_v37, %v1408_v34  ;;  %v1411_v40 = vpop.f32.mrb[2].mxu1 }
 0x10f   : > { %v1412_v41 = vpop.f32.mrb[3].mxu1 }
 0x110   : > { %v966_v43 = vadd.f32 %v1410_v39, %v1388_v35 }
 0x12b   : > { %v1430_v44 = vpop.f32.mrb[4].mxu0 }
 0x12c   : > { %v1431_v45 = vpop.f32.mrb[5].mxu0 }
 0x12d   : > { %v1432_v46 = vadd.f32 %v1431_v45, %v1430_v44  ;;  %v1433_v47 = vpop.f32.mrb[6].mxu0  ;;  %v1452_v48 = vpop.f32.mrb[4].mxu1 }
 0x12e   : > { %v1434_v49 = vpop.f32.mrb[7].mxu0  ;;  %v1453_v42 = vpop.f32.mrb[5].mxu1 }
 0x12f   : > { %v1006_v50 = vadd.f32 %v1432_v46, %v966_v43  ;;  %v1454_v51 = vadd.f32 %v1453_v42, %v1452_v48  ;;  %v1455_v52 = vpop.f32.mrb[6].mxu1 }
 0x130   : > { %v1456_v53 = vpop.f32.mrb[7].mxu1 }
 0x131   : > { %v1046_v54 = vadd.f32 %v1454_v51, %v1006_v50 }
 0x14a   : > { %1096 = sbr.rel (%p1355_p6) target bundleno = 565 (0x235), region = 48 }
 0x14b   : > { %v1085_v56 = vpop.f32.mrb[8].mxu0 }
 0x14c   : > { %v1086_v57 = vadd.f32 %v1085_v56, %v1046_v54  ;;  %v1494_v58 = vpop.f32.mrb[9].mxu0 }
 0x14d   : > { %v1088_v59 = vpop.f32.mrb[10].mxu0 }
 0x14e   : > { %v1091_v60 = vadd.f32 %v1086_v57, %v238_v55  ;;  %v1495_v61 = vpop.f32.mrb[11].mxu0 }
 0x150   : > { %1092 = vst [vmem:[#allocation2] sm:$0x3] %v1091_v60 }
 0x157   : > { %v1097_v5 = vld [vmem:[#allocation2] sm:$0x3] }
 0x158   : > { %v1105_v7 = vadd.f32 %v1356_v6, %v1097_v5 }
 0x15a   : > { %v1106_v9 = vmax.f32 %v1105_v7, 0.0 }
 0x15c   : > { %v1107_v11 = vpack.c.bf16 %v1106_v9, %v1106_v9 }
 0x15e   : > { %1513 = vmatmul.mubr.bf16.vlgmr.msra.gmra.mrb[0].mxu0 %v1107_v11 }
 0x231   : > { %v1213_v13 = vpop.f32.mrb[0].mxu0 }
 0x232   : > { %v1214_v14 = vadd.f32 %v1357_v12, %v1213_v13  ;;  %v1514_v15 = vpop.f32.mrb[1].mxu0 }
 0x233   : > { %v1216_v16 = vpop.f32.mrb[2].mxu0 }
 0x234   : > { %1220 = vst.msk [vmem:[#allocation3] sm:$0x3] %vm1219_vm2, %v1214_v14  ;;  %v1515_v17 = vpop.f32.mrb[3].mxu0 }
 0x235 PF: > { %p1520_p7 = scmp.eq.s32.totalorder %s1699_s19, 7  ;;  %s1662_s26 = smov [#allocation3]  }
 0x236   : > { %s1228_s27 = sshll.u32 %s1662_s26, 4  ;;  %s1229_s27 = int_to_ptr.vmem [resolvable:$true] %s1228_s27 }
 0x237   : > { %s1618_s28 = scalar_lea.vmem %s1229_s27, 32  ;;  %p1625_p11 = scmp.lt.s32.totalorder %s1229_s27, %s1229_s27 }
 0x238   : > { %p1619_p8 = scmp.ne.s32.totalorder %s1229_s27, %s1618_s28  ;;  %p1626_p12 = scmp.lt.s32.totalorder %s1618_s28, %s1618_s28 }
 0x23a   : > { %p1620_p9 = pnand %p1619_p8, %p1520_p7  ;;  %p1627_p13 = por %p1626_p12, %p1625_p11 }
 0x23c   : > { %p1621_p10 = pneg %p1620_p9 }
 0x23e   : > { %p1628_p0 = pnand %p1627_p13, %p1621_p10 }
 0x240   : > { %1631 = shalt.err (!%p1628_p0)
}
 0x241   : > { %s1632_s6 = scalar_lea.hbm %s1866_s5, 32 }
 0x242   : > { %p1633_p1 = scmp.ne.s32.totalorder %s1866_s5, %s1632_s6  ;;  %p1638_p4 = scmp.lt.u32.totalorder %s1632_s6, %s1866_s5 }
 0x244   : > { %p1634_p2 = pnand %p1633_p1, %p1520_p7 }
 0x246   : > { %p1635_p3 = pneg %p1634_p2 }
 0x248   : > { %p1640_p5 = pnand %p1638_p4, %p1635_p3 }
 0x24a   : > { %1643 = shalt.err (!%p1640_p5)
}
 0x24b   : > { %1517 = dma.vmem_to_hbm [thread:$0]  (%p1520_p7), %s1229_s27, 32, %s1866_s5, [#allocation4]  }
 0x24c   : > { %1649 = dma.done.wait (%p1520_p7), [#allocation4], 32  }
 0x24d   : > { %1651 = vsyncadd (%p1520_p7), [#allocation4], 4294967264 }
 0x24e PF: > { %s16_s18 = sadd.s32 1, %s1654_s18  }
 0x24f   : > { %p13_p6 = scmp.ge.s32.totalorder %s16_s18, 10  }
 0x251   :  { %15 = sbr.rel (!%p13_p6) target bundleno = 1 (0x1), region = 78 }
 0x258   :  { %1241 = vsyncpa [#allocation4], 1 }
 0x259   :  { %1243 = vsyncpa [#allocation4 + $0x1], 1 }

// kernel: simple_cnn_forward.6
= control target key start
LH: loop header
LB: loop body
LE: loop exit
PB: predicated region body
PF: predicated region fallthrough
CT: control target
= control target key end

     0   :  { %s4155_s6 = smov 0   ;;  %s8012_s0 = inlined_call_operand.vmem [shape: f32[2,24,12,2,64], index: 0, kind: input, shape index: {}]   ;;  %s8013_s1 = inlined_call_operand.vmem [shape: bf16[2,12,12,64], index: 1, kind: output, shape index: {}]  }
   0x1 LB: > { %s3830_s7 = sadd.s32 4294967295, %s4143_s6   ;;  %p3834_p0 = scmp.ge.s32.totalorder %s4143_s6, 1  ;;  %s4143_s6 = sphi %s4155_s6, %s11_s6  }
   0x2   : > { %p87_p1 = scmp.lt.s32.totalorder %s4143_s6, 3 }
   0x4   : > { %p88_p2 = pnand %p3834_p0, %p87_p1 }
   0x6   : > { %91 = sbr.rel (%p88_p2) target bundleno = 818 (0x332), region = 24 }
   0xd   : > { %p107_p3 = scmp.lt.s32.totalorder %s3830_s7, 1  ;;  %vm405_vm0 = vcmask 517120   ;;  %vm2422_vm1 = vcmask 523264   ;;  %vm3575_vm2 = vcmask 1041409   ;;  %vm3577_vm3 = vcmask 1042434  }
   0xe   : > { %vm3579_vm4 = vcmask 1043459   ;;  %vm3581_vm5 = vcmask 1044484   ;;  %vm3583_vm6 = vcmask 1045509   ;;  %vm3585_vm7 = vcmask 1046534  }
   0xf   : > { %s9225_s7 = smov (!%p107_p3, %s3830_s7), 1  ;;  %vm3587_vm8 = vcmask 1047559   ;;  %vm3750_vm9 = vcmask 519168  }
  0x10   : > { %s4127_s8 = smul.u32 576, %s9225_s7 }
  0x11   : > { %s4128_s12 = smul.u32 96, %s9225_s7 }
  0x12   : > { %s4169_s11 = scalar_lea.vmem %s8012_s0, %s4127_s8 }
  0x13   : > { %v117_v0 = vld [vmem:[%s4169_s11] sm:$0x3]  ;;  %v118_v1 = vld [vmem:[%s4169_s11 + $0x2] sm:$0x3]  ;;  %v119_v2 = vld [vmem:[%s4169_s11 + $0x4] sm:$0x3]  ;;  %s7898_s15 = scalar_lea.vmem %s8013_s1, %s4128_s12 }
  0x14   : > { %v120_v3 = vld [vmem:[%s4169_s11 + $0x6] sm:$0x3]  ;;  %v121_v4 = vld [vmem:[%s4169_s11 + $0x8] sm:$0x3]  ;;  %v122_v5 = vld [vmem:[%s4169_s11 + $0xa] sm:$0x3] }
  0x15   : > { %v123_v6 = vld [vmem:[%s4169_s11 + $0xc] sm:$0x3]  ;;  %v124_v7 = vld [vmem:[%s4169_s11 + $0xe] sm:$0x3]  ;;  %v406_v8 = vsel %vm405_vm0, %v117_v0, -inf  ;;  %v413_v9 = vsel %vm405_vm0, %v118_v1, -inf }
  0x16   : > { %v420_v10 = vsel %vm405_vm0, %v119_v2, -inf  ;;  %v427_v11 = vsel %vm405_vm0, %v120_v3, -inf  ;;  %v407_v12 = vrot.slane %v406_v8, 4  ;;  %v414_v13 = vrot.slane %v413_v9, 4  ;;  %v125_v44 = vld [vmem:[%s4169_s11 + $0x10] sm:$0x3] }
  0x17   : > { %v421_v14 = vrot.slane %v420_v10, 4  ;;  %v428_v15 = vrot.slane %v427_v11, 4  ;;  %v434_v16 = vsel %vm405_vm0, %v121_v4, -inf  ;;  %v441_v17 = vsel %vm405_vm0, %v122_v5, -inf  ;;  %v126_v49 = vld [vmem:[%s4169_s11 + $0x12] sm:$0x3] }
  0x18   : > { %v448_v18 = vsel %vm405_vm0, %v123_v6, -inf  ;;  %v455_v19 = vsel %vm405_vm0, %v124_v7, -inf  ;;  %v408_v20 = vmax.f32 %v406_v8, %v407_v12  ;;  %v415_v21 = vmax.f32 %v413_v9, %v414_v13  ;;  %v127_v50 = vld [vmem:[%s4169_s11 + $0x14] sm:$0x3]  ;;  %v128_v51 = vld [vmem:[%s4169_s11 + $0x16] sm:$0x3] }
  0x19   : > { %v422_v22 = vmax.f32 %v420_v10, %v421_v14  ;;  %v429_v23 = vmax.f32 %v427_v11, %v428_v15  ;;  %v435_v24 = vrot.slane %v434_v16, 4  ;;  %v442_v25 = vrot.slane %v441_v17, 4  ;;  %v129_v56 = vld [vmem:[%s4169_s11 + $0x18] sm:$0x3]  ;;  %v130_v58 = vld [vmem:[%s4169_s11 + $0x1a] sm:$0x3] }
  0x1a   : > { %v449_v26 = vrot.slane %v448_v18, 4  ;;  %v456_v27 = vrot.slane %v455_v19, 4  ;;  %v409_v28 = vrot.slane %v408_v20, 2  ;;  %v416_v29 = vrot.slane %v415_v21, 2  ;;  %v131_v59 = vld [vmem:[%s4169_s11 + $0x1c] sm:$0x3] }
  0x1b   : > { %v423_v30 = vrot.slane %v422_v22, 2  ;;  %v430_v31 = vrot.slane %v429_v23, 2  ;;  %v436_v32 = vmax.f32 %v434_v16, %v435_v24  ;;  %v443_v33 = vmax.f32 %v441_v17, %v442_v25  ;;  %v132_v0 = vld [vmem:[%s4169_s11 + $0x1e] sm:$0x3] }
  0x1c   : > { %v450_v34 = vmax.f32 %v448_v18, %v449_v26  ;;  %v457_v35 = vmax.f32 %v455_v19, %v456_v27  ;;  %v410_v36 = vmax.f32 %v408_v20, %v409_v28  ;;  %v417_v37 = vmax.f32 %v415_v21, %v416_v29 }
  0x1d   : > { %v424_v38 = vmax.f32 %v422_v22, %v423_v30  ;;  %v431_v39 = vmax.f32 %v429_v23, %v430_v31  ;;  %v437_v40 = vrot.slane %v436_v32, 2  ;;  %v444_v41 = vrot.slane %v443_v33, 2 }
  0x1e   : > { %v451_v42 = vrot.slane %v450_v34, 2  ;;  %v458_v43 = vrot.slane %v457_v35, 2  ;;  %v411_v45 = vrot.slane %v410_v36, 1  ;;  %v418_v46 = vrot.slane %v417_v37, 1 }
  0x1f   : > { %v425_v47 = vrot.slane %v424_v38, 1  ;;  %v432_v48 = vrot.slane %v431_v39, 1  ;;  %v438_v52 = vmax.f32 %v436_v32, %v437_v40  ;;  %v4191_v53 = vmax.f32 %v443_v33, %v444_v41  ;;  %v133_v41 = vld [vmem:[%s4169_s11 + $0x20] sm:$0x3] }
  0x20   : > { %v4193_v54 = vmax.f32 %v450_v34, %v451_v42  ;;  %v4195_v55 = vmax.f32 %v457_v35, %v458_v43  ;;  %v4198_v57 = vmax.f32 %v410_v36, %v411_v45  ;;  %v4202_v60 = vmax.f32 %v417_v37, %v418_v46  ;;  %v134_v46 = vld [vmem:[%s4169_s11 + $0x22] sm:$0x3] }
  0x21   : > { %v4204_v61 = vmax.f32 %v424_v38, %v425_v47  ;;  %v4206_v62 = vmax.f32 %v431_v39, %v432_v48  ;;  %v439_v63 = vrot.slane %v438_v52, 1  ;;  %v462_v1 = vsel %vm405_vm0, %v125_v44, -inf  ;;  %v135_v47 = vld [vmem:[%s4169_s11 + $0x24] sm:$0x3]  ;;  %v136_v48 = vld [vmem:[%s4169_s11 + $0x26] sm:$0x3] }
  0x22   : > { %v469_v2 = vsel %vm405_vm0, %v126_v49, -inf  ;;  %v476_v3 = vsel %vm405_vm0, %v127_v50, -inf  ;;  %v483_v4 = vsel %vm405_vm0, %v128_v51, -inf  ;;  %v446_v6 = vrot.slane %v4191_v53, 1 }
  0x23   : > { %v4213_v5 = vmax.f32 %v438_v52, %v439_v63  ;;  %v453_v7 = vrot.slane %v4193_v54, 1  ;;  %v460_v8 = vrot.slane %v4195_v55, 1  ;;  %v463_v9 = vrot.slane %v462_v1, 4 }
  0x24   : > { %v470_v10 = vrot.slane %v469_v2, 4  ;;  %v477_v11 = vrot.slane %v476_v3, 4  ;;  %v484_v12 = vrot.slane %v483_v4, 4  ;;  %v490_v13 = vsel %vm405_vm0, %v129_v56, -inf  ;;  %v137_v56 = vld [vmem:[%s4169_s11 + $0x28] sm:$0x3] }
  0x25   : > { %v497_v14 = vsel %vm405_vm0, %v130_v58, -inf  ;;  %v504_v15 = vsel %vm405_vm0, %v131_v59, -inf  ;;  %v511_v16 = vsel %vm405_vm0, %v132_v0, -inf  ;;  %v464_v17 = vmax.f32 %v462_v1, %v463_v9  ;;  %v138_v1 = vld [vmem:[%s4169_s11 + $0x2a] sm:$0x3] }
  0x26   : > { %v471_v18 = vmax.f32 %v469_v2, %v470_v10  ;;  %v478_v19 = vmax.f32 %v476_v3, %v477_v11  ;;  %v485_v20 = vmax.f32 %v483_v4, %v484_v12  ;;  %v491_v21 = vrot.slane %v490_v13, 4  ;;  %v139_v2 = vld [vmem:[%s4169_s11 + $0x2c] sm:$0x3]  ;;  %v140_v11 = vld [vmem:[%s4169_s11 + $0x2e] sm:$0x3] }
  0x27   : > { %v498_v22 = vrot.slane %v497_v14, 4  ;;  %v505_v23 = vrot.slane %v504_v15, 4  ;;  %v512_v24 = vrot.slane %v511_v16, 4  ;;  %v465_v25 = vrot.slane %v464_v17, 2 }
  0x28   : > { %v472_v26 = vrot.slane %v471_v18, 2  ;;  %v479_v27 = vrot.slane %v478_v19, 2  ;;  %v486_v28 = vrot.slane %v485_v20, 2  ;;  %v492_v29 = vmax.f32 %v490_v13, %v491_v21 }
  0x29   : > { %v499_v30 = vmax.f32 %v497_v14, %v498_v22  ;;  %v506_v31 = vmax.f32 %v504_v15, %v505_v23  ;;  %v513_v32 = vmax.f32 %v511_v16, %v512_v24  ;;  %v466_v33 = vmax.f32 %v464_v17, %v465_v25 }
  0x2a   : > { %v473_v34 = vmax.f32 %v471_v18, %v472_v26  ;;  %v480_v35 = vmax.f32 %v478_v19, %v479_v27  ;;  %v487_v36 = vmax.f32 %v485_v20, %v486_v28  ;;  %v493_v37 = vrot.slane %v492_v29, 2 }
  0x2b   : > { %v500_v38 = vrot.slane %v499_v30, 2  ;;  %v507_v39 = vrot.slane %v506_v31, 2  ;;  %v514_v40 = vrot.slane %v513_v32, 2  ;;  %v467_v42 = vrot.slane %v466_v33, 1 }
  0x2c   : > { %v474_v43 = vrot.slane %v473_v34, 1  ;;  %v481_v44 = vrot.slane %v480_v35, 1  ;;  %v488_v45 = vrot.slane %v487_v36, 1  ;;  %v494_v49 = vmax.f32 %v492_v29, %v493_v37 }
  0x2d   : > { %v4226_v50 = vmax.f32 %v499_v30, %v500_v38  ;;  %v4228_v51 = vmax.f32 %v506_v31, %v507_v39  ;;  %v4230_v52 = vmax.f32 %v513_v32, %v514_v40  ;;  %v4234_v58 = vmax.f32 %v4191_v53, %v446_v6 }
  0x2e   : > { %v4237_v59 = vmax.f32 %v4193_v54, %v453_v7  ;;  %v4240_v63 = vmax.f32 %v4195_v55, %v460_v8  ;;  %v4242_v0 = vmax.f32 %v466_v33, %v467_v42  ;;  %v4246_v3 = vmax.f32 %v473_v34, %v474_v43 }
  0x2f   : > { %v4248_v4 = vmax.f32 %v480_v35, %v481_v44  ;;  %v4250_v9 = vmax.f32 %v487_v36, %v488_v45  ;;  %v495_v10 = vrot.slane %v494_v49, 1  ;;  %v518_v53 = vsel %vm405_vm0, %v133_v41, -inf }
  0x30   : > { %v525_v54 = vsel %vm405_vm0, %v134_v46, -inf  ;;  %v532_v6 = vsel %vm405_vm0, %v135_v47, -inf  ;;  %v539_v55 = vsel %vm405_vm0, %v136_v48, -inf  ;;  %v502_v8 = vrot.slane %v4226_v50, 1  ;;  %v141_v46 = vld [vmem:[%s4169_s11 + $0x30] sm:$0x3] }
  0x31   : > { %8115 = vst [vmem:[#allocation2_spill] sm:$0xff] %v4250_v9  ;;  %v4257_v7 = vmax.f32 %v494_v49, %v495_v10  ;;  %v509_v12 = vrot.slane %v4228_v51, 1  ;;  %v516_v13 = vrot.slane %v4230_v52, 1  ;;  %v519_v14 = vrot.slane %v518_v53, 4  ;;  %v144_v10 = vld [vmem:[%s4169_s11 + $0x36] sm:$0x3] }
  0x32   : > { %v526_v15 = vrot.slane %v525_v54, 4  ;;  %v533_v16 = vrot.slane %v532_v6, 4  ;;  %v540_v17 = vrot.slane %v539_v55, 4  ;;  %v546_v18 = vsel %vm405_vm0, %v137_v56, -inf }
  0x33   : > { %v553_v19 = vsel %vm405_vm0, %v138_v1, -inf  ;;  %v560_v20 = vsel %vm405_vm0, %v139_v2, -inf  ;;  %v567_v21 = vsel %vm405_vm0, %v140_v11, -inf  ;;  %v520_v22 = vmax.f32 %v518_v53, %v519_v14  ;;  %v142_v1 = vld [vmem:[%s4169_s11 + $0x32] sm:$0x3] }
  0x34   : > { %v527_v23 = vmax.f32 %v525_v54, %v526_v15  ;;  %v534_v24 = vmax.f32 %v532_v6, %v533_v16  ;;  %v541_v25 = vmax.f32 %v539_v55, %v540_v17  ;;  %v547_v26 = vrot.slane %v546_v18, 4  ;;  %v143_v2 = vld [vmem:[%s4169_s11 + $0x34] sm:$0x3]  ;;  %v145_v55 = vld [vmem:[%s4169_s11 + $0x38] sm:$0x3] }
  0x35   : > { %v554_v27 = vrot.slane %v553_v19, 4  ;;  %v561_v28 = vrot.slane %v560_v20, 4  ;;  %v568_v29 = vrot.slane %v567_v21, 4  ;;  %v521_v30 = vrot.slane %v520_v22, 2 }
  0x36   : > { %v528_v31 = vrot.slane %v527_v23, 2  ;;  %v535_v32 = vrot.slane %v534_v24, 2  ;;  %v542_v33 = vrot.slane %v541_v25, 2  ;;  %v548_v34 = vmax.f32 %v546_v18, %v547_v26  ;;  %v146_v18 = vld [vmem:[%s4169_s11 + $0x3a] sm:$0x3] }
  0x37   : > { %v555_v35 = vmax.f32 %v553_v19, %v554_v27  ;;  %v562_v36 = vmax.f32 %v560_v20, %v561_v28  ;;  %v569_v37 = vmax.f32 %v567_v21, %v568_v29  ;;  %v522_v38 = vmax.f32 %v520_v22, %v521_v30  ;;  %v147_v19 = vld [vmem:[%s4169_s11 + $0x3c] sm:$0x3] }
  0x38   : > { %v529_v39 = vmax.f32 %v527_v23, %v528_v31  ;;  %v536_v40 = vmax.f32 %v534_v24, %v535_v32  ;;  %v543_v41 = vmax.f32 %v541_v25, %v542_v33  ;;  %v549_v42 = vrot.slane %v548_v34, 2  ;;  %v148_v24 = vld [vmem:[%s4169_s11 + $0x3e] sm:$0x3] }
  0x39   : > { %v556_v43 = vrot.slane %v555_v35, 2  ;;  %v563_v44 = vrot.slane %v562_v36, 2  ;;  %v570_v45 = vrot.slane %v569_v37, 2  ;;  %v523_v47 = vrot.slane %v522_v38, 1 }
  0x3a   : > { %v530_v48 = vrot.slane %v529_v39, 1  ;;  %v537_v49 = vrot.slane %v536_v40, 1  ;;  %v544_v56 = vrot.slane %v543_v41, 1  ;;  %v550_v11 = vmax.f32 %v548_v34, %v549_v42 }
  0x3b   : > { %v4270_v53 = vmax.f32 %v555_v35, %v556_v43  ;;  %v4272_v54 = vmax.f32 %v562_v36, %v563_v44  ;;  %v4274_v6 = vmax.f32 %v569_v37, %v570_v45  ;;  %v4278_v14 = vmax.f32 %v4226_v50, %v502_v8 }
  0x3c   : > { %v4281_v15 = vmax.f32 %v4228_v51, %v509_v12  ;;  %v4284_v16 = vmax.f32 %v4230_v52, %v516_v13  ;;  %v4286_v17 = vmax.f32 %v522_v38, %v523_v47  ;;  %v4290_v20 = vmax.f32 %v529_v39, %v530_v48 }
  0x3d   : > { %v4292_v21 = vmax.f32 %v536_v40, %v537_v49  ;;  %v4294_v22 = vmax.f32 %v543_v41, %v544_v56  ;;  %v551_v23 = vrot.slane %v550_v11, 1  ;;  %v574_v50 = vsel %vm405_vm0, %v141_v46, -inf }
  0x3e   : > { %v581_v51 = vsel %vm405_vm0, %v142_v1, -inf  ;;  %v588_v8 = vsel %vm405_vm0, %v143_v2, -inf  ;;  %v595_v52 = vsel %vm405_vm0, %v144_v10, -inf  ;;  %v558_v13 = vrot.slane %v4270_v53, 1 }
  0x3f   : > { %v4301_v12 = vmax.f32 %v550_v11, %v551_v23  ;;  %v565_v25 = vrot.slane %v4272_v54, 1  ;;  %v572_v26 = vrot.slane %v4274_v6, 1  ;;  %v575_v27 = vrot.slane %v574_v50, 4 }
  0x40   : > { %v582_v28 = vrot.slane %v581_v51, 4  ;;  %v589_v29 = vrot.slane %v588_v8, 4  ;;  %v596_v30 = vrot.slane %v595_v52, 4  ;;  %v602_v31 = vsel %vm405_vm0, %v145_v55, -inf }
  0x41   : > { %v609_v32 = vsel %vm405_vm0, %v146_v18, -inf  ;;  %v616_v33 = vsel %vm405_vm0, %v147_v19, -inf  ;;  %v623_v34 = vsel %vm405_vm0, %v148_v24, -inf  ;;  %v576_v35 = vmax.f32 %v574_v50, %v575_v27  ;;  %v149_v24 = vld [vmem:[%s4169_s11 + $0x40] sm:$0x3] }
  0x42   : > { %v583_v36 = vmax.f32 %v581_v51, %v582_v28  ;;  %v590_v37 = vmax.f32 %v588_v8, %v589_v29  ;;  %v597_v38 = vmax.f32 %v595_v52, %v596_v30  ;;  %v603_v39 = vrot.slane %v602_v31, 4  ;;  %v150_v27 = vld [vmem:[%s4169_s11 + $0x42] sm:$0x3]  ;;  %v151_v28 = vld [vmem:[%s4169_s11 + $0x44] sm:$0x3] }
  0x43   : > { %v610_v40 = vrot.slane %v609_v32, 4  ;;  %v617_v41 = vrot.slane %v616_v33, 4  ;;  %v624_v42 = vrot.slane %v623_v34, 4  ;;  %v577_v43 = vrot.slane %v576_v35, 2  ;;  %v152_v29 = vld [vmem:[%s4169_s11 + $0x46] sm:$0x3] }
  0x44   : > { %v584_v44 = vrot.slane %v583_v36, 2  ;;  %v591_v45 = vrot.slane %v590_v37, 2  ;;  %v598_v46 = vrot.slane %v597_v38, 2  ;;  %v604_v47 = vmax.f32 %v602_v31, %v603_v39  ;;  %v154_v39 = vld [vmem:[%s4169_s11 + $0x4a] sm:$0x3] }
  0x45   : > { %v611_v48 = vmax.f32 %v609_v32, %v610_v40  ;;  %v618_v49 = vmax.f32 %v616_v33, %v617_v41  ;;  %v625_v56 = vmax.f32 %v623_v34, %v624_v42  ;;  %v578_v1 = vmax.f32 %v576_v35, %v577_v43  ;;  %v153_v34 = vld [vmem:[%s4169_s11 + $0x48] sm:$0x3]  ;;  %v155_v40 = vld [vmem:[%s4169_s11 + $0x4c] sm:$0x3] }
  0x46   : > { %v585_v2 = vmax.f32 %v583_v36, %v584_v44  ;;  %v592_v10 = vmax.f32 %v590_v37, %v591_v45  ;;  %v599_v11 = vmax.f32 %v597_v38, %v598_v46  ;;  %v605_v55 = vrot.slane %v604_v47, 2  ;;  %v156_v45 = vld [vmem:[%s4169_s11 + $0x4e] sm:$0x3] }
  0x47   : > { %v612_v18 = vrot.slane %v611_v48, 2  ;;  %v619_v19 = vrot.slane %v618_v49, 2  ;;  %v626_v23 = vrot.slane %v625_v56, 2  ;;  %v579_v50 = vrot.slane %v578_v1, 1 }
  0x48   : > { %v586_v51 = vrot.slane %v585_v2, 1  ;;  %v593_v8 = vrot.slane %v592_v10, 1  ;;  %v600_v52 = vrot.slane %v599_v11, 1  ;;  %v606_v30 = vmax.f32 %v604_v47, %v605_v55 }
  0x49   : > { %v4314_v31 = vmax.f32 %v611_v48, %v612_v18  ;;  %v4316_v32 = vmax.f32 %v618_v49, %v619_v19  ;;  %v4318_v33 = vmax.f32 %v625_v56, %v626_v23  ;;  %v4322_v35 = vmax.f32 %v4270_v53, %v558_v13 }
  0x4a   : > { %v4325_v36 = vmax.f32 %v4272_v54, %v565_v25  ;;  %v4328_v37 = vmax.f32 %v4274_v6, %v572_v26  ;;  %v4330_v38 = vmax.f32 %v578_v1, %v579_v50  ;;  %v4334_v41 = vmax.f32 %v585_v2, %v586_v51 }
  0x4b   : > { %v4336_v42 = vmax.f32 %v592_v10, %v593_v8  ;;  %v4338_v43 = vmax.f32 %v599_v11, %v600_v52  ;;  %v607_v44 = vrot.slane %v606_v30, 1  ;;  %v630_v53 = vsel %vm405_vm0, %v149_v24, -inf }
  0x4c   : > { %8116 = vst [vmem:[#allocation3_spill] sm:$0xff] %v4328_v37  ;;  %8117 = vst [vmem:[#allocation4_spill] sm:$0xff] %v4330_v38  ;;  %v637_v54 = vsel %vm405_vm0, %v150_v27, -inf  ;;  %v644_v13 = vsel %vm405_vm0, %v151_v28, -inf  ;;  %v651_v6 = vsel %vm405_vm0, %v152_v29, -inf  ;;  %v614_v26 = vrot.slane %v4314_v31, 1 }
  0x4d   : > { %8118 = vst [vmem:[#allocation5_spill] sm:$0xff] %v4334_v41  ;;  %8119 = vst [vmem:[#allocation6_spill] sm:$0xff] %v4336_v42  ;;  %v4345_v25 = vmax.f32 %v606_v30, %v607_v44  ;;  %v621_v46 = vrot.slane %v4316_v32, 1  ;;  %v628_v47 = vrot.slane %v4318_v33, 1  ;;  %v631_v48 = vrot.slane %v630_v53, 4 }
  0x4e   : > { %8120 = vst [vmem:[#allocation7_spill] sm:$0xff] %v4338_v43  ;;  %v638_v49 = vrot.slane %v637_v54, 4  ;;  %v645_v56 = vrot.slane %v644_v13, 4  ;;  %v652_v1 = vrot.slane %v651_v6, 4  ;;  %v658_v2 = vsel %vm405_vm0, %v153_v34, -inf }
  0x4f   : > { %8121 = vst [vmem:[#allocation8_spill] sm:$0xff] %v4345_v25  ;;  %v665_v10 = vsel %vm405_vm0, %v154_v39, -inf  ;;  %v672_v11 = vsel %vm405_vm0, %v155_v40, -inf  ;;  %v679_v55 = vsel %vm405_vm0, %v156_v45, -inf  ;;  %v632_v18 = vmax.f32 %v630_v53, %v631_v48 }
  0x50   : > { %v639_v19 = vmax.f32 %v637_v54, %v638_v49  ;;  %v646_v23 = vmax.f32 %v644_v13, %v645_v56  ;;  %v653_v24 = vmax.f32 %v651_v6, %v652_v1  ;;  %v659_v50 = vrot.slane %v658_v2, 4  ;;  %v157_v1 = vld [vmem:[%s4169_s11 + $0x50] sm:$0x3] }
  0x51   : > { %v666_v51 = vrot.slane %v665_v10, 4  ;;  %v673_v8 = vrot.slane %v672_v11, 4  ;;  %v680_v52 = vrot.slane %v679_v55, 4  ;;  %v633_v27 = vrot.slane %v632_v18, 2 }
  0x52   : > { %v640_v28 = vrot.slane %v639_v19, 2  ;;  %v647_v29 = vrot.slane %v646_v23, 2  ;;  %v654_v30 = vrot.slane %v653_v24, 2  ;;  %v660_v34 = vmax.f32 %v658_v2, %v659_v50  ;;  %v159_v50 = vld [vmem:[%s4169_s11 + $0x54] sm:$0x3] }
  0x53   : > { %v667_v44 = vmax.f32 %v665_v10, %v666_v51  ;;  %v674_v39 = vmax.f32 %v672_v11, %v673_v8  ;;  %v681_v40 = vmax.f32 %v679_v55, %v680_v52  ;;  %v634_v45 = vmax.f32 %v632_v18, %v633_v27  ;;  %v158_v11 = vld [vmem:[%s4169_s11 + $0x52] sm:$0x3]  ;;  %v160_v55 = vld [vmem:[%s4169_s11 + $0x56] sm:$0x3]  ;;  %v161_v51 = vld [vmem:[%s4169_s11 + $0x58] sm:$0x3] }
  0x54   : > { %v641_v53 = vmax.f32 %v639_v19, %v640_v28  ;;  %v648_v54 = vmax.f32 %v646_v23, %v647_v29  ;;  %v655_v13 = vmax.f32 %v653_v24, %v654_v30  ;;  %v661_v6 = vrot.slane %v660_v34, 2  ;;  %v162_v29 = vld [vmem:[%s4169_s11 + $0x5a] sm:$0x3]  ;;  %v163_v30 = vld [vmem:[%s4169_s11 + $0x5c] sm:$0x3] }
  0x55   : > { %v668_v48 = vrot.slane %v667_v44, 2  ;;  %v675_v49 = vrot.slane %v674_v39, 2  ;;  %v682_v56 = vrot.slane %v681_v40, 2  ;;  %v635_v25 = vrot.slane %v634_v45, 1 }
  0x56   : > { %v642_v43 = vrot.slane %v641_v53, 1  ;;  %v649_v2 = vrot.slane %v648_v54, 1  ;;  %v656_v10 = vrot.slane %v655_v13, 1  ;;  %v662_v18 = vmax.f32 %v660_v34, %v661_v6  ;;  %v164_v6 = vld [vmem:[%s4169_s11 + $0x5e] sm:$0x3] }
  0x57   : > { %v4358_v19 = vmax.f32 %v667_v44, %v668_v48  ;;  %v4360_v23 = vmax.f32 %v674_v39, %v675_v49  ;;  %v4362_v24 = vmax.f32 %v681_v40, %v682_v56  ;;  %v4366_v8 = vmax.f32 %v4314_v31, %v614_v26 }
  0x58   : > { %v4369_v52 = vmax.f32 %v4316_v32, %v621_v46  ;;  %v4372_v27 = vmax.f32 %v4318_v33, %v628_v47  ;;  %v4374_v28 = vmax.f32 %v634_v45, %v635_v25  ;;  %v4378_v34 = vmax.f32 %v641_v53, %v642_v43 }
  0x59   : > { %8122 = vst [vmem:[#allocation9_spill] sm:$0xff] %v4366_v8  ;;  %v4380_v44 = vmax.f32 %v648_v54, %v649_v2  ;;  %v4382_v39 = vmax.f32 %v655_v13, %v656_v10  ;;  %v663_v40 = vrot.slane %v662_v18, 1  ;;  %v686_v31 = vsel %vm405_vm0, %v157_v1, -inf }
  0x5a   : > { %8123 = vst [vmem:[#allocation10_spill] sm:$0xff] %v4369_v52  ;;  %8124 = vst [vmem:[#allocation11_spill] sm:$0xff] %v4372_v27  ;;  %v693_v32 = vsel %vm405_vm0, %v158_v11, -inf  ;;  %v700_v26 = vsel %vm405_vm0, %v159_v50, -inf  ;;  %v707_v33 = vsel %vm405_vm0, %v160_v55, -inf  ;;  %v670_v46 = vrot.slane %v4358_v19, 1 }
  0x5b   : > { %8125 = vst [vmem:[#allocation12_spill] sm:$0xff] %v4374_v28  ;;  %8126 = vst [vmem:[#allocation13_spill] sm:$0xff] %v4378_v34  ;;  %v4389_v25 = vmax.f32 %v662_v18, %v663_v40  ;;  %v677_v43 = vrot.slane %v4360_v23, 1  ;;  %v684_v47 = vrot.slane %v4362_v24, 1  ;;  %v687_v45 = vrot.slane %v686_v31, 4 }
  0x5c   : > { %8127 = vst [vmem:[#allocation14_spill] sm:$0xff] %v4380_v44  ;;  %8128 = vst [vmem:[#allocation15_spill] sm:$0xff] %v4382_v39  ;;  %v694_v53 = vrot.slane %v693_v32, 4  ;;  %v701_v54 = vrot.slane %v700_v26, 4  ;;  %v708_v13 = vrot.slane %v707_v33, 4  ;;  %v714_v48 = vsel %vm405_vm0, %v161_v51, -inf }
  0x5d   : > { %8129 = vst [vmem:[#allocation16_spill] sm:$0xff] %v4389_v25  ;;  %v721_v49 = vsel %vm405_vm0, %v162_v29, -inf  ;;  %v728_v56 = vsel %vm405_vm0, %v163_v30, -inf  ;;  %v735_v1 = vsel %vm405_vm0, %v164_v6, -inf  ;;  %v688_v2 = vmax.f32 %v686_v31, %v687_v45 }
  0x5e   : > { %v695_v10 = vmax.f32 %v693_v32, %v694_v53  ;;  %v702_v11 = vmax.f32 %v700_v26, %v701_v54  ;;  %v709_v50 = vmax.f32 %v707_v33, %v708_v13  ;;  %v715_v55 = vrot.slane %v714_v48, 4  ;;  %v165_v13 = vld [vmem:[%s4169_s11 + $0x60] sm:$0x3] }
  0x5f   : > { %v722_v18 = vrot.slane %v721_v49, 4  ;;  %v729_v40 = vrot.slane %v728_v56, 4  ;;  %v736_v39 = vrot.slane %v735_v1, 4  ;;  %v689_v44 = vrot.slane %v688_v2, 2 }
  0x60   : > { %v696_v34 = vrot.slane %v695_v10, 2  ;;  %v703_v28 = vrot.slane %v702_v11, 2  ;;  %v710_v27 = vrot.slane %v709_v50, 2  ;;  %v716_v51 = vmax.f32 %v714_v48, %v715_v55  ;;  %v167_v55 = vld [vmem:[%s4169_s11 + $0x64] sm:$0x3] }
  0x61   : > { %v723_v52 = vmax.f32 %v721_v49, %v722_v18  ;;  %v730_v29 = vmax.f32 %v728_v56, %v729_v40  ;;  %v737_v30 = vmax.f32 %v735_v1, %v736_v39  ;;  %v690_v6 = vmax.f32 %v688_v2, %v689_v44  ;;  %v166_v56 = vld [vmem:[%s4169_s11 + $0x62] sm:$0x3]  ;;  %v168_v39 = vld [vmem:[%s4169_s11 + $0x66] sm:$0x3]  ;;  %v169_v1 = vld [vmem:[%s4169_s11 + $0x68] sm:$0x3] }
  0x62   : > { %v697_v31 = vmax.f32 %v695_v10, %v696_v34  ;;  %v704_v32 = vmax.f32 %v702_v11, %v703_v28  ;;  %v711_v26 = vmax.f32 %v709_v50, %v710_v27  ;;  %v717_v33 = vrot.slane %v716_v51, 2  ;;  %v170_v18 = vld [vmem:[%s4169_s11 + $0x6a] sm:$0x3]  ;;  %v171_v40 = vld [vmem:[%s4169_s11 + $0x6c] sm:$0x3] }
  0x63   : > { %v724_v45 = vrot.slane %v723_v52, 2  ;;  %v731_v53 = vrot.slane %v730_v29, 2  ;;  %v738_v54 = vrot.slane %v737_v30, 2  ;;  %v691_v8 = vrot.slane %v690_v6, 1 }
  0x64   : > { %v698_v42 = vrot.slane %v697_v31, 1  ;;  %v705_v48 = vrot.slane %v704_v32, 1  ;;  %v712_v49 = vrot.slane %v711_v26, 1  ;;  %v718_v44 = vmax.f32 %v716_v51, %v717_v33  ;;  %v172_v33 = vld [vmem:[%s4169_s11 + $0x6e] sm:$0x3] }
  0x65   : > { %v4402_v34 = vmax.f32 %v723_v52, %v724_v45  ;;  %v4404_v27 = vmax.f32 %v730_v29, %v731_v53  ;;  %v4406_v28 = vmax.f32 %v737_v30, %v738_v54  ;;  %v4410_v2 = vmax.f32 %v4358_v19, %v670_v46 }
  0x66   : > { %v4413_v10 = vmax.f32 %v4360_v23, %v677_v43  ;;  %v4416_v11 = vmax.f32 %v4362_v24, %v684_v47  ;;  %v4418_v50 = vmax.f32 %v690_v6, %v691_v8  ;;  %v4422_v52 = vmax.f32 %v697_v31, %v698_v42 }
  0x67   : > { %8130 = vst [vmem:[#allocation17_spill] sm:$0xff] %v4410_v2  ;;  %v4424_v51 = vmax.f32 %v704_v32, %v705_v48  ;;  %v4426_v29 = vmax.f32 %v711_v26, %v712_v49  ;;  %v719_v30 = vrot.slane %v718_v44, 1  ;;  %v742_v19 = vsel %vm405_vm0, %v165_v13, -inf }
  0x68   : > { %8131 = vst [vmem:[#allocation18_spill] sm:$0xff] %v4413_v10  ;;  %8132 = vst [vmem:[#allocation19_spill] sm:$0xff] %v4416_v11  ;;  %v749_v23 = vsel %vm405_vm0, %v166_v56, -inf  ;;  %v756_v46 = vsel %vm405_vm0, %v167_v55, -inf  ;;  %v763_v24 = vsel %vm405_vm0, %v168_v39, -inf  ;;  %v726_v43 = vrot.slane %v4402_v34, 1 }
  0x69   : > { %8133 = vst [vmem:[#allocation20_spill] sm:$0xff] %v4418_v50  ;;  %8134 = vst [vmem:[#allocation21_spill] sm:$0xff] %v4422_v52  ;;  %v4433_v8 = vmax.f32 %v718_v44, %v719_v30  ;;  %v733_v42 = vrot.slane %v4404_v27, 1  ;;  %v740_v47 = vrot.slane %v4406_v28, 1  ;;  %v743_v6 = vrot.slane %v742_v19, 4 }
  0x6a   : > { %8135 = vst [vmem:[#allocation22_spill] sm:$0xff] %v4424_v51  ;;  %8136 = vst [vmem:[#allocation23_spill] sm:$0xff] %v4426_v29  ;;  %v750_v31 = vrot.slane %v749_v23, 4  ;;  %v757_v32 = vrot.slane %v756_v46, 4  ;;  %v764_v26 = vrot.slane %v763_v24, 4  ;;  %v770_v45 = vsel %vm405_vm0, %v169_v1, -inf }
  0x6b   : > { %8137 = vst [vmem:[#allocation24_spill] sm:$0xff] %v4433_v8  ;;  %v777_v53 = vsel %vm405_vm0, %v170_v18, -inf  ;;  %v784_v54 = vsel %vm405_vm0, %v171_v40, -inf  ;;  %v791_v13 = vsel %vm405_vm0, %v172_v33, -inf  ;;  %v744_v48 = vmax.f32 %v742_v19, %v743_v6 }
  0x6c   : > { %v751_v49 = vmax.f32 %v749_v23, %v750_v31  ;;  %v758_v56 = vmax.f32 %v756_v46, %v757_v32  ;;  %v765_v55 = vmax.f32 %v763_v24, %v764_v26  ;;  %v771_v39 = vrot.slane %v770_v45, 4  ;;  %v173_v26 = vld [vmem:[%s4169_s11 + $0x70] sm:$0x3] }
  0x6d   : > { %v778_v44 = vrot.slane %v777_v53, 4  ;;  %v785_v30 = vrot.slane %v784_v54, 4  ;;  %v792_v8 = vrot.slane %v791_v13, 4  ;;  %v745_v29 = vrot.slane %v744_v48, 2 }
  0x6e   : > { %v752_v51 = vrot.slane %v751_v49, 2  ;;  %v759_v52 = vrot.slane %v758_v56, 2  ;;  %v766_v50 = vrot.slane %v765_v55, 2  ;;  %v772_v1 = vmax.f32 %v770_v45, %v771_v39  ;;  %v175_v39 = vld [vmem:[%s4169_s11 + $0x74] sm:$0x3] }
  0x6f   : > { %v779_v11 = vmax.f32 %v777_v53, %v778_v44  ;;  %v786_v18 = vmax.f32 %v784_v54, %v785_v30  ;;  %v793_v40 = vmax.f32 %v791_v13, %v792_v8  ;;  %v746_v33 = vmax.f32 %v744_v48, %v745_v29  ;;  %v174_v54 = vld [vmem:[%s4169_s11 + $0x72] sm:$0x3]  ;;  %v176_v8 = vld [vmem:[%s4169_s11 + $0x76] sm:$0x3]  ;;  %v177_v13 = vld [vmem:[%s4169_s11 + $0x78] sm:$0x3] }
  0x70   : > { %v753_v19 = vmax.f32 %v751_v49, %v752_v51  ;;  %v760_v23 = vmax.f32 %v758_v56, %v759_v52  ;;  %v767_v46 = vmax.f32 %v765_v55, %v766_v50  ;;  %v773_v24 = vrot.slane %v772_v1, 2  ;;  %v178_v44 = vld [vmem:[%s4169_s11 + $0x7a] sm:$0x3]  ;;  %v179_v30 = vld [vmem:[%s4169_s11 + $0x7c] sm:$0x3] }
  0x71   : > { %v780_v6 = vrot.slane %v779_v11, 2  ;;  %v787_v31 = vrot.slane %v786_v18, 2  ;;  %v794_v32 = vrot.slane %v793_v40, 2  ;;  %v747_v10 = vrot.slane %v746_v33, 1 }
  0x72   : > { %v754_v2 = vrot.slane %v753_v19, 1  ;;  %v761_v45 = vrot.slane %v760_v23, 1  ;;  %v768_v53 = vrot.slane %v767_v46, 1  ;;  %v774_v29 = vmax.f32 %v772_v1, %v773_v24  ;;  %v180_v24 = vld [vmem:[%s4169_s11 + $0x7e] sm:$0x3] }
  0x73   : > { %v4446_v51 = vmax.f32 %v779_v11, %v780_v6  ;;  %v4448_v50 = vmax.f32 %v786_v18, %v787_v31  ;;  %v4450_v52 = vmax.f32 %v793_v40, %v794_v32  ;;  %v4454_v48 = vmax.f32 %v4402_v34, %v726_v43 }
  0x74   : > { %v4457_v49 = vmax.f32 %v4404_v27, %v733_v42  ;;  %v4460_v56 = vmax.f32 %v4406_v28, %v740_v47  ;;  %v4462_v55 = vmax.f32 %v746_v33, %v747_v10  ;;  %v4466_v11 = vmax.f32 %v753_v19, %v754_v2 }
  0x75   : > { %8138 = vst [vmem:[#allocation25_spill] sm:$0xff] %v4454_v48  ;;  %v4468_v1 = vmax.f32 %v760_v23, %v761_v45  ;;  %v4470_v18 = vmax.f32 %v767_v46, %v768_v53  ;;  %v775_v40 = vrot.slane %v774_v29, 1  ;;  %v798_v34 = vsel %vm405_vm0, %v173_v26, -inf }
  0x76   : > { %8139 = vst [vmem:[#allocation26_spill] sm:$0xff] %v4457_v49  ;;  %8140 = vst [vmem:[#allocation27_spill] sm:$0xff] %v4460_v56  ;;  %v805_v27 = vsel %vm405_vm0, %v174_v54, -inf  ;;  %v812_v43 = vsel %vm405_vm0, %v175_v39, -inf  ;;  %v819_v28 = vsel %vm405_vm0, %v176_v8, -inf  ;;  %v782_v42 = vrot.slane %v4446_v51, 1 }
  0x77   : > { %8141 = vst [vmem:[#allocation28_spill] sm:$0xff] %v4462_v55  ;;  %8142 = vst [vmem:[#allocation29_spill] sm:$0xff] %v4466_v11  ;;  %v4477_v10 = vmax.f32 %v774_v29, %v775_v40  ;;  %v789_v2 = vrot.slane %v4448_v50, 1  ;;  %v796_v47 = vrot.slane %v4450_v52, 1  ;;  %v799_v33 = vrot.slane %v798_v34, 4 }
  0x78   : > { %8143 = vst [vmem:[#allocation30_spill] sm:$0xff] %v4468_v1  ;;  %8144 = vst [vmem:[#allocation31_spill] sm:$0xff] %v4470_v18  ;;  %v806_v19 = vrot.slane %v805_v27, 4  ;;  %v813_v23 = vrot.slane %v812_v43, 4  ;;  %v820_v46 = vrot.slane %v819_v28, 4  ;;  %v826_v6 = vsel %vm405_vm0, %v177_v13, -inf }
  0x79   : > { %8145 = vst [vmem:[#allocation32_spill] sm:$0xff] %v4477_v10  ;;  %v833_v31 = vsel %vm405_vm0, %v178_v44, -inf  ;;  %v840_v32 = vsel %vm405_vm0, %v179_v30, -inf  ;;  %v847_v26 = vsel %vm405_vm0, %v180_v24, -inf  ;;  %v800_v45 = vmax.f32 %v798_v34, %v799_v33 }
  0x7a   : > { %v807_v53 = vmax.f32 %v805_v27, %v806_v19  ;;  %v814_v54 = vmax.f32 %v812_v43, %v813_v23  ;;  %v821_v39 = vmax.f32 %v819_v28, %v820_v46  ;;  %v827_v8 = vrot.slane %v826_v6, 4  ;;  %v181_v46 = vld [vmem:[%s4169_s11 + $0x80] sm:$0x3] }
  0x7b   : > { %v834_v29 = vrot.slane %v833_v31, 4  ;;  %v841_v40 = vrot.slane %v840_v32, 4  ;;  %v848_v10 = vrot.slane %v847_v26, 4  ;;  %v801_v18 = vrot.slane %v800_v45, 2 }
  0x7c   : > { %v808_v1 = vrot.slane %v807_v53, 2  ;;  %v815_v11 = vrot.slane %v814_v54, 2  ;;  %v822_v55 = vrot.slane %v821_v39, 2  ;;  %v828_v13 = vmax.f32 %v826_v6, %v827_v8  ;;  %v183_v8 = vld [vmem:[%s4169_s11 + $0x84] sm:$0x3] }
  0x7d   : > { %v835_v56 = vmax.f32 %v833_v31, %v834_v29  ;;  %v842_v44 = vmax.f32 %v840_v32, %v841_v40  ;;  %v849_v30 = vmax.f32 %v847_v26, %v848_v10  ;;  %v802_v24 = vmax.f32 %v800_v45, %v801_v18  ;;  %v182_v32 = vld [vmem:[%s4169_s11 + $0x82] sm:$0x3]  ;;  %v184_v10 = vld [vmem:[%s4169_s11 + $0x86] sm:$0x3]  ;;  %v185_v26 = vld [vmem:[%s4169_s11 + $0x88] sm:$0x3] }
  0x7e   : > { %v809_v34 = vmax.f32 %v807_v53, %v808_v1  ;;  %v816_v27 = vmax.f32 %v814_v54, %v815_v11  ;;  %v823_v43 = vmax.f32 %v821_v39, %v822_v55  ;;  %v829_v28 = vrot.slane %v828_v13, 2  ;;  %v186_v29 = vld [vmem:[%s4169_s11 + $0x8a] sm:$0x3]  ;;  %v187_v40 = vld [vmem:[%s4169_s11 + $0x8c] sm:$0x3] }
  0x7f   : > { %v836_v33 = vrot.slane %v835_v56, 2  ;;  %v843_v19 = vrot.slane %v842_v44, 2  ;;  %v850_v23 = vrot.slane %v849_v30, 2  ;;  %v803_v49 = vrot.slane %v802_v24, 1 }
  0x80   : > { %v810_v48 = vrot.slane %v809_v34, 1  ;;  %v817_v6 = vrot.slane %v816_v27, 1  ;;  %v824_v31 = vrot.slane %v823_v43, 1  ;;  %v830_v18 = vmax.f32 %v828_v13, %v829_v28  ;;  %v188_v28 = vld [vmem:[%s4169_s11 + $0x8e] sm:$0x3] }
  0x81   : > { %v4490_v1 = vmax.f32 %v835_v56, %v836_v33  ;;  %v4492_v55 = vmax.f32 %v842_v44, %v843_v19  ;;  %v4494_v11 = vmax.f32 %v849_v30, %v850_v23  ;;  %v4498_v45 = vmax.f32 %v4446_v51, %v782_v42 }
  0x82   : > { %v4501_v53 = vmax.f32 %v4448_v50, %v789_v2  ;;  %v4504_v54 = vmax.f32 %v4450_v52, %v796_v47  ;;  %v4506_v39 = vmax.f32 %v802_v24, %v803_v49  ;;  %v4510_v56 = vmax.f32 %v809_v34, %v810_v48 }
  0x83   : > { %8146 = vst [vmem:[#allocation33_spill] sm:$0xff] %v4498_v45  ;;  %v4512_v13 = vmax.f32 %v816_v27, %v817_v6  ;;  %v4514_v44 = vmax.f32 %v823_v43, %v824_v31  ;;  %v831_v30 = vrot.slane %v830_v18, 1  ;;  %v854_v51 = vsel %vm405_vm0, %v181_v46, -inf }
  0x84   : > { %8147 = vst [vmem:[#allocation34_spill] sm:$0xff] %v4501_v53  ;;  %8148 = vst [vmem:[#allocation35_spill] sm:$0xff] %v4504_v54  ;;  %v861_v50 = vsel %vm405_vm0, %v182_v32, -inf  ;;  %v868_v42 = vsel %vm405_vm0, %v183_v8, -inf  ;;  %v875_v52 = vsel %vm405_vm0, %v184_v10, -inf  ;;  %v838_v2 = vrot.slane %v4490_v1, 1 }
  0x85   : > { %8149 = vst [vmem:[#allocation36_spill] sm:$0xff] %v4506_v39  ;;  %8150 = vst [vmem:[#allocation37_spill] sm:$0xff] %v4510_v56  ;;  %v4521_v49 = vmax.f32 %v830_v18, %v831_v30  ;;  %v845_v48 = vrot.slane %v4492_v55, 1  ;;  %v852_v47 = vrot.slane %v4494_v11, 1  ;;  %v855_v24 = vrot.slane %v854_v51, 4 }
  0x86   : > { %8151 = vst [vmem:[#allocation38_spill] sm:$0xff] %v4512_v13  ;;  %8152 = vst [vmem:[#allocation39_spill] sm:$0xff] %v4514_v44  ;;  %v862_v34 = vrot.slane %v861_v50, 4  ;;  %v869_v27 = vrot.slane %v868_v42, 4  ;;  %v876_v43 = vrot.slane %v875_v52, 4  ;;  %v882_v33 = vsel %vm405_vm0, %v185_v26, -inf }
  0x87   : > { %8153 = vst [vmem:[#allocation40_spill] sm:$0xff] %v4521_v49  ;;  %v889_v19 = vsel %vm405_vm0, %v186_v29, -inf  ;;  %v896_v23 = vsel %vm405_vm0, %v187_v40, -inf  ;;  %v903_v46 = vsel %vm405_vm0, %v188_v28, -inf  ;;  %v856_v6 = vmax.f32 %v854_v51, %v855_v24 }
  0x88   : > { %v863_v31 = vmax.f32 %v861_v50, %v862_v34  ;;  %v870_v32 = vmax.f32 %v868_v42, %v869_v27  ;;  %v877_v8 = vmax.f32 %v875_v52, %v876_v43  ;;  %v883_v10 = vrot.slane %v882_v33, 4  ;;  %v189_v43 = vld [vmem:[%s4169_s11 + $0x90] sm:$0x3] }
  0x89   : > { %v890_v18 = vrot.slane %v889_v19, 4  ;;  %v897_v30 = vrot.slane %v896_v23, 4  ;;  %v904_v44 = vrot.slane %v903_v46, 4  ;;  %v857_v13 = vrot.slane %v856_v6, 2 }
  0x8a   : > { %v864_v56 = vrot.slane %v863_v31, 2  ;;  %v871_v39 = vrot.slane %v870_v32, 2  ;;  %v878_v54 = vrot.slane %v877_v8, 2  ;;  %v884_v26 = vmax.f32 %v882_v33, %v883_v10  ;;  %v191_v10 = vld [vmem:[%s4169_s11 + $0x94] sm:$0x3] }
  0x8b   : > { %v891_v53 = vmax.f32 %v889_v19, %v890_v18  ;;  %v898_v29 = vmax.f32 %v896_v23, %v897_v30  ;;  %v905_v40 = vmax.f32 %v903_v46, %v904_v44  ;;  %v858_v28 = vmax.f32 %v856_v6, %v857_v13  ;;  %v190_v23 = vld [vmem:[%s4169_s11 + $0x92] sm:$0x3]  ;;  %v192_v44 = vld [vmem:[%s4169_s11 + $0x96] sm:$0x3]  ;;  %v193_v46 = vld [vmem:[%s4169_s11 + $0x98] sm:$0x3] }
  0x8c   : > { %v865_v51 = vmax.f32 %v863_v31, %v864_v56  ;;  %v872_v50 = vmax.f32 %v870_v32, %v871_v39  ;;  %v879_v42 = vmax.f32 %v877_v8, %v878_v54  ;;  %v885_v52 = vrot.slane %v884_v26, 2  ;;  %v194_v18 = vld [vmem:[%s4169_s11 + $0x9a] sm:$0x3]  ;;  %v195_v30 = vld [vmem:[%s4169_s11 + $0x9c] sm:$0x3] }
  0x8d   : > { %v892_v24 = vrot.slane %v891_v53, 2  ;;  %v899_v34 = vrot.slane %v898_v29, 2  ;;  %v906_v27 = vrot.slane %v905_v40, 2  ;;  %v859_v45 = vrot.slane %v858_v28, 1 }
  0x8e   : > { %v866_v49 = vrot.slane %v865_v51, 1  ;;  %v873_v33 = vrot.slane %v872_v50, 1  ;;  %v880_v19 = vrot.slane %v879_v42, 1  ;;  %v886_v13 = vmax.f32 %v884_v26, %v885_v52  ;;  %v196_v52 = vld [vmem:[%s4169_s11 + $0x9e] sm:$0x3] }
  0x8f   : > { %v4534_v56 = vmax.f32 %v891_v53, %v892_v24  ;;  %v4536_v54 = vmax.f32 %v898_v29, %v899_v34  ;;  %v4538_v39 = vmax.f32 %v905_v40, %v906_v27  ;;  %v4542_v6 = vmax.f32 %v4490_v1, %v838_v2 }
  0x90   : > { %v4545_v31 = vmax.f32 %v4492_v55, %v845_v48  ;;  %v4548_v32 = vmax.f32 %v4494_v11, %v852_v47  ;;  %v4550_v8 = vmax.f32 %v858_v28, %v859_v45  ;;  %v4554_v53 = vmax.f32 %v865_v51, %v866_v49 }
  0x91   : > { %8154 = vst [vmem:[#allocation41_spill] sm:$0xff] %v4542_v6  ;;  %v4556_v26 = vmax.f32 %v872_v50, %v873_v33  ;;  %v4558_v29 = vmax.f32 %v879_v42, %v880_v19  ;;  %v887_v40 = vrot.slane %v886_v13, 1  ;;  %v910_v1 = vsel %vm405_vm0, %v189_v43, -inf }
  0x92   : > { %8155 = vst [vmem:[#allocation42_spill] sm:$0xff] %v4545_v31  ;;  %8156 = vst [vmem:[#allocation43_spill] sm:$0xff] %v4548_v32  ;;  %v917_v55 = vsel %vm405_vm0, %v190_v23, -inf  ;;  %v924_v2 = vsel %vm405_vm0, %v191_v10, -inf  ;;  %v931_v11 = vsel %vm405_vm0, %v192_v44, -inf  ;;  %v894_v48 = vrot.slane %v4534_v56, 1 }
  0x93   : > { %8157 = vst [vmem:[#allocation44_spill] sm:$0xff] %v4550_v8  ;;  %8158 = vst [vmem:[#allocation45_spill] sm:$0xff] %v4554_v53  ;;  %v4565_v45 = vmax.f32 %v886_v13, %v887_v40  ;;  %v901_v49 = vrot.slane %v4536_v54, 1  ;;  %v908_v47 = vrot.slane %v4538_v39, 1  ;;  %v911_v28 = vrot.slane %v910_v1, 4 }
  0x94   : > { %8159 = vst [vmem:[#allocation46_spill] sm:$0xff] %v4556_v26  ;;  %8160 = vst [vmem:[#allocation47_spill] sm:$0xff] %v4558_v29  ;;  %v918_v51 = vrot.slane %v917_v55, 4  ;;  %v925_v50 = vrot.slane %v924_v2, 4  ;;  %v932_v42 = vrot.slane %v931_v11, 4  ;;  %v938_v24 = vsel %vm405_vm0, %v193_v46, -inf }
  0x95   : > { %8161 = vst [vmem:[#allocation48_spill] sm:$0xff] %v4565_v45  ;;  %v945_v34 = vsel %vm405_vm0, %v194_v18, -inf  ;;  %v952_v27 = vsel %vm405_vm0, %v195_v30, -inf  ;;  %v959_v43 = vsel %vm405_vm0, %v196_v52, -inf  ;;  %v912_v33 = vmax.f32 %v910_v1, %v911_v28 }
  0x96   : > { %v919_v19 = vmax.f32 %v917_v55, %v918_v51  ;;  %v926_v23 = vmax.f32 %v924_v2, %v925_v50  ;;  %v933_v10 = vmax.f32 %v931_v11, %v932_v42  ;;  %v939_v44 = vrot.slane %v938_v24, 4  ;;  %v197_v42 = vld [vmem:[%s4169_s11 + $0xa0] sm:$0x3] }
  0x97   : > { %v946_v13 = vrot.slane %v945_v34, 4  ;;  %v953_v40 = vrot.slane %v952_v27, 4  ;;  %v960_v45 = vrot.slane %v959_v43, 4  ;;  %v913_v29 = vrot.slane %v912_v33, 2 }
  0x98   : > { %v920_v26 = vrot.slane %v919_v19, 2  ;;  %v927_v53 = vrot.slane %v926_v23, 2  ;;  %v934_v8 = vrot.slane %v933_v10, 2  ;;  %v940_v46 = vmax.f32 %v938_v24, %v939_v44  ;;  %v199_v44 = vld [vmem:[%s4169_s11 + $0xa4] sm:$0x3] }
  0x99   : > { %v947_v32 = vmax.f32 %v945_v34, %v946_v13  ;;  %v954_v18 = vmax.f32 %v952_v27, %v953_v40  ;;  %v961_v30 = vmax.f32 %v959_v43, %v960_v45  ;;  %v914_v52 = vmax.f32 %v912_v33, %v913_v29  ;;  %v198_v27 = vld [vmem:[%s4169_s11 + $0xa2] sm:$0x3]  ;;  %v200_v45 = vld [vmem:[%s4169_s11 + $0xa6] sm:$0x3]  ;;  %v201_v43 = vld [vmem:[%s4169_s11 + $0xa8] sm:$0x3] }
  0x9a   : > { %v921_v1 = vmax.f32 %v919_v19, %v920_v26  ;;  %v928_v55 = vmax.f32 %v926_v23, %v927_v53  ;;  %v935_v2 = vmax.f32 %v933_v10, %v934_v8  ;;  %v941_v11 = vrot.slane %v940_v46, 2  ;;  %v202_v13 = vld [vmem:[%s4169_s11 + $0xaa] sm:$0x3]  ;;  %v203_v40 = vld [vmem:[%s4169_s11 + $0xac] sm:$0x3] }
  0x9b   : > { %v948_v28 = vrot.slane %v947_v32, 2  ;;  %v955_v51 = vrot.slane %v954_v18, 2  ;;  %v962_v50 = vrot.slane %v961_v30, 2  ;;  %v915_v31 = vrot.slane %v914_v52, 1 }
  0x9c   : > { %v922_v6 = vrot.slane %v921_v1, 1  ;;  %v929_v24 = vrot.slane %v928_v55, 1  ;;  %v936_v34 = vrot.slane %v935_v2, 1  ;;  %v942_v29 = vmax.f32 %v940_v46, %v941_v11  ;;  %v204_v11 = vld [vmem:[%s4169_s11 + $0xae] sm:$0x3] }
  0x9d   : > { %v4578_v26 = vmax.f32 %v947_v32, %v948_v28  ;;  %v4580_v8 = vmax.f32 %v954_v18, %v955_v51  ;;  %v4582_v53 = vmax.f32 %v961_v30, %v962_v50  ;;  %v4586_v33 = vmax.f32 %v4534_v56, %v894_v48 }
  0x9e   : > { %v4589_v19 = vmax.f32 %v4536_v54, %v901_v49  ;;  %v4592_v23 = vmax.f32 %v4538_v39, %v908_v47  ;;  %v4594_v10 = vmax.f32 %v914_v52, %v915_v31  ;;  %v4598_v32 = vmax.f32 %v921_v1, %v922_v6 }
  0x9f   : > { %8162 = vst [vmem:[#allocation49_spill] sm:$0xff] %v4586_v33  ;;  %v4600_v46 = vmax.f32 %v928_v55, %v929_v24  ;;  %v4602_v18 = vmax.f32 %v935_v2, %v936_v34  ;;  %v943_v30 = vrot.slane %v942_v29, 1  ;;  %v966_v56 = vsel %vm405_vm0, %v197_v42, -inf }
  0xa0   : > { %8163 = vst [vmem:[#allocation50_spill] sm:$0xff] %v4589_v19  ;;  %8164 = vst [vmem:[#allocation51_spill] sm:$0xff] %v4592_v23  ;;  %v973_v54 = vsel %vm405_vm0, %v198_v27, -inf  ;;  %v980_v48 = vsel %vm405_vm0, %v199_v44, -inf  ;;  %v987_v39 = vsel %vm405_vm0, %v200_v45, -inf  ;;  %v950_v49 = vrot.slane %v4578_v26, 1 }
  0xa1   : > { %8165 = vst [vmem:[#allocation52_spill] sm:$0xff] %v4594_v10  ;;  %8166 = vst [vmem:[#allocation53_spill] sm:$0xff] %v4598_v32  ;;  %v4609_v31 = vmax.f32 %v942_v29, %v943_v30  ;;  %v957_v6 = vrot.slane %v4580_v8, 1  ;;  %v964_v47 = vrot.slane %v4582_v53, 1  ;;  %v967_v52 = vrot.slane %v966_v56, 4 }
  0xa2   : > { %8167 = vst [vmem:[#allocation54_spill] sm:$0xff] %v4600_v46  ;;  %8168 = vst [vmem:[#allocation55_spill] sm:$0xff] %v4602_v18  ;;  %v974_v1 = vrot.slane %v973_v54, 4  ;;  %v981_v55 = vrot.slane %v980_v48, 4  ;;  %v988_v2 = vrot.slane %v987_v39, 4  ;;  %v994_v28 = vsel %vm405_vm0, %v201_v43, -inf }
  0xa3   : > { %8169 = vst [vmem:[#allocation56_spill] sm:$0xff] %v4609_v31  ;;  %v1001_v51 = vsel %vm405_vm0, %v202_v13, -inf  ;;  %v1008_v50 = vsel %vm405_vm0, %v203_v40, -inf  ;;  %v1015_v42 = vsel %vm405_vm0, %v204_v11, -inf  ;;  %v968_v24 = vmax.f32 %v966_v56, %v967_v52 }
  0xa4   : > { %v975_v34 = vmax.f32 %v973_v54, %v974_v1  ;;  %v982_v27 = vmax.f32 %v980_v48, %v981_v55  ;;  %v989_v44 = vmax.f32 %v987_v39, %v988_v2  ;;  %v995_v45 = vrot.slane %v994_v28, 4  ;;  %v205_v2 = vld [vmem:[%s4169_s11 + $0xb0] sm:$0x3] }
  0xa5   : > { %v1002_v29 = vrot.slane %v1001_v51, 4  ;;  %v1009_v30 = vrot.slane %v1008_v50, 4  ;;  %v1016_v31 = vrot.slane %v1015_v42, 4  ;;  %v969_v18 = vrot.slane %v968_v24, 2 }
  0xa6   : > { %v976_v46 = vrot.slane %v975_v34, 2  ;;  %v983_v32 = vrot.slane %v982_v27, 2  ;;  %v990_v10 = vrot.slane %v989_v44, 2  ;;  %v996_v43 = vmax.f32 %v994_v28, %v995_v45  ;;  %v207_v45 = vld [vmem:[%s4169_s11 + $0xb4] sm:$0x3] }
  0xa7   : > { %v1003_v23 = vmax.f32 %v1001_v51, %v1002_v29  ;;  %v1010_v13 = vmax.f32 %v1008_v50, %v1009_v30  ;;  %v1017_v40 = vmax.f32 %v1015_v42, %v1016_v31  ;;  %v970_v11 = vmax.f32 %v968_v24, %v969_v18  ;;  %v206_v50 = vld [vmem:[%s4169_s11 + $0xb2] sm:$0x3]  ;;  %v208_v31 = vld [vmem:[%s4169_s11 + $0xb6] sm:$0x3]  ;;  %v209_v42 = vld [vmem:[%s4169_s11 + $0xb8] sm:$0x3] }
  0xa8   : > { %v977_v56 = vmax.f32 %v975_v34, %v976_v46  ;;  %v984_v54 = vmax.f32 %v982_v27, %v983_v32  ;;  %v991_v48 = vmax.f32 %v989_v44, %v990_v10  ;;  %v997_v39 = vrot.slane %v996_v43, 2  ;;  %v210_v29 = vld [vmem:[%s4169_s11 + $0xba] sm:$0x3]  ;;  %v211_v30 = vld [vmem:[%s4169_s11 + $0xbc] sm:$0x3] }
  0xa9   : > { %v1004_v52 = vrot.slane %v1003_v23, 2  ;;  %v1011_v1 = vrot.slane %v1010_v13, 2  ;;  %v1018_v55 = vrot.slane %v1017_v40, 2  ;;  %v971_v19 = vrot.slane %v970_v11, 1 }
  0xaa   : > { %v978_v33 = vrot.slane %v977_v56, 1  ;;  %v985_v28 = vrot.slane %v984_v54, 1  ;;  %v992_v51 = vrot.slane %v991_v48, 1  ;;  %v998_v18 = vmax.f32 %v996_v43, %v997_v39  ;;  %v212_v39 = vld [vmem:[%s4169_s11 + $0xbe] sm:$0x3] }
  0xab   : > { %v4622_v46 = vmax.f32 %v1003_v23, %v1004_v52  ;;  %v4624_v10 = vmax.f32 %v1010_v13, %v1011_v1  ;;  %v4626_v32 = vmax.f32 %v1017_v40, %v1018_v55  ;;  %v4630_v24 = vmax.f32 %v4578_v26, %v950_v49 }
  0xac   : > { %v4633_v34 = vmax.f32 %v4580_v8, %v957_v6  ;;  %v4636_v27 = vmax.f32 %v4582_v53, %v964_v47  ;;  %v4638_v44 = vmax.f32 %v970_v11, %v971_v19  ;;  %v4642_v23 = vmax.f32 %v977_v56, %v978_v33 }
  0xad   : > { %8170 = vst [vmem:[#allocation57_spill] sm:$0xff] %v4630_v24  ;;  %v4644_v43 = vmax.f32 %v984_v54, %v985_v28  ;;  %v4646_v13 = vmax.f32 %v991_v48, %v992_v51  ;;  %v999_v40 = vrot.slane %v998_v18, 1  ;;  %v1022_v26 = vsel %vm405_vm0, %v205_v2, -inf }
  0xae   : > { %8171 = vst [vmem:[#allocation58_spill] sm:$0xff] %v4633_v34  ;;  %8172 = vst [vmem:[#allocation59_spill] sm:$0xff] %v4636_v27  ;;  %v1029_v8 = vsel %vm405_vm0, %v206_v50, -inf  ;;  %v1036_v49 = vsel %vm405_vm0, %v207_v45, -inf  ;;  %v1043_v53 = vsel %vm405_vm0, %v208_v31, -inf  ;;  %v1006_v6 = vrot.slane %v4622_v46, 1 }
  0xaf   : > { %8173 = vst [vmem:[#allocation60_spill] sm:$0xff] %v4638_v44  ;;  %8174 = vst [vmem:[#allocation61_spill] sm:$0xff] %v4642_v23  ;;  %v4653_v19 = vmax.f32 %v998_v18, %v999_v40  ;;  %v1013_v33 = vrot.slane %v4624_v10, 1  ;;  %v1020_v47 = vrot.slane %v4626_v32, 1  ;;  %v1023_v11 = vrot.slane %v1022_v26, 4 }
  0xb0   : > { %8175 = vst [vmem:[#allocation62_spill] sm:$0xff] %v4644_v43  ;;  %8176 = vst [vmem:[#allocation63_spill] sm:$0xff] %v4646_v13  ;;  %v1030_v56 = vrot.slane %v1029_v8, 4  ;;  %v1037_v54 = vrot.slane %v1036_v49, 4  ;;  %v1044_v48 = vrot.slane %v1043_v53, 4  ;;  %v1050_v52 = vsel %vm405_vm0, %v209_v42, -inf }
  0xb1   : > { %8177 = vst [vmem:[#allocation64_spill] sm:$0xff] %v4653_v19  ;;  %v1057_v1 = vsel %vm405_vm0, %v210_v29, -inf  ;;  %v1064_v55 = vsel %vm405_vm0, %v211_v30, -inf  ;;  %v1071_v2 = vsel %vm405_vm0, %v212_v39, -inf  ;;  %v1024_v28 = vmax.f32 %v1022_v26, %v1023_v11 }
  0xb2   : > { %v1031_v51 = vmax.f32 %v1029_v8, %v1030_v56  ;;  %v1038_v50 = vmax.f32 %v1036_v49, %v1037_v54  ;;  %v1045_v45 = vmax.f32 %v1043_v53, %v1044_v48  ;;  %v1051_v31 = vrot.slane %v1050_v52, 4  ;;  %v213_v48 = vld [vmem:[%s4169_s11 + $0xc0] sm:$0x3] }
  0xb3   : > { %v1058_v18 = vrot.slane %v1057_v1, 4  ;;  %v1065_v40 = vrot.slane %v1064_v55, 4  ;;  %v1072_v13 = vrot.slane %v1071_v2, 4  ;;  %v1025_v43 = vrot.slane %v1024_v28, 2 }
  0xb4   : > { %v1032_v23 = vrot.slane %v1031_v51, 2  ;;  %v1039_v44 = vrot.slane %v1038_v50, 2  ;;  %v1046_v27 = vrot.slane %v1045_v45, 2  ;;  %v1052_v42 = vmax.f32 %v1050_v52, %v1051_v31  ;;  %v215_v31 = vld [vmem:[%s4169_s11 + $0xc4] sm:$0x3] }
  0xb5   : > { %v1059_v34 = vmax.f32 %v1057_v1, %v1058_v18  ;;  %v1066_v29 = vmax.f32 %v1064_v55, %v1065_v40  ;;  %v1073_v30 = vmax.f32 %v1071_v2, %v1072_v13  ;;  %v1026_v39 = vmax.f32 %v1024_v28, %v1025_v43  ;;  %v214_v55 = vld [vmem:[%s4169_s11 + $0xc2] sm:$0x3]  ;;  %v216_v13 = vld [vmem:[%s4169_s11 + $0xc6] sm:$0x3]  ;;  %v217_v2 = vld [vmem:[%s4169_s11 + $0xc8] sm:$0x3] }
  0xb6   : > { %v1033_v26 = vmax.f32 %v1031_v51, %v1032_v23  ;;  %v1040_v8 = vmax.f32 %v1038_v50, %v1039_v44  ;;  %v1047_v49 = vmax.f32 %v1045_v45, %v1046_v27  ;;  %v1053_v53 = vrot.slane %v1052_v42, 2  ;;  %v218_v18 = vld [vmem:[%s4169_s11 + $0xca] sm:$0x3]  ;;  %v219_v40 = vld [vmem:[%s4169_s11 + $0xcc] sm:$0x3] }
  0xb7   : > { %v1060_v11 = vrot.slane %v1059_v34, 2  ;;  %v1067_v56 = vrot.slane %v1066_v29, 2  ;;  %v1074_v54 = vrot.slane %v1073_v30, 2  ;;  %v1027_v24 = vrot.slane %v1026_v39, 1 }
  0xb8   : > { %v1034_v19 = vrot.slane %v1033_v26, 1  ;;  %v1041_v52 = vrot.slane %v1040_v8, 1  ;;  %v1048_v1 = vrot.slane %v1047_v49, 1  ;;  %v1054_v43 = vmax.f32 %v1052_v42, %v1053_v53  ;;  %v220_v53 = vld [vmem:[%s4169_s11 + $0xce] sm:$0x3] }
  0xb9   : > { %v4666_v23 = vmax.f32 %v1059_v34, %v1060_v11  ;;  %v4668_v27 = vmax.f32 %v1066_v29, %v1067_v56  ;;  %v4670_v44 = vmax.f32 %v1073_v30, %v1074_v54  ;;  %v4674_v28 = vmax.f32 %v4622_v46, %v1006_v6 }
  0xba   : > { %v4677_v51 = vmax.f32 %v4624_v10, %v1013_v33  ;;  %v4680_v50 = vmax.f32 %v4626_v32, %v1020_v47  ;;  %v4682_v45 = vmax.f32 %v1026_v39, %v1027_v24  ;;  %v4686_v34 = vmax.f32 %v1033_v26, %v1034_v19 }
  0xbb   : > { %8178 = vst [vmem:[#allocation65_spill] sm:$0xff] %v4674_v28  ;;  %v4688_v42 = vmax.f32 %v1040_v8, %v1041_v52  ;;  %v4690_v29 = vmax.f32 %v1047_v49, %v1048_v1  ;;  %v1055_v30 = vrot.slane %v1054_v43, 1  ;;  %v1078_v46 = vsel %vm405_vm0, %v213_v48, -inf }
  0xbc   : > { %8179 = vst [vmem:[#allocation66_spill] sm:$0xff] %v4677_v51  ;;  %8180 = vst [vmem:[#allocation67_spill] sm:$0xff] %v4680_v50  ;;  %v1085_v10 = vsel %vm405_vm0, %v214_v55, -inf  ;;  %v1092_v6 = vsel %vm405_vm0, %v215_v31, -inf  ;;  %v1099_v32 = vsel %vm405_vm0, %v216_v13, -inf  ;;  %v1062_v33 = vrot.slane %v4666_v23, 1 }
  0xbd   : > { %8181 = vst [vmem:[#allocation68_spill] sm:$0xff] %v4682_v45  ;;  %8182 = vst [vmem:[#allocation69_spill] sm:$0xff] %v4686_v34  ;;  %v4697_v24 = vmax.f32 %v1054_v43, %v1055_v30  ;;  %v1069_v19 = vrot.slane %v4668_v27, 1  ;;  %v1076_v47 = vrot.slane %v4670_v44, 1  ;;  %v1079_v39 = vrot.slane %v1078_v46, 4 }
  0xbe   : > { %8183 = vst [vmem:[#allocation70_spill] sm:$0xff] %v4688_v42  ;;  %8184 = vst [vmem:[#allocation71_spill] sm:$0xff] %v4690_v29  ;;  %v1086_v26 = vrot.slane %v1085_v10, 4  ;;  %v1093_v8 = vrot.slane %v1092_v6, 4  ;;  %v1100_v49 = vrot.slane %v1099_v32, 4  ;;  %v1106_v11 = vsel %vm405_vm0, %v217_v2, -inf }
  0xbf   : > { %8185 = vst [vmem:[#allocation72_spill] sm:$0xff] %v4697_v24  ;;  %v1113_v56 = vsel %vm405_vm0, %v218_v18, -inf  ;;  %v1120_v54 = vsel %vm405_vm0, %v219_v40, -inf  ;;  %v1127_v48 = vsel %vm405_vm0, %v220_v53, -inf  ;;  %v1080_v52 = vmax.f32 %v1078_v46, %v1079_v39 }
  0xc0   : > { %v1087_v1 = vmax.f32 %v1085_v10, %v1086_v26  ;;  %v1094_v55 = vmax.f32 %v1092_v6, %v1093_v8  ;;  %v1101_v31 = vmax.f32 %v1099_v32, %v1100_v49  ;;  %v1107_v13 = vrot.slane %v1106_v11, 4  ;;  %v221_v49 = vld [vmem:[%s4169_s11 + $0xd0] sm:$0x3] }
  0xc1   : > { %v1114_v43 = vrot.slane %v1113_v56, 4  ;;  %v1121_v30 = vrot.slane %v1120_v54, 4  ;;  %v1128_v24 = vrot.slane %v1127_v48, 4  ;;  %v1081_v29 = vrot.slane %v1080_v52, 2 }
  0xc2   : > { %v1088_v42 = vrot.slane %v1087_v1, 2  ;;  %v1095_v34 = vrot.slane %v1094_v55, 2  ;;  %v1102_v45 = vrot.slane %v1101_v31, 2  ;;  %v1108_v2 = vmax.f32 %v1106_v11, %v1107_v13  ;;  %v223_v13 = vld [vmem:[%s4169_s11 + $0xd4] sm:$0x3] }
  0xc3   : > { %v1115_v50 = vmax.f32 %v1113_v56, %v1114_v43  ;;  %v1122_v18 = vmax.f32 %v1120_v54, %v1121_v30  ;;  %v1129_v40 = vmax.f32 %v1127_v48, %v1128_v24  ;;  %v1082_v53 = vmax.f32 %v1080_v52, %v1081_v29  ;;  %v222_v54 = vld [vmem:[%s4169_s11 + $0xd2] sm:$0x3]  ;;  %v224_v24 = vld [vmem:[%s4169_s11 + $0xd6] sm:$0x3]  ;;  %v225_v48 = vld [vmem:[%s4169_s11 + $0xd8] sm:$0x3] }
  0xc4   : > { %v1089_v46 = vmax.f32 %v1087_v1, %v1088_v42  ;;  %v1096_v10 = vmax.f32 %v1094_v55, %v1095_v34  ;;  %v1103_v6 = vmax.f32 %v1101_v31, %v1102_v45  ;;  %v1109_v32 = vrot.slane %v1108_v2, 2  ;;  %v226_v43 = vld [vmem:[%s4169_s11 + $0xda] sm:$0x3]  ;;  %v227_v30 = vld [vmem:[%s4169_s11 + $0xdc] sm:$0x3] }
  0xc5   : > { %v1116_v39 = vrot.slane %v1115_v50, 2  ;;  %v1123_v26 = vrot.slane %v1122_v18, 2  ;;  %v1130_v8 = vrot.slane %v1129_v40, 2  ;;  %v1083_v51 = vrot.slane %v1082_v53, 1 }
  0xc6   : > { %v1090_v28 = vrot.slane %v1089_v46, 1  ;;  %v1097_v11 = vrot.slane %v1096_v10, 1  ;;  %v1104_v56 = vrot.slane %v1103_v6, 1  ;;  %v1110_v29 = vmax.f32 %v1108_v2, %v1109_v32  ;;  %v228_v32 = vld [vmem:[%s4169_s11 + $0xde] sm:$0x3] }
  0xc7   : > { %v4710_v42 = vmax.f32 %v1115_v50, %v1116_v39  ;;  %v4712_v45 = vmax.f32 %v1122_v18, %v1123_v26  ;;  %v4714_v34 = vmax.f32 %v1129_v40, %v1130_v8  ;;  %v4718_v52 = vmax.f32 %v4666_v23, %v1062_v33 }
  0xc8   : > { %v4721_v1 = vmax.f32 %v4668_v27, %v1069_v19  ;;  %v4724_v55 = vmax.f32 %v4670_v44, %v1076_v47  ;;  %v4726_v31 = vmax.f32 %v1082_v53, %v1083_v51  ;;  %v4730_v50 = vmax.f32 %v1089_v46, %v1090_v28 }
  0xc9   : > { %8186 = vst [vmem:[#allocation73_spill] sm:$0xff] %v4718_v52  ;;  %v4732_v2 = vmax.f32 %v1096_v10, %v1097_v11  ;;  %v4734_v18 = vmax.f32 %v1103_v6, %v1104_v56  ;;  %v1111_v40 = vrot.slane %v1110_v29, 1  ;;  %v1134_v23 = vsel %vm405_vm0, %v221_v49, -inf }
  0xca   : > { %8187 = vst [vmem:[#allocation74_spill] sm:$0xff] %v4721_v1  ;;  %8188 = vst [vmem:[#allocation75_spill] sm:$0xff] %v4724_v55  ;;  %v1141_v27 = vsel %vm405_vm0, %v222_v54, -inf  ;;  %v1148_v33 = vsel %vm405_vm0, %v223_v13, -inf  ;;  %v1155_v44 = vsel %vm405_vm0, %v224_v24, -inf  ;;  %v1118_v19 = vrot.slane %v4710_v42, 1 }
  0xcb   : > { %8189 = vst [vmem:[#allocation76_spill] sm:$0xff] %v4726_v31  ;;  %8190 = vst [vmem:[#allocation77_spill] sm:$0xff] %v4730_v50  ;;  %v4741_v51 = vmax.f32 %v1110_v29, %v1111_v40  ;;  %v1125_v28 = vrot.slane %v4712_v45, 1  ;;  %v1132_v47 = vrot.slane %v4714_v34, 1  ;;  %v1135_v53 = vrot.slane %v1134_v23, 4 }
  0xcc   : > { %8191 = vst [vmem:[#allocation78_spill] sm:$0xff] %v4732_v2  ;;  %8192 = vst [vmem:[#allocation79_spill] sm:$0xff] %v4734_v18  ;;  %v1142_v46 = vrot.slane %v1141_v27, 4  ;;  %v1149_v10 = vrot.slane %v1148_v33, 4  ;;  %v1156_v6 = vrot.slane %v1155_v44, 4  ;;  %v1162_v39 = vsel %vm405_vm0, %v225_v48, -inf }
  0xcd   : > { %8193 = vst [vmem:[#allocation80_spill] sm:$0xff] %v4741_v51  ;;  %v1169_v26 = vsel %vm405_vm0, %v226_v43, -inf  ;;  %v1176_v8 = vsel %vm405_vm0, %v227_v30, -inf  ;;  %v1183_v49 = vsel %vm405_vm0, %v228_v32, -inf  ;;  %v1136_v11 = vmax.f32 %v1134_v23, %v1135_v53 }
  0xce   : > { %v1143_v56 = vmax.f32 %v1141_v27, %v1142_v46  ;;  %v1150_v54 = vmax.f32 %v1148_v33, %v1149_v10  ;;  %v1157_v13 = vmax.f32 %v1155_v44, %v1156_v6  ;;  %v1163_v24 = vrot.slane %v1162_v39, 4  ;;  %v229_v6 = vld [vmem:[%s4169_s11 + $0xe0] sm:$0x3] }
  0xcf   : > { %v1170_v29 = vrot.slane %v1169_v26, 4  ;;  %v1177_v40 = vrot.slane %v1176_v8, 4  ;;  %v1184_v51 = vrot.slane %v1183_v49, 4  ;;  %v1137_v18 = vrot.slane %v1136_v11, 2 }
  0xd0   : > { %v1144_v2 = vrot.slane %v1143_v56, 2  ;;  %v1151_v50 = vrot.slane %v1150_v54, 2  ;;  %v1158_v31 = vrot.slane %v1157_v13, 2  ;;  %v1164_v48 = vmax.f32 %v1162_v39, %v1163_v24  ;;  %v231_v24 = vld [vmem:[%s4169_s11 + $0xe4] sm:$0x3] }
  0xd1   : > { %v1171_v55 = vmax.f32 %v1169_v26, %v1170_v29  ;;  %v1178_v43 = vmax.f32 %v1176_v8, %v1177_v40  ;;  %v1185_v30 = vmax.f32 %v1183_v49, %v1184_v51  ;;  %v1138_v32 = vmax.f32 %v1136_v11, %v1137_v18  ;;  %v230_v8 = vld [vmem:[%s4169_s11 + $0xe2] sm:$0x3]  ;;  %v232_v51 = vld [vmem:[%s4169_s11 + $0xe6] sm:$0x3]  ;;  %v233_v49 = vld [vmem:[%s4169_s11 + $0xe8] sm:$0x3] }
  0xd2   : > { %v1145_v23 = vmax.f32 %v1143_v56, %v1144_v2  ;;  %v1152_v27 = vmax.f32 %v1150_v54, %v1151_v50  ;;  %v1159_v33 = vmax.f32 %v1157_v13, %v1158_v31  ;;  %v1165_v44 = vrot.slane %v1164_v48, 2  ;;  %v234_v29 = vld [vmem:[%s4169_s11 + $0xea] sm:$0x3]  ;;  %v235_v40 = vld [vmem:[%s4169_s11 + $0xec] sm:$0x3] }
  0xd3   : > { %v1172_v53 = vrot.slane %v1171_v55, 2  ;;  %v1179_v46 = vrot.slane %v1178_v43, 2  ;;  %v1186_v10 = vrot.slane %v1185_v30, 2  ;;  %v1139_v1 = vrot.slane %v1138_v32, 1 }
  0xd4   : > { %v1146_v52 = vrot.slane %v1145_v23, 1  ;;  %v1153_v39 = vrot.slane %v1152_v27, 1  ;;  %v1160_v26 = vrot.slane %v1159_v33, 1  ;;  %v1166_v18 = vmax.f32 %v1164_v48, %v1165_v44  ;;  %v236_v44 = vld [vmem:[%s4169_s11 + $0xee] sm:$0x3] }
  0xd5   : > { %v4754_v2 = vmax.f32 %v1171_v55, %v1172_v53  ;;  %v4756_v31 = vmax.f32 %v1178_v43, %v1179_v46  ;;  %v4758_v50 = vmax.f32 %v1185_v30, %v1186_v10  ;;  %v4762_v11 = vmax.f32 %v4710_v42, %v1118_v19 }
  0xd6   : > { %v4765_v56 = vmax.f32 %v4712_v45, %v1125_v28  ;;  %v4768_v54 = vmax.f32 %v4714_v34, %v1132_v47  ;;  %v4770_v13 = vmax.f32 %v1138_v32, %v1139_v1  ;;  %v4774_v55 = vmax.f32 %v1145_v23, %v1146_v52 }
  0xd7   : > { %8194 = vst [vmem:[#allocation81_spill] sm:$0xff] %v4762_v11  ;;  %v4776_v48 = vmax.f32 %v1152_v27, %v1153_v39  ;;  %v4778_v43 = vmax.f32 %v1159_v33, %v1160_v26  ;;  %v1167_v30 = vrot.slane %v1166_v18, 1  ;;  %v1190_v42 = vsel %vm405_vm0, %v229_v6, -inf }
  0xd8   : > { %8195 = vst [vmem:[#allocation82_spill] sm:$0xff] %v4765_v56  ;;  %8196 = vst [vmem:[#allocation83_spill] sm:$0xff] %v4768_v54  ;;  %v1197_v45 = vsel %vm405_vm0, %v230_v8, -inf  ;;  %v1204_v19 = vsel %vm405_vm0, %v231_v24, -inf  ;;  %v1211_v34 = vsel %vm405_vm0, %v232_v51, -inf  ;;  %v1174_v28 = vrot.slane %v4754_v2, 1 }
  0xd9   : > { %8197 = vst [vmem:[#allocation84_spill] sm:$0xff] %v4770_v13  ;;  %8198 = vst [vmem:[#allocation85_spill] sm:$0xff] %v4774_v55  ;;  %v4785_v1 = vmax.f32 %v1166_v18, %v1167_v30  ;;  %v1181_v52 = vrot.slane %v4756_v31, 1  ;;  %v1188_v47 = vrot.slane %v4758_v50, 1  ;;  %v1191_v32 = vrot.slane %v1190_v42, 4 }
  0xda   : > { %8199 = vst [vmem:[#allocation86_spill] sm:$0xff] %v4776_v48  ;;  %8200 = vst [vmem:[#allocation87_spill] sm:$0xff] %v4778_v43  ;;  %v1198_v23 = vrot.slane %v1197_v45, 4  ;;  %v1205_v27 = vrot.slane %v1204_v19, 4  ;;  %v1212_v33 = vrot.slane %v1211_v34, 4  ;;  %v1218_v53 = vsel %vm405_vm0, %v233_v49, -inf }
  0xdb   : > { %8201 = vst [vmem:[#allocation88_spill] sm:$0xff] %v4785_v1  ;;  %v1225_v46 = vsel %vm405_vm0, %v234_v29, -inf  ;;  %v1232_v10 = vsel %vm405_vm0, %v235_v40, -inf  ;;  %v1239_v6 = vsel %vm405_vm0, %v236_v44, -inf  ;;  %v1192_v39 = vmax.f32 %v1190_v42, %v1191_v32 }
  0xdc   : > { %v1199_v26 = vmax.f32 %v1197_v45, %v1198_v23  ;;  %v1206_v8 = vmax.f32 %v1204_v19, %v1205_v27  ;;  %v1213_v24 = vmax.f32 %v1211_v34, %v1212_v33  ;;  %v1219_v51 = vrot.slane %v1218_v53, 4  ;;  %v237_v33 = vld [vmem:[%s4169_s11 + $0xf0] sm:$0x3] }
  0xdd   : > { %v1226_v18 = vrot.slane %v1225_v46, 4  ;;  %v1233_v30 = vrot.slane %v1232_v10, 4  ;;  %v1240_v43 = vrot.slane %v1239_v6, 4  ;;  %v1193_v48 = vrot.slane %v1192_v39, 2 }
  0xde   : > { %v1200_v55 = vrot.slane %v1199_v26, 2  ;;  %v1207_v13 = vrot.slane %v1206_v8, 2  ;;  %v1214_v54 = vrot.slane %v1213_v24, 2  ;;  %v1220_v49 = vmax.f32 %v1218_v53, %v1219_v51  ;;  %v239_v51 = vld [vmem:[%s4169_s11 + $0xf4] sm:$0x3] }
  0xdf   : > { %v1227_v56 = vmax.f32 %v1225_v46, %v1226_v18  ;;  %v1234_v29 = vmax.f32 %v1232_v10, %v1233_v30  ;;  %v1241_v40 = vmax.f32 %v1239_v6, %v1240_v43  ;;  %v1194_v44 = vmax.f32 %v1192_v39, %v1193_v48  ;;  %v238_v10 = vld [vmem:[%s4169_s11 + $0xf2] sm:$0x3]  ;;  %v240_v43 = vld [vmem:[%s4169_s11 + $0xf6] sm:$0x3]  ;;  %v241_v6 = vld [vmem:[%s4169_s11 + $0xf8] sm:$0x3] }
  0xe0   : > { %v1201_v42 = vmax.f32 %v1199_v26, %v1200_v55  ;;  %v1208_v45 = vmax.f32 %v1206_v8, %v1207_v13  ;;  %v1215_v19 = vmax.f32 %v1213_v24, %v1214_v54  ;;  %v1221_v34 = vrot.slane %v1220_v49, 2  ;;  %v242_v18 = vld [vmem:[%s4169_s11 + $0xfa] sm:$0x3]  ;;  %v243_v30 = vld [vmem:[%s4169_s11 + $0xfc] sm:$0x3] }
  0xe1   : > { %v1228_v32 = vrot.slane %v1227_v56, 2  ;;  %v1235_v23 = vrot.slane %v1234_v29, 2  ;;  %v1242_v27 = vrot.slane %v1241_v40, 2  ;;  %v1195_v11 = vrot.slane %v1194_v44, 1 }
  0xe2   : > { %v1202_v1 = vrot.slane %v1201_v42, 1  ;;  %v1209_v53 = vrot.slane %v1208_v45, 1  ;;  %v1216_v46 = vrot.slane %v1215_v19, 1  ;;  %v1222_v48 = vmax.f32 %v1220_v49, %v1221_v34  ;;  %v244_v34 = vld [vmem:[%s4169_s11 + $0xfe] sm:$0x3] }
  0xe3   : > { %v4798_v55 = vmax.f32 %v1227_v56, %v1228_v32  ;;  %v4800_v54 = vmax.f32 %v1234_v29, %v1235_v23  ;;  %v4802_v13 = vmax.f32 %v1241_v40, %v1242_v27  ;;  %v4806_v39 = vmax.f32 %v4754_v2, %v1174_v28 }
  0xe4   : > { %v4809_v26 = vmax.f32 %v4756_v31, %v1181_v52  ;;  %v4812_v8 = vmax.f32 %v4758_v50, %v1188_v47  ;;  %v4814_v24 = vmax.f32 %v1194_v44, %v1195_v11  ;;  %v4818_v56 = vmax.f32 %v1201_v42, %v1202_v1 }
  0xe5   : > { %8202 = vst [vmem:[#allocation89_spill] sm:$0xff] %v4806_v39  ;;  %v4820_v49 = vmax.f32 %v1208_v45, %v1209_v53  ;;  %v4822_v29 = vmax.f32 %v1215_v19, %v1216_v46  ;;  %v1223_v40 = vrot.slane %v1222_v48, 1  ;;  %v1246_v2 = vsel %vm405_vm0, %v237_v33, -inf }
  0xe6   : > { %8203 = vst [vmem:[#allocation90_spill] sm:$0xff] %v4809_v26  ;;  %8204 = vst [vmem:[#allocation91_spill] sm:$0xff] %v4812_v8  ;;  %v1253_v31 = vsel %vm405_vm0, %v238_v10, -inf  ;;  %v1260_v28 = vsel %vm405_vm0, %v239_v51, -inf  ;;  %v1267_v50 = vsel %vm405_vm0, %v240_v43, -inf  ;;  %v1230_v52 = vrot.slane %v4798_v55, 1 }
  0xe7   : > { %8205 = vst [vmem:[#allocation92_spill] sm:$0xff] %v4814_v24  ;;  %8206 = vst [vmem:[#allocation93_spill] sm:$0xff] %v4818_v56  ;;  %v4829_v11 = vmax.f32 %v1222_v48, %v1223_v40  ;;  %v1237_v1 = vrot.slane %v4800_v54, 1  ;;  %v1244_v47 = vrot.slane %v4802_v13, 1  ;;  %v1247_v44 = vrot.slane %v1246_v2, 4 }
  0xe8   : > { %8207 = vst [vmem:[#allocation94_spill] sm:$0xff] %v4820_v49  ;;  %8208 = vst [vmem:[#allocation95_spill] sm:$0xff] %v4822_v29  ;;  %v1254_v42 = vrot.slane %v1253_v31, 4  ;;  %v1261_v45 = vrot.slane %v1260_v28, 4  ;;  %v1268_v19 = vrot.slane %v1267_v50, 4  ;;  %v1274_v32 = vsel %vm405_vm0, %v241_v6, -inf }
  0xe9   : > { %8209 = vst [vmem:[#allocation96_spill] sm:$0xff] %v4829_v11  ;;  %v1281_v23 = vsel %vm405_vm0, %v242_v18, -inf  ;;  %v1288_v27 = vsel %vm405_vm0, %v243_v30, -inf  ;;  %v1295_v33 = vsel %vm405_vm0, %v244_v34, -inf  ;;  %v1248_v53 = vmax.f32 %v1246_v2, %v1247_v44 }
  0xea   : > { %v1255_v46 = vmax.f32 %v1253_v31, %v1254_v42  ;;  %v1262_v10 = vmax.f32 %v1260_v28, %v1261_v45  ;;  %v1269_v51 = vmax.f32 %v1267_v50, %v1268_v19  ;;  %v1275_v43 = vrot.slane %v1274_v32, 4  ;;  %v245_v19 = vld [vmem:[%s4169_s11 + $0x100] sm:$0x3] }
  0xeb   : > { %v1282_v48 = vrot.slane %v1281_v23, 4  ;;  %v1289_v40 = vrot.slane %v1288_v27, 4  ;;  %v1296_v11 = vrot.slane %v1295_v33, 4  ;;  %v1249_v29 = vrot.slane %v1248_v53, 2 }
  0xec   : > { %v1256_v49 = vrot.slane %v1255_v46, 2  ;;  %v1263_v56 = vrot.slane %v1262_v10, 2  ;;  %v1270_v24 = vrot.slane %v1269_v51, 2  ;;  %v1276_v6 = vmax.f32 %v1274_v32, %v1275_v43  ;;  %v247_v43 = vld [vmem:[%s4169_s11 + $0x104] sm:$0x3] }
  0xed   : > { %v1283_v8 = vmax.f32 %v1281_v23, %v1282_v48  ;;  %v1290_v18 = vmax.f32 %v1288_v27, %v1289_v40  ;;  %v1297_v30 = vmax.f32 %v1295_v33, %v1296_v11  ;;  %v1250_v34 = vmax.f32 %v1248_v53, %v1249_v29  ;;  %v246_v27 = vld [vmem:[%s4169_s11 + $0x102] sm:$0x3]  ;;  %v248_v11 = vld [vmem:[%s4169_s11 + $0x106] sm:$0x3]  ;;  %v249_v33 = vld [vmem:[%s4169_s11 + $0x108] sm:$0x3] }
  0xee   : > { %v1257_v2 = vmax.f32 %v1255_v46, %v1256_v49  ;;  %v1264_v31 = vmax.f32 %v1262_v10, %v1263_v56  ;;  %v1271_v28 = vmax.f32 %v1269_v51, %v1270_v24  ;;  %v1277_v50 = vrot.slane %v1276_v6, 2  ;;  %v250_v48 = vld [vmem:[%s4169_s11 + $0x10a] sm:$0x3]  ;;  %v251_v40 = vld [vmem:[%s4169_s11 + $0x10c] sm:$0x3] }
  0xef   : > { %v1284_v44 = vrot.slane %v1283_v8, 2  ;;  %v1291_v42 = vrot.slane %v1290_v18, 2  ;;  %v1298_v45 = vrot.slane %v1297_v30, 2  ;;  %v1251_v26 = vrot.slane %v1250_v34, 1 }
  0xf0   : > { %v1258_v39 = vrot.slane %v1257_v2, 1  ;;  %v1265_v32 = vrot.slane %v1264_v31, 1  ;;  %v1272_v23 = vrot.slane %v1271_v28, 1  ;;  %v1278_v29 = vmax.f32 %v1276_v6, %v1277_v50  ;;  %v252_v50 = vld [vmem:[%s4169_s11 + $0x10e] sm:$0x3] }
  0xf1   : > { %v4842_v49 = vmax.f32 %v1283_v8, %v1284_v44  ;;  %v4844_v24 = vmax.f32 %v1290_v18, %v1291_v42  ;;  %v4846_v56 = vmax.f32 %v1297_v30, %v1298_v45  ;;  %v4850_v53 = vmax.f32 %v4798_v55, %v1230_v52 }
  0xf2   : > { %v4853_v46 = vmax.f32 %v4800_v54, %v1237_v1  ;;  %v4856_v10 = vmax.f32 %v4802_v13, %v1244_v47  ;;  %v4858_v51 = vmax.f32 %v1250_v34, %v1251_v26  ;;  %v4862_v8 = vmax.f32 %v1257_v2, %v1258_v39 }
  0xf3   : > { %8210 = vst [vmem:[#allocation97_spill] sm:$0xff] %v4850_v53  ;;  %v4864_v6 = vmax.f32 %v1264_v31, %v1265_v32  ;;  %v4866_v18 = vmax.f32 %v1271_v28, %v1272_v23  ;;  %v1279_v30 = vrot.slane %v1278_v29, 1  ;;  %v1302_v55 = vsel %vm405_vm0, %v245_v19, -inf }
  0xf4   : > { %8211 = vst [vmem:[#allocation98_spill] sm:$0xff] %v4853_v46  ;;  %8212 = vst [vmem:[#allocation99_spill] sm:$0xff] %v4856_v10  ;;  %v1309_v54 = vsel %vm405_vm0, %v246_v27, -inf  ;;  %v1316_v52 = vsel %vm405_vm0, %v247_v43, -inf  ;;  %v1323_v13 = vsel %vm405_vm0, %v248_v11, -inf  ;;  %v1286_v1 = vrot.slane %v4842_v49, 1 }
  0xf5   : > { %8213 = vst [vmem:[#allocation100_spill] sm:$0xff] %v4858_v51  ;;  %8214 = vst [vmem:[#allocation101_spill] sm:$0xff] %v4862_v8  ;;  %v4873_v26 = vmax.f32 %v1278_v29, %v1279_v30  ;;  %v1293_v39 = vrot.slane %v4844_v24, 1  ;;  %v1300_v47 = vrot.slane %v4846_v56, 1  ;;  %v1303_v34 = vrot.slane %v1302_v55, 4 }
  0xf6   : > { %8215 = vst [vmem:[#allocation102_spill] sm:$0xff] %v4864_v6  ;;  %8216 = vst [vmem:[#allocation103_spill] sm:$0xff] %v4866_v18  ;;  %v1310_v2 = vrot.slane %v1309_v54, 4  ;;  %v1317_v31 = vrot.slane %v1316_v52, 4  ;;  %v1324_v28 = vrot.slane %v1323_v13, 4  ;;  %v1330_v44 = vsel %vm405_vm0, %v249_v33, -inf }
  0xf7   : > { %8217 = vst [vmem:[#allocation104_spill] sm:$0xff] %v4873_v26  ;;  %v1337_v42 = vsel %vm405_vm0, %v250_v48, -inf  ;;  %v1344_v45 = vsel %vm405_vm0, %v251_v40, -inf  ;;  %v1351_v19 = vsel %vm405_vm0, %v252_v50, -inf  ;;  %v1304_v32 = vmax.f32 %v1302_v55, %v1303_v34 }
  0xf8   : > { %v1311_v23 = vmax.f32 %v1309_v54, %v1310_v2  ;;  %v1318_v27 = vmax.f32 %v1316_v52, %v1317_v31  ;;  %v1325_v43 = vmax.f32 %v1323_v13, %v1324_v28  ;;  %v1331_v11 = vrot.slane %v1330_v44, 4  ;;  %v253_v28 = vld [vmem:[%s4169_s11 + $0x110] sm:$0x3] }
  0xf9   : > { %v1338_v29 = vrot.slane %v1337_v42, 4  ;;  %v1345_v30 = vrot.slane %v1344_v45, 4  ;;  %v1352_v26 = vrot.slane %v1351_v19, 4  ;;  %v1305_v18 = vrot.slane %v1304_v32, 2 }
  0xfa   : > { %v1312_v6 = vrot.slane %v1311_v23, 2  ;;  %v1319_v8 = vrot.slane %v1318_v27, 2  ;;  %v1326_v51 = vrot.slane %v1325_v43, 2  ;;  %v1332_v33 = vmax.f32 %v1330_v44, %v1331_v11  ;;  %v255_v11 = vld [vmem:[%s4169_s11 + $0x114] sm:$0x3] }
  0xfb   : > { %v1339_v10 = vmax.f32 %v1337_v42, %v1338_v29  ;;  %v1346_v48 = vmax.f32 %v1344_v45, %v1345_v30  ;;  %v1353_v40 = vmax.f32 %v1351_v19, %v1352_v26  ;;  %v1306_v50 = vmax.f32 %v1304_v32, %v1305_v18  ;;  %v254_v45 = vld [vmem:[%s4169_s11 + $0x112] sm:$0x3]  ;;  %v256_v26 = vld [vmem:[%s4169_s11 + $0x116] sm:$0x3]  ;;  %v257_v19 = vld [vmem:[%s4169_s11 + $0x118] sm:$0x3] }
  0xfc   : > { %v1313_v55 = vmax.f32 %v1311_v23, %v1312_v6  ;;  %v1320_v54 = vmax.f32 %v1318_v27, %v1319_v8  ;;  %v1327_v52 = vmax.f32 %v1325_v43, %v1326_v51  ;;  %v1333_v13 = vrot.slane %v1332_v33, 2  ;;  %v258_v29 = vld [vmem:[%s4169_s11 + $0x11a] sm:$0x3]  ;;  %v259_v30 = vld [vmem:[%s4169_s11 + $0x11c] sm:$0x3] }
  0xfd   : > { %v1340_v34 = vrot.slane %v1339_v10, 2  ;;  %v1347_v2 = vrot.slane %v1346_v48, 2  ;;  %v1354_v31 = vrot.slane %v1353_v40, 2  ;;  %v1307_v46 = vrot.slane %v1306_v50, 1 }
  0xfe   : > { %v1314_v53 = vrot.slane %v1313_v55, 1  ;;  %v1321_v44 = vrot.slane %v1320_v54, 1  ;;  %v1328_v42 = vrot.slane %v1327_v52, 1  ;;  %v1334_v18 = vmax.f32 %v1332_v33, %v1333_v13  ;;  %v260_v13 = vld [vmem:[%s4169_s11 + $0x11e] sm:$0x3] }
  0xff   : > { %v4886_v6 = vmax.f32 %v1339_v10, %v1340_v34  ;;  %v4888_v51 = vmax.f32 %v1346_v48, %v1347_v2  ;;  %v4890_v8 = vmax.f32 %v1353_v40, %v1354_v31  ;;  %v4894_v32 = vmax.f32 %v4842_v49, %v1286_v1 }
 0x100   : > { %v4897_v23 = vmax.f32 %v4844_v24, %v1293_v39  ;;  %v4900_v27 = vmax.f32 %v4846_v56, %v1300_v47  ;;  %v4902_v43 = vmax.f32 %v1306_v50, %v1307_v46  ;;  %v4906_v10 = vmax.f32 %v1313_v55, %v1314_v53 }
 0x101   : > { %8218 = vst [vmem:[#allocation105_spill] sm:$0xff] %v4894_v32  ;;  %v4908_v33 = vmax.f32 %v1320_v54, %v1321_v44  ;;  %v4910_v48 = vmax.f32 %v1327_v52, %v1328_v42  ;;  %v1335_v40 = vrot.slane %v1334_v18, 1  ;;  %v1358_v49 = vsel %vm405_vm0, %v253_v28, -inf }
 0x102   : > { %8219 = vst [vmem:[#allocation106_spill] sm:$0xff] %v4897_v23  ;;  %8220 = vst [vmem:[#allocation107_spill] sm:$0xff] %v4900_v27  ;;  %v1365_v24 = vsel %vm405_vm0, %v254_v45, -inf  ;;  %v1372_v1 = vsel %vm405_vm0, %v255_v11, -inf  ;;  %v1379_v56 = vsel %vm405_vm0, %v256_v26, -inf  ;;  %v1342_v39 = vrot.slane %v4886_v6, 1 }
 0x103   : > { %8221 = vst [vmem:[#allocation108_spill] sm:$0xff] %v4902_v43  ;;  %8222 = vst [vmem:[#allocation109_spill] sm:$0xff] %v4906_v10  ;;  %v4917_v46 = vmax.f32 %v1334_v18, %v1335_v40  ;;  %v1349_v53 = vrot.slane %v4888_v51, 1  ;;  %v1356_v47 = vrot.slane %v4890_v8, 1  ;;  %v1359_v50 = vrot.slane %v1358_v49, 4 }
 0x104   : > { %8223 = vst [vmem:[#allocation110_spill] sm:$0xff] %v4908_v33  ;;  %8224 = vst [vmem:[#allocation111_spill] sm:$0xff] %v4910_v48  ;;  %v1366_v55 = vrot.slane %v1365_v24, 4  ;;  %v1373_v54 = vrot.slane %v1372_v1, 4  ;;  %v1380_v52 = vrot.slane %v1379_v56, 4  ;;  %v1386_v34 = vsel %vm405_vm0, %v257_v19, -inf }
 0x105   : > { %8225 = vst [vmem:[#allocation112_spill] sm:$0xff] %v4917_v46  ;;  %v1393_v2 = vsel %vm405_vm0, %v258_v29, -inf  ;;  %v1400_v31 = vsel %vm405_vm0, %v259_v30, -inf  ;;  %v1407_v28 = vsel %vm405_vm0, %v260_v13, -inf  ;;  %v1360_v44 = vmax.f32 %v1358_v49, %v1359_v50 }
 0x106   : > { %v1367_v42 = vmax.f32 %v1365_v24, %v1366_v55  ;;  %v1374_v45 = vmax.f32 %v1372_v1, %v1373_v54  ;;  %v1381_v11 = vmax.f32 %v1379_v56, %v1380_v52  ;;  %v1387_v26 = vrot.slane %v1386_v34, 4  ;;  %v261_v52 = vld [vmem:[%s4169_s11 + $0x120] sm:$0x3] }
 0x107   : > { %v1394_v18 = vrot.slane %v1393_v2, 4  ;;  %v1401_v40 = vrot.slane %v1400_v31, 4  ;;  %v1408_v48 = vrot.slane %v1407_v28, 4  ;;  %v1361_v33 = vrot.slane %v1360_v44, 2 }
 0x108   : > { %v1368_v10 = vrot.slane %v1367_v42, 2  ;;  %v1375_v43 = vrot.slane %v1374_v45, 2  ;;  %v1382_v27 = vrot.slane %v1381_v11, 2  ;;  %v1388_v19 = vmax.f32 %v1386_v34, %v1387_v26  ;;  %v263_v26 = vld [vmem:[%s4169_s11 + $0x124] sm:$0x3] }
 0x109   : > { %v1395_v23 = vmax.f32 %v1393_v2, %v1394_v18  ;;  %v1402_v29 = vmax.f32 %v1400_v31, %v1401_v40  ;;  %v1409_v30 = vmax.f32 %v1407_v28, %v1408_v48  ;;  %v1362_v13 = vmax.f32 %v1360_v44, %v1361_v33  ;;  %v262_v31 = vld [vmem:[%s4169_s11 + $0x122] sm:$0x3]  ;;  %v264_v48 = vld [vmem:[%s4169_s11 + $0x126] sm:$0x3]  ;;  %v265_v28 = vld [vmem:[%s4169_s11 + $0x128] sm:$0x3] }
 0x10a   : > { %v1369_v49 = vmax.f32 %v1367_v42, %v1368_v10  ;;  %v1376_v24 = vmax.f32 %v1374_v45, %v1375_v43  ;;  %v1383_v1 = vmax.f32 %v1381_v11, %v1382_v27  ;;  %v1389_v56 = vrot.slane %v1388_v19, 2  ;;  %v266_v18 = vld [vmem:[%s4169_s11 + $0x12a] sm:$0x3]  ;;  %v267_v40 = vld [vmem:[%s4169_s11 + $0x12c] sm:$0x3] }
 0x10b   : > { %v1396_v50 = vrot.slane %v1395_v23, 2  ;;  %v1403_v55 = vrot.slane %v1402_v29, 2  ;;  %v1410_v54 = vrot.slane %v1409_v30, 2  ;;  %v1363_v32 = vrot.slane %v1362_v13, 1 }
 0x10c   : > { %v1370_v46 = vrot.slane %v1369_v49, 1  ;;  %v1377_v34 = vrot.slane %v1376_v24, 1  ;;  %v1384_v2 = vrot.slane %v1383_v1, 1  ;;  %v1390_v33 = vmax.f32 %v1388_v19, %v1389_v56  ;;  %v268_v56 = vld [vmem:[%s4169_s11 + $0x12e] sm:$0x3] }
 0x10d   : > { %v4930_v10 = vmax.f32 %v1395_v23, %v1396_v50  ;;  %v4932_v27 = vmax.f32 %v1402_v29, %v1403_v55  ;;  %v4934_v43 = vmax.f32 %v1409_v30, %v1410_v54  ;;  %v4938_v44 = vmax.f32 %v4886_v6, %v1342_v39 }
 0x10e   : > { %v4941_v42 = vmax.f32 %v4888_v51, %v1349_v53  ;;  %v4944_v45 = vmax.f32 %v4890_v8, %v1356_v47  ;;  %v4946_v11 = vmax.f32 %v1362_v13, %v1363_v32  ;;  %v4950_v23 = vmax.f32 %v1369_v49, %v1370_v46 }
 0x10f   : > { %8226 = vst [vmem:[#allocation113_spill] sm:$0xff] %v4938_v44  ;;  %v4952_v19 = vmax.f32 %v1376_v24, %v1377_v34  ;;  %v4954_v29 = vmax.f32 %v1383_v1, %v1384_v2  ;;  %v1391_v30 = vrot.slane %v1390_v33, 1  ;;  %v1414_v6 = vsel %vm405_vm0, %v261_v52, -inf }
 0x110   : > { %8227 = vst [vmem:[#allocation114_spill] sm:$0xff] %v4941_v42  ;;  %8228 = vst [vmem:[#allocation115_spill] sm:$0xff] %v4944_v45  ;;  %v1421_v51 = vsel %vm405_vm0, %v262_v31, -inf  ;;  %v1428_v39 = vsel %vm405_vm0, %v263_v26, -inf  ;;  %v1435_v8 = vsel %vm405_vm0, %v264_v48, -inf  ;;  %v1398_v53 = vrot.slane %v4930_v10, 1 }
 0x111   : > { %8229 = vst [vmem:[#allocation116_spill] sm:$0xff] %v4946_v11  ;;  %8230 = vst [vmem:[#allocation117_spill] sm:$0xff] %v4950_v23  ;;  %v4961_v32 = vmax.f32 %v1390_v33, %v1391_v30  ;;  %v1405_v46 = vrot.slane %v4932_v27, 1  ;;  %v1412_v47 = vrot.slane %v4934_v43, 1  ;;  %v1415_v13 = vrot.slane %v1414_v6, 4 }
 0x112   : > { %8231 = vst [vmem:[#allocation118_spill] sm:$0xff] %v4952_v19  ;;  %8232 = vst [vmem:[#allocation119_spill] sm:$0xff] %v4954_v29  ;;  %v1422_v49 = vrot.slane %v1421_v51, 4  ;;  %v1429_v24 = vrot.slane %v1428_v39, 4  ;;  %v1436_v1 = vrot.slane %v1435_v8, 4  ;;  %v1442_v50 = vsel %vm405_vm0, %v265_v28, -inf }
 0x113   : > { %8233 = vst [vmem:[#allocation120_spill] sm:$0xff] %v4961_v32  ;;  %v1449_v55 = vsel %vm405_vm0, %v266_v18, -inf  ;;  %v1456_v54 = vsel %vm405_vm0, %v267_v40, -inf  ;;  %v1463_v52 = vsel %vm405_vm0, %v268_v56, -inf  ;;  %v1416_v34 = vmax.f32 %v1414_v6, %v1415_v13 }
 0x114   : > { %v1423_v2 = vmax.f32 %v1421_v51, %v1422_v49  ;;  %v1430_v31 = vmax.f32 %v1428_v39, %v1429_v24  ;;  %v1437_v26 = vmax.f32 %v1435_v8, %v1436_v1  ;;  %v1443_v48 = vrot.slane %v1442_v50, 4  ;;  %v269_v1 = vld [vmem:[%s4169_s11 + $0x130] sm:$0x3] }
 0x115   : > { %v1450_v33 = vrot.slane %v1449_v55, 4  ;;  %v1457_v30 = vrot.slane %v1456_v54, 4  ;;  %v1464_v32 = vrot.slane %v1463_v52, 4  ;;  %v1417_v29 = vrot.slane %v1416_v34, 2 }
 0x116   : > { %v1424_v19 = vrot.slane %v1423_v2, 2  ;;  %v1431_v23 = vrot.slane %v1430_v31, 2  ;;  %v1438_v11 = vrot.slane %v1437_v26, 2  ;;  %v1444_v28 = vmax.f32 %v1442_v50, %v1443_v48  ;;  %v271_v48 = vld [vmem:[%s4169_s11 + $0x134] sm:$0x3] }
 0x117   : > { %v1451_v45 = vmax.f32 %v1449_v55, %v1450_v33  ;;  %v1458_v18 = vmax.f32 %v1456_v54, %v1457_v30  ;;  %v1465_v40 = vmax.f32 %v1463_v52, %v1464_v32  ;;  %v1418_v56 = vmax.f32 %v1416_v34, %v1417_v29  ;;  %v270_v54 = vld [vmem:[%s4169_s11 + $0x132] sm:$0x3]  ;;  %v272_v32 = vld [vmem:[%s4169_s11 + $0x136] sm:$0x3]  ;;  %v273_v52 = vld [vmem:[%s4169_s11 + $0x138] sm:$0x3] }
 0x118   : > { %v1425_v6 = vmax.f32 %v1423_v2, %v1424_v19  ;;  %v1432_v51 = vmax.f32 %v1430_v31, %v1431_v23  ;;  %v1439_v39 = vmax.f32 %v1437_v26, %v1438_v11  ;;  %v1445_v8 = vrot.slane %v1444_v28, 2  ;;  %v274_v33 = vld [vmem:[%s4169_s11 + $0x13a] sm:$0x3]  ;;  %v275_v30 = vld [vmem:[%s4169_s11 + $0x13c] sm:$0x3] }
 0x119   : > { %v1452_v13 = vrot.slane %v1451_v45, 2  ;;  %v1459_v49 = vrot.slane %v1458_v18, 2  ;;  %v1466_v24 = vrot.slane %v1465_v40, 2  ;;  %v1419_v42 = vrot.slane %v1418_v56, 1 }
 0x11a   : > { %v1426_v44 = vrot.slane %v1425_v6, 1  ;;  %v1433_v50 = vrot.slane %v1432_v51, 1  ;;  %v1440_v55 = vrot.slane %v1439_v39, 1  ;;  %v1446_v29 = vmax.f32 %v1444_v28, %v1445_v8  ;;  %v276_v8 = vld [vmem:[%s4169_s11 + $0x13e] sm:$0x3] }
 0x11b   : > { %v4974_v19 = vmax.f32 %v1451_v45, %v1452_v13  ;;  %v4976_v11 = vmax.f32 %v1458_v18, %v1459_v49  ;;  %v4978_v23 = vmax.f32 %v1465_v40, %v1466_v24  ;;  %v4982_v34 = vmax.f32 %v4930_v10, %v1398_v53 }
 0x11c   : > { %v4985_v2 = vmax.f32 %v4932_v27, %v1405_v46  ;;  %v4988_v31 = vmax.f32 %v4934_v43, %v1412_v47  ;;  %v4990_v26 = vmax.f32 %v1418_v56, %v1419_v42  ;;  %v4994_v45 = vmax.f32 %v1425_v6, %v1426_v44 }
 0x11d   : > { %8234 = vst [vmem:[#allocation121_spill] sm:$0xff] %v4982_v34  ;;  %v4996_v28 = vmax.f32 %v1432_v51, %v1433_v50  ;;  %v4998_v18 = vmax.f32 %v1439_v39, %v1440_v55  ;;  %v1447_v40 = vrot.slane %v1446_v29, 1  ;;  %v1470_v10 = vsel %vm405_vm0, %v269_v1, -inf }
 0x11e   : > { %8235 = vst [vmem:[#allocation122_spill] sm:$0xff] %v4985_v2  ;;  %8236 = vst [vmem:[#allocation123_spill] sm:$0xff] %v4988_v31  ;;  %v1477_v27 = vsel %vm405_vm0, %v270_v54, -inf  ;;  %v1484_v53 = vsel %vm405_vm0, %v271_v48, -inf  ;;  %v1491_v43 = vsel %vm405_vm0, %v272_v32, -inf  ;;  %v1454_v46 = vrot.slane %v4974_v19, 1 }
 0x11f   : > { %8237 = vst [vmem:[#allocation124_spill] sm:$0xff] %v4990_v26  ;;  %8238 = vst [vmem:[#allocation125_spill] sm:$0xff] %v4994_v45  ;;  %v5005_v42 = vmax.f32 %v1446_v29, %v1447_v40  ;;  %v1461_v44 = vrot.slane %v4976_v11, 1  ;;  %v1468_v47 = vrot.slane %v4978_v23, 1  ;;  %v1471_v56 = vrot.slane %v1470_v10, 4 }
 0x120   : > { %8239 = vst [vmem:[#allocation126_spill] sm:$0xff] %v4996_v28  ;;  %8240 = vst [vmem:[#allocation127_spill] sm:$0xff] %v4998_v18  ;;  %v1478_v6 = vrot.slane %v1477_v27, 4  ;;  %v1485_v51 = vrot.slane %v1484_v53, 4  ;;  %v1492_v39 = vrot.slane %v1491_v43, 4  ;;  %v1498_v13 = vsel %vm405_vm0, %v273_v52, -inf }
 0x121   : > { %8241 = vst [vmem:[#allocation128_spill] sm:$0xff] %v5005_v42  ;;  %v1505_v49 = vsel %vm405_vm0, %v274_v33, -inf  ;;  %v1512_v24 = vsel %vm405_vm0, %v275_v30, -inf  ;;  %v1519_v1 = vsel %vm405_vm0, %v276_v8, -inf  ;;  %v1472_v50 = vmax.f32 %v1470_v10, %v1471_v56 }
 0x122   : > { %v1479_v55 = vmax.f32 %v1477_v27, %v1478_v6  ;;  %v1486_v54 = vmax.f32 %v1484_v53, %v1485_v51  ;;  %v1493_v48 = vmax.f32 %v1491_v43, %v1492_v39  ;;  %v1499_v32 = vrot.slane %v1498_v13, 4  ;;  %v277_v39 = vld [vmem:[%s4169_s11 + $0x140] sm:$0x3] }
 0x123   : > { %v1506_v29 = vrot.slane %v1505_v49, 4  ;;  %v1513_v40 = vrot.slane %v1512_v24, 4  ;;  %v1520_v42 = vrot.slane %v1519_v1, 4  ;;  %v1473_v18 = vrot.slane %v1472_v50, 2 }
 0x124   : > { %v1480_v28 = vrot.slane %v1479_v55, 2  ;;  %v1487_v45 = vrot.slane %v1486_v54, 2  ;;  %v1494_v26 = vrot.slane %v1493_v48, 2  ;;  %v1500_v52 = vmax.f32 %v1498_v13, %v1499_v32  ;;  %v279_v32 = vld [vmem:[%s4169_s11 + $0x144] sm:$0x3] }
 0x125   : > { %v1507_v31 = vmax.f32 %v1505_v49, %v1506_v29  ;;  %v1514_v33 = vmax.f32 %v1512_v24, %v1513_v40  ;;  %v1521_v30 = vmax.f32 %v1519_v1, %v1520_v42  ;;  %v1474_v8 = vmax.f32 %v1472_v50, %v1473_v18  ;;  %v278_v24 = vld [vmem:[%s4169_s11 + $0x142] sm:$0x3]  ;;  %v280_v42 = vld [vmem:[%s4169_s11 + $0x146] sm:$0x3]  ;;  %v281_v1 = vld [vmem:[%s4169_s11 + $0x148] sm:$0x3] }
 0x126   : > { %v1481_v10 = vmax.f32 %v1479_v55, %v1480_v28  ;;  %v1488_v27 = vmax.f32 %v1486_v54, %v1487_v45  ;;  %v1495_v53 = vmax.f32 %v1493_v48, %v1494_v26  ;;  %v1501_v43 = vrot.slane %v1500_v52, 2  ;;  %v282_v29 = vld [vmem:[%s4169_s11 + $0x14a] sm:$0x3]  ;;  %v283_v40 = vld [vmem:[%s4169_s11 + $0x14c] sm:$0x3] }
 0x127   : > { %v1508_v56 = vrot.slane %v1507_v31, 2  ;;  %v1515_v6 = vrot.slane %v1514_v33, 2  ;;  %v1522_v51 = vrot.slane %v1521_v30, 2  ;;  %v1475_v2 = vrot.slane %v1474_v8, 1 }
 0x128   : > { %v1482_v34 = vrot.slane %v1481_v10, 1  ;;  %v1489_v13 = vrot.slane %v1488_v27, 1  ;;  %v1496_v49 = vrot.slane %v1495_v53, 1  ;;  %v1502_v18 = vmax.f32 %v1500_v52, %v1501_v43  ;;  %v284_v43 = vld [vmem:[%s4169_s11 + $0x14e] sm:$0x3] }
 0x129   : > { %v5018_v28 = vmax.f32 %v1507_v31, %v1508_v56  ;;  %v5020_v26 = vmax.f32 %v1514_v33, %v1515_v6  ;;  %v5022_v45 = vmax.f32 %v1521_v30, %v1522_v51  ;;  %v5026_v50 = vmax.f32 %v4974_v19, %v1454_v46 }
 0x12a   : > { %v5029_v55 = vmax.f32 %v4976_v11, %v1461_v44  ;;  %v5032_v54 = vmax.f32 %v4978_v23, %v1468_v47  ;;  %v5034_v48 = vmax.f32 %v1474_v8, %v1475_v2  ;;  %v5038_v31 = vmax.f32 %v1481_v10, %v1482_v34 }
 0x12b   : > { %8242 = vst [vmem:[#allocation129_spill] sm:$0xff] %v5026_v50  ;;  %v5040_v52 = vmax.f32 %v1488_v27, %v1489_v13  ;;  %v5042_v33 = vmax.f32 %v1495_v53, %v1496_v49  ;;  %v1503_v30 = vrot.slane %v1502_v18, 1  ;;  %v1526_v19 = vsel %vm405_vm0, %v277_v39, -inf }
 0x12c   : > { %8243 = vst [vmem:[#allocation130_spill] sm:$0xff] %v5029_v55  ;;  %8244 = vst [vmem:[#allocation131_spill] sm:$0xff] %v5032_v54  ;;  %v1533_v11 = vsel %vm405_vm0, %v278_v24, -inf  ;;  %v1540_v46 = vsel %vm405_vm0, %v279_v32, -inf  ;;  %v1547_v23 = vsel %vm405_vm0, %v280_v42, -inf  ;;  %v1510_v44 = vrot.slane %v5018_v28, 1 }
 0x12d   : > { %8245 = vst [vmem:[#allocation132_spill] sm:$0xff] %v5034_v48  ;;  %8246 = vst [vmem:[#allocation133_spill] sm:$0xff] %v5038_v31  ;;  %v5049_v2 = vmax.f32 %v1502_v18, %v1503_v30  ;;  %v1517_v34 = vrot.slane %v5020_v26, 1  ;;  %v1524_v47 = vrot.slane %v5022_v45, 1  ;;  %v1527_v8 = vrot.slane %v1526_v19, 4 }
 0x12e   : > { %8247 = vst [vmem:[#allocation134_spill] sm:$0xff] %v5040_v52  ;;  %8248 = vst [vmem:[#allocation135_spill] sm:$0xff] %v5042_v33  ;;  %v1534_v10 = vrot.slane %v1533_v11, 4  ;;  %v1541_v27 = vrot.slane %v1540_v46, 4  ;;  %v1548_v53 = vrot.slane %v1547_v23, 4  ;;  %v1554_v56 = vsel %vm405_vm0, %v281_v1, -inf }
 0x12f   : > { %8249 = vst [vmem:[#allocation136_spill] sm:$0xff] %v5049_v2  ;;  %v1561_v6 = vsel %vm405_vm0, %v282_v29, -inf  ;;  %v1568_v51 = vsel %vm405_vm0, %v283_v40, -inf  ;;  %v1575_v39 = vsel %vm405_vm0, %v284_v43, -inf  ;;  %v1528_v13 = vmax.f32 %v1526_v19, %v1527_v8 }
 0x130   : > { %v1535_v49 = vmax.f32 %v1533_v11, %v1534_v10  ;;  %v1542_v24 = vmax.f32 %v1540_v46, %v1541_v27  ;;  %v1549_v32 = vmax.f32 %v1547_v23, %v1548_v53  ;;  %v1555_v42 = vrot.slane %v1554_v56, 4  ;;  %v285_v53 = vld [vmem:[%s4169_s11 + $0x150] sm:$0x3] }
 0x131   : > { %v1562_v18 = vrot.slane %v1561_v6, 4  ;;  %v1569_v30 = vrot.slane %v1568_v51, 4  ;;  %v1576_v33 = vrot.slane %v1575_v39, 4  ;;  %v1529_v52 = vrot.slane %v1528_v13, 2 }
 0x132   : > { %v1536_v31 = vrot.slane %v1535_v49, 2  ;;  %v1543_v48 = vrot.slane %v1542_v24, 2  ;;  %v1550_v54 = vrot.slane %v1549_v32, 2  ;;  %v1556_v1 = vmax.f32 %v1554_v56, %v1555_v42  ;;  %v287_v42 = vld [vmem:[%s4169_s11 + $0x154] sm:$0x3] }
 0x133   : > { %v1563_v55 = vmax.f32 %v1561_v6, %v1562_v18  ;;  %v1570_v29 = vmax.f32 %v1568_v51, %v1569_v30  ;;  %v1577_v40 = vmax.f32 %v1575_v39, %v1576_v33  ;;  %v1530_v43 = vmax.f32 %v1528_v13, %v1529_v52  ;;  %v286_v51 = vld [vmem:[%s4169_s11 + $0x152] sm:$0x3]  ;;  %v288_v33 = vld [vmem:[%s4169_s11 + $0x156] sm:$0x3]  ;;  %v289_v39 = vld [vmem:[%s4169_s11 + $0x158] sm:$0x3] }
 0x134   : > { %v1537_v19 = vmax.f32 %v1535_v49, %v1536_v31  ;;  %v1544_v11 = vmax.f32 %v1542_v24, %v1543_v48  ;;  %v1551_v46 = vmax.f32 %v1549_v32, %v1550_v54  ;;  %v1557_v23 = vrot.slane %v1556_v1, 2  ;;  %v290_v18 = vld [vmem:[%s4169_s11 + $0x15a] sm:$0x3]  ;;  %v291_v30 = vld [vmem:[%s4169_s11 + $0x15c] sm:$0x3] }
 0x135   : > { %v1564_v8 = vrot.slane %v1563_v55, 2  ;;  %v1571_v10 = vrot.slane %v1570_v29, 2  ;;  %v1578_v27 = vrot.slane %v1577_v40, 2  ;;  %v1531_v50 = vrot.slane %v1530_v43, 1 }
 0x136   : > { %v1538_v2 = vrot.slane %v1537_v19, 1  ;;  %v1545_v56 = vrot.slane %v1544_v11, 1  ;;  %v1552_v6 = vrot.slane %v1551_v46, 1  ;;  %v1558_v52 = vmax.f32 %v1556_v1, %v1557_v23  ;;  %v292_v23 = vld [vmem:[%s4169_s11 + $0x15e] sm:$0x3] }
 0x137   : > { %v5062_v31 = vmax.f32 %v1563_v55, %v1564_v8  ;;  %v5064_v54 = vmax.f32 %v1570_v29, %v1571_v10  ;;  %v5066_v48 = vmax.f32 %v1577_v40, %v1578_v27  ;;  %v5070_v13 = vmax.f32 %v5018_v28, %v1510_v44 }
 0x138   : > { %v5073_v49 = vmax.f32 %v5020_v26, %v1517_v34  ;;  %v5076_v24 = vmax.f32 %v5022_v45, %v1524_v47  ;;  %v5078_v32 = vmax.f32 %v1530_v43, %v1531_v50  ;;  %v5082_v55 = vmax.f32 %v1537_v19, %v1538_v2 }
 0x139   : > { %8250 = vst [vmem:[#allocation137_spill] sm:$0xff] %v5070_v13  ;;  %v5084_v1 = vmax.f32 %v1544_v11, %v1545_v56  ;;  %v5086_v29 = vmax.f32 %v1551_v46, %v1552_v6  ;;  %v1559_v40 = vrot.slane %v1558_v52, 1  ;;  %v1582_v28 = vsel %vm405_vm0, %v285_v53, -inf }
 0x13a   : > { %8251 = vst [vmem:[#allocation138_spill] sm:$0xff] %v5073_v49  ;;  %8252 = vst [vmem:[#allocation139_spill] sm:$0xff] %v5076_v24  ;;  %v1589_v26 = vsel %vm405_vm0, %v286_v51, -inf  ;;  %v1596_v44 = vsel %vm405_vm0, %v287_v42, -inf  ;;  %v1603_v45 = vsel %vm405_vm0, %v288_v33, -inf  ;;  %v1566_v34 = vrot.slane %v5062_v31, 1 }
 0x13b   : > { %8253 = vst [vmem:[#allocation140_spill] sm:$0xff] %v5078_v32  ;;  %8254 = vst [vmem:[#allocation141_spill] sm:$0xff] %v5082_v55  ;;  %v5093_v50 = vmax.f32 %v1558_v52, %v1559_v40  ;;  %v1573_v2 = vrot.slane %v5064_v54, 1  ;;  %v1580_v47 = vrot.slane %v5066_v48, 1  ;;  %v1583_v43 = vrot.slane %v1582_v28, 4 }
 0x13c   : > { %8255 = vst [vmem:[#allocation142_spill] sm:$0xff] %v5084_v1  ;;  %8256 = vst [vmem:[#allocation143_spill] sm:$0xff] %v5086_v29  ;;  %v1590_v19 = vrot.slane %v1589_v26, 4  ;;  %v1597_v11 = vrot.slane %v1596_v44, 4  ;;  %v1604_v46 = vrot.slane %v1603_v45, 4  ;;  %v1610_v8 = vsel %vm405_vm0, %v289_v39, -inf }
 0x13d   : > { %8257 = vst [vmem:[#allocation144_spill] sm:$0xff] %v5093_v50  ;;  %v1617_v10 = vsel %vm405_vm0, %v290_v18, -inf  ;;  %v1624_v27 = vsel %vm405_vm0, %v291_v30, -inf  ;;  %v1631_v53 = vsel %vm405_vm0, %v292_v23, -inf  ;;  %v1584_v56 = vmax.f32 %v1582_v28, %v1583_v43 }
 0x13e   : > { %v1591_v6 = vmax.f32 %v1589_v26, %v1590_v19  ;;  %v1598_v51 = vmax.f32 %v1596_v44, %v1597_v11  ;;  %v1605_v42 = vmax.f32 %v1603_v45, %v1604_v46  ;;  %v1611_v33 = vrot.slane %v1610_v8, 4  ;;  %v293_v46 = vld [vmem:[%s4169_s11 + $0x160] sm:$0x3] }
 0x13f   : > { %v1618_v52 = vrot.slane %v1617_v10, 4  ;;  %v1625_v40 = vrot.slane %v1624_v27, 4  ;;  %v1632_v50 = vrot.slane %v1631_v53, 4  ;;  %v1585_v29 = vrot.slane %v1584_v56, 2 }
 0x140   : > { %v1592_v1 = vrot.slane %v1591_v6, 2  ;;  %v1599_v55 = vrot.slane %v1598_v51, 2  ;;  %v1606_v32 = vrot.slane %v1605_v42, 2  ;;  %v1612_v39 = vmax.f32 %v1610_v8, %v1611_v33  ;;  %v295_v33 = vld [vmem:[%s4169_s11 + $0x164] sm:$0x3] }
 0x141   : > { %v1619_v24 = vmax.f32 %v1617_v10, %v1618_v52  ;;  %v1626_v18 = vmax.f32 %v1624_v27, %v1625_v40  ;;  %v1633_v30 = vmax.f32 %v1631_v53, %v1632_v50  ;;  %v1586_v23 = vmax.f32 %v1584_v56, %v1585_v29  ;;  %v294_v27 = vld [vmem:[%s4169_s11 + $0x162] sm:$0x3]  ;;  %v296_v50 = vld [vmem:[%s4169_s11 + $0x166] sm:$0x3]  ;;  %v297_v53 = vld [vmem:[%s4169_s11 + $0x168] sm:$0x3] }
 0x142   : > { %v1593_v28 = vmax.f32 %v1591_v6, %v1592_v1  ;;  %v1600_v26 = vmax.f32 %v1598_v51, %v1599_v55  ;;  %v1607_v44 = vmax.f32 %v1605_v42, %v1606_v32  ;;  %v1613_v45 = vrot.slane %v1612_v39, 2  ;;  %v298_v52 = vld [vmem:[%s4169_s11 + $0x16a] sm:$0x3]  ;;  %v299_v40 = vld [vmem:[%s4169_s11 + $0x16c] sm:$0x3] }
 0x143   : > { %v1620_v43 = vrot.slane %v1619_v24, 2  ;;  %v1627_v19 = vrot.slane %v1626_v18, 2  ;;  %v1634_v11 = vrot.slane %v1633_v30, 2  ;;  %v1587_v49 = vrot.slane %v1586_v23, 1 }
 0x144   : > { %v1594_v13 = vrot.slane %v1593_v28, 1  ;;  %v1601_v8 = vrot.slane %v1600_v26, 1  ;;  %v1608_v10 = vrot.slane %v1607_v44, 1  ;;  %v1614_v29 = vmax.f32 %v1612_v39, %v1613_v45  ;;  %v300_v45 = vld [vmem:[%s4169_s11 + $0x16e] sm:$0x3] }
 0x145   : > { %v5106_v1 = vmax.f32 %v1619_v24, %v1620_v43  ;;  %v5108_v32 = vmax.f32 %v1626_v18, %v1627_v19  ;;  %v5110_v55 = vmax.f32 %v1633_v30, %v1634_v11  ;;  %v5114_v56 = vmax.f32 %v5062_v31, %v1566_v34 }
 0x146   : > { %v5117_v6 = vmax.f32 %v5064_v54, %v1573_v2  ;;  %v5120_v51 = vmax.f32 %v5066_v48, %v1580_v47  ;;  %v5122_v42 = vmax.f32 %v1586_v23, %v1587_v49  ;;  %v5126_v24 = vmax.f32 %v1593_v28, %v1594_v13 }
 0x147   : > { %8258 = vst [vmem:[#allocation145_spill] sm:$0xff] %v5114_v56  ;;  %v5128_v39 = vmax.f32 %v1600_v26, %v1601_v8  ;;  %v5130_v18 = vmax.f32 %v1607_v44, %v1608_v10  ;;  %v1615_v30 = vrot.slane %v1614_v29, 1  ;;  %v1638_v31 = vsel %vm405_vm0, %v293_v46, -inf }
 0x148   : > { %8259 = vst [vmem:[#allocation146_spill] sm:$0xff] %v5117_v6  ;;  %8260 = vst [vmem:[#allocation147_spill] sm:$0xff] %v5120_v51  ;;  %v1645_v54 = vsel %vm405_vm0, %v294_v27, -inf  ;;  %v1652_v34 = vsel %vm405_vm0, %v295_v33, -inf  ;;  %v1659_v48 = vsel %vm405_vm0, %v296_v50, -inf  ;;  %v1622_v2 = vrot.slane %v5106_v1, 1 }
 0x149   : > { %8261 = vst [vmem:[#allocation148_spill] sm:$0xff] %v5122_v42  ;;  %8262 = vst [vmem:[#allocation149_spill] sm:$0xff] %v5126_v24  ;;  %v5137_v49 = vmax.f32 %v1614_v29, %v1615_v30  ;;  %v1629_v13 = vrot.slane %v5108_v32, 1  ;;  %v1636_v47 = vrot.slane %v5110_v55, 1  ;;  %v1639_v23 = vrot.slane %v1638_v31, 4 }
 0x14a   : > { %8263 = vst [vmem:[#allocation150_spill] sm:$0xff] %v5128_v39  ;;  %8264 = vst [vmem:[#allocation151_spill] sm:$0xff] %v5130_v18  ;;  %v1646_v28 = vrot.slane %v1645_v54, 4  ;;  %v1653_v26 = vrot.slane %v1652_v34, 4  ;;  %v1660_v44 = vrot.slane %v1659_v48, 4  ;;  %v1666_v43 = vsel %vm405_vm0, %v297_v53, -inf }
 0x14b   : > { %8265 = vst [vmem:[#allocation152_spill] sm:$0xff] %v5137_v49  ;;  %v1673_v19 = vsel %vm405_vm0, %v298_v52, -inf  ;;  %v1680_v11 = vsel %vm405_vm0, %v299_v40, -inf  ;;  %v1687_v46 = vsel %vm405_vm0, %v300_v45, -inf  ;;  %v1640_v8 = vmax.f32 %v1638_v31, %v1639_v23 }
 0x14c   : > { %v1647_v10 = vmax.f32 %v1645_v54, %v1646_v28  ;;  %v1654_v27 = vmax.f32 %v1652_v34, %v1653_v26  ;;  %v1661_v33 = vmax.f32 %v1659_v48, %v1660_v44  ;;  %v1667_v50 = vrot.slane %v1666_v43, 4  ;;  %v301_v44 = vld [vmem:[%s4169_s11 + $0x170] sm:$0x3] }
 0x14d   : > { %v1674_v29 = vrot.slane %v1673_v19, 4  ;;  %v1681_v30 = vrot.slane %v1680_v11, 4  ;;  %v1688_v49 = vrot.slane %v1687_v46, 4  ;;  %v1641_v18 = vrot.slane %v1640_v8, 2 }
 0x14e   : > { %v1648_v39 = vrot.slane %v1647_v10, 2  ;;  %v1655_v24 = vrot.slane %v1654_v27, 2  ;;  %v1662_v42 = vrot.slane %v1661_v33, 2  ;;  %v1668_v53 = vmax.f32 %v1666_v43, %v1667_v50  ;;  %v303_v50 = vld [vmem:[%s4169_s11 + $0x174] sm:$0x3] }
 0x14f   : > { %v1675_v51 = vmax.f32 %v1673_v19, %v1674_v29  ;;  %v1682_v52 = vmax.f32 %v1680_v11, %v1681_v30  ;;  %v1689_v40 = vmax.f32 %v1687_v46, %v1688_v49  ;;  %v1642_v45 = vmax.f32 %v1640_v8, %v1641_v18  ;;  %v302_v11 = vld [vmem:[%s4169_s11 + $0x172] sm:$0x3]  ;;  %v304_v49 = vld [vmem:[%s4169_s11 + $0x176] sm:$0x3]  ;;  %v305_v46 = vld [vmem:[%s4169_s11 + $0x178] sm:$0x3] }
 0x150   : > { %v1649_v31 = vmax.f32 %v1647_v10, %v1648_v39  ;;  %v1656_v54 = vmax.f32 %v1654_v27, %v1655_v24  ;;  %v1663_v34 = vmax.f32 %v1661_v33, %v1662_v42  ;;  %v1669_v48 = vrot.slane %v1668_v53, 2  ;;  %v306_v29 = vld [vmem:[%s4169_s11 + $0x17a] sm:$0x3]  ;;  %v307_v30 = vld [vmem:[%s4169_s11 + $0x17c] sm:$0x3] }
 0x151   : > { %v1676_v23 = vrot.slane %v1675_v51, 2  ;;  %v1683_v28 = vrot.slane %v1682_v52, 2  ;;  %v1690_v26 = vrot.slane %v1689_v40, 2  ;;  %v1643_v6 = vrot.slane %v1642_v45, 1 }
 0x152   : > { %v1650_v56 = vrot.slane %v1649_v31, 1  ;;  %v1657_v43 = vrot.slane %v1656_v54, 1  ;;  %v1664_v19 = vrot.slane %v1663_v34, 1  ;;  %v1670_v18 = vmax.f32 %v1668_v53, %v1669_v48  ;;  %v308_v48 = vld [vmem:[%s4169_s11 + $0x17e] sm:$0x3] }
 0x153   : > { %v5150_v39 = vmax.f32 %v1675_v51, %v1676_v23  ;;  %v5152_v42 = vmax.f32 %v1682_v52, %v1683_v28  ;;  %v5154_v24 = vmax.f32 %v1689_v40, %v1690_v26  ;;  %v5158_v8 = vmax.f32 %v5106_v1, %v1622_v2 }
 0x154   : > { %v5161_v10 = vmax.f32 %v5108_v32, %v1629_v13  ;;  %v5164_v27 = vmax.f32 %v5110_v55, %v1636_v47  ;;  %v5166_v33 = vmax.f32 %v1642_v45, %v1643_v6  ;;  %v5170_v51 = vmax.f32 %v1649_v31, %v1650_v56 }
 0x155   : > { %8266 = vst [vmem:[#allocation153_spill] sm:$0xff] %v5158_v8  ;;  %v5172_v53 = vmax.f32 %v1656_v54, %v1657_v43  ;;  %v5174_v52 = vmax.f32 %v1663_v34, %v1664_v19  ;;  %v1671_v40 = vrot.slane %v1670_v18, 1  ;;  %v1694_v1 = vsel %vm405_vm0, %v301_v44, -inf }
 0x156   : > { %8267 = vst [vmem:[#allocation154_spill] sm:$0xff] %v5161_v10  ;;  %8268 = vst [vmem:[#allocation155_spill] sm:$0xff] %v5164_v27  ;;  %v1701_v32 = vsel %vm405_vm0, %v302_v11, -inf  ;;  %v1708_v2 = vsel %vm405_vm0, %v303_v50, -inf  ;;  %v1715_v55 = vsel %vm405_vm0, %v304_v49, -inf  ;;  %v1678_v13 = vrot.slane %v5150_v39, 1 }
 0x157   : > { %8269 = vst [vmem:[#allocation156_spill] sm:$0xff] %v5166_v33  ;;  %8270 = vst [vmem:[#allocation157_spill] sm:$0xff] %v5170_v51  ;;  %v5181_v6 = vmax.f32 %v1670_v18, %v1671_v40  ;;  %v1685_v56 = vrot.slane %v5152_v42, 1  ;;  %v1692_v47 = vrot.slane %v5154_v24, 1  ;;  %v1695_v45 = vrot.slane %v1694_v1, 4 }
 0x158   : > { %8271 = vst [vmem:[#allocation158_spill] sm:$0xff] %v5172_v53  ;;  %8272 = vst [vmem:[#allocation159_spill] sm:$0xff] %v5174_v52  ;;  %v1702_v31 = vrot.slane %v1701_v32, 4  ;;  %v1709_v54 = vrot.slane %v1708_v2, 4  ;;  %v1716_v34 = vrot.slane %v1715_v55, 4  ;;  %v1722_v23 = vsel %vm405_vm0, %v305_v46, -inf }
 0x159   : > { %8273 = vst [vmem:[#allocation160_spill] sm:$0xff] %v5181_v6  ;;  %v1729_v28 = vsel %vm405_vm0, %v306_v29, -inf  ;;  %v1736_v26 = vsel %vm405_vm0, %v307_v30, -inf  ;;  %v1743_v44 = vsel %vm405_vm0, %v308_v48, -inf  ;;  %v1696_v43 = vmax.f32 %v1694_v1, %v1695_v45 }
 0x15a   : > { %v1703_v19 = vmax.f32 %v1701_v32, %v1702_v31  ;;  %v1710_v11 = vmax.f32 %v1708_v2, %v1709_v54  ;;  %v1717_v50 = vmax.f32 %v1715_v55, %v1716_v34  ;;  %v1723_v49 = vrot.slane %v1722_v23, 4  ;;  %v309_v34 = vld [vmem:[%s4169_s11 + $0x180] sm:$0x3] }
 0x15b   : > { %v1730_v18 = vrot.slane %v1729_v28, 4  ;;  %v1737_v40 = vrot.slane %v1736_v26, 4  ;;  %v1744_v52 = vrot.slane %v1743_v44, 4  ;;  %v1697_v53 = vrot.slane %v1696_v43, 2 }
 0x15c   : > { %v1704_v51 = vrot.slane %v1703_v19, 2  ;;  %v1711_v33 = vrot.slane %v1710_v11, 2  ;;  %v1718_v27 = vrot.slane %v1717_v50, 2  ;;  %v1724_v46 = vmax.f32 %v1722_v23, %v1723_v49  ;;  %v311_v49 = vld [vmem:[%s4169_s11 + $0x184] sm:$0x3] }
 0x15d   : > { %v1731_v10 = vmax.f32 %v1729_v28, %v1730_v18  ;;  %v1738_v29 = vmax.f32 %v1736_v26, %v1737_v40  ;;  %v1745_v30 = vmax.f32 %v1743_v44, %v1744_v52  ;;  %v1698_v48 = vmax.f32 %v1696_v43, %v1697_v53  ;;  %v310_v26 = vld [vmem:[%s4169_s11 + $0x182] sm:$0x3]  ;;  %v312_v52 = vld [vmem:[%s4169_s11 + $0x186] sm:$0x3]  ;;  %v313_v44 = vld [vmem:[%s4169_s11 + $0x188] sm:$0x3] }
 0x15e   : > { %v1705_v1 = vmax.f32 %v1703_v19, %v1704_v51  ;;  %v1712_v32 = vmax.f32 %v1710_v11, %v1711_v33  ;;  %v1719_v2 = vmax.f32 %v1717_v50, %v1718_v27  ;;  %v1725_v55 = vrot.slane %v1724_v46, 2  ;;  %v314_v18 = vld [vmem:[%s4169_s11 + $0x18a] sm:$0x3]  ;;  %v315_v40 = vld [vmem:[%s4169_s11 + $0x18c] sm:$0x3] }
 0x15f   : > { %v1732_v45 = vrot.slane %v1731_v10, 2  ;;  %v1739_v31 = vrot.slane %v1738_v29, 2  ;;  %v1746_v54 = vrot.slane %v1745_v30, 2  ;;  %v1699_v8 = vrot.slane %v1698_v48, 1 }
 0x160   : > { %v1706_v6 = vrot.slane %v1705_v1, 1  ;;  %v1713_v23 = vrot.slane %v1712_v32, 1  ;;  %v1720_v28 = vrot.slane %v1719_v2, 1  ;;  %v1726_v53 = vmax.f32 %v1724_v46, %v1725_v55  ;;  %v316_v55 = vld [vmem:[%s4169_s11 + $0x18e] sm:$0x3] }
 0x161   : > { %v5194_v51 = vmax.f32 %v1731_v10, %v1732_v45  ;;  %v5196_v27 = vmax.f32 %v1738_v29, %v1739_v31  ;;  %v5198_v33 = vmax.f32 %v1745_v30, %v1746_v54  ;;  %v5202_v43 = vmax.f32 %v5150_v39, %v1678_v13 }
 0x162   : > { %v5205_v19 = vmax.f32 %v5152_v42, %v1685_v56  ;;  %v5208_v11 = vmax.f32 %v5154_v24, %v1692_v47  ;;  %v5210_v50 = vmax.f32 %v1698_v48, %v1699_v8  ;;  %v5214_v10 = vmax.f32 %v1705_v1, %v1706_v6 }
 0x163   : > { %8274 = vst [vmem:[#allocation161_spill] sm:$0xff] %v5202_v43  ;;  %v5216_v46 = vmax.f32 %v1712_v32, %v1713_v23  ;;  %v5218_v29 = vmax.f32 %v1719_v2, %v1720_v28  ;;  %v1727_v30 = vrot.slane %v1726_v53, 1  ;;  %v1750_v39 = vsel %vm405_vm0, %v309_v34, -inf }
 0x164   : > { %8275 = vst [vmem:[#allocation162_spill] sm:$0xff] %v5205_v19  ;;  %8276 = vst [vmem:[#allocation163_spill] sm:$0xff] %v5208_v11  ;;  %v1757_v42 = vsel %vm405_vm0, %v310_v26, -inf  ;;  %v1764_v13 = vsel %vm405_vm0, %v311_v49, -inf  ;;  %v1771_v24 = vsel %vm405_vm0, %v312_v52, -inf  ;;  %v1734_v56 = vrot.slane %v5194_v51, 1 }
 0x165   : > { %8277 = vst [vmem:[#allocation164_spill] sm:$0xff] %v5210_v50  ;;  %8278 = vst [vmem:[#allocation165_spill] sm:$0xff] %v5214_v10  ;;  %v5225_v8 = vmax.f32 %v1726_v53, %v1727_v30  ;;  %v1741_v6 = vrot.slane %v5196_v27, 1  ;;  %v1748_v47 = vrot.slane %v5198_v33, 1  ;;  %v1751_v48 = vrot.slane %v1750_v39, 4 }
 0x166   : > { %8279 = vst [vmem:[#allocation166_spill] sm:$0xff] %v5216_v46  ;;  %8280 = vst [vmem:[#allocation167_spill] sm:$0xff] %v5218_v29  ;;  %v1758_v1 = vrot.slane %v1757_v42, 4  ;;  %v1765_v32 = vrot.slane %v1764_v13, 4  ;;  %v1772_v2 = vrot.slane %v1771_v24, 4  ;;  %v1778_v45 = vsel %vm405_vm0, %v313_v44, -inf }
 0x167   : > { %8281 = vst [vmem:[#allocation168_spill] sm:$0xff] %v5225_v8  ;;  %v1785_v31 = vsel %vm405_vm0, %v314_v18, -inf  ;;  %v1792_v54 = vsel %vm405_vm0, %v315_v40, -inf  ;;  %v1799_v34 = vsel %vm405_vm0, %v316_v55, -inf  ;;  %v1752_v23 = vmax.f32 %v1750_v39, %v1751_v48 }
 0x168   : > { %v1759_v28 = vmax.f32 %v1757_v42, %v1758_v1  ;;  %v1766_v26 = vmax.f32 %v1764_v13, %v1765_v32  ;;  %v1773_v49 = vmax.f32 %v1771_v24, %v1772_v2  ;;  %v1779_v52 = vrot.slane %v1778_v45, 4  ;;  %v317_v2 = vld [vmem:[%s4169_s11 + $0x190] sm:$0x3] }
 0x169   : > { %v1786_v53 = vrot.slane %v1785_v31, 4  ;;  %v1793_v30 = vrot.slane %v1792_v54, 4  ;;  %v1800_v8 = vrot.slane %v1799_v34, 4  ;;  %v1753_v29 = vrot.slane %v1752_v23, 2 }
 0x16a   : > { %v1760_v46 = vrot.slane %v1759_v28, 2  ;;  %v1767_v10 = vrot.slane %v1766_v26, 2  ;;  %v1774_v50 = vrot.slane %v1773_v49, 2  ;;  %v1780_v44 = vmax.f32 %v1778_v45, %v1779_v52  ;;  %v319_v52 = vld [vmem:[%s4169_s11 + $0x194] sm:$0x3] }
 0x16b   : > { %v1787_v11 = vmax.f32 %v1785_v31, %v1786_v53  ;;  %v1794_v18 = vmax.f32 %v1792_v54, %v1793_v30  ;;  %v1801_v40 = vmax.f32 %v1799_v34, %v1800_v8  ;;  %v1754_v55 = vmax.f32 %v1752_v23, %v1753_v29  ;;  %v318_v54 = vld [vmem:[%s4169_s11 + $0x192] sm:$0x3]  ;;  %v320_v8 = vld [vmem:[%s4169_s11 + $0x196] sm:$0x3]  ;;  %v321_v34 = vld [vmem:[%s4169_s11 + $0x198] sm:$0x3] }
 0x16c   : > { %v1761_v39 = vmax.f32 %v1759_v28, %v1760_v46  ;;  %v1768_v42 = vmax.f32 %v1766_v26, %v1767_v10  ;;  %v1775_v13 = vmax.f32 %v1773_v49, %v1774_v50  ;;  %v1781_v24 = vrot.slane %v1780_v44, 2  ;;  %v322_v53 = vld [vmem:[%s4169_s11 + $0x19a] sm:$0x3]  ;;  %v323_v30 = vld [vmem:[%s4169_s11 + $0x19c] sm:$0x3] }
 0x16d   : > { %v1788_v48 = vrot.slane %v1787_v11, 2  ;;  %v1795_v1 = vrot.slane %v1794_v18, 2  ;;  %v1802_v32 = vrot.slane %v1801_v40, 2  ;;  %v1755_v19 = vrot.slane %v1754_v55, 1 }
 0x16e   : > { %v1762_v43 = vrot.slane %v1761_v39, 1  ;;  %v1769_v45 = vrot.slane %v1768_v42, 1  ;;  %v1776_v31 = vrot.slane %v1775_v13, 1  ;;  %v1782_v29 = vmax.f32 %v1780_v44, %v1781_v24  ;;  %v324_v24 = vld [vmem:[%s4169_s11 + $0x19e] sm:$0x3] }
 0x16f   : > { %v5238_v46 = vmax.f32 %v1787_v11, %v1788_v48  ;;  %v5240_v50 = vmax.f32 %v1794_v18, %v1795_v1  ;;  %v5242_v10 = vmax.f32 %v1801_v40, %v1802_v32  ;;  %v5246_v23 = vmax.f32 %v5194_v51, %v1734_v56 }
 0x170   : > { %v5249_v28 = vmax.f32 %v5196_v27, %v1741_v6  ;;  %v5252_v26 = vmax.f32 %v5198_v33, %v1748_v47  ;;  %v5254_v49 = vmax.f32 %v1754_v55, %v1755_v19  ;;  %v5258_v11 = vmax.f32 %v1761_v39, %v1762_v43 }
 0x171   : > { %8282 = vst [vmem:[#allocation169_spill] sm:$0xff] %v5246_v23  ;;  %v5260_v44 = vmax.f32 %v1768_v42, %v1769_v45  ;;  %v5262_v18 = vmax.f32 %v1775_v13, %v1776_v31  ;;  %v1783_v40 = vrot.slane %v1782_v29, 1  ;;  %v1806_v51 = vsel %vm405_vm0, %v317_v2, -inf }
 0x172   : > { %8283 = vst [vmem:[#allocation170_spill] sm:$0xff] %v5249_v28  ;;  %8284 = vst [vmem:[#allocation171_spill] sm:$0xff] %v5252_v26  ;;  %v1813_v27 = vsel %vm405_vm0, %v318_v54, -inf  ;;  %v1820_v56 = vsel %vm405_vm0, %v319_v52, -inf  ;;  %v1827_v33 = vsel %vm405_vm0, %v320_v8, -inf  ;;  %v1790_v6 = vrot.slane %v5238_v46, 1 }
 0x173   : > { %8285 = vst [vmem:[#allocation172_spill] sm:$0xff] %v5254_v49  ;;  %8286 = vst [vmem:[#allocation173_spill] sm:$0xff] %v5258_v11  ;;  %v5269_v19 = vmax.f32 %v1782_v29, %v1783_v40  ;;  %v1797_v43 = vrot.slane %v5240_v50, 1  ;;  %v1804_v47 = vrot.slane %v5242_v10, 1  ;;  %v1807_v55 = vrot.slane %v1806_v51, 4 }
 0x174   : > { %8287 = vst [vmem:[#allocation174_spill] sm:$0xff] %v5260_v44  ;;  %8288 = vst [vmem:[#allocation175_spill] sm:$0xff] %v5262_v18  ;;  %v1814_v39 = vrot.slane %v1813_v27, 4  ;;  %v1821_v42 = vrot.slane %v1820_v56, 4  ;;  %v1828_v13 = vrot.slane %v1827_v33, 4  ;;  %v1834_v48 = vsel %vm405_vm0, %v321_v34, -inf }
 0x175   : > { %8289 = vst [vmem:[#allocation176_spill] sm:$0xff] %v5269_v19  ;;  %v1841_v1 = vsel %vm405_vm0, %v322_v53, -inf  ;;  %v1848_v32 = vsel %vm405_vm0, %v323_v30, -inf  ;;  %v1855_v2 = vsel %vm405_vm0, %v324_v24, -inf  ;;  %v1808_v45 = vmax.f32 %v1806_v51, %v1807_v55 }
 0x176   : > { %v1815_v31 = vmax.f32 %v1813_v27, %v1814_v39  ;;  %v1822_v54 = vmax.f32 %v1820_v56, %v1821_v42  ;;  %v1829_v52 = vmax.f32 %v1827_v33, %v1828_v13  ;;  %v1835_v8 = vrot.slane %v1834_v48, 4  ;;  %v325_v13 = vld [vmem:[%s4169_s11 + $0x1a0] sm:$0x3] }
 0x177   : > { %v1842_v29 = vrot.slane %v1841_v1, 4  ;;  %v1849_v40 = vrot.slane %v1848_v32, 4  ;;  %v1856_v19 = vrot.slane %v1855_v2, 4  ;;  %v1809_v18 = vrot.slane %v1808_v45, 2 }
 0x178   : > { %v1816_v44 = vrot.slane %v1815_v31, 2  ;;  %v1823_v11 = vrot.slane %v1822_v54, 2  ;;  %v1830_v49 = vrot.slane %v1829_v52, 2  ;;  %v1836_v34 = vmax.f32 %v1834_v48, %v1835_v8  ;;  %v327_v8 = vld [vmem:[%s4169_s11 + $0x1a4] sm:$0x3] }
 0x179   : > { %v1843_v26 = vmax.f32 %v1841_v1, %v1842_v29  ;;  %v1850_v53 = vmax.f32 %v1848_v32, %v1849_v40  ;;  %v1857_v30 = vmax.f32 %v1855_v2, %v1856_v19  ;;  %v1810_v24 = vmax.f32 %v1808_v45, %v1809_v18  ;;  %v326_v32 = vld [vmem:[%s4169_s11 + $0x1a2] sm:$0x3]  ;;  %v328_v19 = vld [vmem:[%s4169_s11 + $0x1a6] sm:$0x3]  ;;  %v329_v2 = vld [vmem:[%s4169_s11 + $0x1a8] sm:$0x3] }
 0x17a   : > { %v1817_v51 = vmax.f32 %v1815_v31, %v1816_v44  ;;  %v1824_v27 = vmax.f32 %v1822_v54, %v1823_v11  ;;  %v1831_v56 = vmax.f32 %v1829_v52, %v1830_v49  ;;  %v1837_v33 = vrot.slane %v1836_v34, 2  ;;  %v330_v29 = vld [vmem:[%s4169_s11 + $0x1aa] sm:$0x3]  ;;  %v331_v40 = vld [vmem:[%s4169_s11 + $0x1ac] sm:$0x3] }
 0x17b   : > { %v1844_v55 = vrot.slane %v1843_v26, 2  ;;  %v1851_v39 = vrot.slane %v1850_v53, 2  ;;  %v1858_v42 = vrot.slane %v1857_v30, 2  ;;  %v1811_v28 = vrot.slane %v1810_v24, 1 }
 0x17c   : > { %v1818_v23 = vrot.slane %v1817_v51, 1  ;;  %v1825_v48 = vrot.slane %v1824_v27, 1  ;;  %v1832_v1 = vrot.slane %v1831_v56, 1  ;;  %v1838_v18 = vmax.f32 %v1836_v34, %v1837_v33  ;;  %v332_v33 = vld [vmem:[%s4169_s11 + $0x1ae] sm:$0x3] }
 0x17d   : > { %v5282_v44 = vmax.f32 %v1843_v26, %v1844_v55  ;;  %v5284_v49 = vmax.f32 %v1850_v53, %v1851_v39  ;;  %v5286_v11 = vmax.f32 %v1857_v30, %v1858_v42  ;;  %v5290_v45 = vmax.f32 %v5238_v46, %v1790_v6 }
 0x17e   : > { %v5293_v31 = vmax.f32 %v5240_v50, %v1797_v43  ;;  %v5296_v54 = vmax.f32 %v5242_v10, %v1804_v47  ;;  %v5298_v52 = vmax.f32 %v1810_v24, %v1811_v28  ;;  %v5302_v26 = vmax.f32 %v1817_v51, %v1818_v23 }
 0x17f   : > { %8290 = vst [vmem:[#allocation177_spill] sm:$0xff] %v5290_v45  ;;  %v5304_v34 = vmax.f32 %v1824_v27, %v1825_v48  ;;  %v5306_v53 = vmax.f32 %v1831_v56, %v1832_v1  ;;  %v1839_v30 = vrot.slane %v1838_v18, 1  ;;  %v1862_v46 = vsel %vm405_vm0, %v325_v13, -inf }
 0x180   : > { %8291 = vst [vmem:[#allocation178_spill] sm:$0xff] %v5293_v31  ;;  %8292 = vst [vmem:[#allocation179_spill] sm:$0xff] %v5296_v54  ;;  %v1869_v50 = vsel %vm405_vm0, %v326_v32, -inf  ;;  %v1876_v6 = vsel %vm405_vm0, %v327_v8, -inf  ;;  %v1883_v10 = vsel %vm405_vm0, %v328_v19, -inf  ;;  %v1846_v43 = vrot.slane %v5282_v44, 1 }
 0x181   : > { %8293 = vst [vmem:[#allocation180_spill] sm:$0xff] %v5298_v52  ;;  %8294 = vst [vmem:[#allocation181_spill] sm:$0xff] %v5302_v26  ;;  %v5313_v28 = vmax.f32 %v1838_v18, %v1839_v30  ;;  %v1853_v23 = vrot.slane %v5284_v49, 1  ;;  %v1860_v47 = vrot.slane %v5286_v11, 1  ;;  %v1863_v24 = vrot.slane %v1862_v46, 4 }
 0x182   : > { %8295 = vst [vmem:[#allocation182_spill] sm:$0xff] %v5304_v34  ;;  %8296 = vst [vmem:[#allocation183_spill] sm:$0xff] %v5306_v53  ;;  %v1870_v51 = vrot.slane %v1869_v50, 4  ;;  %v1877_v27 = vrot.slane %v1876_v6, 4  ;;  %v1884_v56 = vrot.slane %v1883_v10, 4  ;;  %v1890_v55 = vsel %vm405_vm0, %v329_v2, -inf }
 0x183   : > { %8297 = vst [vmem:[#allocation184_spill] sm:$0xff] %v5313_v28  ;;  %v1897_v39 = vsel %vm405_vm0, %v330_v29, -inf  ;;  %v1904_v42 = vsel %vm405_vm0, %v331_v40, -inf  ;;  %v1911_v13 = vsel %vm405_vm0, %v332_v33, -inf  ;;  %v1864_v48 = vmax.f32 %v1862_v46, %v1863_v24 }
 0x184   : > { %v1871_v1 = vmax.f32 %v1869_v50, %v1870_v51  ;;  %v1878_v32 = vmax.f32 %v1876_v6, %v1877_v27  ;;  %v1885_v8 = vmax.f32 %v1883_v10, %v1884_v56  ;;  %v1891_v19 = vrot.slane %v1890_v55, 4  ;;  %v333_v56 = vld [vmem:[%s4169_s11 + $0x1b0] sm:$0x3] }
 0x185   : > { %v1898_v18 = vrot.slane %v1897_v39, 4  ;;  %v1905_v30 = vrot.slane %v1904_v42, 4  ;;  %v1912_v53 = vrot.slane %v1911_v13, 4  ;;  %v1865_v34 = vrot.slane %v1864_v48, 2 }
 0x186   : > { %v1872_v26 = vrot.slane %v1871_v1, 2  ;;  %v1879_v52 = vrot.slane %v1878_v32, 2  ;;  %v1886_v54 = vrot.slane %v1885_v8, 2  ;;  %v1892_v2 = vmax.f32 %v1890_v55, %v1891_v19  ;;  %v335_v19 = vld [vmem:[%s4169_s11 + $0x1b4] sm:$0x3] }
 0x187   : > { %v1899_v31 = vmax.f32 %v1897_v39, %v1898_v18  ;;  %v1906_v29 = vmax.f32 %v1904_v42, %v1905_v30  ;;  %v1913_v40 = vmax.f32 %v1911_v13, %v1912_v53  ;;  %v1866_v33 = vmax.f32 %v1864_v48, %v1865_v34  ;;  %v334_v42 = vld [vmem:[%s4169_s11 + $0x1b2] sm:$0x3]  ;;  %v336_v53 = vld [vmem:[%s4169_s11 + $0x1b6] sm:$0x3]  ;;  %v337_v13 = vld [vmem:[%s4169_s11 + $0x1b8] sm:$0x3] }
 0x188   : > { %v1873_v46 = vmax.f32 %v1871_v1, %v1872_v26  ;;  %v1880_v50 = vmax.f32 %v1878_v32, %v1879_v52  ;;  %v1887_v6 = vmax.f32 %v1885_v8, %v1886_v54  ;;  %v1893_v10 = vrot.slane %v1892_v2, 2  ;;  %v338_v18 = vld [vmem:[%s4169_s11 + $0x1ba] sm:$0x3]  ;;  %v339_v30 = vld [vmem:[%s4169_s11 + $0x1bc] sm:$0x3] }
 0x189   : > { %v1900_v24 = vrot.slane %v1899_v31, 2  ;;  %v1907_v51 = vrot.slane %v1906_v29, 2  ;;  %v1914_v27 = vrot.slane %v1913_v40, 2  ;;  %v1867_v45 = vrot.slane %v1866_v33, 1 }
 0x18a   : > { %v1874_v28 = vrot.slane %v1873_v46, 1  ;;  %v1881_v55 = vrot.slane %v1880_v50, 1  ;;  %v1888_v39 = vrot.slane %v1887_v6, 1  ;;  %v1894_v34 = vmax.f32 %v1892_v2, %v1893_v10  ;;  %v340_v10 = vld [vmem:[%s4169_s11 + $0x1be] sm:$0x3] }
 0x18b   : > { %v5326_v26 = vmax.f32 %v1899_v31, %v1900_v24  ;;  %v5328_v54 = vmax.f32 %v1906_v29, %v1907_v51  ;;  %v5330_v52 = vmax.f32 %v1913_v40, %v1914_v27  ;;  %v5334_v48 = vmax.f32 %v5282_v44, %v1846_v43 }
 0x18c   : > { %v5337_v1 = vmax.f32 %v5284_v49, %v1853_v23  ;;  %v5340_v32 = vmax.f32 %v5286_v11, %v1860_v47  ;;  %v5342_v8 = vmax.f32 %v1866_v33, %v1867_v45  ;;  %v5346_v31 = vmax.f32 %v1873_v46, %v1874_v28 }
 0x18d   : > { %8298 = vst [vmem:[#allocation185_spill] sm:$0xff] %v5334_v48  ;;  %v5348_v2 = vmax.f32 %v1880_v50, %v1881_v55  ;;  %v5350_v29 = vmax.f32 %v1887_v6, %v1888_v39  ;;  %v1895_v40 = vrot.slane %v1894_v34, 1  ;;  %v1918_v44 = vsel %vm405_vm0, %v333_v56, -inf }
 0x18e   : > { %8299 = vst [vmem:[#allocation186_spill] sm:$0xff] %v5337_v1  ;;  %8300 = vst [vmem:[#allocation187_spill] sm:$0xff] %v5340_v32  ;;  %v1925_v49 = vsel %vm405_vm0, %v334_v42, -inf  ;;  %v1932_v43 = vsel %vm405_vm0, %v335_v19, -inf  ;;  %v1939_v11 = vsel %vm405_vm0, %v336_v53, -inf  ;;  %v1902_v23 = vrot.slane %v5326_v26, 1 }
 0x18f   : > { %8301 = vst [vmem:[#allocation188_spill] sm:$0xff] %v5342_v8  ;;  %8302 = vst [vmem:[#allocation189_spill] sm:$0xff] %v5346_v31  ;;  %v5357_v45 = vmax.f32 %v1894_v34, %v1895_v40  ;;  %v1909_v28 = vrot.slane %v5328_v54, 1  ;;  %v1916_v47 = vrot.slane %v5330_v52, 1  ;;  %v1919_v33 = vrot.slane %v1918_v44, 4 }
 0x190   : > { %8303 = vst [vmem:[#allocation190_spill] sm:$0xff] %v5348_v2  ;;  %8304 = vst [vmem:[#allocation191_spill] sm:$0xff] %v5350_v29  ;;  %v1926_v46 = vrot.slane %v1925_v49, 4  ;;  %v1933_v50 = vrot.slane %v1932_v43, 4  ;;  %v1940_v6 = vrot.slane %v1939_v11, 4  ;;  %v1946_v24 = vsel %vm405_vm0, %v337_v13, -inf }
 0x191   : > { %8305 = vst [vmem:[#allocation192_spill] sm:$0xff] %v5357_v45  ;;  %v1953_v51 = vsel %vm405_vm0, %v338_v18, -inf  ;;  %v1960_v27 = vsel %vm405_vm0, %v339_v30, -inf  ;;  %v1967_v56 = vsel %vm405_vm0, %v340_v10, -inf  ;;  %v1920_v55 = vmax.f32 %v1918_v44, %v1919_v33 }
 0x192   : > { %v1927_v39 = vmax.f32 %v1925_v49, %v1926_v46  ;;  %v1934_v42 = vmax.f32 %v1932_v43, %v1933_v50  ;;  %v1941_v19 = vmax.f32 %v1939_v11, %v1940_v6  ;;  %v1947_v53 = vrot.slane %v1946_v24, 4  ;;  %v341_v6 = vld [vmem:[%s4169_s11 + $0x1c0] sm:$0x3] }
 0x193   : > { %v1954_v34 = vrot.slane %v1953_v51, 4  ;;  %v1961_v40 = vrot.slane %v1960_v27, 4  ;;  %v1968_v45 = vrot.slane %v1967_v56, 4  ;;  %v1921_v29 = vrot.slane %v1920_v55, 2 }
 0x194   : > { %v1928_v2 = vrot.slane %v1927_v39, 2  ;;  %v1935_v31 = vrot.slane %v1934_v42, 2  ;;  %v1942_v8 = vrot.slane %v1941_v19, 2  ;;  %v1948_v13 = vmax.f32 %v1946_v24, %v1947_v53  ;;  %v343_v53 = vld [vmem:[%s4169_s11 + $0x1c4] sm:$0x3] }
 0x195   : > { %v1955_v32 = vmax.f32 %v1953_v51, %v1954_v34  ;;  %v1962_v18 = vmax.f32 %v1960_v27, %v1961_v40  ;;  %v1969_v30 = vmax.f32 %v1967_v56, %v1968_v45  ;;  %v1922_v10 = vmax.f32 %v1920_v55, %v1921_v29  ;;  %v342_v27 = vld [vmem:[%s4169_s11 + $0x1c2] sm:$0x3]  ;;  %v344_v45 = vld [vmem:[%s4169_s11 + $0x1c6] sm:$0x3]  ;;  %v345_v56 = vld [vmem:[%s4169_s11 + $0x1c8] sm:$0x3] }
 0x196   : > { %v1929_v44 = vmax.f32 %v1927_v39, %v1928_v2  ;;  %v1936_v49 = vmax.f32 %v1934_v42, %v1935_v31  ;;  %v1943_v43 = vmax.f32 %v1941_v19, %v1942_v8  ;;  %v1949_v11 = vrot.slane %v1948_v13, 2  ;;  %v346_v34 = vld [vmem:[%s4169_s11 + $0x1ca] sm:$0x3]  ;;  %v347_v40 = vld [vmem:[%s4169_s11 + $0x1cc] sm:$0x3] }
 0x197   : > { %v1956_v33 = vrot.slane %v1955_v32, 2  ;;  %v1963_v46 = vrot.slane %v1962_v18, 2  ;;  %v1970_v50 = vrot.slane %v1969_v30, 2  ;;  %v1923_v1 = vrot.slane %v1922_v10, 1 }
 0x198   : > { %v1930_v48 = vrot.slane %v1929_v44, 1  ;;  %v1937_v24 = vrot.slane %v1936_v49, 1  ;;  %v1944_v51 = vrot.slane %v1943_v43, 1  ;;  %v1950_v29 = vmax.f32 %v1948_v13, %v1949_v11  ;;  %v348_v11 = vld [vmem:[%s4169_s11 + $0x1ce] sm:$0x3] }
 0x199   : > { %v5370_v2 = vmax.f32 %v1955_v32, %v1956_v33  ;;  %v5372_v8 = vmax.f32 %v1962_v18, %v1963_v46  ;;  %v5374_v31 = vmax.f32 %v1969_v30, %v1970_v50  ;;  %v5378_v55 = vmax.f32 %v5326_v26, %v1902_v23 }
 0x19a   : > { %v5381_v39 = vmax.f32 %v5328_v54, %v1909_v28  ;;  %v5384_v42 = vmax.f32 %v5330_v52, %v1916_v47  ;;  %v5386_v19 = vmax.f32 %v1922_v10, %v1923_v1  ;;  %v5390_v32 = vmax.f32 %v1929_v44, %v1930_v48 }
 0x19b   : > { %8306 = vst [vmem:[#allocation193_spill] sm:$0xff] %v5378_v55  ;;  %v5392_v13 = vmax.f32 %v1936_v49, %v1937_v24  ;;  %v5394_v18 = vmax.f32 %v1943_v43, %v1944_v51  ;;  %v1951_v30 = vrot.slane %v1950_v29, 1  ;;  %v1974_v26 = vsel %vm405_vm0, %v341_v6, -inf }
 0x19c   : > { %8307 = vst [vmem:[#allocation194_spill] sm:$0xff] %v5381_v39  ;;  %8308 = vst [vmem:[#allocation195_spill] sm:$0xff] %v5384_v42  ;;  %v1981_v54 = vsel %vm405_vm0, %v342_v27, -inf  ;;  %v1988_v23 = vsel %vm405_vm0, %v343_v53, -inf  ;;  %v1995_v52 = vsel %vm405_vm0, %v344_v45, -inf  ;;  %v1958_v28 = vrot.slane %v5370_v2, 1 }
 0x19d   : > { %8309 = vst [vmem:[#allocation196_spill] sm:$0xff] %v5386_v19  ;;  %8310 = vst [vmem:[#allocation197_spill] sm:$0xff] %v5390_v32  ;;  %v5401_v1 = vmax.f32 %v1950_v29, %v1951_v30  ;;  %v1965_v48 = vrot.slane %v5372_v8, 1  ;;  %v1972_v47 = vrot.slane %v5374_v31, 1  ;;  %v1975_v10 = vrot.slane %v1974_v26, 4 }
 0x19e   : > { %8311 = vst [vmem:[#allocation198_spill] sm:$0xff] %v5392_v13  ;;  %8312 = vst [vmem:[#allocation199_spill] sm:$0xff] %v5394_v18  ;;  %v1982_v44 = vrot.slane %v1981_v54, 4  ;;  %v1989_v49 = vrot.slane %v1988_v23, 4  ;;  %v1996_v43 = vrot.slane %v1995_v52, 4  ;;  %v2002_v33 = vsel %vm405_vm0, %v345_v56, -inf }
 0x19f   : > { %8313 = vst [vmem:[#allocation200_spill] sm:$0xff] %v5401_v1  ;;  %v2009_v46 = vsel %vm405_vm0, %v346_v34, -inf  ;;  %v2016_v50 = vsel %vm405_vm0, %v347_v40, -inf  ;;  %v2023_v6 = vsel %vm405_vm0, %v348_v11, -inf  ;;  %v1976_v24 = vmax.f32 %v1974_v26, %v1975_v10 }
 0x1a0   : > { %v1983_v51 = vmax.f32 %v1981_v54, %v1982_v44  ;;  %v1990_v27 = vmax.f32 %v1988_v23, %v1989_v49  ;;  %v1997_v53 = vmax.f32 %v1995_v52, %v1996_v43  ;;  %v2003_v45 = vrot.slane %v2002_v33, 4  ;;  %v349_v43 = vld [vmem:[%s4169_s11 + $0x1d0] sm:$0x3] }
 0x1a1   : > { %v2010_v29 = vrot.slane %v2009_v46, 4  ;;  %v2017_v30 = vrot.slane %v2016_v50, 4  ;;  %v2024_v1 = vrot.slane %v2023_v6, 4  ;;  %v1977_v18 = vrot.slane %v1976_v24, 2 }
 0x1a2   : > { %v1984_v13 = vrot.slane %v1983_v51, 2  ;;  %v1991_v32 = vrot.slane %v1990_v27, 2  ;;  %v1998_v19 = vrot.slane %v1997_v53, 2  ;;  %v2004_v56 = vmax.f32 %v2002_v33, %v2003_v45  ;;  %v351_v45 = vld [vmem:[%s4169_s11 + $0x1d4] sm:$0x3] }
 0x1a3   : > { %v2011_v42 = vmax.f32 %v2009_v46, %v2010_v29  ;;  %v2018_v34 = vmax.f32 %v2016_v50, %v2017_v30  ;;  %v2025_v40 = vmax.f32 %v2023_v6, %v2024_v1  ;;  %v1978_v11 = vmax.f32 %v1976_v24, %v1977_v18  ;;  %v350_v50 = vld [vmem:[%s4169_s11 + $0x1d2] sm:$0x3]  ;;  %v352_v1 = vld [vmem:[%s4169_s11 + $0x1d6] sm:$0x3]  ;;  %v353_v6 = vld [vmem:[%s4169_s11 + $0x1d8] sm:$0x3] }
 0x1a4   : > { %v1985_v26 = vmax.f32 %v1983_v51, %v1984_v13  ;;  %v1992_v54 = vmax.f32 %v1990_v27, %v1991_v32  ;;  %v1999_v23 = vmax.f32 %v1997_v53, %v1998_v19  ;;  %v2005_v52 = vrot.slane %v2004_v56, 2  ;;  %v354_v29 = vld [vmem:[%s4169_s11 + $0x1da] sm:$0x3]  ;;  %v355_v30 = vld [vmem:[%s4169_s11 + $0x1dc] sm:$0x3] }
 0x1a5   : > { %v2012_v10 = vrot.slane %v2011_v42, 2  ;;  %v2019_v44 = vrot.slane %v2018_v34, 2  ;;  %v2026_v49 = vrot.slane %v2025_v40, 2  ;;  %v1979_v39 = vrot.slane %v1978_v11, 1 }
 0x1a6   : > { %v1986_v55 = vrot.slane %v1985_v26, 1  ;;  %v1993_v33 = vrot.slane %v1992_v54, 1  ;;  %v2000_v46 = vrot.slane %v1999_v23, 1  ;;  %v2006_v18 = vmax.f32 %v2004_v56, %v2005_v52  ;;  %v356_v52 = vld [vmem:[%s4169_s11 + $0x1de] sm:$0x3] }
 0x1a7   : > { %v5414_v13 = vmax.f32 %v2011_v42, %v2012_v10  ;;  %v5416_v19 = vmax.f32 %v2018_v34, %v2019_v44  ;;  %v5418_v32 = vmax.f32 %v2025_v40, %v2026_v49  ;;  %v5422_v24 = vmax.f32 %v5370_v2, %v1958_v28 }
 0x1a8   : > { %v5425_v51 = vmax.f32 %v5372_v8, %v1965_v48  ;;  %v5428_v27 = vmax.f32 %v5374_v31, %v1972_v47  ;;  %v5430_v53 = vmax.f32 %v1978_v11, %v1979_v39  ;;  %v5434_v42 = vmax.f32 %v1985_v26, %v1986_v55 }
 0x1a9   : > { %8314 = vst [vmem:[#allocation201_spill] sm:$0xff] %v5422_v24  ;;  %v5436_v56 = vmax.f32 %v1992_v54, %v1993_v33  ;;  %v5438_v34 = vmax.f32 %v1999_v23, %v2000_v46  ;;  %v2007_v40 = vrot.slane %v2006_v18, 1  ;;  %v2030_v2 = vsel %vm405_vm0, %v349_v43, -inf }
 0x1aa   : > { %8315 = vst [vmem:[#allocation202_spill] sm:$0xff] %v5425_v51  ;;  %8316 = vst [vmem:[#allocation203_spill] sm:$0xff] %v5428_v27  ;;  %v2037_v8 = vsel %vm405_vm0, %v350_v50, -inf  ;;  %v2044_v28 = vsel %vm405_vm0, %v351_v45, -inf  ;;  %v2051_v31 = vsel %vm405_vm0, %v352_v1, -inf  ;;  %v2014_v48 = vrot.slane %v5414_v13, 1 }
 0x1ab   : > { %8317 = vst [vmem:[#allocation204_spill] sm:$0xff] %v5430_v53  ;;  %8318 = vst [vmem:[#allocation205_spill] sm:$0xff] %v5434_v42  ;;  %v5445_v39 = vmax.f32 %v2006_v18, %v2007_v40  ;;  %v2021_v55 = vrot.slane %v5416_v19, 1  ;;  %v2028_v47 = vrot.slane %v5418_v32, 1  ;;  %v2031_v11 = vrot.slane %v2030_v2, 4 }
 0x1ac   : > { %8319 = vst [vmem:[#allocation206_spill] sm:$0xff] %v5436_v56  ;;  %8320 = vst [vmem:[#allocation207_spill] sm:$0xff] %v5438_v34  ;;  %v2038_v26 = vrot.slane %v2037_v8, 4  ;;  %v2045_v54 = vrot.slane %v2044_v28, 4  ;;  %v2052_v23 = vrot.slane %v2051_v31, 4  ;;  %v2058_v10 = vsel %vm405_vm0, %v353_v6, -inf }
 0x1ad   : > { %8321 = vst [vmem:[#allocation208_spill] sm:$0xff] %v5445_v39  ;;  %v2065_v44 = vsel %vm405_vm0, %v354_v29, -inf  ;;  %v2072_v49 = vsel %vm405_vm0, %v355_v30, -inf  ;;  %v2079_v43 = vsel %vm405_vm0, %v356_v52, -inf  ;;  %v2032_v33 = vmax.f32 %v2030_v2, %v2031_v11 }
 0x1ae   : > { %v2039_v46 = vmax.f32 %v2037_v8, %v2038_v26  ;;  %v2046_v50 = vmax.f32 %v2044_v28, %v2045_v54  ;;  %v2053_v45 = vmax.f32 %v2051_v31, %v2052_v23  ;;  %v2059_v1 = vrot.slane %v2058_v10, 4  ;;  %v357_v23 = vld [vmem:[%s4169_s11 + $0x1e0] sm:$0x3] }
 0x1af   : > { %v2066_v18 = vrot.slane %v2065_v44, 4  ;;  %v2073_v40 = vrot.slane %v2072_v49, 4  ;;  %v2080_v34 = vrot.slane %v2079_v43, 4  ;;  %v2033_v56 = vrot.slane %v2032_v33, 2 }
 0x1b0   : > { %v2040_v42 = vrot.slane %v2039_v46, 2  ;;  %v2047_v53 = vrot.slane %v2046_v50, 2  ;;  %v2054_v27 = vrot.slane %v2053_v45, 2  ;;  %v2060_v6 = vmax.f32 %v2058_v10, %v2059_v1  ;;  %v359_v1 = vld [vmem:[%s4169_s11 + $0x1e4] sm:$0x3] }
 0x1b1   : > { %v2067_v51 = vmax.f32 %v2065_v44, %v2066_v18  ;;  %v2074_v29 = vmax.f32 %v2072_v49, %v2073_v40  ;;  %v2081_v30 = vmax.f32 %v2079_v43, %v2080_v34  ;;  %v2034_v52 = vmax.f32 %v2032_v33, %v2033_v56  ;;  %v358_v49 = vld [vmem:[%s4169_s11 + $0x1e2] sm:$0x3]  ;;  %v360_v34 = vld [vmem:[%s4169_s11 + $0x1e6] sm:$0x3]  ;;  %v361_v43 = vld [vmem:[%s4169_s11 + $0x1e8] sm:$0x3] }
 0x1b2   : > { %v2041_v2 = vmax.f32 %v2039_v46, %v2040_v42  ;;  %v2048_v8 = vmax.f32 %v2046_v50, %v2047_v53  ;;  %v2055_v28 = vmax.f32 %v2053_v45, %v2054_v27  ;;  %v2061_v31 = vrot.slane %v2060_v6, 2  ;;  %v362_v18 = vld [vmem:[%s4169_s11 + $0x1ea] sm:$0x3]  ;;  %v363_v40 = vld [vmem:[%s4169_s11 + $0x1ec] sm:$0x3] }
 0x1b3   : > { %v2068_v11 = vrot.slane %v2067_v51, 2  ;;  %v2075_v26 = vrot.slane %v2074_v29, 2  ;;  %v2082_v54 = vrot.slane %v2081_v30, 2  ;;  %v2035_v24 = vrot.slane %v2034_v52, 1 }
 0x1b4   : > { %v2042_v39 = vrot.slane %v2041_v2, 1  ;;  %v2049_v10 = vrot.slane %v2048_v8, 1  ;;  %v2056_v44 = vrot.slane %v2055_v28, 1  ;;  %v2062_v56 = vmax.f32 %v2060_v6, %v2061_v31  ;;  %v364_v31 = vld [vmem:[%s4169_s11 + $0x1ee] sm:$0x3] }
 0x1b5   : > { %v5458_v42 = vmax.f32 %v2067_v51, %v2068_v11  ;;  %v5460_v27 = vmax.f32 %v2074_v29, %v2075_v26  ;;  %v5462_v53 = vmax.f32 %v2081_v30, %v2082_v54  ;;  %v5466_v33 = vmax.f32 %v5414_v13, %v2014_v48 }
 0x1b6   : > { %v5469_v46 = vmax.f32 %v5416_v19, %v2021_v55  ;;  %v5472_v50 = vmax.f32 %v5418_v32, %v2028_v47  ;;  %v5474_v45 = vmax.f32 %v2034_v52, %v2035_v24  ;;  %v5478_v51 = vmax.f32 %v2041_v2, %v2042_v39 }
 0x1b7   : > { %8322 = vst [vmem:[#allocation209_spill] sm:$0xff] %v5466_v33  ;;  %v5480_v6 = vmax.f32 %v2048_v8, %v2049_v10  ;;  %v5482_v29 = vmax.f32 %v2055_v28, %v2056_v44  ;;  %v2063_v30 = vrot.slane %v2062_v56, 1  ;;  %v2086_v13 = vsel %vm405_vm0, %v357_v23, -inf }
 0x1b8   : > { %8323 = vst [vmem:[#allocation210_spill] sm:$0xff] %v5469_v46  ;;  %8324 = vst [vmem:[#allocation211_spill] sm:$0xff] %v5472_v50  ;;  %v2093_v19 = vsel %vm405_vm0, %v358_v49, -inf  ;;  %v2100_v48 = vsel %vm405_vm0, %v359_v1, -inf  ;;  %v2107_v32 = vsel %vm405_vm0, %v360_v34, -inf  ;;  %v2070_v55 = vrot.slane %v5458_v42, 1 }
 0x1b9   : > { %8325 = vst [vmem:[#allocation212_spill] sm:$0xff] %v5474_v45  ;;  %8326 = vst [vmem:[#allocation213_spill] sm:$0xff] %v5478_v51  ;;  %v5489_v24 = vmax.f32 %v2062_v56, %v2063_v30  ;;  %v2077_v39 = vrot.slane %v5460_v27, 1  ;;  %v2084_v47 = vrot.slane %v5462_v53, 1  ;;  %v2087_v52 = vrot.slane %v2086_v13, 4 }
 0x1ba   : > { %8327 = vst [vmem:[#allocation214_spill] sm:$0xff] %v5480_v6  ;;  %8328 = vst [vmem:[#allocation215_spill] sm:$0xff] %v5482_v29  ;;  %v2094_v2 = vrot.slane %v2093_v19, 4  ;;  %v2101_v8 = vrot.slane %v2100_v48, 4  ;;  %v2108_v28 = vrot.slane %v2107_v32, 4  ;;  %v2114_v11 = vsel %vm405_vm0, %v361_v43, -inf }
 0x1bb   : > { %8329 = vst [vmem:[#allocation216_spill] sm:$0xff] %v5489_v24  ;;  %v2121_v26 = vsel %vm405_vm0, %v362_v18, -inf  ;;  %v2128_v54 = vsel %vm405_vm0, %v363_v40, -inf  ;;  %v2135_v23 = vsel %vm405_vm0, %v364_v31, -inf  ;;  %v2088_v10 = vmax.f32 %v2086_v13, %v2087_v52 }
 0x1bc   : > { %v2095_v44 = vmax.f32 %v2093_v19, %v2094_v2  ;;  %v2102_v49 = vmax.f32 %v2100_v48, %v2101_v8  ;;  %v2109_v1 = vmax.f32 %v2107_v32, %v2108_v28  ;;  %v2115_v34 = vrot.slane %v2114_v11, 4  ;;  %v365_v28 = vld [vmem:[%s4169_s11 + $0x1f0] sm:$0x3] }
 0x1bd   : > { %v2122_v56 = vrot.slane %v2121_v26, 4  ;;  %v2129_v30 = vrot.slane %v2128_v54, 4  ;;  %v2136_v24 = vrot.slane %v2135_v23, 4  ;;  %v2089_v29 = vrot.slane %v2088_v10, 2 }
 0x1be   : > { %v2096_v6 = vrot.slane %v2095_v44, 2  ;;  %v2103_v51 = vrot.slane %v2102_v49, 2  ;;  %v2110_v45 = vrot.slane %v2109_v1, 2  ;;  %v2116_v43 = vmax.f32 %v2114_v11, %v2115_v34  ;;  %v367_v34 = vld [vmem:[%s4169_s11 + $0x1f4] sm:$0x3] }
 0x1bf   : > { %v2123_v50 = vmax.f32 %v2121_v26, %v2122_v56  ;;  %v2130_v18 = vmax.f32 %v2128_v54, %v2129_v30  ;;  %v2137_v40 = vmax.f32 %v2135_v23, %v2136_v24  ;;  %v2090_v31 = vmax.f32 %v2088_v10, %v2089_v29  ;;  %v366_v54 = vld [vmem:[%s4169_s11 + $0x1f2] sm:$0x3]  ;;  %v368_v24 = vld [vmem:[%s4169_s11 + $0x1f6] sm:$0x3]  ;;  %v369_v23 = vld [vmem:[%s4169_s11 + $0x1f8] sm:$0x3] }
 0x1c0   : > { %v2097_v13 = vmax.f32 %v2095_v44, %v2096_v6  ;;  %v2104_v19 = vmax.f32 %v2102_v49, %v2103_v51  ;;  %v2111_v48 = vmax.f32 %v2109_v1, %v2110_v45  ;;  %v2117_v32 = vrot.slane %v2116_v43, 2  ;;  %v370_v56 = vld [vmem:[%s4169_s11 + $0x1fa] sm:$0x3]  ;;  %v371_v30 = vld [vmem:[%s4169_s11 + $0x1fc] sm:$0x3] }
 0x1c1   : > { %v2124_v52 = vrot.slane %v2123_v50, 2  ;;  %v2131_v2 = vrot.slane %v2130_v18, 2  ;;  %v2138_v8 = vrot.slane %v2137_v40, 2  ;;  %v2091_v46 = vrot.slane %v2090_v31, 1 }
 0x1c2   : > { %v2098_v33 = vrot.slane %v2097_v13, 1  ;;  %v2105_v11 = vrot.slane %v2104_v19, 1  ;;  %v2112_v26 = vrot.slane %v2111_v48, 1  ;;  %v2118_v29 = vmax.f32 %v2116_v43, %v2117_v32  ;;  %v372_v32 = vld [vmem:[%s4169_s11 + $0x1fe] sm:$0x3] }
 0x1c3   : > { %v5502_v6 = vmax.f32 %v2123_v50, %v2124_v52  ;;  %v5504_v45 = vmax.f32 %v2130_v18, %v2131_v2  ;;  %v5506_v51 = vmax.f32 %v2137_v40, %v2138_v8  ;;  %v5510_v10 = vmax.f32 %v5458_v42, %v2070_v55 }
 0x1c4   : > { %v5513_v44 = vmax.f32 %v5460_v27, %v2077_v39  ;;  %v5516_v49 = vmax.f32 %v5462_v53, %v2084_v47  ;;  %v5518_v1 = vmax.f32 %v2090_v31, %v2091_v46  ;;  %v5522_v50 = vmax.f32 %v2097_v13, %v2098_v33 }
 0x1c5   : > { %8330 = vst [vmem:[#allocation217_spill] sm:$0xff] %v5510_v10  ;;  %v5524_v43 = vmax.f32 %v2104_v19, %v2105_v11  ;;  %v5526_v18 = vmax.f32 %v2111_v48, %v2112_v26  ;;  %v2119_v40 = vrot.slane %v2118_v29, 1  ;;  %v2142_v42 = vsel %vm405_vm0, %v365_v28, -inf }
 0x1c6   : > { %8331 = vst [vmem:[#allocation218_spill] sm:$0xff] %v5513_v44  ;;  %8332 = vst [vmem:[#allocation219_spill] sm:$0xff] %v5516_v49  ;;  %v2149_v27 = vsel %vm405_vm0, %v366_v54, -inf  ;;  %v2156_v55 = vsel %vm405_vm0, %v367_v34, -inf  ;;  %v2163_v53 = vsel %vm405_vm0, %v368_v24, -inf  ;;  %v2126_v39 = vrot.slane %v5502_v6, 1 }
 0x1c7   : > { %8333 = vst [vmem:[#allocation220_spill] sm:$0xff] %v5518_v1  ;;  %8334 = vst [vmem:[#allocation221_spill] sm:$0xff] %v5522_v50  ;;  %v5533_v46 = vmax.f32 %v2118_v29, %v2119_v40  ;;  %v2133_v33 = vrot.slane %v5504_v45, 1  ;;  %v2140_v47 = vrot.slane %v5506_v51, 1  ;;  %v2143_v31 = vrot.slane %v2142_v42, 4 }
 0x1c8   : > { %8335 = vst [vmem:[#allocation222_spill] sm:$0xff] %v5524_v43  ;;  %8336 = vst [vmem:[#allocation223_spill] sm:$0xff] %v5526_v18  ;;  %v2150_v13 = vrot.slane %v2149_v27, 4  ;;  %v2157_v19 = vrot.slane %v2156_v55, 4  ;;  %v2164_v48 = vrot.slane %v2163_v53, 4  ;;  %v2170_v52 = vsel %vm405_vm0, %v369_v23, -inf }
 0x1c9   : > { %8337 = vst [vmem:[#allocation224_spill] sm:$0xff] %v5533_v46  ;;  %v2177_v2 = vsel %vm405_vm0, %v370_v56, -inf  ;;  %v2184_v8 = vsel %vm405_vm0, %v371_v30, -inf  ;;  %v2191_v28 = vsel %vm405_vm0, %v372_v32, -inf  ;;  %v2144_v11 = vmax.f32 %v2142_v42, %v2143_v31 }
 0x1ca   : > { %v2151_v26 = vmax.f32 %v2149_v27, %v2150_v13  ;;  %v2158_v54 = vmax.f32 %v2156_v55, %v2157_v19  ;;  %v2165_v34 = vmax.f32 %v2163_v53, %v2164_v48  ;;  %v2171_v24 = vrot.slane %v2170_v52, 4  ;;  %v373_v48 = vld [vmem:[%s4169_s11 + $0x200] sm:$0x3] }
 0x1cb   : > { %v2178_v29 = vrot.slane %v2177_v2, 4  ;;  %v2185_v40 = vrot.slane %v2184_v8, 4  ;;  %v2192_v46 = vrot.slane %v2191_v28, 4  ;;  %v2145_v18 = vrot.slane %v2144_v11, 2 }
 0x1cc   : > { %v2152_v43 = vrot.slane %v2151_v26, 2  ;;  %v2159_v50 = vrot.slane %v2158_v54, 2  ;;  %v2166_v1 = vrot.slane %v2165_v34, 2  ;;  %v2172_v23 = vmax.f32 %v2170_v52, %v2171_v24  ;;  %v375_v24 = vld [vmem:[%s4169_s11 + $0x204] sm:$0x3] }
 0x1cd   : > { %v2179_v49 = vmax.f32 %v2177_v2, %v2178_v29  ;;  %v2186_v56 = vmax.f32 %v2184_v8, %v2185_v40  ;;  %v2193_v30 = vmax.f32 %v2191_v28, %v2192_v46  ;;  %v2146_v32 = vmax.f32 %v2144_v11, %v2145_v18  ;;  %v374_v8 = vld [vmem:[%s4169_s11 + $0x202] sm:$0x3]  ;;  %v376_v46 = vld [vmem:[%s4169_s11 + $0x206] sm:$0x3]  ;;  %v377_v28 = vld [vmem:[%s4169_s11 + $0x208] sm:$0x3] }
 0x1ce   : > { %v2153_v42 = vmax.f32 %v2151_v26, %v2152_v43  ;;  %v2160_v27 = vmax.f32 %v2158_v54, %v2159_v50  ;;  %v2167_v55 = vmax.f32 %v2165_v34, %v2166_v1  ;;  %v2173_v53 = vrot.slane %v2172_v23, 2  ;;  %v378_v29 = vld [vmem:[%s4169_s11 + $0x20a] sm:$0x3]  ;;  %v379_v40 = vld [vmem:[%s4169_s11 + $0x20c] sm:$0x3] }
 0x1cf   : > { %v2180_v31 = vrot.slane %v2179_v49, 2  ;;  %v2187_v13 = vrot.slane %v2186_v56, 2  ;;  %v2194_v19 = vrot.slane %v2193_v30, 2  ;;  %v2147_v44 = vrot.slane %v2146_v32, 1 }
 0x1d0   : > { %v2154_v10 = vrot.slane %v2153_v42, 1  ;;  %v2161_v52 = vrot.slane %v2160_v27, 1  ;;  %v2168_v2 = vrot.slane %v2167_v55, 1  ;;  %v2174_v18 = vmax.f32 %v2172_v23, %v2173_v53  ;;  %v380_v53 = vld [vmem:[%s4169_s11 + $0x20e] sm:$0x3] }
 0x1d1   : > { %v5546_v43 = vmax.f32 %v2179_v49, %v2180_v31  ;;  %v5548_v1 = vmax.f32 %v2186_v56, %v2187_v13  ;;  %v5550_v50 = vmax.f32 %v2193_v30, %v2194_v19  ;;  %v5554_v11 = vmax.f32 %v5502_v6, %v2126_v39 }
 0x1d2   : > { %v5557_v26 = vmax.f32 %v5504_v45, %v2133_v33  ;;  %v5560_v54 = vmax.f32 %v5506_v51, %v2140_v47  ;;  %v5562_v34 = vmax.f32 %v2146_v32, %v2147_v44  ;;  %v5566_v49 = vmax.f32 %v2153_v42, %v2154_v10 }
 0x1d3   : > { %8338 = vst [vmem:[#allocation225_spill] sm:$0xff] %v5554_v11  ;;  %v5568_v23 = vmax.f32 %v2160_v27, %v2161_v52  ;;  %v5570_v56 = vmax.f32 %v2167_v55, %v2168_v2  ;;  %v2175_v30 = vrot.slane %v2174_v18, 1  ;;  %v2198_v6 = vsel %vm405_vm0, %v373_v48, -inf }
 0x1d4   : > { %8339 = vst [vmem:[#allocation226_spill] sm:$0xff] %v5557_v26  ;;  %8340 = vst [vmem:[#allocation227_spill] sm:$0xff] %v5560_v54  ;;  %v2205_v45 = vsel %vm405_vm0, %v374_v8, -inf  ;;  %v2212_v39 = vsel %vm405_vm0, %v375_v24, -inf  ;;  %v2219_v51 = vsel %vm405_vm0, %v376_v46, -inf  ;;  %v2182_v33 = vrot.slane %v5546_v43, 1 }
 0x1d5   : > { %8341 = vst [vmem:[#allocation228_spill] sm:$0xff] %v5562_v34  ;;  %8342 = vst [vmem:[#allocation229_spill] sm:$0xff] %v5566_v49  ;;  %v5577_v44 = vmax.f32 %v2174_v18, %v2175_v30  ;;  %v2189_v10 = vrot.slane %v5548_v1, 1  ;;  %v2196_v47 = vrot.slane %v5550_v50, 1  ;;  %v2199_v32 = vrot.slane %v2198_v6, 4 }
 0x1d6   : > { %8343 = vst [vmem:[#allocation230_spill] sm:$0xff] %v5568_v23  ;;  %8344 = vst [vmem:[#allocation231_spill] sm:$0xff] %v5570_v56  ;;  %v2206_v42 = vrot.slane %v2205_v45, 4  ;;  %v2213_v27 = vrot.slane %v2212_v39, 4  ;;  %v2220_v55 = vrot.slane %v2219_v51, 4  ;;  %v2226_v31 = vsel %vm405_vm0, %v377_v28, -inf }
 0x1d7   : > { %8345 = vst [vmem:[#allocation232_spill] sm:$0xff] %v5577_v44  ;;  %v2233_v13 = vsel %vm405_vm0, %v378_v29, -inf  ;;  %v2240_v19 = vsel %vm405_vm0, %v379_v40, -inf  ;;  %v2247_v48 = vsel %vm405_vm0, %v380_v53, -inf  ;;  %v2200_v52 = vmax.f32 %v2198_v6, %v2199_v32 }
 0x1d8   : > { %v2207_v2 = vmax.f32 %v2205_v45, %v2206_v42  ;;  %v2214_v8 = vmax.f32 %v2212_v39, %v2213_v27  ;;  %v2221_v24 = vmax.f32 %v2219_v51, %v2220_v55  ;;  %v2227_v46 = vrot.slane %v2226_v31, 4  ;;  %v381_v55 = vld [vmem:[%s4169_s11 + $0x210] sm:$0x3] }
 0x1d9   : > { %v2234_v18 = vrot.slane %v2233_v13, 4  ;;  %v2241_v30 = vrot.slane %v2240_v19, 4  ;;  %v2248_v56 = vrot.slane %v2247_v48, 4  ;;  %v2201_v23 = vrot.slane %v2200_v52, 2 }
 0x1da   : > { %v2208_v49 = vrot.slane %v2207_v2, 2  ;;  %v2215_v34 = vrot.slane %v2214_v8, 2  ;;  %v2222_v54 = vrot.slane %v2221_v24, 2  ;;  %v2228_v28 = vmax.f32 %v2226_v31, %v2227_v46  ;;  %v383_v46 = vld [vmem:[%s4169_s11 + $0x214] sm:$0x3] }
 0x1db   : > { %v2235_v26 = vmax.f32 %v2233_v13, %v2234_v18  ;;  %v2242_v29 = vmax.f32 %v2240_v19, %v2241_v30  ;;  %v2249_v40 = vmax.f32 %v2247_v48, %v2248_v56  ;;  %v2202_v53 = vmax.f32 %v2200_v52, %v2201_v23  ;;  %v382_v19 = vld [vmem:[%s4169_s11 + $0x212] sm:$0x3]  ;;  %v384_v56 = vld [vmem:[%s4169_s11 + $0x216] sm:$0x3]  ;;  %v385_v48 = vld [vmem:[%s4169_s11 + $0x218] sm:$0x3] }
 0x1dc   : > { %v2209_v6 = vmax.f32 %v2207_v2, %v2208_v49  ;;  %v2216_v45 = vmax.f32 %v2214_v8, %v2215_v34  ;;  %v2223_v39 = vmax.f32 %v2221_v24, %v2222_v54  ;;  %v2229_v51 = vrot.slane %v2228_v28, 2  ;;  %v386_v18 = vld [vmem:[%s4169_s11 + $0x21a] sm:$0x3]  ;;  %v387_v30 = vld [vmem:[%s4169_s11 + $0x21c] sm:$0x3] }
 0x1dd   : > { %v2236_v32 = vrot.slane %v2235_v26, 2  ;;  %v2243_v42 = vrot.slane %v2242_v29, 2  ;;  %v2250_v27 = vrot.slane %v2249_v40, 2  ;;  %v2203_v11 = vrot.slane %v2202_v53, 1 }
 0x1de   : > { %v2210_v44 = vrot.slane %v2209_v6, 1  ;;  %v2217_v31 = vrot.slane %v2216_v45, 1  ;;  %v2224_v13 = vrot.slane %v2223_v39, 1  ;;  %v2230_v23 = vmax.f32 %v2228_v28, %v2229_v51  ;;  %v388_v51 = vld [vmem:[%s4169_s11 + $0x21e] sm:$0x3] }
 0x1df   : > { %v5590_v49 = vmax.f32 %v2235_v26, %v2236_v32  ;;  %v5592_v54 = vmax.f32 %v2242_v29, %v2243_v42  ;;  %v5594_v34 = vmax.f32 %v2249_v40, %v2250_v27  ;;  %v5598_v52 = vmax.f32 %v5546_v43, %v2182_v33 }
 0x1e0   : > { %v5601_v2 = vmax.f32 %v5548_v1, %v2189_v10  ;;  %v5604_v8 = vmax.f32 %v5550_v50, %v2196_v47  ;;  %v5606_v24 = vmax.f32 %v2202_v53, %v2203_v11  ;;  %v5610_v26 = vmax.f32 %v2209_v6, %v2210_v44 }
 0x1e1   : > { %8346 = vst [vmem:[#allocation233_spill] sm:$0xff] %v5598_v52  ;;  %v5612_v28 = vmax.f32 %v2216_v45, %v2217_v31  ;;  %v5614_v29 = vmax.f32 %v2223_v39, %v2224_v13  ;;  %v2231_v40 = vrot.slane %v2230_v23, 1  ;;  %v2254_v43 = vsel %vm405_vm0, %v381_v55, -inf }
 0x1e2   : > { %8347 = vst [vmem:[#allocation234_spill] sm:$0xff] %v5601_v2  ;;  %8348 = vst [vmem:[#allocation235_spill] sm:$0xff] %v5604_v8  ;;  %v2261_v1 = vsel %vm405_vm0, %v382_v19, -inf  ;;  %v2268_v33 = vsel %vm405_vm0, %v383_v46, -inf  ;;  %v2275_v50 = vsel %vm405_vm0, %v384_v56, -inf  ;;  %v2238_v10 = vrot.slane %v5590_v49, 1 }
 0x1e3   : > { %8349 = vst [vmem:[#allocation236_spill] sm:$0xff] %v5606_v24  ;;  %8350 = vst [vmem:[#allocation237_spill] sm:$0xff] %v5610_v26  ;;  %v5621_v11 = vmax.f32 %v2230_v23, %v2231_v40  ;;  %v2245_v44 = vrot.slane %v5592_v54, 1  ;;  %v2252_v47 = vrot.slane %v5594_v34, 1  ;;  %v2255_v53 = vrot.slane %v2254_v43, 4 }
 0x1e4   : > { %8351 = vst [vmem:[#allocation238_spill] sm:$0xff] %v5612_v28  ;;  %8352 = vst [vmem:[#allocation239_spill] sm:$0xff] %v5614_v29  ;;  %v2262_v6 = vrot.slane %v2261_v1, 4  ;;  %v2269_v45 = vrot.slane %v2268_v33, 4  ;;  %v2276_v39 = vrot.slane %v2275_v50, 4  ;;  %v2282_v32 = vsel %vm405_vm0, %v385_v48, -inf }
 0x1e5   : > { %8353 = vst [vmem:[#allocation240_spill] sm:$0xff] %v5621_v11  ;;  %v2289_v42 = vsel %vm405_vm0, %v386_v18, -inf  ;;  %v2296_v27 = vsel %vm405_vm0, %v387_v30, -inf  ;;  %v2303_v55 = vsel %vm405_vm0, %v388_v51, -inf  ;;  %v2256_v31 = vmax.f32 %v2254_v43, %v2255_v53 }
 0x1e6   : > { %v2263_v13 = vmax.f32 %v2261_v1, %v2262_v6  ;;  %v2270_v19 = vmax.f32 %v2268_v33, %v2269_v45  ;;  %v2277_v46 = vmax.f32 %v2275_v50, %v2276_v39  ;;  %v2283_v56 = vrot.slane %v2282_v32, 4  ;;  %v389_v39 = vld [vmem:[%s4169_s11 + $0x220] sm:$0x3] }
 0x1e7   : > { %v2290_v23 = vrot.slane %v2289_v42, 4  ;;  %v2297_v40 = vrot.slane %v2296_v27, 4  ;;  %v2304_v11 = vrot.slane %v2303_v55, 4  ;;  %v2257_v29 = vrot.slane %v2256_v31, 2 }
 0x1e8   : > { %v2264_v28 = vrot.slane %v2263_v13, 2  ;;  %v2271_v26 = vrot.slane %v2270_v19, 2  ;;  %v2278_v24 = vrot.slane %v2277_v46, 2  ;;  %v2284_v48 = vmax.f32 %v2282_v32, %v2283_v56  ;;  %v391_v56 = vld [vmem:[%s4169_s11 + $0x224] sm:$0x3] }
 0x1e9   : > { %v2291_v8 = vmax.f32 %v2289_v42, %v2290_v23  ;;  %v2298_v18 = vmax.f32 %v2296_v27, %v2297_v40  ;;  %v2305_v30 = vmax.f32 %v2303_v55, %v2304_v11  ;;  %v2258_v51 = vmax.f32 %v2256_v31, %v2257_v29  ;;  %v390_v27 = vld [vmem:[%s4169_s11 + $0x222] sm:$0x3]  ;;  %v392_v11 = vld [vmem:[%s4169_s11 + $0x226] sm:$0x3]  ;;  %v393_v55 = vld [vmem:[%s4169_s11 + $0x228] sm:$0x3] }
 0x1ea   : > { %v2265_v43 = vmax.f32 %v2263_v13, %v2264_v28  ;;  %v2272_v1 = vmax.f32 %v2270_v19, %v2271_v26  ;;  %v2279_v33 = vmax.f32 %v2277_v46, %v2278_v24  ;;  %v2285_v50 = vrot.slane %v2284_v48, 2  ;;  %v394_v23 = vld [vmem:[%s4169_s11 + $0x22a] sm:$0x3]  ;;  %v395_v40 = vld [vmem:[%s4169_s11 + $0x22c] sm:$0x3] }
 0x1eb   : > { %v2292_v53 = vrot.slane %v2291_v8, 2  ;;  %v2299_v6 = vrot.slane %v2298_v18, 2  ;;  %v2306_v45 = vrot.slane %v2305_v30, 2  ;;  %v2259_v2 = vrot.slane %v2258_v51, 1 }
 0x1ec   : > { %v2266_v52 = vrot.slane %v2265_v43, 1  ;;  %v2273_v32 = vrot.slane %v2272_v1, 1  ;;  %v2280_v42 = vrot.slane %v2279_v33, 1  ;;  %v2286_v29 = vmax.f32 %v2284_v48, %v2285_v50  ;;  %v396_v50 = vld [vmem:[%s4169_s11 + $0x22e] sm:$0x3] }
 0x1ed   : > { %v5634_v28 = vmax.f32 %v2291_v8, %v2292_v53  ;;  %v5636_v24 = vmax.f32 %v2298_v18, %v2299_v6  ;;  %v5638_v26 = vmax.f32 %v2305_v30, %v2306_v45  ;;  %v5642_v31 = vmax.f32 %v5590_v49, %v2238_v10 }
 0x1ee   : > { %v5645_v13 = vmax.f32 %v5592_v54, %v2245_v44  ;;  %v5648_v19 = vmax.f32 %v5594_v34, %v2252_v47  ;;  %v5650_v46 = vmax.f32 %v2258_v51, %v2259_v2  ;;  %v5654_v8 = vmax.f32 %v2265_v43, %v2266_v52 }
 0x1ef   : > { %8354 = vst [vmem:[#allocation241_spill] sm:$0xff] %v5642_v31  ;;  %v5656_v48 = vmax.f32 %v2272_v1, %v2273_v32  ;;  %v5658_v18 = vmax.f32 %v2279_v33, %v2280_v42  ;;  %v2287_v30 = vrot.slane %v2286_v29, 1  ;;  %v2310_v49 = vsel %vm405_vm0, %v389_v39, -inf }
 0x1f0   : > { %8355 = vst [vmem:[#allocation242_spill] sm:$0xff] %v5645_v13  ;;  %8356 = vst [vmem:[#allocation243_spill] sm:$0xff] %v5648_v19  ;;  %v2317_v54 = vsel %vm405_vm0, %v390_v27, -inf  ;;  %v2324_v10 = vsel %vm405_vm0, %v391_v56, -inf  ;;  %v2331_v34 = vsel %vm405_vm0, %v392_v11, -inf  ;;  %v2294_v44 = vrot.slane %v5634_v28, 1 }
 0x1f1   : > { %8357 = vst [vmem:[#allocation244_spill] sm:$0xff] %v5650_v46  ;;  %8358 = vst [vmem:[#allocation245_spill] sm:$0xff] %v5654_v8  ;;  %v5665_v2 = vmax.f32 %v2286_v29, %v2287_v30  ;;  %v2301_v52 = vrot.slane %v5636_v24, 1  ;;  %v2308_v47 = vrot.slane %v5638_v26, 1  ;;  %v2311_v51 = vrot.slane %v2310_v49, 4 }
 0x1f2   : > { %8359 = vst [vmem:[#allocation246_spill] sm:$0xff] %v5656_v48  ;;  %8360 = vst [vmem:[#allocation247_spill] sm:$0xff] %v5658_v18  ;;  %v2318_v43 = vrot.slane %v2317_v54, 4  ;;  %v2325_v1 = vrot.slane %v2324_v10, 4  ;;  %v2332_v33 = vrot.slane %v2331_v34, 4  ;;  %v2338_v53 = vsel %vm405_vm0, %v393_v55, -inf }
 0x1f3   : > { %8361 = vst [vmem:[#allocation248_spill] sm:$0xff] %v5665_v2  ;;  %v2345_v6 = vsel %vm405_vm0, %v394_v23, -inf  ;;  %v2352_v45 = vsel %vm405_vm0, %v395_v40, -inf  ;;  %v2359_v39 = vsel %vm405_vm0, %v396_v50, -inf  ;;  %v2312_v32 = vmax.f32 %v2310_v49, %v2311_v51 }
 0x1f4   : > { %v2319_v42 = vmax.f32 %v2317_v54, %v2318_v43  ;;  %v2326_v27 = vmax.f32 %v2324_v10, %v2325_v1  ;;  %v2333_v56 = vmax.f32 %v2331_v34, %v2332_v33  ;;  %v2339_v11 = vrot.slane %v2338_v53, 4  ;;  %v397_v33 = vld [vmem:[%s4169_s11 + $0x230] sm:$0x3] }
 0x1f5   : > { %v2346_v29 = vrot.slane %v2345_v6, 4  ;;  %v2353_v30 = vrot.slane %v2352_v45, 4  ;;  %v2360_v2 = vrot.slane %v2359_v39, 4  ;;  %v2313_v18 = vrot.slane %v2312_v32, 2 }
 0x1f6   : > { %v2320_v48 = vrot.slane %v2319_v42, 2  ;;  %v2327_v8 = vrot.slane %v2326_v27, 2  ;;  %v2334_v46 = vrot.slane %v2333_v56, 2  ;;  %v2340_v55 = vmax.f32 %v2338_v53, %v2339_v11  ;;  %v399_v11 = vld [vmem:[%s4169_s11 + $0x234] sm:$0x3] }
 0x1f7   : > { %v2347_v19 = vmax.f32 %v2345_v6, %v2346_v29  ;;  %v2354_v23 = vmax.f32 %v2352_v45, %v2353_v30  ;;  %v2361_v40 = vmax.f32 %v2359_v39, %v2360_v2  ;;  %v2314_v50 = vmax.f32 %v2312_v32, %v2313_v18  ;;  %v398_v45 = vld [vmem:[%s4169_s11 + $0x232] sm:$0x3]  ;;  %v400_v2 = vld [vmem:[%s4169_s11 + $0x236] sm:$0x3]  ;;  %v401_v39 = vld [vmem:[%s4169_s11 + $0x238] sm:$0x3] }
 0x1f8   : > { %v2321_v49 = vmax.f32 %v2319_v42, %v2320_v48  ;;  %v2328_v54 = vmax.f32 %v2326_v27, %v2327_v8  ;;  %v2335_v10 = vmax.f32 %v2333_v56, %v2334_v46  ;;  %v2341_v34 = vrot.slane %v2340_v55, 2  ;;  %v402_v29 = vld [vmem:[%s4169_s11 + $0x23a] sm:$0x3]  ;;  %v403_v30 = vld [vmem:[%s4169_s11 + $0x23c] sm:$0x3] }
 0x1f9   : > { %v2348_v51 = vrot.slane %v2347_v19, 2  ;;  %v2355_v43 = vrot.slane %v2354_v23, 2  ;;  %v2362_v1 = vrot.slane %v2361_v40, 2  ;;  %v2315_v13 = vrot.slane %v2314_v50, 1 }
 0x1fa   : > { %v2322_v31 = vrot.slane %v2321_v49, 1  ;;  %v2329_v53 = vrot.slane %v2328_v54, 1  ;;  %v2336_v6 = vrot.slane %v2335_v10, 1  ;;  %v2342_v18 = vmax.f32 %v2340_v55, %v2341_v34  ;;  %v404_v34 = vld [vmem:[%s4169_s11 + $0x23e] sm:$0x3] }
 0x1fb   : > { %v5678_v48 = vmax.f32 %v2347_v19, %v2348_v51  ;;  %v5680_v46 = vmax.f32 %v2354_v23, %v2355_v43  ;;  %v5682_v8 = vmax.f32 %v2361_v40, %v2362_v1  ;;  %v5686_v32 = vmax.f32 %v5634_v28, %v2294_v44 }
 0x1fc   : > { %v5689_v42 = vmax.f32 %v5636_v24, %v2301_v52  ;;  %v5692_v27 = vmax.f32 %v5638_v26, %v2308_v47  ;;  %v5694_v56 = vmax.f32 %v2314_v50, %v2315_v13  ;;  %v5698_v19 = vmax.f32 %v2321_v49, %v2322_v31 }
 0x1fd   : > { %8362 = vst [vmem:[#allocation249_spill] sm:$0xff] %v5686_v32  ;;  %v5700_v55 = vmax.f32 %v2328_v54, %v2329_v53  ;;  %v5702_v23 = vmax.f32 %v2335_v10, %v2336_v6  ;;  %v2343_v40 = vrot.slane %v2342_v18, 1  ;;  %v2366_v28 = vsel %vm405_vm0, %v397_v33, -inf }
 0x1fe   : > { %8363 = vst [vmem:[#allocation250_spill] sm:$0xff] %v5689_v42  ;;  %8364 = vst [vmem:[#allocation251_spill] sm:$0xff] %v5692_v27  ;;  %v2373_v24 = vsel %vm405_vm0, %v398_v45, -inf  ;;  %v2380_v44 = vsel %vm405_vm0, %v399_v11, -inf  ;;  %v2387_v26 = vsel %vm405_vm0, %v400_v2, -inf  ;;  %v2350_v52 = vrot.slane %v5678_v48, 1 }
 0x1ff   : > { %8365 = vst [vmem:[#allocation252_spill] sm:$0xff] %v5694_v56  ;;  %8366 = vst [vmem:[#allocation253_spill] sm:$0xff] %v5698_v19  ;;  %v5709_v13 = vmax.f32 %v2342_v18, %v2343_v40  ;;  %v2357_v31 = vrot.slane %v5680_v46, 1  ;;  %v2364_v47 = vrot.slane %v5682_v8, 1  ;;  %v2367_v50 = vrot.slane %v2366_v28, 4 }
 0x200   : > { %8367 = vst [vmem:[#allocation254_spill] sm:$0xff] %v5700_v55  ;;  %8368 = vst [vmem:[#allocation255_spill] sm:$0xff] %v5702_v23  ;;  %v2374_v49 = vrot.slane %v2373_v24, 4  ;;  %v2381_v54 = vrot.slane %v2380_v44, 4  ;;  %v2388_v10 = vrot.slane %v2387_v26, 4  ;;  %v2394_v51 = vsel %vm405_vm0, %v401_v39, -inf }
 0x201   : > { %8369 = vst [vmem:[#allocation256_spill] sm:$0xff] %v5709_v13  ;;  %v2401_v43 = vsel %vm405_vm0, %v402_v29, -inf  ;;  %v2408_v1 = vsel %vm405_vm0, %v403_v30, -inf  ;;  %v2415_v33 = vsel %vm405_vm0, %v404_v34, -inf  ;;  %v2368_v53 = vmax.f32 %v2366_v28, %v2367_v50 }
 0x202   : > { %v2375_v6 = vmax.f32 %v2373_v24, %v2374_v49  ;;  %v2382_v45 = vmax.f32 %v2380_v44, %v2381_v54  ;;  %v2389_v11 = vmax.f32 %v2387_v26, %v2388_v10  ;;  %v2395_v2 = vrot.slane %v2394_v51, 4 }
 0x203   : > { %v2402_v18 = vrot.slane %v2401_v43, 4  ;;  %v2409_v40 = vrot.slane %v2408_v1, 4  ;;  %v2416_v23 = vrot.slane %v2415_v33, 4  ;;  %v2369_v55 = vrot.slane %v2368_v53, 2 }
 0x204   : > { %v2376_v19 = vrot.slane %v2375_v6, 2  ;;  %v2383_v56 = vrot.slane %v2382_v45, 2  ;;  %v2390_v27 = vrot.slane %v2389_v11, 2  ;;  %v2396_v42 = vmax.f32 %v2394_v51, %v2395_v2 }
 0x205   : > { %v2403_v39 = vmax.f32 %v2401_v43, %v2402_v18  ;;  %v2410_v32 = vmax.f32 %v2408_v1, %v2409_v40  ;;  %v2417_v29 = vmax.f32 %v2415_v33, %v2416_v23  ;;  %v2370_v13 = vmax.f32 %v2368_v53, %v2369_v55 }
 0x206   : > { %v2377_v30 = vmax.f32 %v2375_v6, %v2376_v19  ;;  %v2384_v41 = vmax.f32 %v2382_v45, %v2383_v56  ;;  %v2391_v34 = vmax.f32 %v2389_v11, %v2390_v27  ;;  %v2397_v28 = vrot.slane %v2396_v42, 2 }
 0x207   : > { %v2404_v24 = vrot.slane %v2403_v39, 2  ;;  %v2411_v44 = vrot.slane %v2410_v32, 2  ;;  %v2418_v26 = vrot.slane %v2417_v29, 2  ;;  %v2371_v50 = vrot.slane %v2370_v13, 1 }
 0x208   : > { %v2378_v49 = vrot.slane %v2377_v30, 1  ;;  %v2385_v54 = vrot.slane %v2384_v41, 1  ;;  %v2392_v10 = vrot.slane %v2391_v34, 1  ;;  %v2398_v25 = vmax.f32 %v2396_v42, %v2397_v28 }
 0x209   : > { %v2405_v38 = vmax.f32 %v2403_v39, %v2404_v24  ;;  %v2412_v37 = vmax.f32 %v2410_v32, %v2411_v44  ;;  %v2419_v9 = vmax.f32 %v2417_v29, %v2418_v26  ;;  %v5719_v51 = vmax.f32 %v5678_v48, %v2350_v52  ;;  %v8370_v29 = vld [vmem:[#allocation2_spill] sm:$0xff]  ;;  %v8373_v24 = vld [vmem:[#allocation16_spill] sm:$0xff] }
 0x20a   : > { %v5722_v55 = vmax.f32 %v5680_v46, %v2357_v31  ;;  %v5725_v27 = vmax.f32 %v5682_v8, %v2364_v47  ;;  %v5727_v56 = vmax.f32 %v2370_v13, %v2371_v50  ;;  %v2399_v19 = vrot.slane %v2398_v25, 1 }
 0x20b   : > { %v2406_v23 = vrot.slane %v2405_v38, 1  ;;  %v2413_v43 = vrot.slane %v2412_v37, 1  ;;  %v2420_v1 = vrot.slane %v2419_v9, 1  ;;  %v5729_v33 = vmax.f32 %v2377_v30, %v2378_v49  ;;  %v8371_v30 = vld [vmem:[#allocation3_spill] sm:$0xff] }
 0x20c   : > { %v5731_v42 = vmax.f32 %v2384_v41, %v2385_v54  ;;  %v5733_v32 = vmax.f32 %v2391_v34, %v2392_v10  ;;  %v5735_v48 = vmax.f32 %v2398_v25, %v2399_v19  ;;  %v2423_v13 = vsel %vm2422_vm1, %v4198_v57, -inf  ;;  %v8372_v34 = vld [vmem:[#allocation4_spill] sm:$0xff]  ;;  %v8376_v10 = vld [vmem:[#allocation6_spill] sm:$0xff] }
 0x20d   : > { %v5737_v46 = vmax.f32 %v2405_v38, %v2406_v23  ;;  %v5739_v52 = vmax.f32 %v2412_v37, %v2413_v43  ;;  %v5741_v8 = vmax.f32 %v2419_v9, %v2420_v1  ;;  %v2424_v31 = vsel %vm2422_vm1, %v4257_v7, -inf  ;;  %v8377_v23 = vld [vmem:[#allocation18_spill] sm:$0xff] }
 0x20e   : > { %v2426_v41 = vsel %vm2422_vm1, %v4202_v60, -inf  ;;  %v2427_v47 = vsel %vm2422_vm1, %v4278_v14, -inf  ;;  %v5751_v25 = vmax.f32 %v2423_v13, %v2424_v31  ;;  %v2429_v9 = vsel %vm2422_vm1, %v4204_v61, -inf  ;;  %v8378_v13 = vld [vmem:[#allocation7_spill] sm:$0xff] }
 0x20f   : > { %v5753_v38 = vmax.f32 %v2426_v41, %v2427_v47  ;;  %v2430_v37 = vsel %vm2422_vm1, %v4281_v15, -inf  ;;  %v2432_v7 = vsel %vm2422_vm1, %v4206_v62, -inf  ;;  %v2433_v60 = vsel %vm2422_vm1, %v4284_v16, -inf  ;;  %v8379_v41 = vld [vmem:[#allocation19_spill] sm:$0xff] }
 0x210   : > { %v5759_v57 = vmax.f32 %v2429_v9, %v2430_v37  ;;  %v2435_v14 = vsel %vm2422_vm1, %v4213_v5, -inf  ;;  %v5767_v53 = vmax.f32 %v2432_v7, %v2433_v60  ;;  %v2436_v6 = vsel %vm2422_vm1, %v4286_v17, -inf  ;;  %v8380_v9 = vld [vmem:[#allocation8_spill] sm:$0xff] }
 0x211   : > { %v2438_v61 = vsel %vm2422_vm1, %v4234_v58, -inf  ;;  %v2439_v15 = vsel %vm2422_vm1, %v4290_v20, -inf  ;;  %v5775_v45 = vmax.f32 %v2435_v14, %v2436_v6  ;;  %v2441_v16 = vsel %vm2422_vm1, %v4237_v59, -inf  ;;  %v8381_v60 = vld [vmem:[#allocation20_spill] sm:$0xff]  ;;  %v8382_v6 = vld [vmem:[#allocation9_spill] sm:$0xff] }
 0x212   : > { %v5777_v62 = vmax.f32 %v2438_v61, %v2439_v15  ;;  %v2442_v5 = vsel %vm2422_vm1, %v4292_v21, -inf  ;;  %v2444_v17 = vsel %vm2422_vm1, %v4240_v63, -inf  ;;  %v2445_v58 = vsel %vm2422_vm1, %v4294_v22, -inf  ;;  %v8383_v15 = vld [vmem:[#allocation21_spill] sm:$0xff] }
 0x213   : > { %v5783_v11 = vmax.f32 %v2441_v16, %v2442_v5  ;;  %v2447_v20 = vsel %vm2422_vm1, %v4242_v0, -inf  ;;  %v5791_v2 = vmax.f32 %v2444_v17, %v2445_v58  ;;  %v2448_v18 = vsel %vm2422_vm1, %v4301_v12, -inf  ;;  %v8384_v58 = vld [vmem:[#allocation10_spill] sm:$0xff] }
 0x214   : > { %v2450_v59 = vsel %vm2422_vm1, %v4246_v3, -inf  ;;  %v2451_v21 = vsel %vm2422_vm1, %v4322_v35, -inf  ;;  %v5799_v40 = vmax.f32 %v2447_v20, %v2448_v18  ;;  %v2453_v22 = vsel %vm2422_vm1, %v4248_v4, -inf  ;;  %v8374_v4 = vld [vmem:[#allocation5_spill] sm:$0xff]  ;;  %v8385_v18 = vld [vmem:[#allocation22_spill] sm:$0xff] }
 0x215   : > { %v5801_v63 = vmax.f32 %v2450_v59, %v2451_v21  ;;  %v2454_v0 = vsel %vm2422_vm1, %v4325_v36, -inf  ;;  %v2456_v12 = vsel %vm2422_vm1, %v8370_v29, -inf  ;;  %v2457_v3 = vsel %vm2422_vm1, %v8371_v30, -inf  ;;  %v8375_v36 = vld [vmem:[#allocation17_spill] sm:$0xff]  ;;  %v8387_v29 = vld [vmem:[#allocation23_spill] sm:$0xff]  ;;  %v8388_v30 = vld [vmem:[#allocation12_spill] sm:$0xff] }
 0x216   : > { %v5807_v39 = vmax.f32 %v2453_v22, %v2454_v0  ;;  %v2459_v35 = vsel %vm2422_vm1, %v8372_v34, -inf  ;;  %v5815_v28 = vmax.f32 %v2456_v12, %v2457_v3  ;;  %v2460_v44 = vsel %vm2422_vm1, %v8373_v24, -inf  ;;  %v8386_v22 = vld [vmem:[#allocation11_spill] sm:$0xff] }
 0x217   : > { %v2462_v26 = vsel %vm2422_vm1, %v8374_v4, -inf  ;;  %v2463_v50 = vsel %vm2422_vm1, %v8375_v36, -inf  ;;  %v5823_v49 = vmax.f32 %v2459_v35, %v2460_v44  ;;  %v2465_v19 = vsel %vm2422_vm1, %v8376_v10, -inf  ;;  %v8389_v35 = vld [vmem:[#allocation24_spill] sm:$0xff]  ;;  %v8390_v44 = vld [vmem:[#allocation13_spill] sm:$0xff] }
 0x218   : > { %v5825_v54 = vmax.f32 %v2462_v26, %v2463_v50  ;;  %v2466_v43 = vsel %vm2422_vm1, %v8377_v23, -inf  ;;  %v2468_v31 = vsel %vm2422_vm1, %v8378_v13, -inf  ;;  %v2469_v47 = vsel %vm2422_vm1, %v8379_v41, -inf  ;;  %v8391_v26 = vld [vmem:[#allocation25_spill] sm:$0xff]  ;;  %v8394_v41 = vld [vmem:[#allocation15_spill] sm:$0xff] }
 0x219   : > { %v5831_v1 = vmax.f32 %v2465_v19, %v2466_v43  ;;  %v2471_v37 = vsel %vm2422_vm1, %v8380_v9, -inf  ;;  %v5839_v7 = vmax.f32 %v2468_v31, %v2469_v47  ;;  %v2472_v14 = vsel %vm2422_vm1, %v8381_v60, -inf  ;;  %v8392_v19 = vld [vmem:[#allocation14_spill] sm:$0xff]  ;;  %v8395_v9 = vld [vmem:[#allocation27_spill] sm:$0xff]  ;;  %v8396_v60 = vld [vmem:[#allocation28_spill] sm:$0xff] }
 0x21a   : > { %v2474_v61 = vsel %vm2422_vm1, %v8382_v6, -inf  ;;  %v2475_v16 = vsel %vm2422_vm1, %v8383_v15, -inf  ;;  %v5847_v5 = vmax.f32 %v2471_v37, %v2472_v14  ;;  %v2477_v20 = vsel %vm2422_vm1, %v8384_v58, -inf  ;;  %v8393_v43 = vld [vmem:[#allocation26_spill] sm:$0xff] }
 0x21b   : > { %v5849_v17 = vmax.f32 %v2474_v61, %v2475_v16  ;;  %v2478_v59 = vsel %vm2422_vm1, %v8385_v18, -inf  ;;  %v2480_v0 = vsel %vm2422_vm1, %v8386_v22, -inf  ;;  %v2481_v12 = vsel %vm2422_vm1, %v8387_v29, -inf  ;;  %v8397_v61 = vld [vmem:[#allocation40_spill] sm:$0xff]  ;;  %v8398_v16 = vld [vmem:[#allocation29_spill] sm:$0xff] }
 0x21c   : > { %v5855_v21 = vmax.f32 %v2477_v20, %v2478_v59  ;;  %v2483_v3 = vsel %vm2422_vm1, %v8388_v30, -inf  ;;  %v5863_v34 = vmax.f32 %v2480_v0, %v2481_v12  ;;  %v2484_v24 = vsel %vm2422_vm1, %v8389_v35, -inf  ;;  %v8399_v20 = vld [vmem:[#allocation41_spill] sm:$0xff]  ;;  %v8400_v0 = vld [vmem:[#allocation30_spill] sm:$0xff]  ;;  %v8402_v35 = vld [vmem:[#allocation31_spill] sm:$0xff] }
 0x21d   : > { %v2486_v4 = vsel %vm2422_vm1, %v8390_v44, -inf  ;;  %v2487_v36 = vsel %vm2422_vm1, %v8391_v26, -inf  ;;  %v5871_v50 = vmax.f32 %v2483_v3, %v2484_v24  ;;  %v2489_v23 = vsel %vm2422_vm1, %v8392_v19, -inf  ;;  %v8401_v12 = vld [vmem:[#allocation42_spill] sm:$0xff]  ;;  %v8403_v44 = vld [vmem:[#allocation43_spill] sm:$0xff]  ;;  %v8404_v26 = vld [vmem:[#allocation32_spill] sm:$0xff] }
 0x21e   : > { %v5873_v10 = vmax.f32 %v2486_v4, %v2487_v36  ;;  %v2490_v13 = vsel %vm2422_vm1, %v8393_v43, -inf  ;;  %v2492_v47 = vsel %vm2422_vm1, %v8394_v41, -inf  ;;  %v2493_v37 = vsel %vm2422_vm1, %v8395_v9, -inf }
 0x21f   : > { %v5879_v31 = vmax.f32 %v2489_v23, %v2490_v13  ;;  %v2495_v14 = vsel %vm2422_vm1, %v8396_v60, -inf  ;;  %v5887_v6 = vmax.f32 %v2492_v47, %v2493_v37  ;;  %v2496_v15 = vsel %vm2422_vm1, %v8397_v61, -inf  ;;  %v8405_v23 = vld [vmem:[#allocation44_spill] sm:$0xff]  ;;  %v8406_v13 = vld [vmem:[#allocation33_spill] sm:$0xff] }
 0x220   : > { %v2498_v58 = vsel %vm2422_vm1, %v8398_v16, -inf  ;;  %v2499_v18 = vsel %vm2422_vm1, %v8399_v20, -inf  ;;  %v5895_v59 = vmax.f32 %v2495_v14, %v2496_v15  ;;  %v2501_v29 = vsel %vm2422_vm1, %v8400_v0, -inf  ;;  %v8407_v47 = vld [vmem:[#allocation45_spill] sm:$0xff]  ;;  %v8408_v14 = vld [vmem:[#allocation34_spill] sm:$0xff]  ;;  %v8410_v20 = vld [vmem:[#allocation35_spill] sm:$0xff] }
 0x221   : > { %v5897_v22 = vmax.f32 %v2498_v58, %v2499_v18  ;;  %v2502_v30 = vsel %vm2422_vm1, %v8401_v12, -inf  ;;  %v2504_v24 = vsel %vm2422_vm1, %v8402_v35, -inf  ;;  %v2505_v4 = vsel %vm2422_vm1, %v8403_v44, -inf  ;;  %v8409_v15 = vld [vmem:[#allocation46_spill] sm:$0xff]  ;;  %v8411_v0 = vld [vmem:[#allocation47_spill] sm:$0xff]  ;;  %v8412_v12 = vld [vmem:[#allocation36_spill] sm:$0xff] }
 0x222   : > { %v5903_v3 = vmax.f32 %v2501_v29, %v2502_v30  ;;  %v2507_v36 = vsel %vm2422_vm1, %v8404_v26, -inf  ;;  %v5911_v19 = vmax.f32 %v2504_v24, %v2505_v4  ;;  %v2508_v43 = vsel %vm2422_vm1, %v8405_v23, -inf  ;;  %v8413_v24 = vld [vmem:[#allocation48_spill] sm:$0xff]  ;;  %v8414_v4 = vld [vmem:[#allocation37_spill] sm:$0xff] }
 0x223   : > { %v2510_v41 = vsel %vm2422_vm1, %v8406_v13, -inf  ;;  %v2511_v9 = vsel %vm2422_vm1, %v8407_v47, -inf  ;;  %v5919_v37 = vmax.f32 %v2507_v36, %v2508_v43  ;;  %v2513_v61 = vsel %vm2422_vm1, %v8408_v14, -inf  ;;  %v8415_v36 = vld [vmem:[#allocation49_spill] sm:$0xff] }
 0x224   : > { %v5921_v60 = vmax.f32 %v2510_v41, %v2511_v9  ;;  %v2514_v16 = vsel %vm2422_vm1, %v8409_v15, -inf  ;;  %v2516_v18 = vsel %vm2422_vm1, %v8410_v20, -inf  ;;  %v2517_v29 = vsel %vm2422_vm1, %v8411_v0, -inf  ;;  %v8416_v41 = vld [vmem:[#allocation38_spill] sm:$0xff]  ;;  %v8419_v15 = vld [vmem:[#allocation39_spill] sm:$0xff]  ;;  %v8421_v0 = vld [vmem:[#allocation52_spill] sm:$0xff] }
 0x225   : > { %v5927_v58 = vmax.f32 %v2513_v61, %v2514_v16  ;;  %v2519_v30 = vsel %vm2422_vm1, %v8412_v12, -inf  ;;  %v5935_v35 = vmax.f32 %v2516_v18, %v2517_v29  ;;  %v2520_v44 = vsel %vm2422_vm1, %v8413_v24, -inf  ;;  %v8417_v9 = vld [vmem:[#allocation50_spill] sm:$0xff]  ;;  %v8420_v20 = vld [vmem:[#allocation51_spill] sm:$0xff] }
 0x226   : > { %v2522_v26 = vsel %vm2422_vm1, %v8414_v4, -inf  ;;  %v2523_v23 = vsel %vm2422_vm1, %v8415_v36, -inf  ;;  %v5943_v43 = vmax.f32 %v2519_v30, %v2520_v44  ;;  %v2525_v47 = vsel %vm2422_vm1, %v8416_v41, -inf  ;;  %v8423_v30 = vld [vmem:[#allocation64_spill] sm:$0xff]  ;;  %v8424_v44 = vld [vmem:[#allocation53_spill] sm:$0xff] }
 0x227   : > { %v5945_v13 = vmax.f32 %v2522_v26, %v2523_v23  ;;  %v2526_v14 = vsel %vm2422_vm1, %v8417_v9, -inf  ;;  %v2528_v16 = vsel %vm2422_vm1, %v8419_v15, -inf  ;;  %v2529_v18 = vsel %vm2422_vm1, %v8420_v20, -inf  ;;  %v8425_v26 = vld [vmem:[#allocation65_spill] sm:$0xff]  ;;  %v8431_v20 = vld [vmem:[#allocation55_spill] sm:$0xff] }
 0x228   : > { %v5951_v61 = vmax.f32 %v2525_v47, %v2526_v14  ;;  %v2531_v29 = vsel %vm2422_vm1, %v8421_v0, -inf  ;;  %v5959_v12 = vmax.f32 %v2528_v16, %v2529_v18  ;;  %v2532_v24 = vsel %vm2422_vm1, %v8423_v30, -inf  ;;  %v8428_v47 = vld [vmem:[#allocation54_spill] sm:$0xff]  ;;  %v8432_v0 = vld [vmem:[#allocation67_spill] sm:$0xff] }
 0x229   : > { %v2534_v4 = vsel %vm2422_vm1, %v8424_v44, -inf  ;;  %v2535_v36 = vsel %vm2422_vm1, %v8425_v26, -inf  ;;  %v5967_v23 = vmax.f32 %v2531_v29, %v2532_v24  ;;  %v2537_v9 = vsel %vm2422_vm1, %v8428_v47, -inf  ;;  %v8429_v14 = vld [vmem:[#allocation66_spill] sm:$0xff]  ;;  %v8433_v44 = vld [vmem:[#allocation56_spill] sm:$0xff] }
 0x22a   : > { %8418 = vst [vmem:[#allocation2_spill] sm:$0xff] %v5951_v61  ;;  %8422 = vst [vmem:[#allocation3_spill] sm:$0xff] %v5959_v12  ;;  %v5969_v41 = vmax.f32 %v2534_v4, %v2535_v36  ;;  %v2538_v15 = vsel %vm2422_vm1, %v8429_v14, -inf  ;;  %v2540_v18 = vsel %vm2422_vm1, %v8431_v20, -inf  ;;  %v2541_v30 = vsel %vm2422_vm1, %v8432_v0, -inf  ;;  %v8435_v4 = vld [vmem:[#allocation68_spill] sm:$0xff] }
 0x22b   : > { %8426 = vst [vmem:[#allocation4_spill] sm:$0xff] %v5967_v23  ;;  %v5975_v16 = vmax.f32 %v2537_v9, %v2538_v15  ;;  %v2543_v29 = vsel %vm2422_vm1, %v8433_v44, -inf  ;;  %v5983_v24 = vmax.f32 %v2540_v18, %v2541_v30  ;;  %v2544_v26 = vsel %vm2422_vm1, %v8435_v4, -inf  ;;  %v8436_v36 = vld [vmem:[#allocation57_spill] sm:$0xff]  ;;  %v8443_v44 = vld [vmem:[#allocation59_spill] sm:$0xff]  ;;  %v8445_v23 = vld [vmem:[#allocation60_spill] sm:$0xff] }
 0x22c   : > { %8427 = vst [vmem:[#allocation16_spill] sm:$0xff] %v5969_v41  ;;  %v2546_v47 = vsel %vm2422_vm1, %v8436_v36, -inf  ;;  %v8437_v14 = vld [vmem:[#allocation69_spill] sm:$0xff]  ;;  %v5991_v15 = vmax.f32 %v2543_v29, %v2544_v26  ;;  %v8441_v41 = vld [vmem:[#allocation70_spill] sm:$0xff]  ;;  %v2552_v4 = vsel %vm2422_vm1, %v8443_v44, -inf  ;;  %v2555_v29 = vsel %vm2422_vm1, %v8445_v23, -inf }
 0x22d   : > { %8430 = vst [vmem:[#allocation5_spill] sm:$0xff] %v5975_v16  ;;  %8434 = vst [vmem:[#allocation17_spill] sm:$0xff] %v5983_v24  ;;  %v2547_v9 = vsel %vm2422_vm1, %v8437_v14, -inf  ;;  %v8440_v16 = vld [vmem:[#allocation58_spill] sm:$0xff]  ;;  %v2550_v18 = vsel %vm2422_vm1, %v8441_v41, -inf  ;;  %v8444_v24 = vld [vmem:[#allocation71_spill] sm:$0xff] }
 0x22e   : > { %8438 = vst [vmem:[#allocation6_spill] sm:$0xff] %v5991_v15  ;;  %v5993_v20 = vmax.f32 %v2546_v47, %v2547_v9  ;;  %v2549_v0 = vsel %vm2422_vm1, %v8440_v16, -inf  ;;  %v2553_v36 = vsel %vm2422_vm1, %v8444_v24, -inf  ;;  %v8447_v47 = vld [vmem:[#allocation72_spill] sm:$0xff]  ;;  %v8448_v16 = vld [vmem:[#allocation61_spill] sm:$0xff] }
 0x22f   : > { %v5999_v30 = vmax.f32 %v2549_v0, %v2550_v18  ;;  %v6007_v26 = vmax.f32 %v2552_v4, %v2553_v36  ;;  %v2556_v14 = vsel %vm2422_vm1, %v8447_v47, -inf  ;;  %v2558_v9 = vsel %vm2422_vm1, %v8448_v16, -inf  ;;  %v8449_v41 = vld [vmem:[#allocation73_spill] sm:$0xff]  ;;  %v8455_v36 = vld [vmem:[#allocation63_spill] sm:$0xff]  ;;  %v8457_v15 = vld [vmem:[#allocation76_spill] sm:$0xff] }
 0x230   : > { %8439 = vst [vmem:[#allocation18_spill] sm:$0xff] %v5993_v20  ;;  %v2559_v0 = vsel %vm2422_vm1, %v8449_v41, -inf  ;;  %v6015_v18 = vmax.f32 %v2555_v29, %v2556_v14  ;;  %v8453_v20 = vld [vmem:[#allocation74_spill] sm:$0xff]  ;;  %v2564_v47 = vsel %vm2422_vm1, %v8455_v36, -inf  ;;  %v2567_v29 = vsel %vm2422_vm1, %v8457_v15, -inf }
 0x231   : > { %8442 = vst [vmem:[#allocation7_spill] sm:$0xff] %v5999_v30  ;;  %8446 = vst [vmem:[#allocation19_spill] sm:$0xff] %v6007_v26  ;;  %v6017_v44 = vmax.f32 %v2558_v9, %v2559_v0  ;;  %v8452_v30 = vld [vmem:[#allocation62_spill] sm:$0xff]  ;;  %v2562_v23 = vsel %vm2422_vm1, %v8453_v20, -inf  ;;  %v8456_v26 = vld [vmem:[#allocation75_spill] sm:$0xff] }
 0x232   : > { %8450 = vst [vmem:[#allocation8_spill] sm:$0xff] %v6015_v18  ;;  %v2561_v24 = vsel %vm2422_vm1, %v8452_v30, -inf  ;;  %v2565_v16 = vsel %vm2422_vm1, %v8456_v26, -inf  ;;  %v8459_v9 = vld [vmem:[#allocation88_spill] sm:$0xff]  ;;  %v8460_v30 = vld [vmem:[#allocation77_spill] sm:$0xff] }
 0x233   : > { %8451 = vst [vmem:[#allocation20_spill] sm:$0xff] %v6017_v44  ;;  %v6023_v4 = vmax.f32 %v2561_v24, %v2562_v23  ;;  %v6031_v14 = vmax.f32 %v2564_v47, %v2565_v16  ;;  %v2568_v41 = vsel %vm2422_vm1, %v8459_v9, -inf  ;;  %v2570_v0 = vsel %vm2422_vm1, %v8460_v30, -inf  ;;  %v8461_v20 = vld [vmem:[#allocation89_spill] sm:$0xff]  ;;  %v8465_v44 = vld [vmem:[#allocation90_spill] sm:$0xff]  ;;  %v8467_v16 = vld [vmem:[#allocation79_spill] sm:$0xff] }
 0x234   : > { %v2571_v24 = vsel %vm2422_vm1, %v8461_v20, -inf  ;;  %v6039_v23 = vmax.f32 %v2567_v29, %v2568_v41  ;;  %v2574_v15 = vsel %vm2422_vm1, %v8465_v44, -inf  ;;  %v2576_v9 = vsel %vm2422_vm1, %v8467_v16, -inf  ;;  %v8469_v18 = vld [vmem:[#allocation80_spill] sm:$0xff]  ;;  %v8473_v44 = vld [vmem:[#allocation93_spill] sm:$0xff] }
 0x235   : > { %8454 = vst [vmem:[#allocation9_spill] sm:$0xff] %v6023_v4  ;;  %8458 = vst [vmem:[#allocation21_spill] sm:$0xff] %v6031_v14  ;;  %v6041_v36 = vmax.f32 %v2570_v0, %v2571_v24  ;;  %v8464_v4 = vld [vmem:[#allocation78_spill] sm:$0xff]  ;;  %v8468_v14 = vld [vmem:[#allocation91_spill] sm:$0xff]  ;;  %v2579_v29 = vsel %vm2422_vm1, %v8469_v18, -inf }
 0x236   : > { %8462 = vst [vmem:[#allocation10_spill] sm:$0xff] %v6039_v23  ;;  %v2573_v26 = vsel %vm2422_vm1, %v8464_v4, -inf  ;;  %v2577_v30 = vsel %vm2422_vm1, %v8468_v14, -inf  ;;  %v8471_v0 = vld [vmem:[#allocation92_spill] sm:$0xff]  ;;  %v8472_v4 = vld [vmem:[#allocation81_spill] sm:$0xff] }
 0x237   : > { %8463 = vst [vmem:[#allocation22_spill] sm:$0xff] %v6041_v36  ;;  %v6047_v47 = vmax.f32 %v2573_v26, %v2574_v15  ;;  %v6055_v41 = vmax.f32 %v2576_v9, %v2577_v30  ;;  %v2580_v20 = vsel %vm2422_vm1, %v8471_v0, -inf  ;;  %v2582_v24 = vsel %vm2422_vm1, %v8472_v4, -inf  ;;  %v8477_v36 = vld [vmem:[#allocation94_spill] sm:$0xff]  ;;  %v8479_v30 = vld [vmem:[#allocation83_spill] sm:$0xff]  ;;  %v8481_v23 = vld [vmem:[#allocation84_spill] sm:$0xff] }
 0x238   : > { %v2583_v26 = vsel %vm2422_vm1, %v8473_v44, -inf  ;;  %v6063_v15 = vmax.f32 %v2579_v29, %v2580_v20  ;;  %v2586_v18 = vsel %vm2422_vm1, %v8477_v36, -inf  ;;  %v2588_v0 = vsel %vm2422_vm1, %v8479_v30, -inf  ;;  %v8485_v36 = vld [vmem:[#allocation97_spill] sm:$0xff] }
 0x239   : > { %8466 = vst [vmem:[#allocation11_spill] sm:$0xff] %v6047_v47  ;;  %8470 = vst [vmem:[#allocation23_spill] sm:$0xff] %v6055_v41  ;;  %v6065_v16 = vmax.f32 %v2582_v24, %v2583_v26  ;;  %v8476_v47 = vld [vmem:[#allocation82_spill] sm:$0xff]  ;;  %v8480_v41 = vld [vmem:[#allocation95_spill] sm:$0xff]  ;;  %v2591_v29 = vsel %vm2422_vm1, %v8481_v23, -inf }
 0x23a   : > { %8474 = vst [vmem:[#allocation12_spill] sm:$0xff] %v6063_v15  ;;  %v2585_v14 = vsel %vm2422_vm1, %v8476_v47, -inf  ;;  %v2589_v4 = vsel %vm2422_vm1, %v8480_v41, -inf  ;;  %v8483_v24 = vld [vmem:[#allocation96_spill] sm:$0xff]  ;;  %v8484_v47 = vld [vmem:[#allocation85_spill] sm:$0xff] }
 0x23b   : > { %8475 = vst [vmem:[#allocation24_spill] sm:$0xff] %v6065_v16  ;;  %v6071_v9 = vmax.f32 %v2585_v14, %v2586_v18  ;;  %v6079_v20 = vmax.f32 %v2588_v0, %v2589_v4  ;;  %v2592_v44 = vsel %vm2422_vm1, %v8483_v24, -inf  ;;  %v2594_v26 = vsel %vm2422_vm1, %v8484_v47, -inf  ;;  %v8489_v16 = vld [vmem:[#allocation98_spill] sm:$0xff]  ;;  %v8491_v4 = vld [vmem:[#allocation87_spill] sm:$0xff]  ;;  %v8493_v15 = vld [vmem:[#allocation100_spill] sm:$0xff] }
 0x23c   : > { %v2595_v14 = vsel %vm2422_vm1, %v8485_v36, -inf  ;;  %v6087_v18 = vmax.f32 %v2591_v29, %v2592_v44  ;;  %v2598_v23 = vsel %vm2422_vm1, %v8489_v16, -inf  ;;  %v2600_v24 = vsel %vm2422_vm1, %v8491_v4, -inf  ;;  %v8497_v16 = vld [vmem:[#allocation113_spill] sm:$0xff] }
 0x23d   : > { %8478 = vst [vmem:[#allocation13_spill] sm:$0xff] %v6071_v9  ;;  %8482 = vst [vmem:[#allocation25_spill] sm:$0xff] %v6079_v20  ;;  %v6089_v30 = vmax.f32 %v2594_v26, %v2595_v14  ;;  %v8488_v9 = vld [vmem:[#allocation86_spill] sm:$0xff]  ;;  %v8492_v20 = vld [vmem:[#allocation99_spill] sm:$0xff]  ;;  %v2603_v29 = vsel %vm2422_vm1, %v8493_v15, -inf }
 0x23e   : > { %8486 = vst [vmem:[#allocation14_spill] sm:$0xff] %v6087_v18  ;;  %v2597_v41 = vsel %vm2422_vm1, %v8488_v9, -inf  ;;  %v2601_v47 = vsel %vm2422_vm1, %v8492_v20, -inf  ;;  %v8495_v26 = vld [vmem:[#allocation112_spill] sm:$0xff]  ;;  %v8496_v9 = vld [vmem:[#allocation101_spill] sm:$0xff] }
 0x23f   : > { %8487 = vst [vmem:[#allocation26_spill] sm:$0xff] %v6089_v30  ;;  %v6095_v0 = vmax.f32 %v2597_v41, %v2598_v23  ;;  %v6103_v44 = vmax.f32 %v2600_v24, %v2601_v47  ;;  %v2604_v36 = vsel %vm2422_vm1, %v8495_v26, -inf  ;;  %v2606_v14 = vsel %vm2422_vm1, %v8496_v9, -inf  ;;  %v8501_v30 = vld [vmem:[#allocation114_spill] sm:$0xff]  ;;  %v8503_v47 = vld [vmem:[#allocation103_spill] sm:$0xff]  ;;  %v8505_v18 = vld [vmem:[#allocation104_spill] sm:$0xff] }
 0x240   : > { %v2607_v41 = vsel %vm2422_vm1, %v8497_v16, -inf  ;;  %v6111_v23 = vmax.f32 %v2603_v29, %v2604_v36  ;;  %v2610_v15 = vsel %vm2422_vm1, %v8501_v30, -inf  ;;  %v2612_v26 = vsel %vm2422_vm1, %v8503_v47, -inf  ;;  %v8509_v30 = vld [vmem:[#allocation117_spill] sm:$0xff] }
 0x241   : > { %8490 = vst [vmem:[#allocation15_spill] sm:$0xff] %v6095_v0  ;;  %8494 = vst [vmem:[#allocation27_spill] sm:$0xff] %v6103_v44  ;;  %v6113_v4 = vmax.f32 %v2606_v14, %v2607_v41  ;;  %v8500_v0 = vld [vmem:[#allocation102_spill] sm:$0xff]  ;;  %v8504_v44 = vld [vmem:[#allocation115_spill] sm:$0xff]  ;;  %v2615_v29 = vsel %vm2422_vm1, %v8505_v18, -inf }
 0x242   : > { %8498 = vst [vmem:[#allocation28_spill] sm:$0xff] %v6111_v23  ;;  %v2609_v20 = vsel %vm2422_vm1, %v8500_v0, -inf  ;;  %v2613_v9 = vsel %vm2422_vm1, %v8504_v44, -inf  ;;  %v8507_v14 = vld [vmem:[#allocation116_spill] sm:$0xff]  ;;  %v8508_v0 = vld [vmem:[#allocation105_spill] sm:$0xff] }
 0x243   : > { %8499 = vst [vmem:[#allocation40_spill] sm:$0xff] %v6113_v4  ;;  %v6119_v24 = vmax.f32 %v2609_v20, %v2610_v15  ;;  %v6127_v36 = vmax.f32 %v2612_v26, %v2613_v9  ;;  %v2616_v16 = vsel %vm2422_vm1, %v8507_v14, -inf  ;;  %v2618_v41 = vsel %vm2422_vm1, %v8508_v0, -inf  ;;  %v8513_v4 = vld [vmem:[#allocation118_spill] sm:$0xff]  ;;  %v8515_v9 = vld [vmem:[#allocation107_spill] sm:$0xff]  ;;  %v8517_v23 = vld [vmem:[#allocation108_spill] sm:$0xff] }
 0x244   : > { %v2619_v20 = vsel %vm2422_vm1, %v8509_v30, -inf  ;;  %v6135_v15 = vmax.f32 %v2615_v29, %v2616_v16  ;;  %v2622_v18 = vsel %vm2422_vm1, %v8513_v4, -inf  ;;  %v2624_v14 = vsel %vm2422_vm1, %v8515_v9, -inf  ;;  %v8521_v4 = vld [vmem:[#allocation121_spill] sm:$0xff] }
 0x245   : > { %8502 = vst [vmem:[#allocation29_spill] sm:$0xff] %v6119_v24  ;;  %8506 = vst [vmem:[#allocation41_spill] sm:$0xff] %v6127_v36  ;;  %v6137_v47 = vmax.f32 %v2618_v41, %v2619_v20  ;;  %v8512_v24 = vld [vmem:[#allocation106_spill] sm:$0xff]  ;;  %v8516_v36 = vld [vmem:[#allocation119_spill] sm:$0xff]  ;;  %v2627_v29 = vsel %vm2422_vm1, %v8517_v23, -inf }
 0x246   : > { %8510 = vst [vmem:[#allocation30_spill] sm:$0xff] %v6135_v15  ;;  %v2621_v44 = vsel %vm2422_vm1, %v8512_v24, -inf  ;;  %v2625_v0 = vsel %vm2422_vm1, %v8516_v36, -inf  ;;  %v8519_v41 = vld [vmem:[#allocation120_spill] sm:$0xff]  ;;  %v8520_v24 = vld [vmem:[#allocation109_spill] sm:$0xff] }
 0x247   : > { %8511 = vst [vmem:[#allocation42_spill] sm:$0xff] %v6137_v47  ;;  %v6143_v26 = vmax.f32 %v2621_v44, %v2622_v18  ;;  %v6151_v16 = vmax.f32 %v2624_v14, %v2625_v0  ;;  %v2628_v30 = vsel %vm2422_vm1, %v8519_v41, -inf  ;;  %v2630_v20 = vsel %vm2422_vm1, %v8520_v24, -inf  ;;  %v8525_v47 = vld [vmem:[#allocation122_spill] sm:$0xff]  ;;  %v8527_v0 = vld [vmem:[#allocation111_spill] sm:$0xff]  ;;  %v8529_v15 = vld [vmem:[#allocation124_spill] sm:$0xff] }
 0x248   : > { %v2631_v44 = vsel %vm2422_vm1, %v8521_v4, -inf  ;;  %v6159_v18 = vmax.f32 %v2627_v29, %v2628_v30  ;;  %v2634_v23 = vsel %vm2422_vm1, %v8525_v47, -inf  ;;  %v2636_v41 = vsel %vm2422_vm1, %v8527_v0, -inf  ;;  %v8533_v47 = vld [vmem:[#allocation137_spill] sm:$0xff] }
 0x249   : > { %8514 = vst [vmem:[#allocation31_spill] sm:$0xff] %v6143_v26  ;;  %8518 = vst [vmem:[#allocation43_spill] sm:$0xff] %v6151_v16  ;;  %v6161_v9 = vmax.f32 %v2630_v20, %v2631_v44  ;;  %v8524_v26 = vld [vmem:[#allocation110_spill] sm:$0xff]  ;;  %v8528_v16 = vld [vmem:[#allocation123_spill] sm:$0xff]  ;;  %v2639_v29 = vsel %vm2422_vm1, %v8529_v15, -inf }
 0x24a   : > { %8522 = vst [vmem:[#allocation32_spill] sm:$0xff] %v6159_v18  ;;  %v2633_v36 = vsel %vm2422_vm1, %v8524_v26, -inf  ;;  %v2637_v24 = vsel %vm2422_vm1, %v8528_v16, -inf  ;;  %v8531_v20 = vld [vmem:[#allocation136_spill] sm:$0xff]  ;;  %v8532_v26 = vld [vmem:[#allocation125_spill] sm:$0xff] }
 0x24b   : > { %8523 = vst [vmem:[#allocation44_spill] sm:$0xff] %v6161_v9  ;;  %v6167_v14 = vmax.f32 %v2633_v36, %v2634_v23  ;;  %v6175_v30 = vmax.f32 %v2636_v41, %v2637_v24  ;;  %v2640_v4 = vsel %vm2422_vm1, %v8531_v20, -inf  ;;  %v2642_v44 = vsel %vm2422_vm1, %v8532_v26, -inf  ;;  %v8537_v9 = vld [vmem:[#allocation138_spill] sm:$0xff]  ;;  %v8539_v24 = vld [vmem:[#allocation127_spill] sm:$0xff]  ;;  %v8541_v18 = vld [vmem:[#allocation128_spill] sm:$0xff] }
 0x24c   : > { %v2643_v36 = vsel %vm2422_vm1, %v8533_v47, -inf  ;;  %v6183_v23 = vmax.f32 %v2639_v29, %v2640_v4  ;;  %v2646_v15 = vsel %vm2422_vm1, %v8537_v9, -inf  ;;  %v2648_v20 = vsel %vm2422_vm1, %v8539_v24, -inf  ;;  %v8545_v9 = vld [vmem:[#allocation141_spill] sm:$0xff] }
 0x24d   : > { %8526 = vst [vmem:[#allocation33_spill] sm:$0xff] %v6167_v14  ;;  %8530 = vst [vmem:[#allocation45_spill] sm:$0xff] %v6175_v30  ;;  %v6185_v0 = vmax.f32 %v2642_v44, %v2643_v36  ;;  %v8536_v14 = vld [vmem:[#allocation126_spill] sm:$0xff]  ;;  %v8540_v30 = vld [vmem:[#allocation139_spill] sm:$0xff]  ;;  %v2651_v29 = vsel %vm2422_vm1, %v8541_v18, -inf }
 0x24e   : > { %8534 = vst [vmem:[#allocation34_spill] sm:$0xff] %v6183_v23  ;;  %v2645_v16 = vsel %vm2422_vm1, %v8536_v14, -inf  ;;  %v2649_v26 = vsel %vm2422_vm1, %v8540_v30, -inf  ;;  %v8543_v44 = vld [vmem:[#allocation140_spill] sm:$0xff]  ;;  %v8544_v14 = vld [vmem:[#allocation129_spill] sm:$0xff] }
 0x24f   : > { %8535 = vst [vmem:[#allocation46_spill] sm:$0xff] %v6185_v0  ;;  %v6191_v41 = vmax.f32 %v2645_v16, %v2646_v15  ;;  %v6199_v4 = vmax.f32 %v2648_v20, %v2649_v26  ;;  %v2652_v47 = vsel %vm2422_vm1, %v8543_v44, -inf  ;;  %v2654_v36 = vsel %vm2422_vm1, %v8544_v14, -inf  ;;  %v8549_v0 = vld [vmem:[#allocation142_spill] sm:$0xff]  ;;  %v8551_v26 = vld [vmem:[#allocation131_spill] sm:$0xff]  ;;  %v8553_v23 = vld [vmem:[#allocation132_spill] sm:$0xff] }
 0x250   : > { %v2655_v16 = vsel %vm2422_vm1, %v8545_v9, -inf  ;;  %v6207_v15 = vmax.f32 %v2651_v29, %v2652_v47  ;;  %v2658_v18 = vsel %vm2422_vm1, %v8549_v0, -inf  ;;  %v2660_v44 = vsel %vm2422_vm1, %v8551_v26, -inf  ;;  %v8557_v0 = vld [vmem:[#allocation145_spill] sm:$0xff] }
 0x251   : > { %8538 = vst [vmem:[#allocation35_spill] sm:$0xff] %v6191_v41  ;;  %8542 = vst [vmem:[#allocation47_spill] sm:$0xff] %v6199_v4  ;;  %v6209_v24 = vmax.f32 %v2654_v36, %v2655_v16  ;;  %v8548_v41 = vld [vmem:[#allocation130_spill] sm:$0xff]  ;;  %v8552_v4 = vld [vmem:[#allocation143_spill] sm:$0xff]  ;;  %v2663_v29 = vsel %vm2422_vm1, %v8553_v23, -inf }
 0x252   : > { %8546 = vst [vmem:[#allocation36_spill] sm:$0xff] %v6207_v15  ;;  %v2657_v30 = vsel %vm2422_vm1, %v8548_v41, -inf  ;;  %v2661_v14 = vsel %vm2422_vm1, %v8552_v4, -inf  ;;  %v8555_v36 = vld [vmem:[#allocation144_spill] sm:$0xff]  ;;  %v8556_v41 = vld [vmem:[#allocation133_spill] sm:$0xff] }
 0x253   : > { %8547 = vst [vmem:[#allocation48_spill] sm:$0xff] %v6209_v24  ;;  %v6215_v20 = vmax.f32 %v2657_v30, %v2658_v18  ;;  %v6223_v47 = vmax.f32 %v2660_v44, %v2661_v14  ;;  %v2664_v9 = vsel %vm2422_vm1, %v8555_v36, -inf  ;;  %v2666_v16 = vsel %vm2422_vm1, %v8556_v41, -inf  ;;  %v8561_v24 = vld [vmem:[#allocation146_spill] sm:$0xff]  ;;  %v8563_v14 = vld [vmem:[#allocation135_spill] sm:$0xff]  ;;  %v8565_v15 = vld [vmem:[#allocation148_spill] sm:$0xff] }
 0x254   : > { %v2667_v30 = vsel %vm2422_vm1, %v8557_v0, -inf  ;;  %v6231_v18 = vmax.f32 %v2663_v29, %v2664_v9  ;;  %v2670_v23 = vsel %vm2422_vm1, %v8561_v24, -inf  ;;  %v2672_v36 = vsel %vm2422_vm1, %v8563_v14, -inf  ;;  %v8569_v24 = vld [vmem:[#allocation161_spill] sm:$0xff] }
 0x255   : > { %8550 = vst [vmem:[#allocation37_spill] sm:$0xff] %v6215_v20  ;;  %8554 = vst [vmem:[#allocation49_spill] sm:$0xff] %v6223_v47  ;;  %v6233_v26 = vmax.f32 %v2666_v16, %v2667_v30  ;;  %v8560_v20 = vld [vmem:[#allocation134_spill] sm:$0xff]  ;;  %v8564_v47 = vld [vmem:[#allocation147_spill] sm:$0xff]  ;;  %v2675_v29 = vsel %vm2422_vm1, %v8565_v15, -inf }
 0x256   : > { %8558 = vst [vmem:[#allocation38_spill] sm:$0xff] %v6231_v18  ;;  %v2669_v4 = vsel %vm2422_vm1, %v8560_v20, -inf  ;;  %v2673_v41 = vsel %vm2422_vm1, %v8564_v47, -inf  ;;  %v8567_v16 = vld [vmem:[#allocation160_spill] sm:$0xff]  ;;  %v8568_v20 = vld [vmem:[#allocation149_spill] sm:$0xff] }
 0x257   : > { %8559 = vst [vmem:[#allocation50_spill] sm:$0xff] %v6233_v26  ;;  %v6239_v44 = vmax.f32 %v2669_v4, %v2670_v23  ;;  %v6247_v9 = vmax.f32 %v2672_v36, %v2673_v41  ;;  %v2676_v0 = vsel %vm2422_vm1, %v8567_v16, -inf  ;;  %v2678_v30 = vsel %vm2422_vm1, %v8568_v20, -inf  ;;  %v8573_v26 = vld [vmem:[#allocation162_spill] sm:$0xff]  ;;  %v8575_v41 = vld [vmem:[#allocation151_spill] sm:$0xff]  ;;  %v8577_v18 = vld [vmem:[#allocation152_spill] sm:$0xff] }
 0x258   : > { %v2679_v4 = vsel %vm2422_vm1, %v8569_v24, -inf  ;;  %v6255_v23 = vmax.f32 %v2675_v29, %v2676_v0  ;;  %v2682_v15 = vsel %vm2422_vm1, %v8573_v26, -inf  ;;  %v2684_v16 = vsel %vm2422_vm1, %v8575_v41, -inf  ;;  %v8581_v26 = vld [vmem:[#allocation165_spill] sm:$0xff] }
 0x259   : > { %8562 = vst [vmem:[#allocation39_spill] sm:$0xff] %v6239_v44  ;;  %8566 = vst [vmem:[#allocation51_spill] sm:$0xff] %v6247_v9  ;;  %v6257_v14 = vmax.f32 %v2678_v30, %v2679_v4  ;;  %v8572_v44 = vld [vmem:[#allocation150_spill] sm:$0xff]  ;;  %v8576_v9 = vld [vmem:[#allocation163_spill] sm:$0xff]  ;;  %v2687_v29 = vsel %vm2422_vm1, %v8577_v18, -inf }
 0x25a   : > { %8570 = vst [vmem:[#allocation52_spill] sm:$0xff] %v6255_v23  ;;  %v2681_v47 = vsel %vm2422_vm1, %v8572_v44, -inf  ;;  %v2685_v20 = vsel %vm2422_vm1, %v8576_v9, -inf  ;;  %v8579_v30 = vld [vmem:[#allocation164_spill] sm:$0xff]  ;;  %v8580_v44 = vld [vmem:[#allocation153_spill] sm:$0xff] }
 0x25b   : > { %8571 = vst [vmem:[#allocation64_spill] sm:$0xff] %v6257_v14  ;;  %v6263_v36 = vmax.f32 %v2681_v47, %v2682_v15  ;;  %v6271_v0 = vmax.f32 %v2684_v16, %v2685_v20  ;;  %v2688_v24 = vsel %vm2422_vm1, %v8579_v30, -inf  ;;  %v2690_v4 = vsel %vm2422_vm1, %v8580_v44, -inf  ;;  %v8585_v14 = vld [vmem:[#allocation166_spill] sm:$0xff]  ;;  %v8587_v20 = vld [vmem:[#allocation155_spill] sm:$0xff]  ;;  %v8589_v23 = vld [vmem:[#allocation156_spill] sm:$0xff] }
 0x25c   : > { %v2691_v47 = vsel %vm2422_vm1, %v8581_v26, -inf  ;;  %v6279_v15 = vmax.f32 %v2687_v29, %v2688_v24  ;;  %v2694_v18 = vsel %vm2422_vm1, %v8585_v14, -inf  ;;  %v2696_v30 = vsel %vm2422_vm1, %v8587_v20, -inf  ;;  %v8593_v14 = vld [vmem:[#allocation169_spill] sm:$0xff] }
 0x25d   : > { %8574 = vst [vmem:[#allocation53_spill] sm:$0xff] %v6263_v36  ;;  %8578 = vst [vmem:[#allocation65_spill] sm:$0xff] %v6271_v0  ;;  %v6281_v41 = vmax.f32 %v2690_v4, %v2691_v47  ;;  %v8584_v36 = vld [vmem:[#allocation154_spill] sm:$0xff]  ;;  %v8588_v0 = vld [vmem:[#allocation167_spill] sm:$0xff]  ;;  %v2699_v29 = vsel %vm2422_vm1, %v8589_v23, -inf }
 0x25e   : > { %8582 = vst [vmem:[#allocation54_spill] sm:$0xff] %v6279_v15  ;;  %v2693_v9 = vsel %vm2422_vm1, %v8584_v36, -inf  ;;  %v2697_v44 = vsel %vm2422_vm1, %v8588_v0, -inf  ;;  %v8591_v4 = vld [vmem:[#allocation168_spill] sm:$0xff]  ;;  %v8592_v36 = vld [vmem:[#allocation157_spill] sm:$0xff] }
 0x25f   : > { %8583 = vst [vmem:[#allocation66_spill] sm:$0xff] %v6281_v41  ;;  %v6287_v16 = vmax.f32 %v2693_v9, %v2694_v18  ;;  %v6295_v24 = vmax.f32 %v2696_v30, %v2697_v44  ;;  %v2700_v26 = vsel %vm2422_vm1, %v8591_v4, -inf  ;;  %v2702_v47 = vsel %vm2422_vm1, %v8592_v36, -inf  ;;  %v8597_v41 = vld [vmem:[#allocation170_spill] sm:$0xff]  ;;  %v8599_v44 = vld [vmem:[#allocation159_spill] sm:$0xff]  ;;  %v8601_v15 = vld [vmem:[#allocation172_spill] sm:$0xff] }
 0x260   : > { %v2703_v9 = vsel %vm2422_vm1, %v8593_v14, -inf  ;;  %v6303_v18 = vmax.f32 %v2699_v29, %v2700_v26  ;;  %v2706_v23 = vsel %vm2422_vm1, %v8597_v41, -inf  ;;  %v2708_v4 = vsel %vm2422_vm1, %v8599_v44, -inf  ;;  %v8605_v41 = vld [vmem:[#allocation185_spill] sm:$0xff] }
 0x261   : > { %8586 = vst [vmem:[#allocation55_spill] sm:$0xff] %v6287_v16  ;;  %8590 = vst [vmem:[#allocation67_spill] sm:$0xff] %v6295_v24  ;;  %v6305_v20 = vmax.f32 %v2702_v47, %v2703_v9  ;;  %v8596_v16 = vld [vmem:[#allocation158_spill] sm:$0xff]  ;;  %v8600_v24 = vld [vmem:[#allocation171_spill] sm:$0xff]  ;;  %v2711_v29 = vsel %vm2422_vm1, %v8601_v15, -inf }
 0x262   : > { %8594 = vst [vmem:[#allocation56_spill] sm:$0xff] %v6303_v18  ;;  %v2705_v0 = vsel %vm2422_vm1, %v8596_v16, -inf  ;;  %v2709_v36 = vsel %vm2422_vm1, %v8600_v24, -inf  ;;  %v8603_v47 = vld [vmem:[#allocation184_spill] sm:$0xff]  ;;  %v8604_v16 = vld [vmem:[#allocation173_spill] sm:$0xff] }
 0x263   : > { %8595 = vst [vmem:[#allocation68_spill] sm:$0xff] %v6305_v20  ;;  %v6311_v30 = vmax.f32 %v2705_v0, %v2706_v23  ;;  %v6319_v26 = vmax.f32 %v2708_v4, %v2709_v36  ;;  %v2712_v14 = vsel %vm2422_vm1, %v8603_v47, -inf  ;;  %v2714_v9 = vsel %vm2422_vm1, %v8604_v16, -inf  ;;  %v8609_v20 = vld [vmem:[#allocation186_spill] sm:$0xff]  ;;  %v8611_v36 = vld [vmem:[#allocation175_spill] sm:$0xff]  ;;  %v8613_v18 = vld [vmem:[#allocation176_spill] sm:$0xff] }
 0x264   : > { %v2715_v0 = vsel %vm2422_vm1, %v8605_v41, -inf  ;;  %v6327_v23 = vmax.f32 %v2711_v29, %v2712_v14  ;;  %v2718_v15 = vsel %vm2422_vm1, %v8609_v20, -inf  ;;  %v2720_v47 = vsel %vm2422_vm1, %v8611_v36, -inf  ;;  %v8617_v20 = vld [vmem:[#allocation189_spill] sm:$0xff] }
 0x265   : > { %8598 = vst [vmem:[#allocation57_spill] sm:$0xff] %v6311_v30  ;;  %8602 = vst [vmem:[#allocation69_spill] sm:$0xff] %v6319_v26  ;;  %v6329_v44 = vmax.f32 %v2714_v9, %v2715_v0  ;;  %v8608_v30 = vld [vmem:[#allocation174_spill] sm:$0xff]  ;;  %v8612_v26 = vld [vmem:[#allocation187_spill] sm:$0xff]  ;;  %v2723_v29 = vsel %vm2422_vm1, %v8613_v18, -inf }
 0x266   : > { %8606 = vst [vmem:[#allocation58_spill] sm:$0xff] %v6327_v23  ;;  %v2717_v24 = vsel %vm2422_vm1, %v8608_v30, -inf  ;;  %v2721_v16 = vsel %vm2422_vm1, %v8612_v26, -inf  ;;  %v8615_v9 = vld [vmem:[#allocation188_spill] sm:$0xff]  ;;  %v8616_v30 = vld [vmem:[#allocation177_spill] sm:$0xff] }
 0x267   : > { %8607 = vst [vmem:[#allocation70_spill] sm:$0xff] %v6329_v44  ;;  %v6335_v4 = vmax.f32 %v2717_v24, %v2718_v15  ;;  %v6343_v14 = vmax.f32 %v2720_v47, %v2721_v16  ;;  %v2724_v41 = vsel %vm2422_vm1, %v8615_v9, -inf  ;;  %v2726_v0 = vsel %vm2422_vm1, %v8616_v30, -inf  ;;  %v8621_v44 = vld [vmem:[#allocation190_spill] sm:$0xff]  ;;  %v8623_v16 = vld [vmem:[#allocation179_spill] sm:$0xff]  ;;  %v8625_v23 = vld [vmem:[#allocation180_spill] sm:$0xff] }
 0x268   : > { %v2727_v24 = vsel %vm2422_vm1, %v8617_v20, -inf  ;;  %v6351_v15 = vmax.f32 %v2723_v29, %v2724_v41  ;;  %v2730_v18 = vsel %vm2422_vm1, %v8621_v44, -inf  ;;  %v2732_v9 = vsel %vm2422_vm1, %v8623_v16, -inf  ;;  %v8629_v44 = vld [vmem:[#allocation193_spill] sm:$0xff] }
 0x269   : > { %8610 = vst [vmem:[#allocation59_spill] sm:$0xff] %v6335_v4  ;;  %8614 = vst [vmem:[#allocation71_spill] sm:$0xff] %v6343_v14  ;;  %v6353_v36 = vmax.f32 %v2726_v0, %v2727_v24  ;;  %v8620_v4 = vld [vmem:[#allocation178_spill] sm:$0xff]  ;;  %v8624_v14 = vld [vmem:[#allocation191_spill] sm:$0xff]  ;;  %v2735_v29 = vsel %vm2422_vm1, %v8625_v23, -inf }
 0x26a   : > { %8618 = vst [vmem:[#allocation60_spill] sm:$0xff] %v6351_v15  ;;  %v2729_v26 = vsel %vm2422_vm1, %v8620_v4, -inf  ;;  %v2733_v30 = vsel %vm2422_vm1, %v8624_v14, -inf  ;;  %v8627_v0 = vld [vmem:[#allocation192_spill] sm:$0xff]  ;;  %v8628_v4 = vld [vmem:[#allocation181_spill] sm:$0xff] }
 0x26b   : > { %8619 = vst [vmem:[#allocation72_spill] sm:$0xff] %v6353_v36  ;;  %v6359_v47 = vmax.f32 %v2729_v26, %v2730_v18  ;;  %v6367_v41 = vmax.f32 %v2732_v9, %v2733_v30  ;;  %v2736_v20 = vsel %vm2422_vm1, %v8627_v0, -inf  ;;  %v2738_v24 = vsel %vm2422_vm1, %v8628_v4, -inf  ;;  %v8633_v36 = vld [vmem:[#allocation194_spill] sm:$0xff]  ;;  %v8635_v30 = vld [vmem:[#allocation183_spill] sm:$0xff]  ;;  %v8637_v15 = vld [vmem:[#allocation196_spill] sm:$0xff] }
 0x26c   : > { %v2739_v26 = vsel %vm2422_vm1, %v8629_v44, -inf  ;;  %v6375_v18 = vmax.f32 %v2735_v29, %v2736_v20  ;;  %v2742_v23 = vsel %vm2422_vm1, %v8633_v36, -inf  ;;  %v2744_v0 = vsel %vm2422_vm1, %v8635_v30, -inf  ;;  %v8641_v36 = vld [vmem:[#allocation209_spill] sm:$0xff] }
 0x26d   : > { %8622 = vst [vmem:[#allocation61_spill] sm:$0xff] %v6359_v47  ;;  %8626 = vst [vmem:[#allocation73_spill] sm:$0xff] %v6367_v41  ;;  %v6377_v16 = vmax.f32 %v2738_v24, %v2739_v26  ;;  %v8632_v47 = vld [vmem:[#allocation182_spill] sm:$0xff]  ;;  %v8636_v41 = vld [vmem:[#allocation195_spill] sm:$0xff]  ;;  %v2747_v29 = vsel %vm2422_vm1, %v8637_v15, -inf }
 0x26e   : > { %8630 = vst [vmem:[#allocation62_spill] sm:$0xff] %v6375_v18  ;;  %v2741_v14 = vsel %vm2422_vm1, %v8632_v47, -inf  ;;  %v2745_v4 = vsel %vm2422_vm1, %v8636_v41, -inf  ;;  %v8639_v24 = vld [vmem:[#allocation208_spill] sm:$0xff]  ;;  %v8640_v47 = vld [vmem:[#allocation197_spill] sm:$0xff] }
 0x26f   : > { %8631 = vst [vmem:[#allocation74_spill] sm:$0xff] %v6377_v16  ;;  %v6383_v9 = vmax.f32 %v2741_v14, %v2742_v23  ;;  %v6391_v20 = vmax.f32 %v2744_v0, %v2745_v4  ;;  %v2748_v44 = vsel %vm2422_vm1, %v8639_v24, -inf  ;;  %v2750_v26 = vsel %vm2422_vm1, %v8640_v47, -inf  ;;  %v8645_v16 = vld [vmem:[#allocation210_spill] sm:$0xff]  ;;  %v8647_v4 = vld [vmem:[#allocation199_spill] sm:$0xff]  ;;  %v8649_v18 = vld [vmem:[#allocation200_spill] sm:$0xff] }
 0x270   : > { %v2751_v14 = vsel %vm2422_vm1, %v8641_v36, -inf  ;;  %v6399_v23 = vmax.f32 %v2747_v29, %v2748_v44  ;;  %v2754_v15 = vsel %vm2422_vm1, %v8645_v16, -inf  ;;  %v2756_v24 = vsel %vm2422_vm1, %v8647_v4, -inf  ;;  %v8653_v16 = vld [vmem:[#allocation213_spill] sm:$0xff] }
 0x271   : > { %8634 = vst [vmem:[#allocation63_spill] sm:$0xff] %v6383_v9  ;;  %8638 = vst [vmem:[#allocation75_spill] sm:$0xff] %v6391_v20  ;;  %v6401_v30 = vmax.f32 %v2750_v26, %v2751_v14  ;;  %v8644_v9 = vld [vmem:[#allocation198_spill] sm:$0xff]  ;;  %v8648_v20 = vld [vmem:[#allocation211_spill] sm:$0xff]  ;;  %v2759_v29 = vsel %vm2422_vm1, %v8649_v18, -inf }
 0x272   : > { %8642 = vst [vmem:[#allocation76_spill] sm:$0xff] %v6399_v23  ;;  %v2753_v41 = vsel %vm2422_vm1, %v8644_v9, -inf  ;;  %v2757_v47 = vsel %vm2422_vm1, %v8648_v20, -inf  ;;  %v8651_v26 = vld [vmem:[#allocation212_spill] sm:$0xff]  ;;  %v8652_v9 = vld [vmem:[#allocation201_spill] sm:$0xff] }
 0x273   : > { %8643 = vst [vmem:[#allocation88_spill] sm:$0xff] %v6401_v30  ;;  %v6407_v0 = vmax.f32 %v2753_v41, %v2754_v15  ;;  %v6415_v44 = vmax.f32 %v2756_v24, %v2757_v47  ;;  %v2760_v36 = vsel %vm2422_vm1, %v8651_v26, -inf  ;;  %v2762_v14 = vsel %vm2422_vm1, %v8652_v9, -inf  ;;  %v8657_v30 = vld [vmem:[#allocation214_spill] sm:$0xff]  ;;  %v8659_v47 = vld [vmem:[#allocation203_spill] sm:$0xff]  ;;  %v8661_v23 = vld [vmem:[#allocation204_spill] sm:$0xff] }
 0x274   : > { %v2763_v41 = vsel %vm2422_vm1, %v8653_v16, -inf  ;;  %v6423_v15 = vmax.f32 %v2759_v29, %v2760_v36  ;;  %v2766_v18 = vsel %vm2422_vm1, %v8657_v30, -inf  ;;  %v2768_v26 = vsel %vm2422_vm1, %v8659_v47, -inf  ;;  %v8665_v30 = vld [vmem:[#allocation217_spill] sm:$0xff] }
 0x275   : > { %8646 = vst [vmem:[#allocation77_spill] sm:$0xff] %v6407_v0  ;;  %8650 = vst [vmem:[#allocation89_spill] sm:$0xff] %v6415_v44  ;;  %v6425_v4 = vmax.f32 %v2762_v14, %v2763_v41  ;;  %v8656_v0 = vld [vmem:[#allocation202_spill] sm:$0xff]  ;;  %v8660_v44 = vld [vmem:[#allocation215_spill] sm:$0xff]  ;;  %v2771_v29 = vsel %vm2422_vm1, %v8661_v23, -inf }
 0x276   : > { %8654 = vst [vmem:[#allocation78_spill] sm:$0xff] %v6423_v15  ;;  %v2765_v20 = vsel %vm2422_vm1, %v8656_v0, -inf  ;;  %v2769_v9 = vsel %vm2422_vm1, %v8660_v44, -inf  ;;  %v8663_v14 = vld [vmem:[#allocation216_spill] sm:$0xff]  ;;  %v8664_v0 = vld [vmem:[#allocation205_spill] sm:$0xff] }
 0x277   : > { %8655 = vst [vmem:[#allocation90_spill] sm:$0xff] %v6425_v4  ;;  %v6431_v24 = vmax.f32 %v2765_v20, %v2766_v18  ;;  %v6439_v36 = vmax.f32 %v2768_v26, %v2769_v9  ;;  %v2772_v16 = vsel %vm2422_vm1, %v8663_v14, -inf  ;;  %v2774_v41 = vsel %vm2422_vm1, %v8664_v0, -inf  ;;  %v8669_v4 = vld [vmem:[#allocation218_spill] sm:$0xff]  ;;  %v8671_v9 = vld [vmem:[#allocation207_spill] sm:$0xff]  ;;  %v8673_v15 = vld [vmem:[#allocation220_spill] sm:$0xff] }
 0x278   : > { %v2775_v20 = vsel %vm2422_vm1, %v8665_v30, -inf  ;;  %v6447_v18 = vmax.f32 %v2771_v29, %v2772_v16  ;;  %v2778_v23 = vsel %vm2422_vm1, %v8669_v4, -inf  ;;  %v2780_v14 = vsel %vm2422_vm1, %v8671_v9, -inf  ;;  %v8677_v4 = vld [vmem:[#allocation233_spill] sm:$0xff] }
 0x279   : > { %8658 = vst [vmem:[#allocation79_spill] sm:$0xff] %v6431_v24  ;;  %8662 = vst [vmem:[#allocation91_spill] sm:$0xff] %v6439_v36  ;;  %v6449_v47 = vmax.f32 %v2774_v41, %v2775_v20  ;;  %v8668_v24 = vld [vmem:[#allocation206_spill] sm:$0xff]  ;;  %v8672_v36 = vld [vmem:[#allocation219_spill] sm:$0xff]  ;;  %v2783_v29 = vsel %vm2422_vm1, %v8673_v15, -inf }
 0x27a   : > { %8666 = vst [vmem:[#allocation80_spill] sm:$0xff] %v6447_v18  ;;  %v2777_v44 = vsel %vm2422_vm1, %v8668_v24, -inf  ;;  %v2781_v0 = vsel %vm2422_vm1, %v8672_v36, -inf  ;;  %v8675_v41 = vld [vmem:[#allocation232_spill] sm:$0xff]  ;;  %v8676_v24 = vld [vmem:[#allocation221_spill] sm:$0xff] }
 0x27b   : > { %8667 = vst [vmem:[#allocation92_spill] sm:$0xff] %v6449_v47  ;;  %v6455_v26 = vmax.f32 %v2777_v44, %v2778_v23  ;;  %v6463_v16 = vmax.f32 %v2780_v14, %v2781_v0  ;;  %v2784_v30 = vsel %vm2422_vm1, %v8675_v41, -inf  ;;  %v2786_v20 = vsel %vm2422_vm1, %v8676_v24, -inf  ;;  %v8681_v47 = vld [vmem:[#allocation234_spill] sm:$0xff]  ;;  %v8683_v0 = vld [vmem:[#allocation223_spill] sm:$0xff]  ;;  %v8685_v18 = vld [vmem:[#allocation224_spill] sm:$0xff] }
 0x27c   : > { %v2787_v44 = vsel %vm2422_vm1, %v8677_v4, -inf  ;;  %v6471_v23 = vmax.f32 %v2783_v29, %v2784_v30  ;;  %v2790_v15 = vsel %vm2422_vm1, %v8681_v47, -inf  ;;  %v2792_v41 = vsel %vm2422_vm1, %v8683_v0, -inf  ;;  %v8689_v47 = vld [vmem:[#allocation237_spill] sm:$0xff] }
 0x27d   : > { %8670 = vst [vmem:[#allocation81_spill] sm:$0xff] %v6455_v26  ;;  %8674 = vst [vmem:[#allocation93_spill] sm:$0xff] %v6463_v16  ;;  %v6473_v9 = vmax.f32 %v2786_v20, %v2787_v44  ;;  %v8680_v26 = vld [vmem:[#allocation222_spill] sm:$0xff]  ;;  %v8684_v16 = vld [vmem:[#allocation235_spill] sm:$0xff]  ;;  %v2795_v29 = vsel %vm2422_vm1, %v8685_v18, -inf }
 0x27e   : > { %8678 = vst [vmem:[#allocation82_spill] sm:$0xff] %v6471_v23  ;;  %v2789_v36 = vsel %vm2422_vm1, %v8680_v26, -inf  ;;  %v2793_v24 = vsel %vm2422_vm1, %v8684_v16, -inf  ;;  %v8687_v20 = vld [vmem:[#allocation236_spill] sm:$0xff]  ;;  %v8688_v26 = vld [vmem:[#allocation225_spill] sm:$0xff] }
 0x27f   : > { %8679 = vst [vmem:[#allocation94_spill] sm:$0xff] %v6473_v9  ;;  %v6479_v14 = vmax.f32 %v2789_v36, %v2790_v15  ;;  %v6487_v30 = vmax.f32 %v2792_v41, %v2793_v24  ;;  %v2796_v4 = vsel %vm2422_vm1, %v8687_v20, -inf  ;;  %v2798_v44 = vsel %vm2422_vm1, %v8688_v26, -inf  ;;  %v8693_v9 = vld [vmem:[#allocation238_spill] sm:$0xff]  ;;  %v8695_v24 = vld [vmem:[#allocation227_spill] sm:$0xff]  ;;  %v8697_v23 = vld [vmem:[#allocation228_spill] sm:$0xff] }
 0x280   : > { %v2799_v36 = vsel %vm2422_vm1, %v8689_v47, -inf  ;;  %v6495_v15 = vmax.f32 %v2795_v29, %v2796_v4  ;;  %v2802_v18 = vsel %vm2422_vm1, %v8693_v9, -inf  ;;  %v2804_v20 = vsel %vm2422_vm1, %v8695_v24, -inf  ;;  %v8701_v9 = vld [vmem:[#allocation241_spill] sm:$0xff] }
 0x281   : > { %8682 = vst [vmem:[#allocation83_spill] sm:$0xff] %v6479_v14  ;;  %8686 = vst [vmem:[#allocation95_spill] sm:$0xff] %v6487_v30  ;;  %v6497_v0 = vmax.f32 %v2798_v44, %v2799_v36  ;;  %v8692_v14 = vld [vmem:[#allocation226_spill] sm:$0xff]  ;;  %v8696_v30 = vld [vmem:[#allocation239_spill] sm:$0xff]  ;;  %v2807_v29 = vsel %vm2422_vm1, %v8697_v23, -inf }
 0x282   : > { %8690 = vst [vmem:[#allocation84_spill] sm:$0xff] %v6495_v15  ;;  %v2801_v16 = vsel %vm2422_vm1, %v8692_v14, -inf  ;;  %v2805_v26 = vsel %vm2422_vm1, %v8696_v30, -inf  ;;  %v8699_v44 = vld [vmem:[#allocation240_spill] sm:$0xff]  ;;  %v8700_v14 = vld [vmem:[#allocation229_spill] sm:$0xff] }
 0x283   : > { %8691 = vst [vmem:[#allocation96_spill] sm:$0xff] %v6497_v0  ;;  %v6503_v41 = vmax.f32 %v2801_v16, %v2802_v18  ;;  %v6511_v4 = vmax.f32 %v2804_v20, %v2805_v26  ;;  %v2808_v47 = vsel %vm2422_vm1, %v8699_v44, -inf  ;;  %v2810_v36 = vsel %vm2422_vm1, %v8700_v14, -inf  ;;  %v8703_v0 = vld [vmem:[#allocation242_spill] sm:$0xff]  ;;  %v8704_v26 = vld [vmem:[#allocation231_spill] sm:$0xff]  ;;  %v8706_v15 = vld [vmem:[#allocation244_spill] sm:$0xff] }
 0x284   : > { %v2811_v16 = vsel %vm2422_vm1, %v8701_v9, -inf  ;;  %v6519_v18 = vmax.f32 %v2807_v29, %v2808_v47  ;;  %v2814_v23 = vsel %vm2422_vm1, %v8703_v0, -inf  ;;  %v2816_v44 = vsel %vm2422_vm1, %v8704_v26, -inf  ;;  %v8710_v26 = vld [vmem:[#allocation246_spill] sm:$0xff] }
 0x285   : > { %8694 = vst [vmem:[#allocation85_spill] sm:$0xff] %v6503_v41  ;;  %8698 = vst [vmem:[#allocation97_spill] sm:$0xff] %v6511_v4  ;;  %v6521_v24 = vmax.f32 %v2810_v36, %v2811_v16  ;;  %v8702_v41 = vld [vmem:[#allocation230_spill] sm:$0xff]  ;;  %v8705_v4 = vld [vmem:[#allocation243_spill] sm:$0xff]  ;;  %v2819_v29 = vsel %vm2422_vm1, %v8706_v15, -inf  ;;  %v2823_v0 = vsel %vm2422_vm1, %v5719_v51, -inf }
 0x286   : > { %v2813_v30 = vsel %vm2422_vm1, %v8702_v41, -inf  ;;  %v2817_v14 = vsel %vm2422_vm1, %v8705_v4, -inf  ;;  %v8708_v36 = vld [vmem:[#allocation256_spill] sm:$0xff]  ;;  %v8709_v41 = vld [vmem:[#allocation245_spill] sm:$0xff]  ;;  %v2825_v4 = vsel %vm2422_vm1, %v8710_v26, -inf  ;;  %v2826_v15 = vsel %vm2422_vm1, %v5722_v55, -inf }
 0x287   : > { %v6527_v20 = vmax.f32 %v2813_v30, %v2814_v23  ;;  %v6535_v47 = vmax.f32 %v2816_v44, %v2817_v14  ;;  %v2820_v9 = vsel %vm2422_vm1, %v8708_v36, -inf  ;;  %v2822_v16 = vsel %vm2422_vm1, %v8709_v41, -inf  ;;  %v8711_v14 = vld [vmem:[#allocation247_spill] sm:$0xff] }
 0x288   : > { %v6543_v30 = vmax.f32 %v2819_v29, %v2820_v9  ;;  %v6545_v23 = vmax.f32 %v2822_v16, %v2823_v0  ;;  %v6551_v44 = vmax.f32 %v2825_v4, %v2826_v15  ;;  %v2828_v36 = vsel %vm2422_vm1, %v8711_v14, -inf  ;;  %v8713_v16 = vld [vmem:[#allocation249_spill] sm:$0xff]  ;;  %v8715_v15 = vld [vmem:[#allocation250_spill] sm:$0xff]  ;;  %v8808_v61 = vld [vmem:[#allocation83_spill] sm:$0xff] }
 0x289   : > { %8707 = vst [vmem:[#allocation86_spill] sm:$0xff] %v6535_v47  ;;  %v2829_v41 = vsel %vm2422_vm1, %v5725_v27, -inf  ;;  %v8712_v47 = vld [vmem:[#allocation248_spill] sm:$0xff]  ;;  %v2832_v9 = vsel %vm2422_vm1, %v5727_v56, -inf  ;;  %v2834_v0 = vsel %vm2422_vm1, %v8713_v16, -inf  ;;  %v2835_v55 = vsel %vm2422_vm1, %v5729_v33, -inf }
 0x28a   : > { %v2831_v51 = vsel %vm2422_vm1, %v8712_v47, -inf  ;;  %v6559_v29 = vmax.f32 %v2828_v36, %v2829_v41  ;;  %v6569_v4 = vmax.f32 %v2834_v0, %v2835_v55  ;;  %v2837_v27 = vsel %vm2422_vm1, %v8715_v15, -inf  ;;  %v8716_v36 = vld [vmem:[#allocation251_spill] sm:$0xff]  ;;  %v8717_v16 = vld [vmem:[#allocation252_spill] sm:$0xff]  ;;  %v8718_v0 = vld [vmem:[#allocation253_spill] sm:$0xff] }
 0x28b   : > { %v6567_v26 = vmax.f32 %v2831_v51, %v2832_v9  ;;  %v2838_v47 = vsel %vm2422_vm1, %v5731_v42, -inf  ;;  %v2840_v56 = vsel %vm2422_vm1, %v8716_v36, -inf  ;;  %v2841_v41 = vsel %vm2422_vm1, %v5733_v32, -inf }
 0x28c   : > { %8714 = vst [vmem:[#allocation98_spill] sm:$0xff] %v6569_v4  ;;  %v6575_v14 = vmax.f32 %v2837_v27, %v2838_v47  ;;  %v2843_v33 = vsel %vm2422_vm1, %v8717_v16, -inf  ;;  %v6583_v51 = vmax.f32 %v2840_v56, %v2841_v41  ;;  %v2844_v9 = vsel %vm2422_vm1, %v5735_v48, -inf  ;;  %v8719_v47 = vld [vmem:[#allocation254_spill] sm:$0xff]  ;;  %v8721_v41 = vld [vmem:[#allocation255_spill] sm:$0xff] }
 0x28d   : > { %v2846_v55 = vsel %vm2422_vm1, %v8718_v0, -inf  ;;  %v2847_v42 = vsel %vm2422_vm1, %v5737_v46, -inf  ;;  %v6591_v15 = vmax.f32 %v2843_v33, %v2844_v9  ;;  %v2849_v32 = vsel %vm2422_vm1, %v8719_v47, -inf  ;;  %v8806_v9 = vld [vmem:[#allocation82_spill] sm:$0xff]  ;;  %v8813_v0 = vld [vmem:[#allocation97_spill] sm:$0xff] }
 0x28e   : > { %v6593_v27 = vmax.f32 %v2846_v55, %v2847_v42  ;;  %v2850_v36 = vsel %vm2422_vm1, %v5739_v52, -inf  ;;  %v2852_v48 = vsel %vm2422_vm1, %v8721_v41, -inf  ;;  %v2853_v16 = vsel %vm2422_vm1, %v5741_v8, -inf  ;;  %v8807_v46 = vld [vmem:[#allocation94_spill] sm:$0xff]  ;;  %v8810_v8 = vld [vmem:[#allocation84_spill] sm:$0xff]  ;;  %v8812_v52 = vld [vmem:[#allocation85_spill] sm:$0xff] }
 0x28f   : > { %v6599_v56 = vmax.f32 %v2849_v32, %v2850_v36  ;;  %v6607_v33 = vmax.f32 %v2852_v48, %v2853_v16  ;;  %v8811_v55 = vld [vmem:[#allocation96_spill] sm:$0xff]  ;;  %v8815_v48 = vpack.c.bf16 %v5751_v25, %v5751_v25  ;;  %v8816_v42 = vpack.c.bf16 %v5753_v38, %v5753_v38  ;;  %v8854_v41 = vld [vmem:[#allocation2_spill] sm:$0xff] }
 0x290   : > { %v8814_v12 = vld [vmem:[#allocation86_spill] sm:$0xff]  ;;  %v8817_v47 = vpack.c.bf16 %v5759_v57, %v5759_v57  ;;  %v8818_v36 = vpack.c.bf16 %v5767_v53, %v5767_v53  ;;  %v8819_v25 = vpack.c.bf16 %v5775_v45, %v5775_v45  ;;  %v8820_v38 = vpack.c.bf16 %v5777_v62, %v5777_v62 }
 0x291   : > { %8720 = vst [vmem:[#allocation87_spill] sm:$0xff] %v6599_v56  ;;  %v6898_v4 = vunpack.c.l.b16 %v8815_v48  ;;  %v6903_v16 = vunpack.c.l.b16 %v8816_v42  ;;  %v8821_v57 = vpack.c.bf16 %v5783_v11, %v5783_v11  ;;  %v8822_v53 = vpack.c.bf16 %v5791_v2, %v5791_v2 }
 0x292   : > { %v6908_v32 = vunpack.c.l.b16 %v8817_v47  ;;  %v6913_v56 = vunpack.c.l.b16 %v8818_v36  ;;  %v6918_v48 = vunpack.c.l.b16 %v8819_v25  ;;  %v6923_v42 = vunpack.c.l.b16 %v8820_v38 }
 0x293   : > { %v6928_v47 = vunpack.c.l.b16 %v8821_v57  ;;  %v6933_v36 = vunpack.c.l.b16 %v8822_v53  ;;  %v8823_v45 = vpack.c.bf16 %v5799_v40, %v5799_v40  ;;  %v8824_v62 = vpack.c.bf16 %v5801_v63, %v5801_v63 }
 0x294   : > { %v8825_v11 = vpack.c.bf16 %v5807_v39, %v5807_v39  ;;  %v8826_v2 = vpack.c.bf16 %v5815_v28, %v5815_v28  ;;  %v8827_v40 = vpack.c.bf16 %v5823_v49, %v5823_v49  ;;  %v8828_v63 = vpack.c.bf16 %v5825_v54, %v5825_v54 }
 0x295   : > { %v6938_v25 = vunpack.c.l.b16 %v8823_v45  ;;  %v6943_v38 = vunpack.c.l.b16 %v8824_v62  ;;  %v8829_v39 = vpack.c.bf16 %v5831_v1, %v5831_v1  ;;  %v8830_v28 = vpack.c.bf16 %v5839_v7, %v5839_v7 }
 0x296   : > { %v6948_v57 = vunpack.c.l.b16 %v8825_v11  ;;  %v6953_v53 = vunpack.c.l.b16 %v8826_v2  ;;  %v6958_v45 = vunpack.c.l.b16 %v8827_v40  ;;  %v6963_v62 = vunpack.c.l.b16 %v8828_v63 }
 0x297   : > { %v6968_v11 = vunpack.c.l.b16 %v8829_v39  ;;  %v6973_v2 = vunpack.c.l.b16 %v8830_v28  ;;  %v8831_v49 = vpack.c.bf16 %v5847_v5, %v5847_v5  ;;  %v8832_v54 = vpack.c.bf16 %v5849_v17, %v5849_v17 }
 0x298   : > { %v8833_v1 = vpack.c.bf16 %v5855_v21, %v5855_v21  ;;  %v8834_v7 = vpack.c.bf16 %v5863_v34, %v5863_v34  ;;  %v8836_v5 = vpack.c.bf16 %v5871_v50, %v5871_v50  ;;  %v8837_v17 = vpack.c.bf16 %v5873_v10, %v5873_v10 }
 0x299   : > { %v6978_v40 = vunpack.c.l.b16 %v8831_v49  ;;  %v6983_v63 = vunpack.c.l.b16 %v8832_v54  ;;  %v8838_v21 = vpack.c.bf16 %v5879_v31, %v5879_v31  ;;  %v8839_v34 = vpack.c.bf16 %v5887_v6, %v5887_v6 }
 0x29a   : > { %v6988_v39 = vunpack.c.l.b16 %v8833_v1  ;;  %v6993_v28 = vunpack.c.l.b16 %v8834_v7  ;;  %v6998_v49 = vunpack.c.l.b16 %v8836_v5  ;;  %v7003_v54 = vunpack.c.l.b16 %v8837_v17 }
 0x29b   : > { %v7008_v1 = vunpack.c.l.b16 %v8838_v21  ;;  %v7013_v7 = vunpack.c.l.b16 %v8839_v34  ;;  %v8840_v50 = vpack.c.bf16 %v5895_v59, %v5895_v59  ;;  %v8841_v10 = vpack.c.bf16 %v5897_v22, %v5897_v22 }
 0x29c   : > { %8835 = vst [vmem:[#allocation99_spill] sm:$0xff] %v6993_v28  ;;  %v8842_v31 = vpack.c.bf16 %v5903_v3, %v5903_v3  ;;  %v8843_v6 = vpack.c.bf16 %v5911_v19, %v5911_v19  ;;  %v8844_v59 = vpack.c.bf16 %v5919_v37, %v5919_v37  ;;  %v8846_v22 = vpack.c.bf16 %v5921_v60, %v5921_v60  ;;  %v8868_v28 = vld [vmem:[#allocation17_spill] sm:$0xff] }
 0x29d   : > { %v7018_v5 = vunpack.c.l.b16 %v8840_v50  ;;  %v7023_v17 = vunpack.c.l.b16 %v8841_v10  ;;  %v8848_v3 = vpack.c.bf16 %v5927_v58, %v5927_v58  ;;  %v8850_v19 = vpack.c.bf16 %v5935_v35, %v5935_v35 }
 0x29e   : > { %v7028_v21 = vunpack.c.l.b16 %v8842_v31  ;;  %v7033_v34 = vunpack.c.l.b16 %v8843_v6  ;;  %v7038_v50 = vunpack.c.l.b16 %v8844_v59  ;;  %v7043_v10 = vunpack.c.l.b16 %v8846_v22 }
 0x29f   : > { %v7048_v31 = vunpack.c.l.b16 %v8848_v3  ;;  %v7053_v6 = vunpack.c.l.b16 %v8850_v19  ;;  %v8852_v37 = vpack.c.bf16 %v5943_v43, %v5943_v43  ;;  %v8853_v60 = vpack.c.bf16 %v5945_v13, %v5945_v13 }
 0x2a0   : > { %8845 = vst [vmem:[#allocation100_spill] sm:$0xff] %v7038_v50  ;;  %8847 = vst [vmem:[#allocation112_spill] sm:$0xff] %v7043_v10  ;;  %v8855_v58 = vpack.c.bf16 %v8854_v41, %v8854_v41  ;;  %v8862_v10 = vld [vmem:[#allocation16_spill] sm:$0xff]  ;;  %v8865_v50 = vld [vmem:[#allocation5_spill] sm:$0xff] }
 0x2a1   : > { %8849 = vst [vmem:[#allocation101_spill] sm:$0xff] %v7048_v31  ;;  %8851 = vst [vmem:[#allocation113_spill] sm:$0xff] %v7053_v6  ;;  %v7058_v59 = vunpack.c.l.b16 %v8852_v37  ;;  %v7063_v22 = vunpack.c.l.b16 %v8853_v60  ;;  %v8856_v31 = vld [vmem:[#allocation3_spill] sm:$0xff]  ;;  %v8859_v6 = vld [vmem:[#allocation4_spill] sm:$0xff]  ;;  %v8863_v13 = vpack.c.bf16 %v8862_v10, %v8862_v10  ;;  %v8866_v41 = vpack.c.bf16 %v8865_v50, %v8865_v50 }
 0x2a2   : > { %v7068_v3 = vunpack.c.l.b16 %v8855_v58  ;;  %v8857_v35 = vpack.c.bf16 %v8856_v31, %v8856_v31  ;;  %v8860_v43 = vpack.c.bf16 %v8859_v6, %v8859_v6  ;;  %v8869_v31 = vpack.c.bf16 %v8868_v28, %v8868_v28 }
 0x2a3   : > { %v7083_v60 = vunpack.c.l.b16 %v8863_v13  ;;  %v7088_v58 = vunpack.c.l.b16 %v8866_v41 }
 0x2a4   : > { %v7073_v19 = vunpack.c.l.b16 %v8857_v35  ;;  %v7078_v37 = vunpack.c.l.b16 %v8860_v43  ;;  %v7093_v35 = vunpack.c.l.b16 %v8869_v31 }
 0x2a5   : > { %8864 = vst [vmem:[#allocation103_spill] sm:$0xff] %v7083_v60  ;;  %8867 = vst [vmem:[#allocation115_spill] sm:$0xff] %v7088_v58  ;;  %v8877_v60 = vld [vmem:[#allocation7_spill] sm:$0xff] }
 0x2a6   : > { %8858 = vst [vmem:[#allocation102_spill] sm:$0xff] %v7073_v19  ;;  %8861 = vst [vmem:[#allocation114_spill] sm:$0xff] %v7078_v37  ;;  %v8871_v19 = vld [vmem:[#allocation6_spill] sm:$0xff]  ;;  %v8878_v50 = vpack.c.bf16 %v8877_v60, %v8877_v60  ;;  %v8880_v58 = vld [vmem:[#allocation19_spill] sm:$0xff] }
 0x2a7   : > { %8870 = vst [vmem:[#allocation104_spill] sm:$0xff] %v7093_v35  ;;  %v8872_v6 = vpack.c.bf16 %v8871_v19, %v8871_v19  ;;  %v8874_v37 = vld [vmem:[#allocation18_spill] sm:$0xff]  ;;  %v8881_v28 = vpack.c.bf16 %v8880_v58, %v8880_v58  ;;  %v8883_v35 = vld [vmem:[#allocation8_spill] sm:$0xff] }
 0x2a8   : > { %v8875_v10 = vpack.c.bf16 %v8874_v37, %v8874_v37  ;;  %v7108_v41 = vunpack.c.l.b16 %v8878_v50  ;;  %v8884_v19 = vpack.c.bf16 %v8883_v35, %v8883_v35 }
 0x2a9   : > { %v7098_v43 = vunpack.c.l.b16 %v8872_v6  ;;  %v7113_v31 = vunpack.c.l.b16 %v8881_v28 }
 0x2aa   : > { %v7103_v13 = vunpack.c.l.b16 %v8875_v10  ;;  %8879 = vst [vmem:[#allocation117_spill] sm:$0xff] %v7108_v41  ;;  %v7118_v6 = vunpack.c.l.b16 %v8884_v19  ;;  %v8892_v41 = vld [vmem:[#allocation21_spill] sm:$0xff] }
 0x2ab   : > { %8873 = vst [vmem:[#allocation116_spill] sm:$0xff] %v7098_v43  ;;  %8882 = vst [vmem:[#allocation106_spill] sm:$0xff] %v7113_v31  ;;  %v8886_v43 = vld [vmem:[#allocation20_spill] sm:$0xff]  ;;  %v8893_v58 = vpack.c.bf16 %v8892_v41, %v8892_v41  ;;  %v8895_v31 = vld [vmem:[#allocation10_spill] sm:$0xff] }
 0x2ac   : > { %8876 = vst [vmem:[#allocation105_spill] sm:$0xff] %v7103_v13  ;;  %8885 = vst [vmem:[#allocation118_spill] sm:$0xff] %v7118_v6  ;;  %v8887_v37 = vpack.c.bf16 %v8886_v43, %v8886_v43  ;;  %v8889_v13 = vld [vmem:[#allocation9_spill] sm:$0xff]  ;;  %v8896_v35 = vpack.c.bf16 %v8895_v31, %v8895_v31  ;;  %v8898_v6 = vld [vmem:[#allocation22_spill] sm:$0xff] }
 0x2ad   : > { %v8890_v60 = vpack.c.bf16 %v8889_v13, %v8889_v13  ;;  %v7133_v28 = vunpack.c.l.b16 %v8893_v58  ;;  %v8899_v43 = vpack.c.bf16 %v8898_v6, %v8898_v6 }
 0x2ae   : > { %v7123_v10 = vunpack.c.l.b16 %v8887_v37  ;;  %v7138_v19 = vunpack.c.l.b16 %v8896_v35 }
 0x2af   : > { %v7128_v50 = vunpack.c.l.b16 %v8890_v60  ;;  %8894 = vst [vmem:[#allocation108_spill] sm:$0xff] %v7133_v28  ;;  %v7143_v37 = vunpack.c.l.b16 %v8899_v43  ;;  %v8907_v28 = vld [vmem:[#allocation12_spill] sm:$0xff] }
 0x2b0   : > { %8888 = vst [vmem:[#allocation107_spill] sm:$0xff] %v7123_v10  ;;  %8897 = vst [vmem:[#allocation120_spill] sm:$0xff] %v7138_v19  ;;  %v8901_v10 = vld [vmem:[#allocation11_spill] sm:$0xff]  ;;  %v8908_v31 = vpack.c.bf16 %v8907_v28, %v8907_v28  ;;  %v8910_v19 = vld [vmem:[#allocation24_spill] sm:$0xff] }
 0x2b1   : > { %8891 = vst [vmem:[#allocation119_spill] sm:$0xff] %v7128_v50  ;;  %8900 = vst [vmem:[#allocation109_spill] sm:$0xff] %v7143_v37  ;;  %v8902_v13 = vpack.c.bf16 %v8901_v10, %v8901_v10  ;;  %v8904_v50 = vld [vmem:[#allocation23_spill] sm:$0xff]  ;;  %v8911_v6 = vpack.c.bf16 %v8910_v19, %v8910_v19  ;;  %v8913_v37 = vld [vmem:[#allocation13_spill] sm:$0xff] }
 0x2b2   : > { %v8905_v41 = vpack.c.bf16 %v8904_v50, %v8904_v50  ;;  %v7158_v35 = vunpack.c.l.b16 %v8908_v31  ;;  %v8914_v10 = vpack.c.bf16 %v8913_v37, %v8913_v37 }
 0x2b3   : > { %v7148_v60 = vunpack.c.l.b16 %v8902_v13  ;;  %v7163_v43 = vunpack.c.l.b16 %v8911_v6 }
 0x2b4   : > { %v7153_v58 = vunpack.c.l.b16 %v8905_v41  ;;  %8909 = vst [vmem:[#allocation122_spill] sm:$0xff] %v7158_v35  ;;  %v7168_v13 = vunpack.c.l.b16 %v8914_v10  ;;  %v8922_v35 = vld [vmem:[#allocation26_spill] sm:$0xff] }
 0x2b5   : > { %8903 = vst [vmem:[#allocation121_spill] sm:$0xff] %v7148_v60  ;;  %8912 = vst [vmem:[#allocation111_spill] sm:$0xff] %v7163_v43  ;;  %v8916_v60 = vld [vmem:[#allocation25_spill] sm:$0xff]  ;;  %v8923_v19 = vpack.c.bf16 %v8922_v35, %v8922_v35  ;;  %v8925_v43 = vld [vmem:[#allocation15_spill] sm:$0xff] }
 0x2b6   : > { %8906 = vst [vmem:[#allocation110_spill] sm:$0xff] %v7153_v58  ;;  %8915 = vst [vmem:[#allocation123_spill] sm:$0xff] %v7168_v13  ;;  %v8917_v50 = vpack.c.bf16 %v8916_v60, %v8916_v60  ;;  %v8919_v58 = vld [vmem:[#allocation14_spill] sm:$0xff]  ;;  %v8926_v37 = vpack.c.bf16 %v8925_v43, %v8925_v43  ;;  %v8928_v13 = vld [vmem:[#allocation27_spill] sm:$0xff] }
 0x2b7   : > { %v8920_v28 = vpack.c.bf16 %v8919_v58, %v8919_v58  ;;  %v7183_v6 = vunpack.c.l.b16 %v8923_v19  ;;  %v8929_v60 = vpack.c.bf16 %v8928_v13, %v8928_v13 }
 0x2b8   : > { %v7173_v41 = vunpack.c.l.b16 %v8917_v50  ;;  %v7188_v10 = vunpack.c.l.b16 %v8926_v37 }
 0x2b9   : > { %v7178_v31 = vunpack.c.l.b16 %v8920_v28  ;;  %8924 = vst [vmem:[#allocation125_spill] sm:$0xff] %v7183_v6  ;;  %v7193_v50 = vunpack.c.l.b16 %v8929_v60  ;;  %v8937_v6 = vld [vmem:[#allocation29_spill] sm:$0xff] }
 0x2ba   : > { %8918 = vst [vmem:[#allocation124_spill] sm:$0xff] %v7173_v41  ;;  %8927 = vst [vmem:[#allocation137_spill] sm:$0xff] %v7188_v10  ;;  %v8931_v41 = vld [vmem:[#allocation28_spill] sm:$0xff]  ;;  %v8938_v43 = vpack.c.bf16 %v8937_v6, %v8937_v6  ;;  %v8940_v10 = vld [vmem:[#allocation41_spill] sm:$0xff] }
 0x2bb   : > { %8921 = vst [vmem:[#allocation136_spill] sm:$0xff] %v7178_v31  ;;  %8930 = vst [vmem:[#allocation126_spill] sm:$0xff] %v7193_v50  ;;  %v8932_v58 = vpack.c.bf16 %v8931_v41, %v8931_v41  ;;  %v8934_v31 = vld [vmem:[#allocation40_spill] sm:$0xff]  ;;  %v8941_v13 = vpack.c.bf16 %v8940_v10, %v8940_v10  ;;  %v8943_v50 = vld [vmem:[#allocation30_spill] sm:$0xff] }
 0x2bc   : > { %v8935_v35 = vpack.c.bf16 %v8934_v31, %v8934_v31  ;;  %v7208_v37 = vunpack.c.l.b16 %v8938_v43  ;;  %v8944_v41 = vpack.c.bf16 %v8943_v50, %v8943_v50 }
 0x2bd   : > { %v7198_v28 = vunpack.c.l.b16 %v8932_v58  ;;  %v7213_v60 = vunpack.c.l.b16 %v8941_v13 }
 0x2be   : > { %v7203_v19 = vunpack.c.l.b16 %v8935_v35  ;;  %8939 = vst [vmem:[#allocation139_spill] sm:$0xff] %v7208_v37  ;;  %v7218_v58 = vunpack.c.l.b16 %v8944_v41  ;;  %v8952_v37 = vld [vmem:[#allocation43_spill] sm:$0xff] }
 0x2bf   : > { %8933 = vst [vmem:[#allocation138_spill] sm:$0xff] %v7198_v28  ;;  %8942 = vst [vmem:[#allocation128_spill] sm:$0xff] %v7213_v60  ;;  %v8946_v28 = vld [vmem:[#allocation42_spill] sm:$0xff]  ;;  %v8953_v10 = vpack.c.bf16 %v8952_v37, %v8952_v37  ;;  %v8955_v60 = vld [vmem:[#allocation32_spill] sm:$0xff] }
 0x2c0   : > { %8936 = vst [vmem:[#allocation127_spill] sm:$0xff] %v7203_v19  ;;  %8945 = vst [vmem:[#allocation140_spill] sm:$0xff] %v7218_v58  ;;  %v8947_v31 = vpack.c.bf16 %v8946_v28, %v8946_v28  ;;  %v8949_v19 = vld [vmem:[#allocation31_spill] sm:$0xff]  ;;  %v8956_v50 = vpack.c.bf16 %v8955_v60, %v8955_v60  ;;  %v8958_v58 = vld [vmem:[#allocation44_spill] sm:$0xff] }
 0x2c1   : > { %v8950_v6 = vpack.c.bf16 %v8949_v19, %v8949_v19  ;;  %v7233_v13 = vunpack.c.l.b16 %v8953_v10  ;;  %v8959_v28 = vpack.c.bf16 %v8958_v58, %v8958_v58 }
 0x2c2   : > { %v7223_v35 = vunpack.c.l.b16 %v8947_v31  ;;  %v7238_v41 = vunpack.c.l.b16 %v8956_v50 }
 0x2c3   : > { %v7228_v43 = vunpack.c.l.b16 %v8950_v6  ;;  %8954 = vst [vmem:[#allocation130_spill] sm:$0xff] %v7233_v13  ;;  %v7243_v31 = vunpack.c.l.b16 %v8959_v28  ;;  %v8967_v13 = vld [vmem:[#allocation34_spill] sm:$0xff] }
 0x2c4   : > { %8948 = vst [vmem:[#allocation129_spill] sm:$0xff] %v7223_v35  ;;  %8957 = vst [vmem:[#allocation142_spill] sm:$0xff] %v7238_v41  ;;  %v8961_v35 = vld [vmem:[#allocation33_spill] sm:$0xff]  ;;  %v8968_v60 = vpack.c.bf16 %v8967_v13, %v8967_v13  ;;  %v8970_v41 = vld [vmem:[#allocation46_spill] sm:$0xff] }
 0x2c5   : > { %8951 = vst [vmem:[#allocation141_spill] sm:$0xff] %v7228_v43  ;;  %8960 = vst [vmem:[#allocation131_spill] sm:$0xff] %v7243_v31  ;;  %v8962_v19 = vpack.c.bf16 %v8961_v35, %v8961_v35  ;;  %v8964_v43 = vld [vmem:[#allocation45_spill] sm:$0xff]  ;;  %v8971_v58 = vpack.c.bf16 %v8970_v41, %v8970_v41  ;;  %v8973_v31 = vld [vmem:[#allocation35_spill] sm:$0xff] }
 0x2c6   : > { %v8965_v37 = vpack.c.bf16 %v8964_v43, %v8964_v43  ;;  %v7258_v50 = vunpack.c.l.b16 %v8968_v60  ;;  %v8974_v35 = vpack.c.bf16 %v8973_v31, %v8973_v31 }
 0x2c7   : > { %v7248_v6 = vunpack.c.l.b16 %v8962_v19  ;;  %v7263_v28 = vunpack.c.l.b16 %v8971_v58 }
 0x2c8   : > { %v7253_v10 = vunpack.c.l.b16 %v8965_v37  ;;  %8969 = vst [vmem:[#allocation144_spill] sm:$0xff] %v7258_v50  ;;  %v7268_v19 = vunpack.c.l.b16 %v8974_v35  ;;  %v8982_v50 = vld [vmem:[#allocation48_spill] sm:$0xff] }
 0x2c9   : > { %8963 = vst [vmem:[#allocation143_spill] sm:$0xff] %v7248_v6  ;;  %8972 = vst [vmem:[#allocation133_spill] sm:$0xff] %v7263_v28  ;;  %v8976_v6 = vld [vmem:[#allocation47_spill] sm:$0xff]  ;;  %v8983_v41 = vpack.c.bf16 %v8982_v50, %v8982_v50  ;;  %v8985_v28 = vld [vmem:[#allocation37_spill] sm:$0xff] }
 0x2ca   : > { %8966 = vst [vmem:[#allocation132_spill] sm:$0xff] %v7253_v10  ;;  %8975 = vst [vmem:[#allocation145_spill] sm:$0xff] %v7268_v19  ;;  %v8977_v43 = vpack.c.bf16 %v8976_v6, %v8976_v6  ;;  %v8979_v10 = vld [vmem:[#allocation36_spill] sm:$0xff]  ;;  %v8986_v31 = vpack.c.bf16 %v8985_v28, %v8985_v28  ;;  %v8988_v19 = vld [vmem:[#allocation49_spill] sm:$0xff] }
 0x2cb   : > { %v8980_v13 = vpack.c.bf16 %v8979_v10, %v8979_v10  ;;  %v7283_v58 = vunpack.c.l.b16 %v8983_v41  ;;  %v8989_v6 = vpack.c.bf16 %v8988_v19, %v8988_v19 }
 0x2cc   : > { %v7273_v37 = vunpack.c.l.b16 %v8977_v43  ;;  %v7288_v35 = vunpack.c.l.b16 %v8986_v31 }
 0x2cd   : > { %v7278_v60 = vunpack.c.l.b16 %v8980_v13  ;;  %8984 = vst [vmem:[#allocation135_spill] sm:$0xff] %v7283_v58  ;;  %v7293_v43 = vunpack.c.l.b16 %v8989_v6  ;;  %v8997_v58 = vld [vmem:[#allocation39_spill] sm:$0xff] }
 0x2ce   : > { %8978 = vst [vmem:[#allocation134_spill] sm:$0xff] %v7273_v37  ;;  %8987 = vst [vmem:[#allocation147_spill] sm:$0xff] %v7288_v35  ;;  %v8991_v37 = vld [vmem:[#allocation38_spill] sm:$0xff]  ;;  %v8998_v28 = vpack.c.bf16 %v8997_v58, %v8997_v58  ;;  %v9000_v35 = vld [vmem:[#allocation51_spill] sm:$0xff] }
 0x2cf   : > { %8981 = vst [vmem:[#allocation146_spill] sm:$0xff] %v7278_v60  ;;  %8990 = vst [vmem:[#allocation148_spill] sm:$0xff] %v7293_v43  ;;  %v8992_v10 = vpack.c.bf16 %v8991_v37, %v8991_v37  ;;  %v8994_v60 = vld [vmem:[#allocation50_spill] sm:$0xff]  ;;  %v9001_v19 = vpack.c.bf16 %v9000_v35, %v9000_v35  ;;  %v9003_v43 = vld [vmem:[#allocation52_spill] sm:$0xff] }
 0x2d0   : > { %v8995_v50 = vpack.c.bf16 %v8994_v60, %v8994_v60  ;;  %v7308_v31 = vunpack.c.l.b16 %v8998_v28  ;;  %v9004_v37 = vpack.c.bf16 %v9003_v43, %v9003_v43 }
 0x2d1   : > { %v7298_v13 = vunpack.c.l.b16 %v8992_v10  ;;  %v7313_v6 = vunpack.c.l.b16 %v9001_v19 }
 0x2d2   : > { %v7303_v41 = vunpack.c.l.b16 %v8995_v50  ;;  %8999 = vst [vmem:[#allocation161_spill] sm:$0xff] %v7308_v31  ;;  %v7318_v10 = vunpack.c.l.b16 %v9004_v37  ;;  %v9012_v31 = vld [vmem:[#allocation65_spill] sm:$0xff] }
 0x2d3   : > { %8993 = vst [vmem:[#allocation160_spill] sm:$0xff] %v7298_v13  ;;  %9002 = vst [vmem:[#allocation150_spill] sm:$0xff] %v7313_v6  ;;  %v9006_v13 = vld [vmem:[#allocation64_spill] sm:$0xff]  ;;  %v9013_v35 = vpack.c.bf16 %v9012_v31, %v9012_v31  ;;  %v9015_v6 = vld [vmem:[#allocation54_spill] sm:$0xff] }
 0x2d4   : > { %8996 = vst [vmem:[#allocation149_spill] sm:$0xff] %v7303_v41  ;;  %9005 = vst [vmem:[#allocation162_spill] sm:$0xff] %v7318_v10  ;;  %v9007_v60 = vpack.c.bf16 %v9006_v13, %v9006_v13  ;;  %v9009_v41 = vld [vmem:[#allocation53_spill] sm:$0xff]  ;;  %v9016_v43 = vpack.c.bf16 %v9015_v6, %v9015_v6  ;;  %v9018_v10 = vld [vmem:[#allocation66_spill] sm:$0xff] }
 0x2d5   : > { %v9010_v58 = vpack.c.bf16 %v9009_v41, %v9009_v41  ;;  %v7333_v19 = vunpack.c.l.b16 %v9013_v35  ;;  %v9019_v13 = vpack.c.bf16 %v9018_v10, %v9018_v10 }
 0x2d6   : > { %v7323_v50 = vunpack.c.l.b16 %v9007_v60  ;;  %v7338_v37 = vunpack.c.l.b16 %v9016_v43 }
 0x2d7   : > { %v7328_v28 = vunpack.c.l.b16 %v9010_v58  ;;  %9014 = vst [vmem:[#allocation152_spill] sm:$0xff] %v7333_v19  ;;  %v7343_v60 = vunpack.c.l.b16 %v9019_v13  ;;  %v9027_v19 = vld [vmem:[#allocation56_spill] sm:$0xff] }
 0x2d8   : > { %9008 = vst [vmem:[#allocation151_spill] sm:$0xff] %v7323_v50  ;;  %9017 = vst [vmem:[#allocation164_spill] sm:$0xff] %v7338_v37  ;;  %v9021_v50 = vld [vmem:[#allocation55_spill] sm:$0xff]  ;;  %v9028_v6 = vpack.c.bf16 %v9027_v19, %v9027_v19  ;;  %v9030_v37 = vld [vmem:[#allocation68_spill] sm:$0xff] }
 0x2d9   : > { %9011 = vst [vmem:[#allocation163_spill] sm:$0xff] %v7328_v28  ;;  %9020 = vst [vmem:[#allocation153_spill] sm:$0xff] %v7343_v60  ;;  %v9022_v41 = vpack.c.bf16 %v9021_v50, %v9021_v50  ;;  %v9024_v28 = vld [vmem:[#allocation67_spill] sm:$0xff]  ;;  %v9031_v10 = vpack.c.bf16 %v9030_v37, %v9030_v37  ;;  %v9033_v60 = vld [vmem:[#allocation57_spill] sm:$0xff] }
 0x2da   : > { %v9025_v31 = vpack.c.bf16 %v9024_v28, %v9024_v28  ;;  %v7358_v43 = vunpack.c.l.b16 %v9028_v6  ;;  %v9034_v50 = vpack.c.bf16 %v9033_v60, %v9033_v60 }
 0x2db   : > { %v7348_v58 = vunpack.c.l.b16 %v9022_v41  ;;  %v7363_v13 = vunpack.c.l.b16 %v9031_v10 }
 0x2dc   : > { %v7353_v35 = vunpack.c.l.b16 %v9025_v31  ;;  %9029 = vst [vmem:[#allocation166_spill] sm:$0xff] %v7358_v43  ;;  %v7368_v41 = vunpack.c.l.b16 %v9034_v50  ;;  %v9042_v43 = vld [vmem:[#allocation70_spill] sm:$0xff] }
 0x2dd   : > { %9023 = vst [vmem:[#allocation165_spill] sm:$0xff] %v7348_v58  ;;  %9032 = vst [vmem:[#allocation155_spill] sm:$0xff] %v7363_v13  ;;  %v9036_v58 = vld [vmem:[#allocation69_spill] sm:$0xff]  ;;  %v9043_v37 = vpack.c.bf16 %v9042_v43, %v9042_v43  ;;  %v9045_v13 = vld [vmem:[#allocation59_spill] sm:$0xff] }
 0x2de   : > { %9026 = vst [vmem:[#allocation154_spill] sm:$0xff] %v7353_v35  ;;  %9035 = vst [vmem:[#allocation167_spill] sm:$0xff] %v7368_v41  ;;  %v9037_v28 = vpack.c.bf16 %v9036_v58, %v9036_v58  ;;  %v9039_v35 = vld [vmem:[#allocation58_spill] sm:$0xff]  ;;  %v9046_v60 = vpack.c.bf16 %v9045_v13, %v9045_v13  ;;  %v9048_v41 = vld [vmem:[#allocation71_spill] sm:$0xff] }
 0x2df   : > { %v9040_v19 = vpack.c.bf16 %v9039_v35, %v9039_v35  ;;  %v7383_v10 = vunpack.c.l.b16 %v9043_v37  ;;  %v9049_v58 = vpack.c.bf16 %v9048_v41, %v9048_v41 }
 0x2e0   : > { %v7373_v31 = vunpack.c.l.b16 %v9037_v28  ;;  %v7388_v50 = vunpack.c.l.b16 %v9046_v60 }
 0x2e1   : > { %v7378_v6 = vunpack.c.l.b16 %v9040_v19  ;;  %9044 = vst [vmem:[#allocation157_spill] sm:$0xff] %v7383_v10  ;;  %v7393_v28 = vunpack.c.l.b16 %v9049_v58  ;;  %v9057_v10 = vld [vmem:[#allocation61_spill] sm:$0xff] }
 0x2e2   : > { %9038 = vst [vmem:[#allocation156_spill] sm:$0xff] %v7373_v31  ;;  %9047 = vst [vmem:[#allocation169_spill] sm:$0xff] %v7388_v50  ;;  %v9051_v31 = vld [vmem:[#allocation60_spill] sm:$0xff]  ;;  %v9058_v13 = vpack.c.bf16 %v9057_v10, %v9057_v10  ;;  %v9060_v50 = vld [vmem:[#allocation73_spill] sm:$0xff] }
 0x2e3   : > { %9041 = vst [vmem:[#allocation168_spill] sm:$0xff] %v7378_v6  ;;  %9050 = vst [vmem:[#allocation158_spill] sm:$0xff] %v7393_v28  ;;  %v9052_v35 = vpack.c.bf16 %v9051_v31, %v9051_v31  ;;  %v9054_v6 = vld [vmem:[#allocation72_spill] sm:$0xff]  ;;  %v9061_v41 = vpack.c.bf16 %v9060_v50, %v9060_v50  ;;  %v9063_v28 = vld [vmem:[#allocation62_spill] sm:$0xff] }
 0x2e4   : > { %v9055_v43 = vpack.c.bf16 %v9054_v6, %v9054_v6  ;;  %v7408_v60 = vunpack.c.l.b16 %v9058_v13  ;;  %v9064_v31 = vpack.c.bf16 %v9063_v28, %v9063_v28 }
 0x2e5   : > { %v7398_v19 = vunpack.c.l.b16 %v9052_v35  ;;  %v7413_v58 = vunpack.c.l.b16 %v9061_v41 }
 0x2e6   : > { %v7403_v37 = vunpack.c.l.b16 %v9055_v43  ;;  %9059 = vst [vmem:[#allocation171_spill] sm:$0xff] %v7408_v60  ;;  %v7418_v35 = vunpack.c.l.b16 %v9064_v31  ;;  %v9072_v60 = vld [vmem:[#allocation75_spill] sm:$0xff] }
 0x2e7   : > { %9053 = vst [vmem:[#allocation170_spill] sm:$0xff] %v7398_v19  ;;  %9062 = vst [vmem:[#allocation172_spill] sm:$0xff] %v7413_v58  ;;  %v9066_v19 = vld [vmem:[#allocation74_spill] sm:$0xff]  ;;  %v9073_v50 = vpack.c.bf16 %v9072_v60, %v9072_v60  ;;  %v9075_v58 = vld [vmem:[#allocation76_spill] sm:$0xff] }
 0x2e8   : > { %9056 = vst [vmem:[#allocation159_spill] sm:$0xff] %v7403_v37  ;;  %9065 = vst [vmem:[#allocation184_spill] sm:$0xff] %v7418_v35  ;;  %v9067_v6 = vpack.c.bf16 %v9066_v19, %v9066_v19  ;;  %v9069_v37 = vld [vmem:[#allocation63_spill] sm:$0xff]  ;;  %v9076_v28 = vpack.c.bf16 %v9075_v58, %v9075_v58  ;;  %v9078_v35 = vld [vmem:[#allocation88_spill] sm:$0xff] }
 0x2e9   : > { %v9070_v10 = vpack.c.bf16 %v9069_v37, %v9069_v37  ;;  %v7433_v41 = vunpack.c.l.b16 %v9073_v50  ;;  %v9079_v19 = vpack.c.bf16 %v9078_v35, %v9078_v35 }
 0x2ea   : > { %v7423_v43 = vunpack.c.l.b16 %v9067_v6  ;;  %v7438_v31 = vunpack.c.l.b16 %v9076_v28 }
 0x2eb   : > { %v7428_v13 = vunpack.c.l.b16 %v9070_v10  ;;  %9074 = vst [vmem:[#allocation174_spill] sm:$0xff] %v7433_v41  ;;  %v7443_v6 = vunpack.c.l.b16 %v9079_v19  ;;  %v9087_v41 = vld [vmem:[#allocation78_spill] sm:$0xff] }
 0x2ec   : > { %9068 = vst [vmem:[#allocation173_spill] sm:$0xff] %v7423_v43  ;;  %9077 = vst [vmem:[#allocation186_spill] sm:$0xff] %v7438_v31  ;;  %v9081_v43 = vld [vmem:[#allocation77_spill] sm:$0xff]  ;;  %v9088_v58 = vpack.c.bf16 %v9087_v41, %v9087_v41  ;;  %v9090_v31 = vld [vmem:[#allocation90_spill] sm:$0xff] }
 0x2ed   : > { %9071 = vst [vmem:[#allocation185_spill] sm:$0xff] %v7428_v13  ;;  %9080 = vst [vmem:[#allocation175_spill] sm:$0xff] %v7443_v6  ;;  %v9082_v37 = vpack.c.bf16 %v9081_v43, %v9081_v43  ;;  %v9084_v13 = vld [vmem:[#allocation89_spill] sm:$0xff]  ;;  %v9091_v35 = vpack.c.bf16 %v9090_v31, %v9090_v31  ;;  %v9093_v6 = vld [vmem:[#allocation79_spill] sm:$0xff] }
 0x2ee   : > { %v9085_v60 = vpack.c.bf16 %v9084_v13, %v9084_v13  ;;  %v7458_v28 = vunpack.c.l.b16 %v9088_v58  ;;  %v9094_v43 = vpack.c.bf16 %v9093_v6, %v9093_v6 }
 0x2ef   : > { %v7448_v10 = vunpack.c.l.b16 %v9082_v37  ;;  %v7463_v19 = vunpack.c.l.b16 %v9091_v35 }
 0x2f0   : > { %v7453_v50 = vunpack.c.l.b16 %v9085_v60  ;;  %9089 = vst [vmem:[#allocation188_spill] sm:$0xff] %v7458_v28  ;;  %v7468_v37 = vunpack.c.l.b16 %v9094_v43  ;;  %v9101_v28 = vld [vmem:[#allocation92_spill] sm:$0xff] }
 0x2f1   : > { %9083 = vst [vmem:[#allocation187_spill] sm:$0xff] %v7448_v10  ;;  %9092 = vst [vmem:[#allocation177_spill] sm:$0xff] %v7463_v19  ;;  %v9096_v10 = vld [vmem:[#allocation91_spill] sm:$0xff]  ;;  %v9102_v31 = vpack.c.bf16 %v9101_v28, %v9101_v28  ;;  %v9103_v19 = vld [vmem:[#allocation81_spill] sm:$0xff]  ;;  %v9108_v28 = vpack.c.bf16 %v8807_v46, %v8807_v46  ;;  %v9113_v46 = vpack.c.bf16 %v8811_v55, %v8811_v55 }
 0x2f2   : > { %9086 = vst [vmem:[#allocation176_spill] sm:$0xff] %v7453_v50  ;;  %9095 = vst [vmem:[#allocation189_spill] sm:$0xff] %v7468_v37  ;;  %v9097_v13 = vpack.c.bf16 %v9096_v10, %v9096_v10  ;;  %v9099_v50 = vld [vmem:[#allocation80_spill] sm:$0xff]  ;;  %v9104_v6 = vpack.c.bf16 %v9103_v19, %v9103_v19  ;;  %v9105_v37 = vld [vmem:[#allocation93_spill] sm:$0xff]  ;;  %v9109_v19 = vpack.c.bf16 %v8808_v61, %v8808_v61 }
 0x2f3   : > { %v9100_v41 = vpack.c.bf16 %v9099_v50, %v9099_v50  ;;  %v7483_v35 = vunpack.c.l.b16 %v9102_v31  ;;  %v9106_v10 = vpack.c.bf16 %v9105_v37, %v9105_v37  ;;  %v9107_v50 = vpack.c.bf16 %v8806_v9, %v8806_v9 }
 0x2f4   : > { %v7473_v60 = vunpack.c.l.b16 %v9097_v13  ;;  %v7488_v43 = vunpack.c.l.b16 %v9104_v6  ;;  %v7503_v31 = vunpack.c.l.b16 %v9108_v28  ;;  %v7508_v6 = vunpack.c.l.b16 %v9109_v19 }
 0x2f5   : > { %v7478_v58 = vunpack.c.l.b16 %v9100_v41  ;;  %v7493_v13 = vunpack.c.l.b16 %v9106_v10  ;;  %v7498_v41 = vunpack.c.l.b16 %v9107_v50  ;;  %v9112_v9 = vpack.c.bf16 %v8810_v8, %v8810_v8 }
 0x2f6   : > { %9098 = vst [vmem:[#allocation178_spill] sm:$0xff] %v7473_v60  ;;  %v9110_v60 = vld [vmem:[#allocation95_spill] sm:$0xff]  ;;  %v7523_v28 = vunpack.c.l.b16 %v9113_v46  ;;  %v9114_v61 = vpack.c.bf16 %v8812_v52, %v8812_v52  ;;  %v9117_v8 = vpack.c.bf16 %v6519_v18, %v6519_v18  ;;  %v9118_v55 = vpack.c.bf16 %v6521_v24, %v6521_v24 }
 0x2f7   : > { %v9111_v37 = vpack.c.bf16 %v9110_v60, %v9110_v60  ;;  %v7518_v50 = vunpack.c.l.b16 %v9112_v9  ;;  %v9115_v60 = vpack.c.bf16 %v8813_v0, %v8813_v0  ;;  %v9119_v52 = vpack.c.bf16 %v6527_v20, %v6527_v20 }
 0x2f8   : > { %v7528_v19 = vunpack.c.l.b16 %v9114_v61  ;;  %v7538_v9 = vunpack.c.l.b16 %v9117_v8  ;;  %v7543_v46 = vunpack.c.l.b16 %v9118_v55  ;;  %v9120_v0 = vpack.c.bf16 %v8814_v12, %v8814_v12 }
 0x2f9   : > { %v7513_v10 = vunpack.c.l.b16 %v9111_v37  ;;  %v7533_v37 = vunpack.c.l.b16 %v9115_v60  ;;  %v7548_v61 = vunpack.c.l.b16 %v9119_v52  ;;  %v9121_v18 = vpack.c.bf16 %v6543_v30, %v6543_v30 }
 0x2fa   : > { %v7553_v60 = vunpack.c.l.b16 %v9120_v0  ;;  %v9122_v24 = vpack.c.bf16 %v6545_v23, %v6545_v23  ;;  %v9123_v20 = vpack.c.bf16 %v6551_v44, %v6551_v44  ;;  %v9124_v12 = vpack.c.bf16 %v6559_v29, %v6559_v29 }
 0x2fb   : > { %9116 = vst [vmem:[#allocation190_spill] sm:$0xff] %v7533_v37  ;;  %v7558_v8 = vunpack.c.l.b16 %v9121_v18  ;;  %v9125_v30 = vpack.c.bf16 %v6567_v26, %v6567_v26  ;;  %v9126_v37 = vld [vmem:[#allocation98_spill] sm:$0xff]  ;;  %v9129_v44 = vpack.c.bf16 %v6575_v14, %v6575_v14  ;;  %v9130_v29 = vpack.c.bf16 %v6583_v51, %v6583_v51 }
 0x2fc   : > { %v7563_v55 = vunpack.c.l.b16 %v9122_v24  ;;  %v7568_v52 = vunpack.c.l.b16 %v9123_v20  ;;  %v7573_v0 = vunpack.c.l.b16 %v9124_v12  ;;  %v9127_v23 = vpack.c.bf16 %v9126_v37, %v9126_v37 }
 0x2fd   : > { %v7578_v18 = vunpack.c.l.b16 %v9125_v30  ;;  %v7588_v20 = vunpack.c.l.b16 %v9129_v44  ;;  %v7593_v12 = vunpack.c.l.b16 %v9130_v29  ;;  %v9131_v26 = vpack.c.bf16 %v6591_v15, %v6591_v15 }
 0x2fe   : > { %v7583_v24 = vunpack.c.l.b16 %v9127_v23  ;;  %v9132_v37 = vpack.c.bf16 %v6593_v27, %v6593_v27  ;;  %v9135_v51 = vpack.c.bf16 %v6607_v33, %v6607_v33  ;;  %v3576_v15 = vsel %vm3575_vm2, %v6903_v16, %v6898_v4 }
 0x2ff   : > { %v7598_v30 = vunpack.c.l.b16 %v9131_v26  ;;  %v3578_v27 = vsel %vm3577_vm3, %v6908_v32, %v3576_v15  ;;  %v3589_v33 = vsel %vm3575_vm2, %v6943_v38, %v6938_v25  ;;  %v3599_v26 = vsel %vm3575_vm2, %v7003_v54, %v6998_v49  ;;  %v9144_v15 = vld [vmem:[#allocation115_spill] sm:$0xff] }
 0x300   : > { %9128 = vst [vmem:[#allocation179_spill] sm:$0xff] %v7583_v24  ;;  %v7603_v23 = vunpack.c.l.b16 %v9132_v37  ;;  %v9133_v24 = vld [vmem:[#allocation87_spill] sm:$0xff]  ;;  %v7613_v29 = vunpack.c.l.b16 %v9135_v51  ;;  %v3580_v4 = vsel %vm3579_vm4, %v6913_v56, %v3578_v27  ;;  %v3590_v16 = vsel %vm3577_vm3, %v6948_v57, %v3589_v33  ;;  %v9141_v37 = vld [vmem:[#allocation118_spill] sm:$0xff] }
 0x301   : > { %v9134_v14 = vpack.c.bf16 %v9133_v24, %v9133_v24  ;;  %v3592_v24 = vsel %vm3575_vm2, %v6963_v62, %v6958_v45  ;;  %v3600_v25 = vsel %vm3577_vm3, %v7008_v1, %v3599_v26  ;;  %v3582_v38 = vsel %vm3581_vm5, %v6918_v48, %v3580_v4  ;;  %v9145_v33 = vld [vmem:[#allocation119_spill] sm:$0xff]  ;;  %v9146_v26 = vld [vmem:[#allocation120_spill] sm:$0xff]  ;;  %v9147_v4 = vld [vmem:[#allocation109_spill] sm:$0xff] }
 0x302   : > { %v3593_v32 = vsel %vm3577_vm3, %v6968_v11, %v3592_v24  ;;  %v7641_v45 = vsel %vm3579_vm4, %v6953_v53, %v3590_v16  ;;  %v7647_v56 = vsel %vm3579_vm4, %v7013_v7, %v3600_v25  ;;  %v3584_v57 = vsel %vm3583_vm6, %v6923_v42, %v3582_v38  ;;  %v9149_v38 = vld [vmem:[#allocation104_spill] sm:$0xff] }
 0x303   : > { %v7608_v44 = vunpack.c.l.b16 %v9134_v14  ;;  %v3594_v62 = vsel %vm3579_vm4, %v6973_v2, %v3593_v32  ;;  %v3602_v48 = vsel %vm3575_vm2, %v7023_v17, %v7018_v5  ;;  %v3609_v53 = vsel %vm3575_vm2, %v7063_v22, %v7058_v59  ;;  %v9139_v22 = vld [vmem:[#allocation114_spill] sm:$0xff]  ;;  %v9148_v32 = vld [vmem:[#allocation101_spill] sm:$0xff] }
 0x304   : > { %v3595_v11 = vsel %vm3581_vm5, %v6978_v40, %v3594_v62  ;;  %v3586_v2 = vsel %vm3585_vm7, %v6928_v47, %v3584_v57  ;;  %v3603_v42 = vsel %vm3577_vm3, %v7028_v21, %v3602_v48  ;;  %v3610_v40 = vsel %vm3577_vm3, %v7068_v3, %v3609_v53  ;;  %v9136_v47 = vld [vmem:[#allocation102_spill] sm:$0xff]  ;;  %v9138_v21 = vld [vmem:[#allocation100_spill] sm:$0xff]  ;;  %v9151_v48 = vld [vmem:[#allocation121_spill] sm:$0xff] }
 0x305   : > { %v3596_v49 = vsel %vm3583_vm6, %v6983_v63, %v3595_v11  ;;  %v7669_v54 = vsel %vm3587_vm8, %v6933_v36, %v3586_v2  ;;  %v3604_v7 = vsel %vm3579_vm4, %v7033_v34, %v3603_v42  ;;  %v7677_v5 = vsel %vm3579_vm4, %v9136_v47, %v3610_v40  ;;  %v9137_v63 = vld [vmem:[#allocation99_spill] sm:$0xff]  ;;  %v9143_v34 = vld [vmem:[#allocation112_spill] sm:$0xff]  ;;  %v9152_v2 = vld [vmem:[#allocation113_spill] sm:$0xff] }
 0x306   : > { %v3597_v1 = vsel %vm3585_vm7, %v6988_v39, %v3596_v49  ;;  %v3605_v59 = vsel %vm3581_vm5, %v9138_v21, %v3604_v7  ;;  %v9140_v36 = vld [vmem:[#allocation103_spill] sm:$0xff]  ;;  %v3622_v16 = vsel %vm3575_vm2, %v9147_v4, %v9146_v26  ;;  %v9150_v57 = vld [vmem:[#allocation108_spill] sm:$0xff]  ;;  %v9164_v26 = vld [vmem:[#allocation126_spill] sm:$0xff] }
 0x307   : > { %v7681_v17 = vsel %vm3587_vm8, %v9137_v63, %v3597_v1  ;;  %v3612_v3 = vsel %vm3575_vm2, %v9140_v36, %v9139_v22  ;;  %v9142_v39 = vld [vmem:[#allocation107_spill] sm:$0xff]  ;;  %v3606_v51 = vsel %vm3583_vm6, %v9143_v34, %v3605_v59  ;;  %v3623_v53 = vsel %vm3577_vm3, %v9151_v48, %v3622_v16  ;;  %v9153_v42 = vld [vmem:[#allocation116_spill] sm:$0xff]  ;;  %v9154_v1 = vld [vmem:[#allocation110_spill] sm:$0xff] }
 0x308   : > { %v3619_v14 = vsel %vm3575_vm2, %v9142_v39, %v9141_v37  ;;  %v3613_v27 = vsel %vm3577_vm3, %v9144_v15, %v3612_v3  ;;  %v3607_v25 = vsel %vm3585_vm7, %v9148_v32, %v3606_v51  ;;  %v3624_v7 = vsel %vm3579_vm4, %v9154_v1, %v3623_v53  ;;  %v9155_v47 = vld [vmem:[#allocation136_spill] sm:$0xff]  ;;  %v9156_v63 = vld [vmem:[#allocation125_spill] sm:$0xff]  ;;  %v9158_v36 = vld [vmem:[#allocation122_spill] sm:$0xff] }
 0x309   : > { %v3620_v24 = vsel %vm3577_vm3, %v9145_v33, %v3619_v14  ;;  %v3614_v62 = vsel %vm3579_vm4, %v9149_v38, %v3613_v27  ;;  %v7712_v49 = vsel %vm3587_vm8, %v9152_v2, %v3607_v25  ;;  %v3629_v21 = vsel %vm3575_vm2, %v9156_v63, %v9155_v47  ;;  %v9157_v59 = vld [vmem:[#allocation105_spill] sm:$0xff]  ;;  %v9160_v14 = vld [vmem:[#allocation138_spill] sm:$0xff]  ;;  %v9161_v34 = vld [vmem:[#allocation127_spill] sm:$0xff] }
 0x30a   : > { %v7706_v11 = vsel %vm3579_vm4, %v9150_v57, %v3620_v24  ;;  %v3615_v40 = vsel %vm3581_vm5, %v9153_v42, %v3614_v62  ;;  %v3625_v3 = vsel %vm3581_vm5, %v9158_v36, %v3624_v7  ;;  %v9159_v37 = vld [vmem:[#allocation137_spill] sm:$0xff]  ;;  %v3632_v51 = vsel %vm3575_vm2, %v9161_v34, %v9160_v14  ;;  %v9163_v33 = vld [vmem:[#allocation111_spill] sm:$0xff]  ;;  %v9166_v25 = vld [vmem:[#allocation106_spill] sm:$0xff] }
 0x30b   : > { %v3616_v22 = vsel %vm3583_vm6, %v9157_v59, %v3615_v40  ;;  %v3630_v39 = vsel %vm3577_vm3, %v9159_v37, %v3629_v21  ;;  %v9162_v15 = vld [vmem:[#allocation117_spill] sm:$0xff]  ;;  %v3626_v24 = vsel %vm3583_vm6, %v9163_v33, %v3625_v3  ;;  %v9165_v16 = vld [vmem:[#allocation139_spill] sm:$0xff]  ;;  %v9168_v48 = vld [vmem:[#allocation128_spill] sm:$0xff] }
 0x30c   : > { %v3617_v27 = vsel %vm3585_vm7, %v9162_v15, %v3616_v22  ;;  %v7736_v4 = vsel %vm3579_vm4, %v9164_v26, %v3630_v39  ;;  %v3633_v32 = vsel %vm3577_vm3, %v9165_v16, %v3632_v51  ;;  %v9167_v62 = vld [vmem:[#allocation123_spill] sm:$0xff]  ;;  %v9169_v2 = vld [vmem:[#allocation142_spill] sm:$0xff]  ;;  %v9171_v1 = vld [vmem:[#allocation124_spill] sm:$0xff] }
 0x30d   : > { %v7742_v38 = vsel %vm3587_vm8, %v9166_v25, %v3617_v27  ;;  %v3627_v57 = vsel %vm3585_vm7, %v9167_v62, %v3626_v24  ;;  %v3634_v53 = vsel %vm3579_vm4, %v9168_v48, %v3633_v32  ;;  %v9170_v42 = vld [vmem:[#allocation131_spill] sm:$0xff]  ;;  %v9172_v47 = vld [vmem:[#allocation140_spill] sm:$0xff]  ;;  %v9175_v36 = vld [vmem:[#allocation133_spill] sm:$0xff] }
 0x30e   : > { %v3639_v40 = vsel %vm3575_vm2, %v9170_v42, %v9169_v2  ;;  %v7753_v7 = vsel %vm3587_vm8, %v9171_v1, %v3627_v57  ;;  %v3635_v63 = vsel %vm3581_vm5, %v9172_v47, %v3634_v53  ;;  %v9173_v21 = vld [vmem:[#allocation143_spill] sm:$0xff]  ;;  %v9174_v22 = vld [vmem:[#allocation144_spill] sm:$0xff]  ;;  %v9176_v37 = vld [vmem:[#allocation129_spill] sm:$0xff] }
 0x30f   : > { %v3640_v59 = vsel %vm3577_vm3, %v9173_v21, %v3639_v40  ;;  %v3642_v3 = vsel %vm3575_vm2, %v9175_v36, %v9174_v22  ;;  %v3636_v39 = vsel %vm3583_vm6, %v9176_v37, %v3635_v63  ;;  %v9177_v14 = vld [vmem:[#allocation132_spill] sm:$0xff]  ;;  %v9178_v51 = vld [vmem:[#allocation145_spill] sm:$0xff]  ;;  %v9182_v32 = vld [vmem:[#allocation134_spill] sm:$0xff] }
 0x310   : > { %v7766_v34 = vsel %vm3579_vm4, %v9177_v14, %v3640_v59  ;;  %v3643_v15 = vsel %vm3577_vm3, %v9178_v51, %v3642_v3  ;;  %v9179_v27 = vld [vmem:[#allocation160_spill] sm:$0xff]  ;;  %v9180_v33 = vld [vmem:[#allocation149_spill] sm:$0xff]  ;;  %v9184_v48 = vld [vmem:[#allocation162_spill] sm:$0xff] }
 0x311   : > { %v3649_v24 = vsel %vm3575_vm2, %v9180_v33, %v9179_v27  ;;  %v9181_v26 = vld [vmem:[#allocation141_spill] sm:$0xff]  ;;  %v3644_v25 = vsel %vm3579_vm4, %v9182_v32, %v3643_v15  ;;  %v9185_v53 = vld [vmem:[#allocation151_spill] sm:$0xff]  ;;  %v9186_v42 = vld [vmem:[#allocation130_spill] sm:$0xff] }
 0x312   : > { %v3637_v16 = vsel %vm3585_vm7, %v9181_v26, %v3636_v39  ;;  %v9183_v62 = vld [vmem:[#allocation161_spill] sm:$0xff]  ;;  %v3652_v2 = vsel %vm3575_vm2, %v9185_v53, %v9184_v48  ;;  %v9187_v1 = vld [vmem:[#allocation146_spill] sm:$0xff]  ;;  %v9189_v59 = vld [vmem:[#allocation163_spill] sm:$0xff] }
 0x313   : > { %v3650_v57 = vsel %vm3577_vm3, %v9183_v62, %v3649_v24  ;;  %v7784_v40 = vsel %vm3587_vm8, %v9186_v42, %v3637_v16  ;;  %v3645_v47 = vsel %vm3581_vm5, %v9187_v1, %v3644_v25  ;;  %v9188_v63 = vld [vmem:[#allocation150_spill] sm:$0xff]  ;;  %v3653_v22 = vsel %vm3577_vm3, %v9189_v59, %v3652_v2  ;;  %v9190_v36 = vld [vmem:[#allocation135_spill] sm:$0xff]  ;;  %v9191_v37 = vld [vmem:[#allocation152_spill] sm:$0xff] }
 0x314   : > { %v7790_v21 = vsel %vm3579_vm4, %v9188_v63, %v3650_v57  ;;  %v3646_v3 = vsel %vm3583_vm6, %v9190_v36, %v3645_v47  ;;  %v3654_v39 = vsel %vm3579_vm4, %v9191_v37, %v3653_v22  ;;  %v9192_v14 = vld [vmem:[#allocation166_spill] sm:$0xff]  ;;  %v9193_v51 = vld [vmem:[#allocation155_spill] sm:$0xff]  ;;  %v9194_v27 = vld [vmem:[#allocation168_spill] sm:$0xff] }
 0x315   : > { %v3659_v15 = vsel %vm3575_vm2, %v9193_v51, %v9192_v14  ;;  %v9195_v33 = vld [vmem:[#allocation157_spill] sm:$0xff]  ;;  %v9196_v26 = vld [vmem:[#allocation147_spill] sm:$0xff]  ;;  %v9197_v32 = vld [vmem:[#allocation164_spill] sm:$0xff] }
 0x316   : > { %v3662_v24 = vsel %vm3575_vm2, %v9195_v33, %v9194_v27  ;;  %v3647_v16 = vsel %vm3585_vm7, %v9196_v26, %v3646_v3  ;;  %v3655_v25 = vsel %vm3581_vm5, %v9197_v32, %v3654_v39  ;;  %v9198_v62 = vld [vmem:[#allocation167_spill] sm:$0xff]  ;;  %v9199_v48 = vld [vmem:[#allocation169_spill] sm:$0xff]  ;;  %v9200_v2 = vld [vmem:[#allocation148_spill] sm:$0xff] }
 0x317   : > { %v3660_v57 = vsel %vm3577_vm3, %v9198_v62, %v3659_v15  ;;  %v3663_v53 = vsel %vm3577_vm3, %v9199_v48, %v3662_v24  ;;  %v7814_v42 = vsel %vm3587_vm8, %v9200_v2, %v3647_v16  ;;  %v9201_v1 = vld [vmem:[#allocation153_spill] sm:$0xff]  ;;  %v9202_v63 = vld [vmem:[#allocation156_spill] sm:$0xff]  ;;  %v9203_v22 = vld [vmem:[#allocation158_spill] sm:$0xff] }
 0x318   : > { %v3656_v47 = vsel %vm3583_vm6, %v9201_v1, %v3655_v25  ;;  %v7820_v59 = vsel %vm3579_vm4, %v9202_v63, %v3660_v57  ;;  %v3664_v36 = vsel %vm3579_vm4, %v9203_v22, %v3663_v53  ;;  %v9204_v3 = vld [vmem:[#allocation165_spill] sm:$0xff]  ;;  %v9205_v39 = vld [vmem:[#allocation170_spill] sm:$0xff]  ;;  %v9206_v51 = vld [vmem:[#allocation184_spill] sm:$0xff] }
 0x319   : > { %v3657_v37 = vsel %vm3585_vm7, %v9204_v3, %v3656_v47  ;;  %v3665_v14 = vsel %vm3581_vm5, %v9205_v39, %v3664_v36  ;;  %v9207_v15 = vld [vmem:[#allocation173_spill] sm:$0xff]  ;;  %v9208_v33 = vld [vmem:[#allocation186_spill] sm:$0xff]  ;;  %v9209_v24 = vld [vmem:[#allocation175_spill] sm:$0xff] }
 0x31a   : > { %v3669_v27 = vsel %vm3575_vm2, %v9207_v15, %v9206_v51  ;;  %v3672_v26 = vsel %vm3575_vm2, %v9209_v24, %v9208_v33  ;;  %v9210_v16 = vld [vmem:[#allocation154_spill] sm:$0xff]  ;;  %v9211_v25 = vld [vmem:[#allocation159_spill] sm:$0xff]  ;;  %v9212_v57 = vld [vmem:[#allocation185_spill] sm:$0xff]  ;;  %v3682_v33 = vsel %vm3575_vm2, %v7503_v31, %v7498_v41 }
 0x31b   : > { %v7836_v32 = vsel %vm3587_vm8, %v9210_v16, %v3657_v37  ;;  %v3666_v62 = vsel %vm3583_vm6, %v9211_v25, %v3665_v14  ;;  %v3670_v48 = vsel %vm3577_vm3, %v9212_v57, %v3669_v27  ;;  %v9213_v53 = vld [vmem:[#allocation187_spill] sm:$0xff]  ;;  %v9215_v63 = vld [vmem:[#allocation174_spill] sm:$0xff]  ;;  %v9216_v36 = vld [vmem:[#allocation176_spill] sm:$0xff]  ;;  %v3679_v37 = vsel %vm3575_vm2, %v7483_v35, %v7478_v58 }
 0x31c   : > { %v3673_v2 = vsel %vm3577_vm3, %v9213_v53, %v3672_v26  ;;  %v9214_v1 = vld [vmem:[#allocation171_spill] sm:$0xff]  ;;  %v7848_v22 = vsel %vm3579_vm4, %v9215_v63, %v3670_v48  ;;  %v9217_v39 = vld [vmem:[#allocation172_spill] sm:$0xff]  ;;  %v3680_v27 = vsel %vm3577_vm3, %v7488_v43, %v3679_v37  ;;  %v9219_v24 = vld [vmem:[#allocation177_spill] sm:$0xff]  ;;  %v3683_v35 = vsel %vm3577_vm3, %v7508_v6, %v3682_v33 }
 0x31d   : > { %v3667_v47 = vsel %vm3585_vm7, %v9214_v1, %v3666_v62  ;;  %v3674_v3 = vsel %vm3579_vm4, %v9216_v36, %v3673_v2  ;;  %v9218_v51 = vld [vmem:[#allocation188_spill] sm:$0xff]  ;;  %v7871_v58 = vsel %vm3579_vm4, %v7493_v13, %v3680_v27  ;;  %v3689_v16 = vsel %vm3575_vm2, %v7543_v46, %v7538_v9  ;;  %v9220_v25 = vld [vmem:[#allocation189_spill] sm:$0xff]  ;;  %v9221_v62 = vld [vmem:[#allocation178_spill] sm:$0xff] }
 0x31e   : > { %v7858_v14 = vsel %vm3587_vm8, %v9217_v39, %v3667_v47  ;;  %v3675_v15 = vsel %vm3581_vm5, %v9218_v51, %v3674_v3  ;;  %v3684_v41 = vsel %vm3579_vm4, %v7513_v10, %v3683_v35  ;;  %v3690_v31 = vsel %vm3577_vm3, %v7548_v61, %v3689_v16  ;;  %v9223_v53 = vld [vmem:[#allocation179_spill] sm:$0xff] }
 0x31f   : > { %v3676_v26 = vsel %vm3583_vm6, %v9219_v24, %v3675_v15  ;;  %v3692_v13 = vsel %vm3575_vm2, %v7563_v55, %v7558_v8  ;;  %v3685_v57 = vsel %vm3581_vm5, %v7518_v50, %v3684_v41  ;;  %v3691_v9 = vsel %vm3579_vm4, %v7553_v60, %v3690_v31 }
 0x320   : > { %v3677_v43 = vsel %vm3585_vm7, %v9220_v25, %v3676_v26  ;;  %v3693_v46 = vsel %vm3577_vm3, %v7568_v52, %v3692_v13  ;;  %v3686_v10 = vsel %vm3583_vm6, %v7523_v28, %v3685_v57  ;;  %v3699_v50 = vsel %vm3575_vm2, %v7603_v23, %v7598_v30 }
 0x321   : > { %v3678_v6 = vsel %vm3587_vm8, %v9221_v62, %v3677_v43  ;;  %v3694_v61 = vsel %vm3579_vm4, %v7573_v0, %v3693_v46  ;;  %v3702_v60 = vpack.c.b16 %v7669_v54, %v7669_v54  ;;  %v3687_v8 = vsel %vm3585_vm7, %v7528_v19, %v3686_v10  ;;  %v9222_v0 = vld [vmem:[#allocation190_spill] sm:$0xff] }
 0x322   : > { %v3695_v55 = vsel %vm3581_vm5, %v7578_v18, %v3694_v61  ;;  %v3700_v28 = vsel %vm3577_vm3, %v7608_v44, %v3699_v50  ;;  %v3703_v52 = vpack.c.b16 %v7641_v45, %v7641_v45  ;;  %v3688_v48 = vsel %vm3587_vm8, %v9222_v0, %v3687_v8 }
 0x323   : > { %v3696_v30 = vsel %vm3583_vm6, %v9223_v53, %v3695_v55  ;;  %v3701_v23 = vsel %vm3579_vm4, %v7613_v29, %v3700_v28  ;;  %v3704_v19 = vpack.c.b16 %v7681_v17, %v7681_v17  ;;  %v3705_v44 = vpack.c.b16 %v7647_v56, %v7647_v56  ;;  %3751 = vst.msk [vmem:[%s7898_s15] sm:$0xf] %vm3750_vm9, %v3702_v60 }
 0x324   : > { %v3697_v18 = vsel %vm3585_vm7, %v7588_v20, %v3696_v30  ;;  %v3706_v45 = vpack.c.b16 %v7712_v49, %v7712_v49  ;;  %v3707_v54 = vpack.c.b16 %v7677_v5, %v7677_v5  ;;  %3752 = vst.msk [vmem:[%s7898_s15 + $0x4] sm:$0x3] %vm405_vm0, %v3703_v52  ;;  %v3708_v17 = vpack.c.b16 %v7742_v38, %v7742_v38 }
 0x325   : > { %v3698_v29 = vsel %vm3587_vm8, %v7593_v12, %v3697_v18  ;;  %v3709_v20 = vpack.c.b16 %v7706_v11, %v7706_v11  ;;  %v3710_v56 = vpack.c.b16 %v7753_v7, %v7753_v7  ;;  %v3711_v49 = vpack.c.b16 %v7736_v4, %v7736_v4  ;;  %3754 = vst.msk [vmem:[%s7898_s15 + $0xc] sm:$0x3] %vm405_vm0, %v3705_v44 }
 0x326   : > { %v3712_v5 = vpack.c.b16 %v7784_v40, %v7784_v40  ;;  %v3713_v12 = vpack.c.b16 %v7766_v34, %v7766_v34  ;;  %v3714_v38 = vpack.c.b16 %v7814_v42, %v7814_v42  ;;  %3756 = vst.msk [vmem:[%s7898_s15 + $0x14] sm:$0x3] %vm405_vm0, %v3707_v54  ;;  %v3715_v11 = vpack.c.b16 %v7790_v21, %v7790_v21 }
 0x327   : > { %v3716_v4 = vpack.c.b16 %v7836_v32, %v7836_v32  ;;  %v3717_v7 = vpack.c.b16 %v7820_v59, %v7820_v59  ;;  %v3718_v34 = vpack.c.b16 %v7858_v14, %v7858_v14  ;;  %3758 = vst.msk [vmem:[%s7898_s15 + $0x1c] sm:$0x3] %vm405_vm0, %v3709_v20  ;;  %v3719_v40 = vpack.c.b16 %v7848_v22, %v7848_v22 }
 0x328   : > { %v3720_v21 = vpack.c.b16 %v3678_v6, %v3678_v6  ;;  %v3721_v42 = vpack.c.b16 %v7871_v58, %v7871_v58  ;;  %v3722_v32 = vpack.c.b16 %v3688_v48, %v3688_v48  ;;  %3760 = vst.msk [vmem:[%s7898_s15 + $0x24] sm:$0x3] %vm405_vm0, %v3711_v49  ;;  %3762 = vst.msk [vmem:[%s7898_s15 + $0x2c] sm:$0x3] %vm405_vm0, %v3713_v12 }
 0x329   : > { %v3723_v59 = vpack.c.b16 %v3691_v9, %v3691_v9  ;;  %v3724_v2 = vpack.c.b16 %v3698_v29, %v3698_v29  ;;  %v3725_v1 = vpack.c.b16 %v3701_v23, %v3701_v23  ;;  %3764 = vst.msk [vmem:[%s7898_s15 + $0x34] sm:$0x3] %vm405_vm0, %v3715_v11  ;;  %3766 = vst.msk [vmem:[%s7898_s15 + $0x3c] sm:$0x3] %vm405_vm0, %v3717_v7 }
 0x32a   : > { %3753 = vst.msk [vmem:[%s7898_s15 + $0x8] sm:$0xf] %vm3750_vm9, %v3704_v19  ;;  %3755 = vst.msk [vmem:[%s7898_s15 + $0x10] sm:$0xf] %vm3750_vm9, %v3706_v45 }
 0x32b   : > { %3757 = vst.msk [vmem:[%s7898_s15 + $0x18] sm:$0xf] %vm3750_vm9, %v3708_v17  ;;  %3759 = vst.msk [vmem:[%s7898_s15 + $0x20] sm:$0xf] %vm3750_vm9, %v3710_v56 }
 0x32c   : > { %3761 = vst.msk [vmem:[%s7898_s15 + $0x28] sm:$0xf] %vm3750_vm9, %v3712_v5  ;;  %3763 = vst.msk [vmem:[%s7898_s15 + $0x30] sm:$0xf] %vm3750_vm9, %v3714_v38 }
 0x32d   : > { %3765 = vst.msk [vmem:[%s7898_s15 + $0x38] sm:$0xf] %vm3750_vm9, %v3716_v4  ;;  %3767 = vst.msk [vmem:[%s7898_s15 + $0x40] sm:$0xf] %vm3750_vm9, %v3718_v34 }
 0x32e   : > { %3768 = vst.msk [vmem:[%s7898_s15 + $0x44] sm:$0x3] %vm405_vm0, %v3719_v40  ;;  %3770 = vst.msk [vmem:[%s7898_s15 + $0x4c] sm:$0x3] %vm405_vm0, %v3721_v42 }
 0x32f   : > { %3769 = vst.msk [vmem:[%s7898_s15 + $0x48] sm:$0xf] %vm3750_vm9, %v3720_v21  ;;  %3771 = vst.msk [vmem:[%s7898_s15 + $0x50] sm:$0xf] %vm3750_vm9, %v3722_v32 }
 0x330   : > { %3772 = vst.msk [vmem:[%s7898_s15 + $0x54] sm:$0x3] %vm405_vm0, %v3723_v59  ;;  %3774 = vst.msk [vmem:[%s7898_s15 + $0x5c] sm:$0x3] %vm405_vm0, %v3725_v1 }
 0x331   : > { %3773 = vst.msk [vmem:[%s7898_s15 + $0x58] sm:$0xf] %vm3750_vm9, %v3724_v2 }
 0x332 PF: > { %s11_s6 = sadd.s32 1, %s4143_s6  }
 0x333   : > { %p8_p4 = scmp.ge.s32.totalorder %s11_s6, 4  }
 0x335   :  { %10 = sbr.rel (!%p8_p4) target bundleno = 1 (0x1), region = 54 }

</bundles_post_ra>
